<compile_context>
chip_gen: v6e
topology: v6e:2x2x1
jax: 0.10.0
libtpu: 0.0.40
codegen_flags: <defaults>
</compile_context>

<pallas_src>
import functools

import numpy as np
import jax
import jax.numpy as jnp
from jax import lax
from jax.experimental import pallas as pl
from jax.experimental.pallas import tpu as pltpu

_EPS = 1e-5
LANE_PACK = 4    # batch images packed along the lane axis per grid step
CH_PAD = 32      # per-image channel count padded to this -> 4*32 = 128 lanes


# ---------------------------------------------------------------------------
# In-kernel helpers (activations are flat (H*W, LANE_PACK*CH_PAD) f32 images)
# ---------------------------------------------------------------------------
def _col_keep_masks(S, W):
    """Per-width source-column masks for the dj = -1 / +1 taps.

    Built once per width on the zero-padded (S + 4W rows) image; the pad is a
    multiple of W so `row & (W-1)` is the image column for every real row.
    """
    col = lax.broadcasted_iota(jnp.int32, (S + 4 * W, 1), 0) & (W - 1)
    return col != (W - 1), col != 0          # keep for dj=-1, keep for dj=+1


def _conv3x3_bn_relu(x, w_ref, b_ref, width, keep_m1, keep_p1):
    """3x3 / stride-1 / SAME conv + folded-BN bias + ReLU on a flat image.

    x      : (S, L) f32, row-major flattened lane-packed image(s), L = nb*CH_PAD
    w_ref  : (9*L, N) bf16 folded weights, row = tap*(nb*cp) + img*cp + ci,
             col = img*cout + co, tap = ki*3 + kj
    b_ref  : (1, N) f32 folded bias
    keep_* : (S + 4*width, 1) bool column-wrap masks (hoisted, shared per width)
    """
    S, L = x.shape
    W = width
    P = 2 * W                                   # >= W+1 and a multiple of W
    zpad = jnp.zeros((P, L), x.dtype)
    xp = jnp.concatenate([zpad, x, zpad], axis=0)            # (S + 2P, L)
    src = {
        -1: jnp.where(keep_m1, xp, 0.0).astype(jnp.bfloat16),
        0: xp.astype(jnp.bfloat16),
        1: jnp.where(keep_p1, xp, 0.0).astype(jnp.bfloat16),
    }
    taps = []
    for di in (-1, 0, 1):
        for dj in (-1, 0, 1):
            s0 = P + di * W + dj                # static sublane slice per tap
            taps.append(src[dj][s0:s0 + S, :])
    lhs = jnp.concatenate(taps, axis=1)                       # (S, 9L) bf16
    acc = jnp.dot(lhs, w_ref[...], preferred_element_type=jnp.float32)
    return jnp.maximum(acc + b_ref[...], 0.0)


def _shift_rows_zero(v, s):
    """w[r] = v[r + s] (s > 0), zeros shifted in at the bottom."""
    return jnp.concatenate([v[s:], jnp.zeros((s, v.shape[1]), v.dtype)], axis=0)


def _maxpool2x2(y, width, p_ref):
    """MaxPool2d(2,2): two shifted maxima + a 0/1 selection matmul (top-left)."""
    m = jnp.maximum(y, _shift_rows_zero(y, 1))
    m = jnp.maximum(m, _shift_rows_zero(m, width))
    return jnp.dot(p_ref[...], m.astype(jnp.bfloat16),
                   preferred_element_type=jnp.float32)


def _rocknet_kernel(x_ref,
                    w1, b1, w2, b2, w3, b3, w4, b4, w5, b5, w6, b6,
                    p1, p2, p3, u4, u5, u6, ga, gb,
                    o_ref, *, base_w, nb, do_round):
    W0 = base_w
    S0 = x_ref.shape[1]
    # column-wrap masks, built once per width (each width is used by 2 stages)
    m_a = _col_keep_masks(S0, W0)
    m_b = _col_keep_masks(S0 // 4, W0 // 2)
    m_c = _col_keep_masks(S0 // 16, W0 // 4)

    a = x_ref[0]                                              # (S0, 128) f32
    # --- encoder: pool(relu(bn(conv(x)))) --------------------------------
    a = _maxpool2x2(_conv3x3_bn_relu(a, w1, b1, W0, *m_a), W0, p1)
    a = _maxpool2x2(_conv3x3_bn_relu(a, w2, b2, W0 // 2, *m_b), W0 // 2, p2)
    a = _maxpool2x2(_conv3x3_bn_relu(a, w3, b3, W0 // 4, *m_c), W0 // 4, p3)
    # --- decoder: relu(bn(convt(upsample(x)))) ---------------------------
    a = jnp.dot(u4[...], a.astype(jnp.bfloat16), preferred_element_type=jnp.float32)
    a = _conv3x3_bn_relu(a, w4, b4, W0 // 4, *m_c)
    a = jnp.dot(u5[...], a.astype(jnp.bfloat16), preferred_element_type=jnp.float32)
    a = _conv3x3_bn_relu(a, w5, b5, W0 // 2, *m_b)
    a = jnp.dot(u6[...], a.astype(jnp.bfloat16), preferred_element_type=jnp.float32)
    a = _conv3x3_bn_relu(a, w6, b6, W0, *m_a)                 # (S0, nb)
    if do_round:
        a = jnp.round(a)                        # torch.round (half-to-even)
    # lane-dense store: per packed image, gather the (S0,) column into
    # (S0/128, 128) tiles (kept in f32 to preserve the pre-round values).
    for b in range(nb):
        o_ref[0, b] = jnp.dot(ga[...], a[:, b:b + 1] * gb[...],
                              preferred_element_type=jnp.float32)


# ---------------------------------------------------------------------------
# Deterministic parameters (shapes from RockClassification.__init__)
# ---------------------------------------------------------------------------
def make_params():
    key = jax.random.PRNGKey(0)

    def nxt():
        nonlocal key
        key, sub = jax.random.split(key)
        return sub

    def conv(cout, cin):   # nn.Conv2d: weight (out, in, 3, 3), bias (out,)
        w = 0.15 * jax.random.normal(nxt(), (cout, cin, 3, 3), jnp.float32)
        b = 0.10 * jax.random.normal(nxt(), (cout,), jnp.float32)
        return w, b

    def convt(cin, cout):  # nn.ConvTranspose2d: weight (in, out, 3, 3), bias (out,)
        w = 0.15 * jax.random.normal(nxt(), (cin, cout, 3, 3), jnp.float32)
        b = 0.10 * jax.random.normal(nxt(), (cout,), jnp.float32)
        return w, b

    def bn(c):             # eval-mode BatchNorm2d: gamma, beta, running_mean, running_var
        gamma = 1.0 + 0.1 * jax.random.normal(nxt(), (c,), jnp.float32)
        beta = 0.1 * jax.random.normal(nxt(), (c,), jnp.float32)
        mean = 0.1 * jax.random.normal(nxt(), (c,), jnp.float32)
        var = 0.5 + jax.random.uniform(nxt(), (c,), jnp.float32)
        return gamma, beta, mean, var

    return dict(conv1=conv(8, 1), conv2=conv(16, 8), conv3=conv(32, 16),
                convt3=convt(32, 16), convt2=convt(16, 8), convt1=convt(8, 1),
                bn0=bn(1), bn1=bn(8), bn2=bn(16), bn3=bn(32))


def _oihw_to_hwio(w):          # Conv2d weight -> HWIO
    return jnp.transpose(w, (2, 3, 1, 0))


def _convt_to_hwio(wt):        # ConvTranspose2d(stride=1,pad=1) == flipped conv
    return jnp.transpose(wt[:, :, ::-1, ::-1], (2, 3, 0, 1))


def build_stages(p, nb=LANE_PACK, cp=CH_PAD):
    """Per stage: packed weights (9*nb*cp, nb*cout_p) bf16, bias (1, nb*cout_p) f32.

    Eval-mode BatchNorm is folded into the weights (bias = beta + scale*(b-mean));
    channels are zero-padded to `cp` and the weights are made block-diagonal
    (kron(I_nb, W)) over the nb lane-packed batch images.
    """
    spec = [("conv1", "bn1", False), ("conv2", "bn2", False), ("conv3", "bn3", False),
            ("convt3", "bn2", True), ("convt2", "bn1", True), ("convt1", "bn0", True)]
    eye = jnp.eye(nb, dtype=jnp.float32)
    stages = []
    for si, (name, bn_name, is_t) in enumerate(spec):
        w, b = p[name]
        w_hwio = _convt_to_hwio(w) if is_t else _oihw_to_hwio(w)   # (3,3,Cin,Cout)
        gamma, beta, mean, var = p[bn_name]
        scale = gamma / jnp.sqrt(var + _EPS)
        bias = beta + scale * (b - mean)          # bias is NOT re-scaled
        w_fold = w_hwio * scale[None, None, None, :]
        cin, cout = w_fold.shape[2], w_fold.shape[3]
        cout_p = cout if si == len(spec) - 1 else cp   # last stage keeps 1 channel
        w9 = jnp.zeros((9, cp, cout_p), jnp.float32)
        w9 = w9.at[:, :cin, :cout].set(w_fold.reshape(9, cin, cout))
        b_p = jnp.zeros((cout_p,), jnp.float32).at[:cout].set(bias)
        # row = tap*(nb*cp) + img*cp + ci ;  col = img*cout_p + co
        w_pack = jnp.einsum("tio,bB->tbiBo", w9, eye).reshape(9 * nb * cp, nb * cout_p)
        b_pack = jnp.tile(b_p.reshape(1, cout_p), (1, nb))
        stages.append((w_pack.astype(jnp.bfloat16), b_pack.astype(jnp.float32)))
    return stages


# ---------------------------------------------------------------------------
# Constant 0/1 selection matrices (pool / upsample / dense output gather)
# ---------------------------------------------------------------------------
def _pool_select(h, w):
    ho, wo = h // 2, w // 2
    k = np.arange(ho * wo)
    src = (k // wo) * 2 * w + (k % wo) * 2
    m = np.zeros((ho * wo, h * w), np.float32)
    m[k, src] = 1.0
    return jnp.asarray(m)


def _upsample_select(h, w):
    ho, wo = 2 * h, 2 * w
    r = np.arange(ho * wo)
    src = (r // wo // 2) * w + (r % wo) // 2
    m = np.zeros((ho * wo, h * w), np.float32)
    m[r, src] = 1.0
    return jnp.asarray(m)


def _dense_store_gather(s, lanes=128):
    r = np.arange(s)
    a = np.zeros((s // lanes, s), np.float32)
    a[r // lanes, r] = 1.0
    b = np.zeros((s, lanes), np.float32)
    b[r, r % lanes] = 1.0
    return jnp.asarray(a), jnp.asarray(b)


def build_consts(h, w):
    assert h % 8 == 0 and w % 8 == 0 and (h * w) % 128 == 0
    assert (w & (w - 1)) == 0, "width must be a power of two"
    bf = lambda m: m.astype(jnp.bfloat16)          # MXU-side constants in bf16
    ga, gb = _dense_store_gather(h * w)            # output gather stays f32
    return (bf(_pool_select(h, w)), bf(_pool_select(h // 2, w // 2)),
            bf(_pool_select(h // 4, w // 4)),
            bf(_upsample_select(h // 8, w // 8)), bf(_upsample_select(h // 4, w // 4)),
            bf(_upsample_select(h // 2, w // 2)),
            ga, gb)


# ---------------------------------------------------------------------------
# Forward pass (single fused pallas_call) and pure-JAX reference
# ---------------------------------------------------------------------------
def _zero_map(rank):
    return lambda g: (0,) * rank


@functools.partial(jax.jit, static_argnames=("apply_round",))
def forward(x_nchw, stages, consts, apply_round=True):
    n, c, h, w = x_nchw.shape
    assert c == 1
    s = h * w
    nb, cp = LANE_PACK, CH_PAD
    groups = (n + nb - 1) // nb
    n_pad = groups * nb

    x_imgs = x_nchw.reshape(n, s).astype(jnp.float32)
    if n_pad != n:
        x_imgs = jnp.concatenate(
            [x_imgs, jnp.zeros((n_pad - n, s), jnp.float32)], axis=0)
    # lane layout (img, channel) with channels padded to CH_PAD (only ch 0 real)
    x_imgs = x_imgs.reshape(groups, nb, s)
    x_packed = jnp.zeros((groups, nb, cp, s), jnp.float32)
    x_packed = x_packed.at[:, :, 0, :].set(x_imgs)
    x_packed = x_packed.transpose(0, 3, 1, 2).reshape(groups, s, nb * cp)

    operands = [x_packed]
    for wk, bk in stages:
        operands += [wk, bk]
    operands += list(consts)

    in_specs = [pl.BlockSpec((1, s, nb * cp), lambda g: (g, 0, 0))]
    for op in operands[1:]:
        # grid-invariant constants: full-array blocks, constant index map
        in_specs.append(pl.BlockSpec(op.shape, _zero_map(op.ndim)))

    kernel = functools.partial(_rocknet_kernel, base_w=w, nb=nb,
                               do_round=apply_round)
    out = pl.pallas_call(
        kernel,
        out_shape=jax.ShapeDtypeStruct((groups, nb, s // 128, 128), jnp.float32),
        grid=(groups,),
        in_specs=in_specs,
        out_specs=pl.BlockSpec((1, nb, s // 128, 128), lambda g: (g, 0, 0, 0)),
        compiler_params=pltpu.CompilerParams(
            dimension_semantics=("parallel",),        # grid>=2 keeps v7x's 2nd TC busy
            vmem_limit_bytes=32 * 1024 * 1024),       # budget vs v7x 64 MiB physical
    )(*operands)
    return out.reshape(n_pad, s)[:n].reshape(n, 1, h, w)


def ref_forward(x_nchw, params):           # pre-round reference from raw params
    dn = ("NHWC", "HWIO", "NHWC")
    x = jnp.transpose(x_nchw, (0, 2, 3, 1))

    def bn(y, bp):
        gamma, beta, mean, var = bp
        return (y - mean) * gamma / jnp.sqrt(var + _EPS) + beta

    def conv(y, w_hwio, b):
        return lax.conv_general_dilated(y, w_hwio, (1, 1), "SAME",
                                        dimension_numbers=dn) + b

    def pool(y):
        nn_, hh, ww, cc = y.shape
        return jnp.max(y.reshape(nn_, hh // 2, 2, ww // 2, 2, cc), axis=(2, 4))

    def up(y):
        return jnp.repeat(jnp.repeat(y, 2, axis=1), 2, axis=2)

    for cname, bname in [("conv1", "bn1"), ("conv2", "bn2"), ("conv3", "bn3")]:
        w, b = params[cname]
        x = pool(jax.nn.relu(bn(conv(x, _oihw_to_hwio(w), b), params[bname])))
    for cname, bname in [("convt3", "bn2"), ("convt2", "bn1"), ("convt1", "bn0")]:
        w, b = params[cname]
        x = jax.nn.relu(bn(conv(up(x), _convt_to_hwio(w), b), params[bname]))
    return jnp.transpose(x, (0, 3, 1, 2))


if __name__ == "__main__":
    params = make_params()
    stages = build_stages(params)
    consts = build_consts(16, 16)

    # batch 8 -> 2 lane-packed groups of 4 -> grid of length 2 ("parallel")
    x = jax.random.normal(jax.random.PRNGKey(0), (8, 1, 16, 16), jnp.float32)

    out = jax.block_until_ready(forward(x, stages, consts, apply_round=True))
    assert out.shape == (8, 1, 16, 16)

    # correctness check on the pre-round activations (round is discontinuous);
    # tolerance sized for bf16 MXU inputs chained through the 6 conv stages.
    got = jax.block_until_ready(forward(x, stages, consts, apply_round=False))
    ref = jax.block_until_ready(ref_forward(x, params))
    err = float(jnp.max(jnp.abs(got - ref)))
    tol = 5e-2 * (1.0 + float(jnp.max(jnp.abs(ref))))
    assert err <= tol, f"mismatch: {err} > {tol}"

    print("KERNEL_OK")
</pallas_src>

<mosaic_0001>
module attributes {stable_mosaic.version = 11 : i64} {
  func.func @_rocknet_kernel(%arg0: i32, %arg1: memref<1x256x128xf32, #tpu.memory_space<vmem>>, %arg2: memref<1152x128xbf16, #tpu.memory_space<vmem>>, %arg3: memref<1x128xf32, #tpu.memory_space<vmem>>, %arg4: memref<1152x128xbf16, #tpu.memory_space<vmem>>, %arg5: memref<1x128xf32, #tpu.memory_space<vmem>>, %arg6: memref<1152x128xbf16, #tpu.memory_space<vmem>>, %arg7: memref<1x128xf32, #tpu.memory_space<vmem>>, %arg8: memref<1152x128xbf16, #tpu.memory_space<vmem>>, %arg9: memref<1x128xf32, #tpu.memory_space<vmem>>, %arg10: memref<1152x128xbf16, #tpu.memory_space<vmem>>, %arg11: memref<1x128xf32, #tpu.memory_space<vmem>>, %arg12: memref<1152x4xbf16, #tpu.memory_space<vmem>>, %arg13: memref<1x4xf32, #tpu.memory_space<vmem>>, %arg14: memref<64x256xbf16, #tpu.memory_space<vmem>>, %arg15: memref<16x64xbf16, #tpu.memory_space<vmem>>, %arg16: memref<4x16xbf16, #tpu.memory_space<vmem>>, %arg17: memref<16x4xbf16, #tpu.memory_space<vmem>>, %arg18: memref<64x16xbf16, #tpu.memory_space<vmem>>, %arg19: memref<256x64xbf16, #tpu.memory_space<vmem>>, %arg20: memref<2x256xf32, #tpu.memory_space<vmem>>, %arg21: memref<256x128xf32, #tpu.memory_space<vmem>>, %arg22: memref<1x4x2x128xf32, #tpu.memory_space<vmem>>) attributes {dimension_semantics = [#tpu.dimension_semantics<parallel>], iteration_bounds = array<i64: 2>, scalar_prefetch = 0 : i64, scratch_operands = 0 : i64, tpu.core_type = #tpu.core_type<tc>, window_params = [{transform_indices = @transform_0, window_bounds = array<i64: 1, 256, 128>}, {pipeline_mode = #tpu.pipeline_mode<synchronous>, transform_indices = @transform_1, window_bounds = array<i64: 1152, 128>}, {pipeline_mode = #tpu.pipeline_mode<synchronous>, transform_indices = @transform_2, window_bounds = array<i64: 1, 128>}, {pipeline_mode = #tpu.pipeline_mode<synchronous>, transform_indices = @transform_3, window_bounds = array<i64: 1152, 128>}, {pipeline_mode = #tpu.pipeline_mode<synchronous>, transform_indices = @transform_4, window_bounds = array<i64: 1, 128>}, {pipeline_mode = #tpu.pipeline_mode<synchronous>, transform_indices = @transform_5, window_bounds = array<i64: 1152, 128>}, {pipeline_mode = #tpu.pipeline_mode<synchronous>, transform_indices = @transform_6, window_bounds = array<i64: 1, 128>}, {pipeline_mode = #tpu.pipeline_mode<synchronous>, transform_indices = @transform_7, window_bounds = array<i64: 1152, 128>}, {pipeline_mode = #tpu.pipeline_mode<synchronous>, transform_indices = @transform_8, window_bounds = array<i64: 1, 128>}, {pipeline_mode = #tpu.pipeline_mode<synchronous>, transform_indices = @transform_9, window_bounds = array<i64: 1152, 128>}, {pipeline_mode = #tpu.pipeline_mode<synchronous>, transform_indices = @transform_10, window_bounds = array<i64: 1, 128>}, {pipeline_mode = #tpu.pipeline_mode<synchronous>, transform_indices = @transform_11, window_bounds = array<i64: 1152, 4>}, {pipeline_mode = #tpu.pipeline_mode<synchronous>, transform_indices = @transform_12, window_bounds = array<i64: 1, 4>}, {pipeline_mode = #tpu.pipeline_mode<synchronous>, transform_indices = @transform_13, window_bounds = array<i64: 64, 256>}, {pipeline_mode = #tpu.pipeline_mode<synchronous>, transform_indices = @transform_14, window_bounds = array<i64: 16, 64>}, {pipeline_mode = #tpu.pipeline_mode<synchronous>, transform_indices = @transform_15, window_bounds = array<i64: 4, 16>}, {pipeline_mode = #tpu.pipeline_mode<synchronous>, transform_indices = @transform_16, window_bounds = array<i64: 16, 4>}, {pipeline_mode = #tpu.pipeline_mode<synchronous>, transform_indices = @transform_17, window_bounds = array<i64: 64, 16>}, {pipeline_mode = #tpu.pipeline_mode<synchronous>, transform_indices = @transform_18, window_bounds = array<i64: 256, 64>}, {pipeline_mode = #tpu.pipeline_mode<synchronous>, transform_indices = @transform_19, window_bounds = array<i64: 2, 256>}, {pipeline_mode = #tpu.pipeline_mode<synchronous>, transform_indices = @transform_20, window_bounds = array<i64: 256, 128>}, {transform_indices = @transform_21, window_bounds = array<i64: 1, 4, 2, 128>}]} {
    %0 = tpu.iota {dimensions = array<i32: 0>} : vector<320x1xi32>
    %c15_i32 = arith.constant 15 : i32
    %1 = vector.broadcast %c15_i32 : i32 to vector<320x1xi32>
    %2 = arith.andi %0, %1 : vector<320x1xi32>
    %c15_i32_0 = arith.constant 15 : i32
    %3 = vector.broadcast %c15_i32_0 : i32 to vector<320x1xi32>
    %4 = arith.cmpi ne, %2, %3 : vector<320x1xi32>
    %c0_i32 = arith.constant 0 : i32
    %5 = vector.broadcast %c0_i32 : i32 to vector<320x1xi32>
    %6 = arith.cmpi ne, %2, %5 : vector<320x1xi32>
    %7 = tpu.iota {dimensions = array<i32: 0>} : vector<96x1xi32>
    %c7_i32 = arith.constant 7 : i32
    %8 = vector.broadcast %c7_i32 : i32 to vector<96x1xi32>
    %9 = arith.andi %7, %8 : vector<96x1xi32>
    %c7_i32_1 = arith.constant 7 : i32
    %10 = vector.broadcast %c7_i32_1 : i32 to vector<96x1xi32>
    %11 = arith.cmpi ne, %9, %10 : vector<96x1xi32>
    %c0_i32_2 = arith.constant 0 : i32
    %12 = vector.broadcast %c0_i32_2 : i32 to vector<96x1xi32>
    %13 = arith.cmpi ne, %9, %12 : vector<96x1xi32>
    %14 = tpu.iota {dimensions = array<i32: 0>} : vector<32x1xi32>
    %c3_i32 = arith.constant 3 : i32
    %15 = vector.broadcast %c3_i32 : i32 to vector<32x1xi32>
    %16 = arith.andi %14, %15 : vector<32x1xi32>
    %c3_i32_3 = arith.constant 3 : i32
    %17 = vector.broadcast %c3_i32_3 : i32 to vector<32x1xi32>
    %18 = arith.cmpi ne, %16, %17 : vector<32x1xi32>
    %c0_i32_4 = arith.constant 0 : i32
    %19 = vector.broadcast %c0_i32_4 : i32 to vector<32x1xi32>
    %20 = arith.cmpi ne, %16, %19 : vector<32x1xi32>
    %c0 = arith.constant 0 : index
    %c0_5 = arith.constant 0 : index
    %c0_6 = arith.constant 0 : index
    %21 = vector.load %arg1[%c0, %c0_5, %c0_6] : memref<1x256x128xf32, #tpu.memory_space<vmem>>, vector<1x256x128xf32>
    %22 = vector.shape_cast %21 : vector<1x256x128xf32> to vector<256x128xf32>
    %cst = arith.constant 0.000000e+00 : f32
    %23 = vector.broadcast %cst : f32 to vector<32x128xf32>
    %24 = tpu.concatenate %23, %22, %23 in 0 : vector<32x128xf32>, vector<256x128xf32>, vector<32x128xf32> -> vector<320x128xf32>
    %cst_7 = arith.constant 0.000000e+00 : f32
    %25 = vector.shape_cast %4 : vector<320x1xi1> to vector<320x1xi1>
    %26 = vector.broadcast %25 : vector<320x1xi1> to vector<320x128xi1>
    %27 = vector.broadcast %cst_7 : f32 to vector<320x128xf32>
    %28 = arith.select %26, %24, %27 : vector<320x128xi1>, vector<320x128xf32>
    %29 = arith.truncf %28 : vector<320x128xf32> to vector<320x128xbf16>
    %30 = arith.truncf %24 : vector<320x128xf32> to vector<320x128xbf16>
    %cst_8 = arith.constant 0.000000e+00 : f32
    %31 = vector.shape_cast %6 : vector<320x1xi1> to vector<320x1xi1>
    %32 = vector.broadcast %31 : vector<320x1xi1> to vector<320x128xi1>
    %33 = vector.broadcast %cst_8 : f32 to vector<320x128xf32>
    %34 = arith.select %32, %24, %33 : vector<320x128xi1>, vector<320x128xf32>
    %35 = arith.truncf %34 : vector<320x128xf32> to vector<320x128xbf16>
    %36 = vector.extract_strided_slice %29 {offsets = [15, 0], sizes = [256, 128], strides = [1, 1]} : vector<320x128xbf16> to vector<256x128xbf16>
    %37 = vector.extract_strided_slice %30 {offsets = [16, 0], sizes = [256, 128], strides = [1, 1]} : vector<320x128xbf16> to vector<256x128xbf16>
    %38 = vector.extract_strided_slice %35 {offsets = [17, 0], sizes = [256, 128], strides = [1, 1]} : vector<320x128xbf16> to vector<256x128xbf16>
    %39 = vector.extract_strided_slice %29 {offsets = [31, 0], sizes = [256, 128], strides = [1, 1]} : vector<320x128xbf16> to vector<256x128xbf16>
    %40 = vector.extract_strided_slice %30 {offsets = [32, 0], sizes = [256, 128], strides = [1, 1]} : vector<320x128xbf16> to vector<256x128xbf16>
    %41 = vector.extract_strided_slice %35 {offsets = [33, 0], sizes = [256, 128], strides = [1, 1]} : vector<320x128xbf16> to vector<256x128xbf16>
    %42 = vector.extract_strided_slice %29 {offsets = [47, 0], sizes = [256, 128], strides = [1, 1]} : vector<320x128xbf16> to vector<256x128xbf16>
    %43 = vector.extract_strided_slice %30 {offsets = [48, 0], sizes = [256, 128], strides = [1, 1]} : vector<320x128xbf16> to vector<256x128xbf16>
    %44 = vector.extract_strided_slice %35 {offsets = [49, 0], sizes = [256, 128], strides = [1, 1]} : vector<320x128xbf16> to vector<256x128xbf16>
    %45 = tpu.concatenate %36, %37, %38, %39, %40, %41, %42, %43, %44 in 1 : vector<256x128xbf16>, vector<256x128xbf16>, vector<256x128xbf16>, vector<256x128xbf16>, vector<256x128xbf16>, vector<256x128xbf16>, vector<256x128xbf16>, vector<256x128xbf16>, vector<256x128xbf16> -> vector<256x1152xbf16>
    %c0_9 = arith.constant 0 : index
    %c0_10 = arith.constant 0 : index
    %46 = vector.load %arg2[%c0_9, %c0_10] : memref<1152x128xbf16, #tpu.memory_space<vmem>>, vector<1152x128xbf16>
    %cst_11 = arith.constant dense<0.000000e+00> : vector<256x128xf32>
    %47 = tpu.matmul %45, %46, %cst_11 {dimension_numbers = #tpu.dot_dimension_numbers<[1], [0], [0], [1], [0, 0, 1, 1], [], []>} : vector<256x1152xbf16>, vector<1152x128xbf16>, vector<256x128xf32> -> vector<256x128xf32>
    %c0_12 = arith.constant 0 : index
    %c0_13 = arith.constant 0 : index
    %48 = vector.load %arg3[%c0_12, %c0_13] : memref<1x128xf32, #tpu.memory_space<vmem>>, vector<1x128xf32>
    %49 = vector.broadcast %48 : vector<1x128xf32> to vector<256x128xf32>
    %50 = arith.addf %47, %49 : vector<256x128xf32>
    %cst_14 = arith.constant 0.000000e+00 : f32
    %51 = vector.broadcast %cst_14 : f32 to vector<256x128xf32>
    %52 = arith.maximumf %50, %51 : vector<256x128xf32>
    %53 = vector.extract_strided_slice %52 {offsets = [1, 0], sizes = [255, 128], strides = [1, 1]} : vector<256x128xf32> to vector<255x128xf32>
    %cst_15 = arith.constant 0.000000e+00 : f32
    %54 = vector.broadcast %cst_15 : f32 to vector<1x128xf32>
    %55 = tpu.concatenate %53, %54 in 0 : vector<255x128xf32>, vector<1x128xf32> -> vector<256x128xf32>
    %56 = arith.maximumf %52, %55 : vector<256x128xf32>
    %57 = vector.extract_strided_slice %56 {offsets = [16, 0], sizes = [240, 128], strides = [1, 1]} : vector<256x128xf32> to vector<240x128xf32>
    %cst_16 = arith.constant 0.000000e+00 : f32
    %58 = vector.broadcast %cst_16 : f32 to vector<16x128xf32>
    %59 = tpu.concatenate %57, %58 in 0 : vector<240x128xf32>, vector<16x128xf32> -> vector<256x128xf32>
    %60 = arith.maximumf %56, %59 : vector<256x128xf32>
    %c0_17 = arith.constant 0 : index
    %c0_18 = arith.constant 0 : index
    %61 = vector.load %arg14[%c0_17, %c0_18] : memref<64x256xbf16, #tpu.memory_space<vmem>>, vector<64x256xbf16>
    %62 = arith.truncf %60 : vector<256x128xf32> to vector<256x128xbf16>
    %cst_19 = arith.constant dense<0.000000e+00> : vector<64x128xf32>
    %63 = tpu.matmul %61, %62, %cst_19 {dimension_numbers = #tpu.dot_dimension_numbers<[1], [0], [0], [1], [0, 0, 1, 1], [], []>} : vector<64x256xbf16>, vector<256x128xbf16>, vector<64x128xf32> -> vector<64x128xf32>
    %cst_20 = arith.constant 0.000000e+00 : f32
    %64 = vector.broadcast %cst_20 : f32 to vector<16x128xf32>
    %65 = tpu.concatenate %64, %63, %64 in 0 : vector<16x128xf32>, vector<64x128xf32>, vector<16x128xf32> -> vector<96x128xf32>
    %cst_21 = arith.constant 0.000000e+00 : f32
    %66 = vector.shape_cast %11 : vector<96x1xi1> to vector<96x1xi1>
    %67 = vector.broadcast %66 : vector<96x1xi1> to vector<96x128xi1>
    %68 = vector.broadcast %cst_21 : f32 to vector<96x128xf32>
    %69 = arith.select %67, %65, %68 : vector<96x128xi1>, vector<96x128xf32>
    %70 = arith.truncf %69 : vector<96x128xf32> to vector<96x128xbf16>
    %71 = arith.truncf %65 : vector<96x128xf32> to vector<96x128xbf16>
    %cst_22 = arith.constant 0.000000e+00 : f32
    %72 = vector.shape_cast %13 : vector<96x1xi1> to vector<96x1xi1>
    %73 = vector.broadcast %72 : vector<96x1xi1> to vector<96x128xi1>
    %74 = vector.broadcast %cst_22 : f32 to vector<96x128xf32>
    %75 = arith.select %73, %65, %74 : vector<96x128xi1>, vector<96x128xf32>
    %76 = arith.truncf %75 : vector<96x128xf32> to vector<96x128xbf16>
    %77 = vector.extract_strided_slice %70 {offsets = [7, 0], sizes = [64, 128], strides = [1, 1]} : vector<96x128xbf16> to vector<64x128xbf16>
    %78 = vector.extract_strided_slice %71 {offsets = [8, 0], sizes = [64, 128], strides = [1, 1]} : vector<96x128xbf16> to vector<64x128xbf16>
    %79 = vector.extract_strided_slice %76 {offsets = [9, 0], sizes = [64, 128], strides = [1, 1]} : vector<96x128xbf16> to vector<64x128xbf16>
    %80 = vector.extract_strided_slice %70 {offsets = [15, 0], sizes = [64, 128], strides = [1, 1]} : vector<96x128xbf16> to vector<64x128xbf16>
    %81 = vector.extract_strided_slice %71 {offsets = [16, 0], sizes = [64, 128], strides = [1, 1]} : vector<96x128xbf16> to vector<64x128xbf16>
    %82 = vector.extract_strided_slice %76 {offsets = [17, 0], sizes = [64, 128], strides = [1, 1]} : vector<96x128xbf16> to vector<64x128xbf16>
    %83 = vector.extract_strided_slice %70 {offsets = [23, 0], sizes = [64, 128], strides = [1, 1]} : vector<96x128xbf16> to vector<64x128xbf16>
    %84 = vector.extract_strided_slice %71 {offsets = [24, 0], sizes = [64, 128], strides = [1, 1]} : vector<96x128xbf16> to vector<64x128xbf16>
    %85 = vector.extract_strided_slice %76 {offsets = [25, 0], sizes = [64, 128], strides = [1, 1]} : vector<96x128xbf16> to vector<64x128xbf16>
    %86 = tpu.concatenate %77, %78, %79, %80, %81, %82, %83, %84, %85 in 1 : vector<64x128xbf16>, vector<64x128xbf16>, vector<64x128xbf16>, vector<64x128xbf16>, vector<64x128xbf16>, vector<64x128xbf16>, vector<64x128xbf16>, vector<64x128xbf16>, vector<64x128xbf16> -> vector<64x1152xbf16>
    %c0_23 = arith.constant 0 : index
    %c0_24 = arith.constant 0 : index
    %87 = vector.load %arg4[%c0_23, %c0_24] : memref<1152x128xbf16, #tpu.memory_space<vmem>>, vector<1152x128xbf16>
    %cst_25 = arith.constant dense<0.000000e+00> : vector<64x128xf32>
    %88 = tpu.matmul %86, %87, %cst_25 {dimension_numbers = #tpu.dot_dimension_numbers<[1], [0], [0], [1], [0, 0, 1, 1], [], []>} : vector<64x1152xbf16>, vector<1152x128xbf16>, vector<64x128xf32> -> vector<64x128xf32>
    %c0_26 = arith.constant 0 : index
    %c0_27 = arith.constant 0 : index
    %89 = vector.load %arg5[%c0_26, %c0_27] : memref<1x128xf32, #tpu.memory_space<vmem>>, vector<1x128xf32>
    %90 = vector.broadcast %89 : vector<1x128xf32> to vector<64x128xf32>
    %91 = arith.addf %88, %90 : vector<64x128xf32>
    %cst_28 = arith.constant 0.000000e+00 : f32
    %92 = vector.broadcast %cst_28 : f32 to vector<64x128xf32>
    %93 = arith.maximumf %91, %92 : vector<64x128xf32>
    %94 = vector.extract_strided_slice %93 {offsets = [1, 0], sizes = [63, 128], strides = [1, 1]} : vector<64x128xf32> to vector<63x128xf32>
    %cst_29 = arith.constant 0.000000e+00 : f32
    %95 = vector.broadcast %cst_29 : f32 to vector<1x128xf32>
    %96 = tpu.concatenate %94, %95 in 0 : vector<63x128xf32>, vector<1x128xf32> -> vector<64x128xf32>
    %97 = arith.maximumf %93, %96 : vector<64x128xf32>
    %98 = vector.extract_strided_slice %97 {offsets = [8, 0], sizes = [56, 128], strides = [1, 1]} : vector<64x128xf32> to vector<56x128xf32>
    %cst_30 = arith.constant 0.000000e+00 : f32
    %99 = vector.broadcast %cst_30 : f32 to vector<8x128xf32>
    %100 = tpu.concatenate %98, %99 in 0 : vector<56x128xf32>, vector<8x128xf32> -> vector<64x128xf32>
    %101 = arith.maximumf %97, %100 : vector<64x128xf32>
    %c0_31 = arith.constant 0 : index
    %c0_32 = arith.constant 0 : index
    %102 = vector.load %arg15[%c0_31, %c0_32] : memref<16x64xbf16, #tpu.memory_space<vmem>>, vector<16x64xbf16>
    %103 = arith.truncf %101 : vector<64x128xf32> to vector<64x128xbf16>
    %cst_33 = arith.constant dense<0.000000e+00> : vector<16x128xf32>
    %104 = tpu.matmul %102, %103, %cst_33 {dimension_numbers = #tpu.dot_dimension_numbers<[1], [0], [0], [1], [0, 0, 1, 1], [], []>} : vector<16x64xbf16>, vector<64x128xbf16>, vector<16x128xf32> -> vector<16x128xf32>
    %cst_34 = arith.constant 0.000000e+00 : f32
    %105 = vector.broadcast %cst_34 : f32 to vector<8x128xf32>
    %106 = tpu.concatenate %105, %104, %105 in 0 : vector<8x128xf32>, vector<16x128xf32>, vector<8x128xf32> -> vector<32x128xf32>
    %cst_35 = arith.constant 0.000000e+00 : f32
    %107 = vector.shape_cast %18 : vector<32x1xi1> to vector<32x1xi1>
    %108 = vector.broadcast %107 : vector<32x1xi1> to vector<32x128xi1>
    %109 = vector.broadcast %cst_35 : f32 to vector<32x128xf32>
    %110 = arith.select %108, %106, %109 : vector<32x128xi1>, vector<32x128xf32>
    %111 = arith.truncf %110 : vector<32x128xf32> to vector<32x128xbf16>
    %112 = arith.truncf %106 : vector<32x128xf32> to vector<32x128xbf16>
    %cst_36 = arith.constant 0.000000e+00 : f32
    %113 = vector.shape_cast %20 : vector<32x1xi1> to vector<32x1xi1>
    %114 = vector.broadcast %113 : vector<32x1xi1> to vector<32x128xi1>
    %115 = vector.broadcast %cst_36 : f32 to vector<32x128xf32>
    %116 = arith.select %114, %106, %115 : vector<32x128xi1>, vector<32x128xf32>
    %117 = arith.truncf %116 : vector<32x128xf32> to vector<32x128xbf16>
    %118 = vector.extract_strided_slice %111 {offsets = [3, 0], sizes = [16, 128], strides = [1, 1]} : vector<32x128xbf16> to vector<16x128xbf16>
    %119 = vector.extract_strided_slice %112 {offsets = [4, 0], sizes = [16, 128], strides = [1, 1]} : vector<32x128xbf16> to vector<16x128xbf16>
    %120 = vector.extract_strided_slice %117 {offsets = [5, 0], sizes = [16, 128], strides = [1, 1]} : vector<32x128xbf16> to vector<16x128xbf16>
    %121 = vector.extract_strided_slice %111 {offsets = [7, 0], sizes = [16, 128], strides = [1, 1]} : vector<32x128xbf16> to vector<16x128xbf16>
    %122 = vector.extract_strided_slice %112 {offsets = [8, 0], sizes = [16, 128], strides = [1, 1]} : vector<32x128xbf16> to vector<16x128xbf16>
    %123 = vector.extract_strided_slice %117 {offsets = [9, 0], sizes = [16, 128], strides = [1, 1]} : vector<32x128xbf16> to vector<16x128xbf16>
    %124 = vector.extract_strided_slice %111 {offsets = [11, 0], sizes = [16, 128], strides = [1, 1]} : vector<32x128xbf16> to vector<16x128xbf16>
    %125 = vector.extract_strided_slice %112 {offsets = [12, 0], sizes = [16, 128], strides = [1, 1]} : vector<32x128xbf16> to vector<16x128xbf16>
    %126 = vector.extract_strided_slice %117 {offsets = [13, 0], sizes = [16, 128], strides = [1, 1]} : vector<32x128xbf16> to vector<16x128xbf16>
    %127 = tpu.concatenate %118, %119, %120, %121, %122, %123, %124, %125, %126 in 1 : vector<16x128xbf16>, vector<16x128xbf16>, vector<16x128xbf16>, vector<16x128xbf16>, vector<16x128xbf16>, vector<16x128xbf16>, vector<16x128xbf16>, vector<16x128xbf16>, vector<16x128xbf16> -> vector<16x1152xbf16>
    %c0_37 = arith.constant 0 : index
    %c0_38 = arith.constant 0 : index
    %128 = vector.load %arg6[%c0_37, %c0_38] : memref<1152x128xbf16, #tpu.memory_space<vmem>>, vector<1152x128xbf16>
    %cst_39 = arith.constant dense<0.000000e+00> : vector<16x128xf32>
    %129 = tpu.matmul %127, %128, %cst_39 {dimension_numbers = #tpu.dot_dimension_numbers<[1], [0], [0], [1], [0, 0, 1, 1], [], []>} : vector<16x1152xbf16>, vector<1152x128xbf16>, vector<16x128xf32> -> vector<16x128xf32>
    %c0_40 = arith.constant 0 : index
    %c0_41 = arith.constant 0 : index
    %130 = vector.load %arg7[%c0_40, %c0_41] : memref<1x128xf32, #tpu.memory_space<vmem>>, vector<1x128xf32>
    %131 = vector.broadcast %130 : vector<1x128xf32> to vector<16x128xf32>
    %132 = arith.addf %129, %131 : vector<16x128xf32>
    %cst_42 = arith.constant 0.000000e+00 : f32
    %133 = vector.broadcast %cst_42 : f32 to vector<16x128xf32>
    %134 = arith.maximumf %132, %133 : vector<16x128xf32>
    %135 = vector.extract_strided_slice %134 {offsets = [1, 0], sizes = [15, 128], strides = [1, 1]} : vector<16x128xf32> to vector<15x128xf32>
    %cst_43 = arith.constant 0.000000e+00 : f32
    %136 = vector.broadcast %cst_43 : f32 to vector<1x128xf32>
    %137 = tpu.concatenate %135, %136 in 0 : vector<15x128xf32>, vector<1x128xf32> -> vector<16x128xf32>
    %138 = arith.maximumf %134, %137 : vector<16x128xf32>
    %139 = vector.extract_strided_slice %138 {offsets = [4, 0], sizes = [12, 128], strides = [1, 1]} : vector<16x128xf32> to vector<12x128xf32>
    %cst_44 = arith.constant 0.000000e+00 : f32
    %140 = vector.broadcast %cst_44 : f32 to vector<4x128xf32>
    %141 = tpu.concatenate %139, %140 in 0 : vector<12x128xf32>, vector<4x128xf32> -> vector<16x128xf32>
    %142 = arith.maximumf %138, %141 : vector<16x128xf32>
    %c0_45 = arith.constant 0 : index
    %c0_46 = arith.constant 0 : index
    %143 = vector.load %arg16[%c0_45, %c0_46] : memref<4x16xbf16, #tpu.memory_space<vmem>>, vector<4x16xbf16>
    %144 = arith.truncf %142 : vector<16x128xf32> to vector<16x128xbf16>
    %cst_47 = arith.constant dense<0.000000e+00> : vector<4x128xf32>
    %145 = tpu.matmul %143, %144, %cst_47 {dimension_numbers = #tpu.dot_dimension_numbers<[1], [0], [0], [1], [0, 0, 1, 1], [], []>} : vector<4x16xbf16>, vector<16x128xbf16>, vector<4x128xf32> -> vector<4x128xf32>
    %c0_48 = arith.constant 0 : index
    %c0_49 = arith.constant 0 : index
    %146 = vector.load %arg17[%c0_48, %c0_49] : memref<16x4xbf16, #tpu.memory_space<vmem>>, vector<16x4xbf16>
    %147 = arith.truncf %145 : vector<4x128xf32> to vector<4x128xbf16>
    %cst_50 = arith.constant dense<0.000000e+00> : vector<16x128xf32>
    %148 = tpu.matmul %146, %147, %cst_50 {dimension_numbers = #tpu.dot_dimension_numbers<[1], [0], [0], [1], [0, 0, 1, 1], [], []>} : vector<16x4xbf16>, vector<4x128xbf16>, vector<16x128xf32> -> vector<16x128xf32>
    %cst_51 = arith.constant 0.000000e+00 : f32
    %149 = vector.broadcast %cst_51 : f32 to vector<8x128xf32>
    %150 = tpu.concatenate %149, %148, %149 in 0 : vector<8x128xf32>, vector<16x128xf32>, vector<8x128xf32> -> vector<32x128xf32>
    %cst_52 = arith.constant 0.000000e+00 : f32
    %151 = vector.shape_cast %18 : vector<32x1xi1> to vector<32x1xi1>
    %152 = vector.broadcast %151 : vector<32x1xi1> to vector<32x128xi1>
    %153 = vector.broadcast %cst_52 : f32 to vector<32x128xf32>
    %154 = arith.select %152, %150, %153 : vector<32x128xi1>, vector<32x128xf32>
    %155 = arith.truncf %154 : vector<32x128xf32> to vector<32x128xbf16>
    %156 = arith.truncf %150 : vector<32x128xf32> to vector<32x128xbf16>
    %cst_53 = arith.constant 0.000000e+00 : f32
    %157 = vector.shape_cast %20 : vector<32x1xi1> to vector<32x1xi1>
    %158 = vector.broadcast %157 : vector<32x1xi1> to vector<32x128xi1>
    %159 = vector.broadcast %cst_53 : f32 to vector<32x128xf32>
    %160 = arith.select %158, %150, %159 : vector<32x128xi1>, vector<32x128xf32>
    %161 = arith.truncf %160 : vector<32x128xf32> to vector<32x128xbf16>
    %162 = vector.extract_strided_slice %155 {offsets = [3, 0], sizes = [16, 128], strides = [1, 1]} : vector<32x128xbf16> to vector<16x128xbf16>
    %163 = vector.extract_strided_slice %156 {offsets = [4, 0], sizes = [16, 128], strides = [1, 1]} : vector<32x128xbf16> to vector<16x128xbf16>
    %164 = vector.extract_strided_slice %161 {offsets = [5, 0], sizes = [16, 128], strides = [1, 1]} : vector<32x128xbf16> to vector<16x128xbf16>
    %165 = vector.extract_strided_slice %155 {offsets = [7, 0], sizes = [16, 128], strides = [1, 1]} : vector<32x128xbf16> to vector<16x128xbf16>
    %166 = vector.extract_strided_slice %156 {offsets = [8, 0], sizes = [16, 128], strides = [1, 1]} : vector<32x128xbf16> to vector<16x128xbf16>
    %167 = vector.extract_strided_slice %161 {offsets = [9, 0], sizes = [16, 128], strides = [1, 1]} : vector<32x128xbf16> to vector<16x128xbf16>
    %168 = vector.extract_strided_slice %155 {offsets = [11, 0], sizes = [16, 128], strides = [1, 1]} : vector<32x128xbf16> to vector<16x128xbf16>
    %169 = vector.extract_strided_slice %156 {offsets = [12, 0], sizes = [16, 128], strides = [1, 1]} : vector<32x128xbf16> to vector<16x128xbf16>
    %170 = vector.extract_strided_slice %161 {offsets = [13, 0], sizes = [16, 128], strides = [1, 1]} : vector<32x128xbf16> to vector<16x128xbf16>
    %171 = tpu.concatenate %162, %163, %164, %165, %166, %167, %168, %169, %170 in 1 : vector<16x128xbf16>, vector<16x128xbf16>, vector<16x128xbf16>, vector<16x128xbf16>, vector<16x128xbf16>, vector<16x128xbf16>, vector<16x128xbf16>, vector<16x128xbf16>, vector<16x128xbf16> -> vector<16x1152xbf16>
    %c0_54 = arith.constant 0 : index
    %c0_55 = arith.constant 0 : index
    %172 = vector.load %arg8[%c0_54, %c0_55] : memref<1152x128xbf16, #tpu.memory_space<vmem>>, vector<1152x128xbf16>
    %cst_56 = arith.constant dense<0.000000e+00> : vector<16x128xf32>
    %173 = tpu.matmul %171, %172, %cst_56 {dimension_numbers = #tpu.dot_dimension_numbers<[1], [0], [0], [1], [0, 0, 1, 1], [], []>} : vector<16x1152xbf16>, vector<1152x128xbf16>, vector<16x128xf32> -> vector<16x128xf32>
    %c0_57 = arith.constant 0 : index
    %c0_58 = arith.constant 0 : index
    %174 = vector.load %arg9[%c0_57, %c0_58] : memref<1x128xf32, #tpu.memory_space<vmem>>, vector<1x128xf32>
    %175 = vector.broadcast %174 : vector<1x128xf32> to vector<16x128xf32>
    %176 = arith.addf %173, %175 : vector<16x128xf32>
    %cst_59 = arith.constant 0.000000e+00 : f32
    %177 = vector.broadcast %cst_59 : f32 to vector<16x128xf32>
    %178 = arith.maximumf %176, %177 : vector<16x128xf32>
    %c0_60 = arith.constant 0 : index
    %c0_61 = arith.constant 0 : index
    %179 = vector.load %arg18[%c0_60, %c0_61] : memref<64x16xbf16, #tpu.memory_space<vmem>>, vector<64x16xbf16>
    %180 = arith.truncf %178 : vector<16x128xf32> to vector<16x128xbf16>
    %cst_62 = arith.constant dense<0.000000e+00> : vector<64x128xf32>
    %181 = tpu.matmul %179, %180, %cst_62 {dimension_numbers = #tpu.dot_dimension_numbers<[1], [0], [0], [1], [0, 0, 1, 1], [], []>} : vector<64x16xbf16>, vector<16x128xbf16>, vector<64x128xf32> -> vector<64x128xf32>
    %cst_63 = arith.constant 0.000000e+00 : f32
    %182 = vector.broadcast %cst_63 : f32 to vector<16x128xf32>
    %183 = tpu.concatenate %182, %181, %182 in 0 : vector<16x128xf32>, vector<64x128xf32>, vector<16x128xf32> -> vector<96x128xf32>
    %cst_64 = arith.constant 0.000000e+00 : f32
    %184 = vector.shape_cast %11 : vector<96x1xi1> to vector<96x1xi1>
    %185 = vector.broadcast %184 : vector<96x1xi1> to vector<96x128xi1>
    %186 = vector.broadcast %cst_64 : f32 to vector<96x128xf32>
    %187 = arith.select %185, %183, %186 : vector<96x128xi1>, vector<96x128xf32>
    %188 = arith.truncf %187 : vector<96x128xf32> to vector<96x128xbf16>
    %189 = arith.truncf %183 : vector<96x128xf32> to vector<96x128xbf16>
    %cst_65 = arith.constant 0.000000e+00 : f32
    %190 = vector.shape_cast %13 : vector<96x1xi1> to vector<96x1xi1>
    %191 = vector.broadcast %190 : vector<96x1xi1> to vector<96x128xi1>
    %192 = vector.broadcast %cst_65 : f32 to vector<96x128xf32>
    %193 = arith.select %191, %183, %192 : vector<96x128xi1>, vector<96x128xf32>
    %194 = arith.truncf %193 : vector<96x128xf32> to vector<96x128xbf16>
    %195 = vector.extract_strided_slice %188 {offsets = [7, 0], sizes = [64, 128], strides = [1, 1]} : vector<96x128xbf16> to vector<64x128xbf16>
    %196 = vector.extract_strided_slice %189 {offsets = [8, 0], sizes = [64, 128], strides = [1, 1]} : vector<96x128xbf16> to vector<64x128xbf16>
    %197 = vector.extract_strided_slice %194 {offsets = [9, 0], sizes = [64, 128], strides = [1, 1]} : vector<96x128xbf16> to vector<64x128xbf16>
    %198 = vector.extract_strided_slice %188 {offsets = [15, 0], sizes = [64, 128], strides = [1, 1]} : vector<96x128xbf16> to vector<64x128xbf16>
    %199 = vector.extract_strided_slice %189 {offsets = [16, 0], sizes = [64, 128], strides = [1, 1]} : vector<96x128xbf16> to vector<64x128xbf16>
    %200 = vector.extract_strided_slice %194 {offsets = [17, 0], sizes = [64, 128], strides = [1, 1]} : vector<96x128xbf16> to vector<64x128xbf16>
    %201 = vector.extract_strided_slice %188 {offsets = [23, 0], sizes = [64, 128], strides = [1, 1]} : vector<96x128xbf16> to vector<64x128xbf16>
    %202 = vector.extract_strided_slice %189 {offsets = [24, 0], sizes = [64, 128], strides = [1, 1]} : vector<96x128xbf16> to vector<64x128xbf16>
    %203 = vector.extract_strided_slice %194 {offsets = [25, 0], sizes = [64, 128], strides = [1, 1]} : vector<96x128xbf16> to vector<64x128xbf16>
    %204 = tpu.concatenate %195, %196, %197, %198, %199, %200, %201, %202, %203 in 1 : vector<64x128xbf16>, vector<64x128xbf16>, vector<64x128xbf16>, vector<64x128xbf16>, vector<64x128xbf16>, vector<64x128xbf16>, vector<64x128xbf16>, vector<64x128xbf16>, vector<64x128xbf16> -> vector<64x1152xbf16>
    %c0_66 = arith.constant 0 : index
    %c0_67 = arith.constant 0 : index
    %205 = vector.load %arg10[%c0_66, %c0_67] : memref<1152x128xbf16, #tpu.memory_space<vmem>>, vector<1152x128xbf16>
    %cst_68 = arith.constant dense<0.000000e+00> : vector<64x128xf32>
    %206 = tpu.matmul %204, %205, %cst_68 {dimension_numbers = #tpu.dot_dimension_numbers<[1], [0], [0], [1], [0, 0, 1, 1], [], []>} : vector<64x1152xbf16>, vector<1152x128xbf16>, vector<64x128xf32> -> vector<64x128xf32>
    %c0_69 = arith.constant 0 : index
    %c0_70 = arith.constant 0 : index
    %207 = vector.load %arg11[%c0_69, %c0_70] : memref<1x128xf32, #tpu.memory_space<vmem>>, vector<1x128xf32>
    %208 = vector.broadcast %207 : vector<1x128xf32> to vector<64x128xf32>
    %209 = arith.addf %206, %208 : vector<64x128xf32>
    %cst_71 = arith.constant 0.000000e+00 : f32
    %210 = vector.broadcast %cst_71 : f32 to vector<64x128xf32>
    %211 = arith.maximumf %209, %210 : vector<64x128xf32>
    %c0_72 = arith.constant 0 : index
    %c0_73 = arith.constant 0 : index
    %212 = vector.load %arg19[%c0_72, %c0_73] : memref<256x64xbf16, #tpu.memory_space<vmem>>, vector<256x64xbf16>
    %213 = arith.truncf %211 : vector<64x128xf32> to vector<64x128xbf16>
    %cst_74 = arith.constant dense<0.000000e+00> : vector<256x128xf32>
    %214 = tpu.matmul %212, %213, %cst_74 {dimension_numbers = #tpu.dot_dimension_numbers<[1], [0], [0], [1], [0, 0, 1, 1], [], []>} : vector<256x64xbf16>, vector<64x128xbf16>, vector<256x128xf32> -> vector<256x128xf32>
    %cst_75 = arith.constant 0.000000e+00 : f32
    %215 = vector.broadcast %cst_75 : f32 to vector<32x128xf32>
    %216 = tpu.concatenate %215, %214, %215 in 0 : vector<32x128xf32>, vector<256x128xf32>, vector<32x128xf32> -> vector<320x128xf32>
    %cst_76 = arith.constant 0.000000e+00 : f32
    %217 = vector.shape_cast %4 : vector<320x1xi1> to vector<320x1xi1>
    %218 = vector.broadcast %217 : vector<320x1xi1> to vector<320x128xi1>
    %219 = vector.broadcast %cst_76 : f32 to vector<320x128xf32>
    %220 = arith.select %218, %216, %219 : vector<320x128xi1>, vector<320x128xf32>
    %221 = arith.truncf %220 : vector<320x128xf32> to vector<320x128xbf16>
    %222 = arith.truncf %216 : vector<320x128xf32> to vector<320x128xbf16>
    %cst_77 = arith.constant 0.000000e+00 : f32
    %223 = vector.shape_cast %6 : vector<320x1xi1> to vector<320x1xi1>
    %224 = vector.broadcast %223 : vector<320x1xi1> to vector<320x128xi1>
    %225 = vector.broadcast %cst_77 : f32 to vector<320x128xf32>
    %226 = arith.select %224, %216, %225 : vector<320x128xi1>, vector<320x128xf32>
    %227 = arith.truncf %226 : vector<320x128xf32> to vector<320x128xbf16>
    %228 = vector.extract_strided_slice %221 {offsets = [15, 0], sizes = [256, 128], strides = [1, 1]} : vector<320x128xbf16> to vector<256x128xbf16>
    %229 = vector.extract_strided_slice %222 {offsets = [16, 0], sizes = [256, 128], strides = [1, 1]} : vector<320x128xbf16> to vector<256x128xbf16>
    %230 = vector.extract_strided_slice %227 {offsets = [17, 0], sizes = [256, 128], strides = [1, 1]} : vector<320x128xbf16> to vector<256x128xbf16>
    %231 = vector.extract_strided_slice %221 {offsets = [31, 0], sizes = [256, 128], strides = [1, 1]} : vector<320x128xbf16> to vector<256x128xbf16>
    %232 = vector.extract_strided_slice %222 {offsets = [32, 0], sizes = [256, 128], strides = [1, 1]} : vector<320x128xbf16> to vector<256x128xbf16>
    %233 = vector.extract_strided_slice %227 {offsets = [33, 0], sizes = [256, 128], strides = [1, 1]} : vector<320x128xbf16> to vector<256x128xbf16>
    %234 = vector.extract_strided_slice %221 {offsets = [47, 0], sizes = [256, 128], strides = [1, 1]} : vector<320x128xbf16> to vector<256x128xbf16>
    %235 = vector.extract_strided_slice %222 {offsets = [48, 0], sizes = [256, 128], strides = [1, 1]} : vector<320x128xbf16> to vector<256x128xbf16>
    %236 = vector.extract_strided_slice %227 {offsets = [49, 0], sizes = [256, 128], strides = [1, 1]} : vector<320x128xbf16> to vector<256x128xbf16>
    %237 = tpu.concatenate %228, %229, %230, %231, %232, %233, %234, %235, %236 in 1 : vector<256x128xbf16>, vector<256x128xbf16>, vector<256x128xbf16>, vector<256x128xbf16>, vector<256x128xbf16>, vector<256x128xbf16>, vector<256x128xbf16>, vector<256x128xbf16>, vector<256x128xbf16> -> vector<256x1152xbf16>
    %c0_78 = arith.constant 0 : index
    %c0_79 = arith.constant 0 : index
    %238 = vector.load %arg12[%c0_78, %c0_79] : memref<1152x4xbf16, #tpu.memory_space<vmem>>, vector<1152x4xbf16>
    %cst_80 = arith.constant dense<0.000000e+00> : vector<256x4xf32>
    %239 = tpu.matmul %237, %238, %cst_80 {dimension_numbers = #tpu.dot_dimension_numbers<[1], [0], [0], [1], [0, 0, 1, 1], [], []>} : vector<256x1152xbf16>, vector<1152x4xbf16>, vector<256x4xf32> -> vector<256x4xf32>
    %c0_81 = arith.constant 0 : index
    %c0_82 = arith.constant 0 : index
    %240 = vector.load %arg13[%c0_81, %c0_82] : memref<1x4xf32, #tpu.memory_space<vmem>>, vector<1x4xf32>
    %241 = vector.broadcast %240 : vector<1x4xf32> to vector<256x4xf32>
    %242 = arith.addf %239, %241 : vector<256x4xf32>
    %cst_83 = arith.constant 0.000000e+00 : f32
    %243 = vector.broadcast %cst_83 : f32 to vector<256x4xf32>
    %244 = arith.maximumf %242, %243 : vector<256x4xf32>
    %245 = math.roundeven %244 : vector<256x4xf32>
    %c0_84 = arith.constant 0 : index
    %c0_85 = arith.constant 0 : index
    %246 = vector.load %arg20[%c0_84, %c0_85] : memref<2x256xf32, #tpu.memory_space<vmem>>, vector<2x256xf32>
    %247 = vector.extract_strided_slice %245 {offsets = [0, 0], sizes = [256, 1], strides = [1, 1]} : vector<256x4xf32> to vector<256x1xf32>
    %c0_86 = arith.constant 0 : index
    %c0_87 = arith.constant 0 : index
    %248 = vector.load %arg21[%c0_86, %c0_87] : memref<256x128xf32, #tpu.memory_space<vmem>>, vector<256x128xf32>
    %249 = vector.broadcast %247 : vector<256x1xf32> to vector<256x128xf32>
    %250 = arith.mulf %249, %248 : vector<256x128xf32>
    %cst_88 = arith.constant dense<0.000000e+00> : vector<2x128xf32>
    %251 = tpu.matmul %246, %250, %cst_88 {dimension_numbers = #tpu.dot_dimension_numbers<[1], [0], [0], [1], [0, 0, 1, 1], [], []>} : vector<2x256xf32>, vector<256x128xf32>, vector<2x128xf32> -> vector<2x128xf32>
    %c0_89 = arith.constant 0 : index
    %c0_90 = arith.constant 0 : index
    %c0_91 = arith.constant 0 : index
    %c0_92 = arith.constant 0 : index
    %252 = vector.load %arg22[%c0_89, %c0_90, %c0_91, %c0_92] : memref<1x4x2x128xf32, #tpu.memory_space<vmem>>, vector<1x1x2x128xf32>
    %253 = vector.shape_cast %252 : vector<1x1x2x128xf32> to vector<2x128xf32>
    %254 = vector.shape_cast %251 : vector<2x128xf32> to vector<1x1x2x128xf32>
    tpu.vector_store %arg22[%c0_89, %c0_90, %c0_91, %c0_92], %254 {strides = array<i32>} : memref<1x4x2x128xf32, #tpu.memory_space<vmem>>, vector<1x1x2x128xf32>,
    %c0_93 = arith.constant 0 : index
    %c0_94 = arith.constant 0 : index
    %255 = vector.load %arg20[%c0_93, %c0_94] : memref<2x256xf32, #tpu.memory_space<vmem>>, vector<2x256xf32>
    %256 = vector.extract_strided_slice %245 {offsets = [0, 1], sizes = [256, 1], strides = [1, 1]} : vector<256x4xf32> to vector<256x1xf32>
    %c0_95 = arith.constant 0 : index
    %c0_96 = arith.constant 0 : index
    %257 = vector.load %arg21[%c0_95, %c0_96] : memref<256x128xf32, #tpu.memory_space<vmem>>, vector<256x128xf32>
    %258 = vector.broadcast %256 : vector<256x1xf32> to vector<256x128xf32>
    %259 = arith.mulf %258, %257 : vector<256x128xf32>
    %cst_97 = arith.constant dense<0.000000e+00> : vector<2x128xf32>
    %260 = tpu.matmul %255, %259, %cst_97 {dimension_numbers = #tpu.dot_dimension_numbers<[1], [0], [0], [1], [0, 0, 1, 1], [], []>} : vector<2x256xf32>, vector<256x128xf32>, vector<2x128xf32> -> vector<2x128xf32>
    %c0_98 = arith.constant 0 : index
    %c1 = arith.constant 1 : index
    %c0_99 = arith.constant 0 : index
    %c0_100 = arith.constant 0 : index
    %261 = vector.load %arg22[%c0_98, %c1, %c0_99, %c0_100] : memref<1x4x2x128xf32, #tpu.memory_space<vmem>>, vector<1x1x2x128xf32>
    %262 = vector.shape_cast %261 : vector<1x1x2x128xf32> to vector<2x128xf32>
    %263 = vector.shape_cast %260 : vector<2x128xf32> to vector<1x1x2x128xf32>
    tpu.vector_store %arg22[%c0_98, %c1, %c0_99, %c0_100], %263 {strides = array<i32>} : memref<1x4x2x128xf32, #tpu.memory_space<vmem>>, vector<1x1x2x128xf32>,
    %c0_101 = arith.constant 0 : index
    %c0_102 = arith.constant 0 : index
    %264 = vector.load %arg20[%c0_101, %c0_102] : memref<2x256xf32, #tpu.memory_space<vmem>>, vector<2x256xf32>
    %265 = vector.extract_strided_slice %245 {offsets = [0, 2], sizes = [256, 1], strides = [1, 1]} : vector<256x4xf32> to vector<256x1xf32>
    %c0_103 = arith.constant 0 : index
    %c0_104 = arith.constant 0 : index
    %266 = vector.load %arg21[%c0_103, %c0_104] : memref<256x128xf32, #tpu.memory_space<vmem>>, vector<256x128xf32>
    %267 = vector.broadcast %265 : vector<256x1xf32> to vector<256x128xf32>
    %268 = arith.mulf %267, %266 : vector<256x128xf32>
    %cst_105 = arith.constant dense<0.000000e+00> : vector<2x128xf32>
    %269 = tpu.matmul %264, %268, %cst_105 {dimension_numbers = #tpu.dot_dimension_numbers<[1], [0], [0], [1], [0, 0, 1, 1], [], []>} : vector<2x256xf32>, vector<256x128xf32>, vector<2x128xf32> -> vector<2x128xf32>
    %c0_106 = arith.constant 0 : index
    %c2 = arith.constant 2 : index
    %c0_107 = arith.constant 0 : index
    %c0_108 = arith.constant 0 : index
    %270 = vector.load %arg22[%c0_106, %c2, %c0_107, %c0_108] : memref<1x4x2x128xf32, #tpu.memory_space<vmem>>, vector<1x1x2x128xf32>
    %271 = vector.shape_cast %270 : vector<1x1x2x128xf32> to vector<2x128xf32>
    %272 = vector.shape_cast %269 : vector<2x128xf32> to vector<1x1x2x128xf32>
    tpu.vector_store %arg22[%c0_106, %c2, %c0_107, %c0_108], %272 {strides = array<i32>} : memref<1x4x2x128xf32, #tpu.memory_space<vmem>>, vector<1x1x2x128xf32>,
    %c0_109 = arith.constant 0 : index
    %c0_110 = arith.constant 0 : index
    %273 = vector.load %arg20[%c0_109, %c0_110] : memref<2x256xf32, #tpu.memory_space<vmem>>, vector<2x256xf32>
    %274 = vector.extract_strided_slice %245 {offsets = [0, 3], sizes = [256, 1], strides = [1, 1]} : vector<256x4xf32> to vector<256x1xf32>
    %c0_111 = arith.constant 0 : index
    %c0_112 = arith.constant 0 : index
    %275 = vector.load %arg21[%c0_111, %c0_112] : memref<256x128xf32, #tpu.memory_space<vmem>>, vector<256x128xf32>
    %276 = vector.broadcast %274 : vector<256x1xf32> to vector<256x128xf32>
    %277 = arith.mulf %276, %275 : vector<256x128xf32>
    %cst_113 = arith.constant dense<0.000000e+00> : vector<2x128xf32>
    %278 = tpu.matmul %273, %277, %cst_113 {dimension_numbers = #tpu.dot_dimension_numbers<[1], [0], [0], [1], [0, 0, 1, 1], [], []>} : vector<2x256xf32>, vector<256x128xf32>, vector<2x128xf32> -> vector<2x128xf32>
    %c0_114 = arith.constant 0 : index
    %c3 = arith.constant 3 : index
    %c0_115 = arith.constant 0 : index
    %c0_116 = arith.constant 0 : index
    %279 = vector.load %arg22[%c0_114, %c3, %c0_115, %c0_116] : memref<1x4x2x128xf32, #tpu.memory_space<vmem>>, vector<1x1x2x128xf32>
    %280 = vector.shape_cast %279 : vector<1x1x2x128xf32> to vector<2x128xf32>
    %281 = vector.shape_cast %278 : vector<2x128xf32> to vector<1x1x2x128xf32>
    tpu.vector_store %arg22[%c0_114, %c3, %c0_115, %c0_116], %281 {strides = array<i32>} : memref<1x4x2x128xf32, #tpu.memory_space<vmem>>, vector<1x1x2x128xf32>,
    return
  }
  func.func @transform_0(%arg0: i32) -> (i32, i32, i32) {
    %c0_i32 = arith.constant 0 : i32
    %c0_i32_0 = arith.constant 0 : i32
    %c0_i32_1 = arith.constant 0 : i32
    return %arg0, %c0_i32, %c0_i32_0 : i32, i32, i32
  }
  func.func @transform_1(%arg0: i32) -> (i32, i32) {
    %c0_i32 = arith.constant 0 : i32
    %c0_i32_0 = arith.constant 0 : i32
    %c0_i32_1 = arith.constant 0 : i32
    return %c0_i32, %c0_i32_0 : i32, i32
  }
  func.func @transform_2(%arg0: i32) -> (i32, i32) {
    %c0_i32 = arith.constant 0 : i32
    %c0_i32_0 = arith.constant 0 : i32
    %c0_i32_1 = arith.constant 0 : i32
    return %c0_i32, %c0_i32_0 : i32, i32
  }
  func.func @transform_3(%arg0: i32) -> (i32, i32) {
    %c0_i32 = arith.constant 0 : i32
    %c0_i32_0 = arith.constant 0 : i32
    %c0_i32_1 = arith.constant 0 : i32
    return %c0_i32, %c0_i32_0 : i32, i32
  }
  func.func @transform_4(%arg0: i32) -> (i32, i32) {
    %c0_i32 = arith.constant 0 : i32
    %c0_i32_0 = arith.constant 0 : i32
    %c0_i32_1 = arith.constant 0 : i32
    return %c0_i32, %c0_i32_0 : i32, i32
  }
  func.func @transform_5(%arg0: i32) -> (i32, i32) {
    %c0_i32 = arith.constant 0 : i32
    %c0_i32_0 = arith.constant 0 : i32
    %c0_i32_1 = arith.constant 0 : i32
    return %c0_i32, %c0_i32_0 : i32, i32
  }
  func.func @transform_6(%arg0: i32) -> (i32, i32) {
    %c0_i32 = arith.constant 0 : i32
    %c0_i32_0 = arith.constant 0 : i32
    %c0_i32_1 = arith.constant 0 : i32
    return %c0_i32, %c0_i32_0 : i32, i32
  }
  func.func @transform_7(%arg0: i32) -> (i32, i32) {
    %c0_i32 = arith.constant 0 : i32
    %c0_i32_0 = arith.constant 0 : i32
    %c0_i32_1 = arith.constant 0 : i32
    return %c0_i32, %c0_i32_0 : i32, i32
  }
  func.func @transform_8(%arg0: i32) -> (i32, i32) {
    %c0_i32 = arith.constant 0 : i32
    %c0_i32_0 = arith.constant 0 : i32
    %c0_i32_1 = arith.constant 0 : i32
    return %c0_i32, %c0_i32_0 : i32, i32
  }
  func.func @transform_9(%arg0: i32) -> (i32, i32) {
    %c0_i32 = arith.constant 0 : i32
    %c0_i32_0 = arith.constant 0 : i32
    %c0_i32_1 = arith.constant 0 : i32
    return %c0_i32, %c0_i32_0 : i32, i32
  }
  func.func @transform_10(%arg0: i32) -> (i32, i32) {
    %c0_i32 = arith.constant 0 : i32
    %c0_i32_0 = arith.constant 0 : i32
    %c0_i32_1 = arith.constant 0 : i32
    return %c0_i32, %c0_i32_0 : i32, i32
  }
  func.func @transform_11(%arg0: i32) -> (i32, i32) {
    %c0_i32 = arith.constant 0 : i32
    %c0_i32_0 = arith.constant 0 : i32
    %c0_i32_1 = arith.constant 0 : i32
    return %c0_i32, %c0_i32_0 : i32, i32
  }
  func.func @transform_12(%arg0: i32) -> (i32, i32) {
    %c0_i32 = arith.constant 0 : i32
    %c0_i32_0 = arith.constant 0 : i32
    %c0_i32_1 = arith.constant 0 : i32
    return %c0_i32, %c0_i32_0 : i32, i32
  }
  func.func @transform_13(%arg0: i32) -> (i32, i32) {
    %c0_i32 = arith.constant 0 : i32
    %c0_i32_0 = arith.constant 0 : i32
    %c0_i32_1 = arith.constant 0 : i32
    return %c0_i32, %c0_i32_0 : i32, i32
  }
  func.func @transform_14(%arg0: i32) -> (i32, i32) {
    %c0_i32 = arith.constant 0 : i32
    %c0_i32_0 = arith.constant 0 : i32
    %c0_i32_1 = arith.constant 0 : i32
    return %c0_i32, %c0_i32_0 : i32, i32
  }
  func.func @transform_15(%arg0: i32) -> (i32, i32) {
    %c0_i32 = arith.constant 0 : i32
    %c0_i32_0 = arith.constant 0 : i32
    %c0_i32_1 = arith.constant 0 : i32
    return %c0_i32, %c0_i32_0 : i32, i32
  }
  func.func @transform_16(%arg0: i32) -> (i32, i32) {
    %c0_i32 = arith.constant 0 : i32
    %c0_i32_0 = arith.constant 0 : i32
    %c0_i32_1 = arith.constant 0 : i32
    return %c0_i32, %c0_i32_0 : i32, i32
  }
  func.func @transform_17(%arg0: i32) -> (i32, i32) {
    %c0_i32 = arith.constant 0 : i32
    %c0_i32_0 = arith.constant 0 : i32
    %c0_i32_1 = arith.constant 0 : i32
    return %c0_i32, %c0_i32_0 : i32, i32
  }
  func.func @transform_18(%arg0: i32) -> (i32, i32) {
    %c0_i32 = arith.constant 0 : i32
    %c0_i32_0 = arith.constant 0 : i32
    %c0_i32_1 = arith.constant 0 : i32
    return %c0_i32, %c0_i32_0 : i32, i32
  }
  func.func @transform_19(%arg0: i32) -> (i32, i32) {
    %c0_i32 = arith.constant 0 : i32
    %c0_i32_0 = arith.constant 0 : i32
    %c0_i32_1 = arith.constant 0 : i32
    return %c0_i32, %c0_i32_0 : i32, i32
  }
  func.func @transform_20(%arg0: i32) -> (i32, i32) {
    %c0_i32 = arith.constant 0 : i32
    %c0_i32_0 = arith.constant 0 : i32
    %c0_i32_1 = arith.constant 0 : i32
    return %c0_i32, %c0_i32_0 : i32, i32
  }
  func.func @transform_21(%arg0: i32) -> (i32, i32, i32, i32) {
    %c0_i32 = arith.constant 0 : i32
    %c0_i32_0 = arith.constant 0 : i32
    %c0_i32_1 = arith.constant 0 : i32
    %c0_i32_2 = arith.constant 0 : i32
    return %arg0, %c0_i32, %c0_i32_0, %c0_i32_1 : i32, i32, i32, i32
  }
}

</mosaic_0001>

<bundles_post_ra>
// kernel: forward.1
= control target key start
LH: loop header
LB: loop body
LE: loop exit
PB: predicated region body
PF: predicated region fallthrough
CT: control target
= control target key end

     0   :  { %s21827_s0 = inlined_call_operand.vmem [shape: f32[2,256,128], index: 0, kind: input, shape index: {}]   ;;  %s21828_s1 = inlined_call_operand.vmem [shape: bf16[1152,128], index: 1, kind: input, shape index: {}]   ;;  %s21829_s2 = inlined_call_operand.vmem [shape: f32[1,128], index: 2, kind: input, shape index: {}]   ;;  %s21830_s3 = inlined_call_operand.vmem [shape: bf16[1152,128], index: 3, kind: input, shape index: {}]   ;;  %s21831_s4 = inlined_call_operand.vmem [shape: f32[1,128], index: 4, kind: input, shape index: {}]   ;;  %s21832_s5 = inlined_call_operand.vmem [shape: bf16[1152,128], index: 5, kind: input, shape index: {}]   ;;  %s21833_s6 = inlined_call_operand.vmem [shape: f32[1,128], index: 6, kind: input, shape index: {}]   ;;  %s21834_s7 = inlined_call_operand.vmem [shape: bf16[1152,128], index: 7, kind: input, shape index: {}]   ;;  %s21835_s8 = inlined_call_operand.vmem [shape: f32[1,128], index: 8, kind: input, shape index: {}]   ;;  %s21836_s9 = inlined_call_operand.hbm [shape: bf16[1152,128], index: 9, kind: input, shape index: {}]   ;;  %s21837_s10 = inlined_call_operand.vmem [shape: f32[1,128], index: 10, kind: input, shape index: {}]   ;;  %s21838_s11 = inlined_call_operand.vmem [shape: bf16[1152,4], index: 11, kind: input, shape index: {}]   ;;  %s21839_s12 = inlined_call_operand.vmem [shape: f32[1,4], index: 12, kind: input, shape index: {}]   ;;  %s21840_s13 = inlined_call_operand.vmem [shape: bf16[64,256], index: 13, kind: input, shape index: {}]   ;;  %s21841_s14 = inlined_call_operand.vmem [shape: bf16[16,64], index: 14, kind: input, shape index: {}]   ;;  %s21842_s15 = inlined_call_operand.vmem [shape: bf16[4,16], index: 15, kind: input, shape index: {}]   ;;  %s21843_s16 = inlined_call_operand.vmem [shape: bf16[16,4], index: 16, kind: input, shape index: {}]   ;;  %s21844_s17 = inlined_call_operand.vmem [shape: bf16[64,16], index: 17, kind: input, shape index: {}]   ;;  %s21845_s18 = inlined_call_operand.vmem [shape: bf16[256,64], index: 18, kind: input, shape index: {}]   ;;  %s21846_s19 = inlined_call_operand.vmem [shape: f32[2,256], index: 19, kind: input, shape index: {}]   ;;  %s21847_s20 = inlined_call_operand.hbm [shape: f32[256,128], index: 20, kind: input, shape index: {}]   ;;  %s21848_s21 = inlined_call_operand.vmem [shape: f32[2,4,2,128], index: 21, kind: output, shape index: {}]  }
   0x1   :  { %22066 = sst [smem:[#allocation72_spill]] %s21827_s0 }
   0x2   :  { %22067 = sst [smem:[#allocation73_spill]] %s21828_s1 }
   0x3   :  { %22068 = sst [smem:[#allocation74_spill]] %s21829_s2 }
   0x4   :  { %22069 = sst [smem:[#allocation75_spill]] %s21830_s3 }
   0x5   :  { %22070 = sst [smem:[#allocation76_spill]] %s21831_s4 }
   0x6   :  { %22071 = sst [smem:[#allocation77_spill]] %s21832_s5 }
   0x7   :  { %22072 = sst [smem:[#allocation78_spill]] %s21836_s9 }
   0x8   :  { %26 = vsyncpa [#allocation3], 0 }
   0x9   :  { %27 = vsyncpa [#allocation5], 0  ;;  %s15958_s2 = smov 0  }
   0xa LB: > { %s15835_s25 = smov [#allocation2]   ;;  %s15964_s27 = sadd.s32 4294967295, %s15833_s2   ;;  %s15833_s2 = sphi %s15958_s2, %s33_s2  }
   0xb   : > { %s546_s26 = sshll.u32 %s15835_s25, 4  ;;  %p12437_p0 = scmp.ge.s32.totalorder %s15833_s2, 1  ;;  %s547_s26 = int_to_ptr.vmem [resolvable:$true] %s546_s26 }
   0xc   : > { %p510_p1 = scmp.lt.s32.totalorder %s15833_s2, 3  ;;  %p15175_p3 = scmp.eq.s32.totalorder %s15964_s27, 0 }
   0xd   : > { %s15836_s28 = smov [#allocation4]   ;;  %s15778_s4 = scalar_lea.vmem %s547_s26, 9216 }
   0xe   : > { %p15968_p2 = pnand %p12437_p0, %p510_p1  ;;  %s589_s29 = sshll.u32 %s15836_s28, 4  ;;  %s590_s29 = int_to_ptr.vmem [resolvable:$true] %s589_s29 }
   0xf   : > { %p15779_p7 = scmp.ne.s32.totalorder %s547_s26, %s15778_s4  ;;  %p15786_p10 = scmp.lt.s32.totalorder %s547_s26, %s547_s26 }
  0x10   : > { %p15168_p4 = pneg %p15968_p2  ;;  %p15787_p11 = scmp.lt.s32.totalorder %s15778_s4, %s15778_s4 }
  0x12   : > { %p15977_p5 = pnand %p15175_p3, %p15168_p4  ;;  %p15788_p12 = por %p15787_p11, %p15786_p10 }
  0x14   : > { %p15769_p6 = pneg %p15977_p5 }
  0x16   : > { %p15781_p8 = pnand %p15779_p7, %p15769_p6 }
  0x18   : > { %p15782_p9 = pneg %p15781_p8 }
  0x1a   : > { %p15789_p13 = pnand %p15788_p12, %p15782_p9 }
  0x1c   : > { %15792 = shalt.err (!%p15789_p13)
}
  0x1d   : > { %s15837_s30 = smov 64   ;;  %s15838_s5 = smov 4  }
  0x1e   : > { %s22075_s9 = sld [smem:[#allocation78_spill]]  ;;  %s15804_s1 = scalar_lea.vmem %s590_s29, 4096 }
  0x1f   : > { %p15805_p0 = scmp.ne.s32.totalorder %s590_s29, %s15804_s1  ;;  %p15812_p7 = scmp.lt.s32.totalorder %s590_s29, %s590_s29 }
  0x20   : > { %p15813_p8 = scmp.lt.s32.totalorder %s15804_s1, %s15804_s1 }
  0x21   : > { %p15807_p1 = pnand %p15805_p0, %p15769_p6 }
  0x22   : > { %p15814_p10 = por %p15813_p8, %p15812_p7 }
  0x23   : > { %p15808_p4 = pneg %p15807_p1 }
  0x24   : > { %15171 = dma.hbm_to_vmem [thread:$0]  (!%p15977_p5), %s22075_s9, 9216, %s547_s26, [#allocation3], %s15837_s30, %s15837_s30, %s15838_s5  }
  0x25   : > { %p15815_p9 = pnand %p15814_p10, %p15808_p4 }
  0x27   : > { %15818 = shalt.err (!%p15815_p9)
}
  0x28   : > { %s15839_s24 = smov 128   ;;  %s15840_s25 = smov 8  }
  0x29   : > { %15174 = dma.hbm_to_vmem [thread:$0]  (!%p15977_p5), %s21847_s20, 4096, %s590_s29, [#allocation5], %s15839_s24, %s15839_s24, %s15840_s25  }
  0x2a   : > { %613 = sbr.rel (%p15968_p2) target bundleno = 4272 (0x10b0), region = 104 }
  0x2f   : > { %15824 = dma.done.wait (%p15175_p3), [#allocation3], 9216  }
  0x30   : > { %15826 = vsyncadd (%p15175_p3), [#allocation3], 4294958080 }
  0x31   : > { %15828 = dma.done.wait (%p15175_p3), [#allocation5], 4096  }
  0x32   : > { %15830 = vsyncadd (%p15175_p3), [#allocation5], 4294963200  ;;  %p677_p6 = scmp.lt.s32.totalorder %s15964_s27, 1  ;;  %v21855_v0 = vmov 0   ;;  %v688_v1 = vlaneseq  ;;  %s22079_s29 = sld [smem:[#allocation73_spill]]  ;;  %v21857_v7 = vmov 0.0|0.0  }
  0x33   : > { %15200 = vset.pattern.permute.xlu1 %v21855_v0  ;;  %15202 = vset.pattern.permute.xlu0 %v21855_v0  ;;  %v16016_v2 = vrot.slane %v21855_v0, 1  ;;  %v16020_v4 = vrot.slane %v21855_v0, 7  ;;  %v16028_v8 = vrot.slane %v21857_v7, 1  ;;  %v22089_v49 = vmov 0  ;;  %s22101_s23 = sld [smem:[#allocation72_spill]] }
  0x34   : > { %s22946_s27 = smov (!%p677_p6, %s15964_s27), 1  ;;  %v16022_v5 = vshrl.u32 %v688_v1, 7  ;;  %v22092_v50 = vmov 0  ;;  %v22095_v53 = vmov 0  ;;  %v22098_v56 = vmov 0  ;;  %s22267_s22 = sld [smem:[#allocation74_spill]] }
  0x35   : > { %22076 = vst [vmem:[#allocation8_spill] sm:$0xff] %v16016_v2  ;;  %v21854_v3 = vshrl.u32 %v16016_v2, 16  ;;  %22077 = vst [vmem:[#allocation9_spill] sm:$0xff] %v16020_v4  ;;  %s12948_s5 = sshll.u32 %s22946_s27, 8  ;;  %v21853_v21 = vshrl.u32 %v16028_v8, 16  ;;  %vm21864_vm4 = vcmask 1046528  }
  0x36   : > { %22078 = vst [vmem:[#allocation10_spill] sm:$0xff] %v16022_v5  ;;  %22080 = vst [vmem:[#allocation11_spill] sm:$0xff] %v16028_v8  ;;  %v16038_v11 = vadd.s32 40, %v16022_v5  ;;  %v16044_v13 = vadd.s32 32, %v16022_v5  ;;  %v16050_v15 = vadd.s32 56, %v16022_v5  ;;  %v16056_v17 = vadd.s32 48, %v16022_v5 }
  0x37   : > { %v16063_v19 = vrot.slane %v21854_v3, 7  ;;  %v16073_v23 = vadd.s32 72, %v16022_v5  ;;  %v16079_v25 = vadd.s32 64, %v16022_v5  ;;  %v16102_v35 = vrot.slane %v21853_v21, 7  ;;  %s22293_s26 = sld [smem:[#allocation75_spill]]  ;;  %s12949_s28 = sshll.u32 %s22946_s27, 3 }
  0x38   : > { %v15300_v6 = vld [vmem:[%s22079_s29 + $0x78] sm:$0xff]   ;;  %22081 = vst [vmem:[#allocation12_spill] sm:$0xff] %v16038_v11  ;;  %22082 = vst [vmem:[#allocation13_spill] sm:$0xff] %v16044_v13  ;;  %v15304_v14 = vld [vmem:[%s22079_s29 + $0x70] sm:$0xff]   ;;  %v723_v27 = vand.u32 15, %v16038_v11  ;;  %v722_v29 = vand.u32 15, %v16044_v13 }
  0x39   : > { %v15301_v9 = vld [vmem:[%s22079_s29 + $0x38] sm:$0xff]   ;;  %12950 = vmatprep.subr.bf16.mxu0 %v15300_v6  ;;  %22083 = vst [vmem:[#allocation14_spill] sm:$0xff] %v16050_v15  ;;  %v15305_v16 = vld [vmem:[%s22079_s29 + $0x30] sm:$0xff]   ;;  %22084 = vst [vmem:[#allocation15_spill] sm:$0xff] %v16056_v17  ;;  %v725_v31 = vand.u32 15, %v16050_v15  ;;  %v724_v33 = vand.u32 15, %v16056_v17  ;;  %s16194_s1 = scalar_lea.vmem %s22101_s23, %s12948_s5 }
  0x3a   : > { %v15302_v10 = vld [vmem:[%s22079_s29 + $0xf8] sm:$0xff]   ;;  %12951 = vmatpush3.bf16.msra.mxu0 %v15301_v9  ;;  %v15306_v18 = vld [vmem:[%s22079_s29 + $0xf0] sm:$0xff]   ;;  %22085 = vst [vmem:[#allocation16_spill] sm:$0xff] %v16063_v19  ;;  %v15308_v22 = vld [vmem:[%s22079_s29 + $0x68] sm:$0xff]   ;;  %v727_v37 = vand.u32 15, %v16073_v23  ;;  %v726_v39 = vand.u32 15, %v16079_v25 }
  0x3b   : > { %v15303_v12 = vld [vmem:[%s22079_s29 + $0xb8] sm:$0xff]   ;;  %13062 = vmatprep.subr.bf16.mxu1 %v15302_v10  ;;  %12952 = vmatprep.subr.bf16.mxu0 %v15304_v14  ;;  %v15307_v20 = vld [vmem:[%s22079_s29 + $0xb0] sm:$0xff]   ;;  %22086 = vst [vmem:[#allocation17_spill] sm:$0xff] %v16073_v23  ;;  %v15309_v24 = vld [vmem:[%s22079_s29 + $0x28] sm:$0xff]   ;;  %v16116_v41 = vadd.s32 88, %v16022_v5  ;;  %v16122_v43 = vadd.s32 80, %v16022_v5 }
  0x3c   : > { %13063 = vmatpush3.bf16.msra.mxu1 %v15303_v12  ;;  %22087 = vst [vmem:[#allocation18_spill] sm:$0xff] %v16079_v25  ;;  %v15310_v26 = vld [vmem:[%s22079_s29 + $0xe8] sm:$0xff]   ;;  %v15312_v30 = vld [vmem:[%s22079_s29 + $0x60] sm:$0xff]   ;;  %22088 = vst [vmem:[#allocation19_spill] sm:$0xff] %v16102_v35  ;;  %v16128_v45 = vadd.s32 104, %v16022_v5  ;;  %v16134_v47 = vadd.s32 96, %v16022_v5 }
  0x3d   : > { %13064 = vmatprep.subr.bf16.mxu1 %v15306_v18  ;;  %v15311_v28 = vld [vmem:[%s22079_s29 + $0xa8] sm:$0xff]   ;;  %v15313_v32 = vld [vmem:[%s22079_s29 + $0x20] sm:$0xff]   ;;  %v15316_v38 = vld [vmem:[%s22079_s29 + $0x58] sm:$0xff]   ;;  %vm16139_vm0 = vcmp.ne.s32.totalorder %v723_v27, 15  ;;  %vm16143_vm1 = vcmp.ne.s32.totalorder %v722_v29, 0  ;;  %v729_v51 = vand.u32 15, %v16116_v41 }
  0x3e   : > { %12953 = vmatpush3.bf16.msra.mxu0 %v15305_v16  ;;  %v15314_v34 = vld [vmem:[%s22079_s29 + $0xe0] sm:$0xff]   ;;  %v15317_v40 = vld [vmem:[%s22079_s29 + $0x18] sm:$0xff]   ;;  %v15320_v46 = vld [vmem:[%s22079_s29 + $0x50] sm:$0xff]   ;;  %v22090_v49 = vsel %vm16139_vm0, 4294967295, %v22089_v49  ;;  %v22093_v50 = vsel %vm16143_vm1, 4294967295, %v22092_v50  ;;  %vm16151_vm2 = vcmp.ne.s32.totalorder %v724_v33, 0 }
  0x3f   : > { %12954 = vmatprep.subr.bf16.mxu0 %v15308_v22  ;;  %v15315_v36 = vld [vmem:[%s22079_s29 + $0xa0] sm:$0xff]   ;;  %v15318_v42 = vld [vmem:[%s22079_s29 + $0xd8] sm:$0xff]   ;;  %v15321_v48 = vld [vmem:[%s22079_s29 + $0x10] sm:$0xff]   ;;  %22091 = vst [vmem:[#allocation20_spill] sm:$0xff] %v22090_v49  ;;  %v22096_v53 = vsel %vm16151_vm2, 4294967295, %v22095_v53  ;;  %v728_v54 = vand.u32 15, %v16122_v43 }
  0x40   : > { %13065 = vmatpush3.bf16.msra.mxu1 %v15307_v20  ;;  %v15319_v44 = vld [vmem:[%s22079_s29 + $0x98] sm:$0xff]   ;;  %22094 = vst [vmem:[#allocation21_spill] sm:$0xff] %v22093_v50  ;;  %v15322_v52 = vld [vmem:[%s22079_s29 + $0xd0] sm:$0xff]   ;;  %22097 = vst [vmem:[#allocation22_spill] sm:$0xff] %v22096_v53  ;;  %vm16159_vm3 = vcmp.ne.s32.totalorder %v725_v31, 15  ;;  %v731_v57 = vand.u32 15, %v16128_v45 }
  0x41   : > { %13066 = vmatprep.subr.bf16.mxu1 %v15310_v26  ;;  %v15323_v55 = vld [vmem:[%s22079_s29 + $0x90] sm:$0xff]   ;;  %v22099_v56 = vsel %vm16159_vm3, 4294967295, %v22098_v56  ;;  %v15324_v58 = vld [vmem:[%s22079_s29 + $0x48] sm:$0xff]   ;;  %v16172_v61 = vadd.s32 120, %v16022_v5  ;;  %v16178_v63 = vadd.s32 112, %v16022_v5  ;;  %v16184_v6 = vadd.s32 136, %v16022_v5 }
  0x42   : > { %12955 = vmatpush3.bf16.msra.mxu0 %v15309_v24  ;;  %22100 = vst [vmem:[#allocation23_spill] sm:$0xff] %v22099_v56  ;;  %v15325_v60 = vld [vmem:[%s22079_s29 + $0x8] sm:$0xff]   ;;  %vm21867_vm5 = vsmask.f32 7424  ;;  %v15328_v9 = vld [vmem:[%s22079_s29 + $0x40] sm:$0xff]   ;;  %v16197_v10 = vadd.s32 128, %v16022_v5 }
  0x43   : > { %12956 = vmatprep.subr.bf16.mxu0 %v15312_v30  ;;  %v15326_v62 = vld [vmem:[%s22079_s29 + $0xc8] sm:$0xff]   ;;  %v15329_v12 = vld [vmem:[%s22079_s29] sm:$0xff]   ;;  %vm21870_vm6 = vsmask.f32 256  ;;  %v853_v31 = vld [vmem:[%s16194_s1 + $0x10] sm:$0xff]  ;;  %vm16235_vm7 = vcmp.ne.s32.totalorder %v727_v37, 15 }
  0x44   : > { %13067 = vmatpush3.bf16.msra.mxu1 %v15311_v28  ;;  %v15327_v1 = vld [vmem:[%s22079_s29 + $0x88] sm:$0xff]   ;;  %v15330_v16 = vld [vmem:[%s22079_s29 + $0xc0] sm:$0xff]   ;;  %vm16249_vm8 = vcmp.ne.s32.totalorder %v726_v39, 0  ;;  %v22105_v37 = vmov 0  ;;  %vm16264_vm9 = vcmp.ne.s32.totalorder %v729_v51, 15  ;;  %vm16276_vm10 = vcmp.ne.s32.totalorder %v728_v54, 0 }
  0x45   : > { %13068 = vmatprep.subr.bf16.mxu1 %v15314_v34  ;;  %v851_v20 = vld [vmem:[%s16194_s1] sm:$0xff]  ;;  %v852_v22 = vld [vmem:[%s16194_s1 + $0x8] sm:$0xff]  ;;  %v854_v34 = vld [vmem:[%s16194_s1 + $0x18] sm:$0xff]  ;;  %v22106_v37 = vsel %vm16249_vm8, 4294967295, %v22105_v37  ;;  %vm16322_vm11 = vcmp.ne.s32.totalorder %v731_v57, 15  ;;  %v22147_v49 = vmov 0 }
  0x46   : > { %12957 = vmatpush3.bf16.msra.mxu0 %v15313_v32  ;;  %v996_v27 = vpack.c.bf16 %v852_v22, %v851_v20  ;;  %v15331_v28 = vld [vmem:[%s22079_s29 + $0x80] sm:$0xff]   ;;  %v948_v29 = vsel %vm16139_vm0, %v852_v22, 0.0  ;;  %v1076_v30 = vsel %vm16143_vm1, %v851_v20, 0.0  ;;  %22107 = vst [vmem:[#allocation25_spill] sm:$0xff] %v22106_v37  ;;  %v15334_v21 = vld [vmem:[%s22079_s29 + $0x1f8] sm:$0xff]   ;;  %v16366_v59 = vld [vmem:[%s16194_s1 + $0x48] sm:$0xff] }
  0x47   : > { %12958 = vmatprep.subr.bf16.mxu0 %v15316_v38  ;;  %v980_v32 = vpack.c.bf16 %v948_v29, %v851_v20  ;;  %v1108_v33 = vpack.c.bf16 %v852_v22, %v1076_v30  ;;  %v16223_v38 = vld [vmem:[%s16194_s1 + $0x20] sm:$0xff]  ;;  %vm22381_vm1 = vsmask.f32 7424  ;;  %s22421_s4 = sld [smem:[#allocation77_spill]] }
  0x48   : > { %13069 = vmatpush3.bf16.msra.mxu1 %v15315_v36  ;;  %v1078_v36 = vsel %vm16151_vm2, %v853_v31, 0.0  ;;  %v16737_v25 = vld [vmem:[%s16194_s1 + $0xa0] sm:$0xff]  ;;  %s22422_s3 = sld [smem:[#allocation76_spill]] }
  0x49   : > { %13070 = vmatprep.subr.bf16.mxu1 %v15318_v42  ;;  %v16229_v42 = vadd.s32 152, %v16022_v5 }
  0x4a   : > { %12959 = vmatpush3.bf16.msra.mxu0 %v15317_v40  ;;  %v16226_v40 = vld [vmem:[%s16194_s1 + $0x28] sm:$0xff] }
  0x4b   : > { %12960 = vmatprep.subr.bf16.mxu0 %v15320_v46  ;;  %v997_v46 = vpack.c.bf16 %v854_v34, %v853_v31  ;;  %v16245_v20 = vpack.c.bf16 %v16226_v40, %v16223_v38 }
  0x4c   : > { %13071 = vmatpush3.bf16.msra.mxu1 %v15319_v44  ;;  %v1133_v44 = vshll.u32 %v996_v27, 16 }
  0x4d   : > { %13072 = vmatprep.subr.bf16.mxu1 %v15322_v52  ;;  %v950_v52 = vsel %vm16159_vm3, %v854_v34, 0.0 }
  0x4e   : > { %12961 = vmatpush3.bf16.msra.mxu0 %v15321_v48  ;;  %v1137_v48 = vshrl.u32 %v996_v27, 16 }
  0x4f   : > { %12962 = vmatprep.subr.bf16.mxu0 %v15324_v58  ;;  %v1494_v58 = vshrl.u32 %v980_v32, 16 }
  0x50   : > { %13073 = vmatpush3.bf16.msra.mxu1 %v15323_v55  ;;  %v22102_v55 = vmov 0 }
  0x51   : > { %13074 = vmatprep.subr.bf16.mxu1 %v15326_v62  ;;  %v22103_v55 = vsel %vm16235_vm7, 4294967295, %v22102_v55  ;;  %v16239_v62 = vrot.slane %v1108_v33, 1  ;;  %v1496_v22 = vrot.slane %v1494_v58, 7 }
  0x52   : > { %12963 = vmatpush3.bf16.msra.mxu0 %v15325_v60  ;;  %22104 = vst [vmem:[#allocation24_spill] sm:$0xff] %v22103_v55  ;;  %v1497_v60 = vshll.u32 %v980_v32, 16 }
  0x53   : > { %12964 = vmatprep.subr.bf16.mxu0 %v15328_v9  ;;  %v16241_v9 = vrot.slane %v1133_v44, 1  ;;  %v1272_v27 = vsel %vm21864_vm4, %v16028_v8, %v16239_v62 }
  0x54   : > { %13075 = vmatpush3.bf16.msra.mxu1 %v15327_v1  ;;  %v981_v1 = vpack.c.bf16 %v950_v52, %v853_v31  ;;  %v1486_v31 = vshrl.u32 %v1272_v27, 16  ;;  %v1489_v32 = vshll.u32 %v1272_v27, 16  ;;  %v22108_v52 = vmov 0 }
  0x55   : > { %13076 = vmatprep.subr.bf16.mxu1 %v15330_v16  ;;  %v1109_v16 = vpack.c.bf16 %v854_v34, %v1078_v36  ;;  %v1136_v30 = vsel %vm21867_vm5, %v16016_v2, %v16241_v9  ;;  %v1139_v33 = vor.u32 %v1137_v48, %v16241_v9  ;;  %v1499_v36 = vor.u32 %v1497_v60, %v1496_v22 }
  0x56   : > { %12965 = vmatpush3.bf16.msra.mxu0 %v15329_v12  ;;  %v1141_v12 = vshll.u32 %v997_v46, 16  ;;  %v1529_v29 = vshll.u32 %v981_v1, 16  ;;  %v1474_v34 = vshrl.u32 %v1136_v30, 16  ;;  %v1477_v39 = vshll.u32 %v1136_v30, 16  ;;  %v16291_v30 = vld [vmem:[%s16194_s1 + $0x30] sm:$0xff] }
  0x57   : > { %v22109_v52 = vsel %vm16264_vm9, 4294967295, %v22108_v52  ;;  %v16268_v58 = vrot.slane %v1486_v31, 7  ;;  %v16272_v27 = vrot.slane %v1109_v16, 1  ;;  %v1145_v48 = vshrl.u32 %v997_v46, 16  ;;  %v16294_v31 = vld [vmem:[%s16194_s1 + $0x38] sm:$0xff] }
  0x58   : > { %13077 = vmatpush3.bf16.msra.mxu1 %v15331_v28  ;;  %v1526_v28 = vshrl.u32 %v981_v1, 16  ;;  %v16260_v44 = vrot.slane %v1141_v12, 1  ;;  %22110 = vst [vmem:[#allocation26_spill] sm:$0xff] %v22109_v52  ;;  %v22111_v60 = vmov 0  ;;  %v1476_v41 = vrot.slane %v1474_v34, 7  ;;  %v15332_v34 = vld [vmem:[%s22079_s29 + $0x178] sm:$0xff]  }
  0x59   : > { %v22112_v60 = vsel %vm16276_vm10, 4294967295, %v22111_v60  ;;  %v16282_v51 = vsel %vm21870_vm6, %v16020_v4, %v1499_v36  ;;  %v1491_v46 = vor.u32 %v1489_v32, %v16268_v58  ;;  %v1274_v32 = vsel %vm21864_vm4, %v16239_v62, %v16272_v27  ;;  %13174 = vmatprep.subr.bf16.mxu0 %v15332_v34  ;;  %13286 = vmatprep.subr.bf16.mxu1 %v15334_v21  ;;  %v15337_v21 = vld [vmem:[%s22079_s29 + $0x130] sm:$0xff]  }
  0x5a   : > { %v16270_v1 = vrot.slane %v1526_v28, 7  ;;  %22113 = vst [vmem:[#allocation27_spill] sm:$0xff] %v22112_v60  ;;  %v1144_v12 = vsel %vm21867_vm5, %v1139_v33, %v16260_v44  ;;  %v1149_v28 = vshll.u32 %v16245_v20, 16  ;;  %2615 = vmatprep.mubr.bf16.mxu1 %v16282_v51  ;;  %v15333_v33 = vld [vmem:[%s22079_s29 + $0x138] sm:$0xff]   ;;  %v1479_v36 = vor.u32 %v1477_v39, %v1476_v41  ;;  %v15344_v60 = vld [vmem:[%s22079_s29 + $0x160] sm:$0xff]  }
  0x5b   : > { %v1506_v16 = vshrl.u32 %v1144_v12, 16  ;;  %v1509_v43 = vshll.u32 %v1144_v12, 16  ;;  %v1147_v12 = vor.u32 %v1145_v48, %v16260_v44  ;;  %v1492_v3 = vsel %vm21870_vm6, %v16102_v35, %v1491_v46 }
  0x5c   : > { %v1531_v54 = vor.u32 %v1529_v29, %v16270_v1  ;;  %v1151_v29 = vrot.slane %v1149_v28, 1  ;;  %v1518_v26 = vshrl.u32 %v1274_v32, 16  ;;  %v1480_v39 = vsel %vm21870_vm6, %v16063_v19, %v1479_v36  ;;  %2616 = vmatmul.mubr.bf16.vlgmr.msra.gmra.mxu1 %v1492_v3  ;;  %v15336_v3 = vld [vmem:[%s22079_s29 + $0x170] sm:$0xff]  }
  0x5d   : > { %v1508_v0 = vrot.slane %v1506_v16, 7  ;;  %v1521_v24 = vshll.u32 %v1274_v32, 16  ;;  %v952_v28 = vsel %vm16235_vm7, %v16226_v40, 0.0  ;;  %v22114_v46 = vmov 0  ;;  %2454 = vmatprep.mubr.bf16.mxu0 %v1480_v39  ;;  %v16351_v32 = vld [vmem:[%s16194_s1 + $0x40] sm:$0xff] }
  0x5e   : > { %v16312_v7 = vsel %vm21870_vm6, %v1496_v22, %v1531_v54  ;;  %v1152_v48 = vsel %vm21867_vm5, %v1147_v12, %v1151_v29  ;;  %v22115_v46 = vsel %vm16322_vm11, 4294967295, %v22114_v46  ;;  %v15335_v22 = vld [vmem:[%s22079_s29 + $0x1b8] sm:$0xff]   ;;  %v16335_v45 = vrot.slane %v1518_v26, 7  ;;  %2455 = vmatmul.mubr.bf16.vlgmr.msra.gmra.mxu0 %v16020_v4 }
  0x5f   : > { %22116 = vst [vmem:[#allocation28_spill] sm:$0xff] %v22115_v46  ;;  %v16332_v16 = vor.u32 %v1509_v43, %v1508_v0  ;;  %2623 = vmatprep.mubr.bf16.mxu1 %v16312_v7  ;;  %v1538_v57 = vshrl.u32 %v1152_v48, 16  ;;  %v1541_v54 = vshll.u32 %v1152_v48, 16  ;;  %v982_v34 = vpack.c.bf16 %v952_v28, %v16223_v38  ;;  %13287 = vmatpush3.bf16.msra.mxu1 %v15335_v22  ;;  %v15338_v28 = vld [vmem:[%s22079_s29 + $0x1f0] sm:$0xff]  }
  0x60   : > { %v1080_v36 = vsel %vm16249_vm8, %v16223_v38, 0.0  ;;  %v16347_v43 = vpack.c.bf16 %v16294_v31, %v16291_v30  ;;  %v1153_v26 = vshrl.u32 %v16245_v20, 16  ;;  %v16356_v39 = vor.u32 %v1521_v24, %v16335_v45  ;;  %13175 = vmatpush3.bf16.msra.mxu0 %v15333_v33  ;;  %13288 = vmatprep.subr.bf16.mxu1 %v15338_v28 }
  0x61   : > { %v1557_v12 = vsel %vm21870_vm6, %v1476_v41, %v16332_v16  ;;  %v16358_v48 = vrot.slane %v1538_v57, 7  ;;  %v1110_v38 = vpack.c.bf16 %v16226_v40, %v1080_v36  ;;  %v1562_v20 = vshrl.u32 %v982_v34, 16  ;;  %13176 = vmatprep.subr.bf16.mxu0 %v15336_v3 }
  0x62   : > { %2462 = vmatprep.mubr.bf16.mxu0 %v1557_v12  ;;  %v1565_v18 = vshll.u32 %v982_v34, 16  ;;  %v1155_v14 = vor.u32 %v1153_v26, %v1151_v29  ;;  %v1157_v22 = vshll.u32 %v16347_v43, 16  ;;  %v22117_v24 = vand.u32 15, %v16134_v47  ;;  %v15339_v47 = vld [vmem:[%s22079_s29 + $0x1b0] sm:$0xff]  }
  0x63   : > { %v22118_v41 = vmov 0  ;;  %v1558_v40 = vsel %vm21870_vm6, %v16268_v58, %v16356_v39  ;;  %v16378_v33 = vor.u32 %v1541_v54, %v16358_v48  ;;  %v1275_v57 = vrot.slane %v1110_v38, 1  ;;  %v15340_v54 = vld [vmem:[%s22079_s29 + $0x168] sm:$0xff]   ;;  %13289 = vmatpush3.bf16.msra.mxu1 %v15339_v47 }
  0x64   : > { %vm16370_vm12 = vcmp.ne.s32.totalorder %v22117_v24, 0  ;;  %v954_v29 = vsel %vm16264_vm9, %v16294_v31, 0.0  ;;  %v1564_v34 = vrot.slane %v1562_v20, 7  ;;  %v1159_v36 = vrot.slane %v1157_v22, 1  ;;  %13177 = vmatpush3.bf16.msra.mxu0 %v15337_v21  ;;  %2624 = vmatmul.mubr.bf16.gmra.mxu1 %v1558_v40 }
  0x65   : > { %v22119_v41 = vsel %vm16370_vm12, 4294967295, %v22118_v41  ;;  %v983_v3 = vpack.c.bf16 %v954_v29, %v16291_v30  ;;  %v1082_v58 = vsel %vm16276_vm10, %v16291_v30, 0.0  ;;  %v16395_v26 = vsel %vm21870_vm6, %v1508_v0, %v16378_v33  ;;  %13178 = vmatprep.subr.bf16.mxu0 %v15340_v54 }
  0x66   : > { %22120 = vst [vmem:[#allocation29_spill] sm:$0xff] %v22119_v41  ;;  %v1276_v12 = vsel %vm21864_vm4, %v16272_v27, %v1275_v57  ;;  %v16400_v38 = vpack.c.bf16 %v16294_v31, %v1082_v58  ;;  %v16404_v28 = vpack.c.bf16 %v16366_v59, %v16351_v32  ;;  %v22121_v30 = vand.u32 15, %v16172_v61  ;;  %v15341_v31 = vld [vmem:[%s22079_s29 + $0x128] sm:$0xff]   ;;  %2463 = vmatmul.mubr.bf16.gmra.mxu0 %v16282_v51 }
  0x67   : > { %v22122_v20 = vmov 0  ;;  %v1567_v0 = vor.u32 %v1565_v18, %v1564_v34  ;;  %v1550_v22 = vshrl.u32 %v1276_v12, 16  ;;  %v1553_v24 = vshll.u32 %v1276_v12, 16  ;;  %v15342_v61 = vld [vmem:[%s22079_s29 + $0x1e8] sm:$0xff]   ;;  %2470 = vmatprep.mubr.bf16.mxu0 %v16395_v26 }
  0x68   : > { %vm16408_vm13 = vcmp.ne.s32.totalorder %v22121_v30, 15  ;;  %v1160_v29 = vsel %vm21867_vm5, %v1155_v14, %v1159_v36  ;;  %v1586_v55 = vshrl.u32 %v983_v3, 16  ;;  %v1589_v52 = vshll.u32 %v983_v3, 16  ;;  %13290 = vmatprep.subr.bf16.mxu1 %v15342_v61  ;;  %13179 = vmatpush3.bf16.msra.mxu0 %v15341_v31 }
  0x69   : > { %v22123_v20 = vsel %vm16408_vm13, 4294967295, %v22122_v20  ;;  %v1570_v58 = vshrl.u32 %v1160_v29, 16  ;;  %v1573_v30 = vshll.u32 %v1160_v29, 16  ;;  %v22125_v21 = vand.u32 15, %v16178_v63  ;;  %v15343_v63 = vld [vmem:[%s22079_s29 + $0x1a8] sm:$0xff]   ;;  %13180 = vmatprep.subr.bf16.mxu0 %v15344_v60 }
  0x6a   : > { %22124 = vst [vmem:[#allocation30_spill] sm:$0xff] %v22123_v20  ;;  %v22126_v18 = vmov 0  ;;  %v16428_v14 = vsel %vm21870_vm6, %v16270_v1, %v1567_v0  ;;  %v1552_v40 = vrot.slane %v1550_v22, 7  ;;  %v21865_v54 = vrot.slane %v16400_v38, 1  ;;  %v16444_v0 = vld [vmem:[%s16194_s1 + $0x50] sm:$0xff]  ;;  %13291 = vmatpush3.bf16.msra.mxu1 %v15343_v63 }
  0x6b   : > { %vm16421_vm14 = vcmp.ne.s32.totalorder %v22125_v21, 0  ;;  %v1161_v3 = vshrl.u32 %v16347_v43, 16  ;;  %2631 = vmatprep.mubr.bf16.mxu1 %v16428_v14  ;;  %v16437_v47 = vrot.slane %v1570_v58, 7  ;;  %v1588_v51 = vrot.slane %v1586_v55, 7  ;;  %v16447_v43 = vld [vmem:[%s16194_s1 + $0x58] sm:$0xff] }
  0x6c   : > { %v22127_v18 = vsel %vm16421_vm14, 4294967295, %v22126_v18  ;;  %v1165_v1 = vshll.u32 %v16404_v28, 16  ;;  %v956_v12 = vsel %vm16322_vm11, %v16366_v59, 0.0  ;;  %v16449_v22 = vor.u32 %v1553_v24, %v1552_v40  ;;  %v15345_v24 = vld [vmem:[%s22079_s29 + $0x120] sm:$0xff]  }
  0x6d   : > { %22128 = vst [vmem:[#allocation31_spill] sm:$0xff] %v22127_v18  ;;  %v1278_v29 = vsel %vm21864_vm4, %v1275_v57, %v21865_v54  ;;  %v1163_v61 = vor.u32 %v1161_v3, %v1159_v36  ;;  %v984_v58 = vpack.c.bf16 %v956_v12, %v16351_v32  ;;  %v1575_v55 = vor.u32 %v1573_v30, %v16437_v47 }
  0x6e   : > { %22129 = vst [vmem:[#allocation32_spill] sm:$0xff] %v16449_v22  ;;  %v1591_v21 = vor.u32 %v1589_v52, %v1588_v51  ;;  %v1578_v37 = vshrl.u32 %v1278_v29, 16  ;;  %v1581_v46 = vshll.u32 %v1278_v29, 16  ;;  %v16465_v57 = vsel %vm21870_vm6, %v16335_v45, %v16449_v22  ;;  %v15346_v45 = vld [vmem:[%s22079_s29 + $0x1e0] sm:$0xff]   ;;  %13181 = vmatpush3.bf16.msra.mxu0 %v15345_v24 }
  0x6f   : > { %v1167_v36 = vrot.slane %v1165_v1, 1  ;;  %v1610_v31 = vshrl.u32 %v984_v58, 16  ;;  %v1613_v30 = vshll.u32 %v984_v58, 16  ;;  %v22130_v52 = vand.u32 15, %v16184_v6  ;;  %2632 = vmatmul.mubr.bf16.gmra.mxu1 %v16465_v57  ;;  %13292 = vmatprep.subr.bf16.mxu1 %v15346_v45  ;;  %v16846_v22 = vld [vmem:[%s16194_s1 + $0xc0] sm:$0xff] }
  0x70   : > { %v22131_v3 = vmov 0  ;;  %v22134_v63 = vand.u32 15, %v16197_v10  ;;  %v22135_v12 = vmov 0  ;;  %v16484_v1 = vsel %vm21870_vm6, %v16358_v48, %v1575_v55  ;;  %2471 = vmatmul.mubr.bf16.gmra.mxu0 %v16312_v7 }
  0x71   : > { %vm16469_vm15 = vcmp.ne.s32.totalorder %v22130_v52, 15  ;;  %v16487_v6 = vsel %vm21870_vm6, %v1564_v34, %v1591_v21  ;;  %v16489_v29 = vrot.slane %v1578_v37, 7  ;;  %v1084_v10 = vsel %vm16370_vm12, %v16351_v32, 0.0  ;;  %v16509_v21 = vld [vmem:[%s16194_s1 + $0x60] sm:$0xff]  ;;  %2478 = vmatprep.mubr.bf16.mxu0 %v16484_v1 }
  0x72   : > { %v22132_v3 = vsel %vm16469_vm15, 4294967295, %v22131_v3  ;;  %vm16475_vm4 = vcmp.ne.s32.totalorder %v22134_v63, 0  ;;  %v1168_v58 = vsel %vm21867_vm5, %v1163_v61, %v1167_v36  ;;  %v16496_v52 = vrot.slane %v1610_v31, 7  ;;  %2639 = vmatprep.mubr.bf16.mxu1 %v16487_v6  ;;  %v16512_v61 = vld [vmem:[%s16194_s1 + $0x68] sm:$0xff]  ;;  %v15348_v63 = vld [vmem:[%s22079_s29 + $0x158] sm:$0xff]  }
  0x73   : > { %22133 = vst [vmem:[#allocation33_spill] sm:$0xff] %v22132_v3  ;;  %v22136_v12 = vsel %vm16475_vm4, 4294967295, %v22135_v12  ;;  %v16499_v48 = vpack.c.bf16 %v16366_v59, %v1084_v10  ;;  %v16503_v34 = vpack.c.bf16 %v16447_v43, %v16444_v0  ;;  %v1583_v37 = vor.u32 %v1581_v46, %v16489_v29  ;;  %v15347_v59 = vld [vmem:[%s22079_s29 + $0x1a0] sm:$0xff]   ;;  %13182 = vmatprep.subr.bf16.mxu0 %v15348_v63  ;;  %v15354_v3 = vld [vmem:[%s22079_s29 + $0x1d0] sm:$0xff]  }
  0x74   : > { %22137 = vst [vmem:[#allocation34_spill] sm:$0xff] %v22136_v12  ;;  %v1594_v32 = vshrl.u32 %v1168_v58, 16  ;;  %v1597_v60 = vshll.u32 %v1168_v58, 16  ;;  %v1169_v55 = vshrl.u32 %v16404_v28, 16  ;;  %v1615_v24 = vor.u32 %v1613_v30, %v16496_v52  ;;  %13293 = vmatpush3.bf16.msra.mxu1 %v15347_v59 }
  0x75   : > { %v1279_v31 = vrot.slane %v16499_v48, 1  ;;  %v1173_v46 = vshll.u32 %v16503_v34, 16  ;;  %v958_v28 = vsel %vm16408_vm13, %v16447_v43, 0.0  ;;  %v16529_v45 = vsel %vm21870_vm6, %v1552_v40, %v1583_v37  ;;  %v15349_v48 = vld [vmem:[%s22079_s29 + $0x118] sm:$0xff]  }
  0x76   : > { %v1596_v10 = vrot.slane %v1594_v32, 7  ;;  %v1171_v58 = vor.u32 %v1169_v55, %v1167_v36  ;;  %v985_v30 = vpack.c.bf16 %v958_v28, %v16444_v0  ;;  %v16536_v54 = vsel %vm21870_vm6, %v1588_v51, %v1615_v24  ;;  %13183 = vmatpush3.bf16.msra.mxu0 %v15349_v48  ;;  %v15350_v51 = vld [vmem:[%s22079_s29 + $0x1d8] sm:$0xff]  }
  0x77   : > { %v22138_v41 = vrot.slane %v16400_v38, 1  ;;  %vm22139_vm5 = vcmask 1046528   ;;  %v1175_v53 = vrot.slane %v1173_v46, 1  ;;  %v1086_v40 = vsel %vm16421_vm14, %v16444_v0, 0.0  ;;  %13294 = vmatprep.subr.bf16.mxu1 %v15350_v51  ;;  %2640 = vmatmul.mubr.bf16.gmra.mxu1 %v16529_v45  ;;  %v16587_v51 = vld [vmem:[%s16194_s1 + $0x78] sm:$0xff] }
  0x78   : > { %v1599_v36 = vor.u32 %v1597_v60, %v1596_v10  ;;  %v1634_v55 = vshrl.u32 %v985_v30, 16  ;;  %vm22140_vm6 = vsmask.f32 7424  ;;  %v1637_v38 = vshll.u32 %v985_v30, 16  ;;  %2647 = vmatprep.mubr.bf16.mxu1 %v16536_v54  ;;  %2479 = vmatmul.mubr.bf16.gmra.mxu0 %v16428_v14 }
  0x79   : > { %v1280_v20 = vsel %vm22139_vm5, %v22138_v41, %v1279_v31  ;;  %v1176_v59 = vsel %vm22140_vm6, %v1171_v58, %v1175_v53  ;;  %v16549_v41 = vpack.c.bf16 %v16447_v43, %v1086_v40  ;;  %v16553_v24 = vpack.c.bf16 %v16512_v61, %v16509_v21  ;;  %v15352_v43 = vld [vmem:[%s22079_s29 + $0x150] sm:$0xff]  }
  0x7a   : > { %v1602_v37 = vshrl.u32 %v1280_v20, 16  ;;  %v1605_v32 = vshll.u32 %v1280_v20, 16  ;;  %v15351_v20 = vld [vmem:[%s22079_s29 + $0x198] sm:$0xff]   ;;  %vm22141_vm5 = vsmask.f32 256  ;;  %v1618_v46 = vshrl.u32 %v1176_v59, 16  ;;  %13184 = vmatprep.subr.bf16.mxu0 %v15352_v43 }
  0x7b   : > { %v16560_v0 = vsel %vm22141_vm5, %v16437_v47, %v1599_v36  ;;  %v1621_v28 = vshll.u32 %v1176_v59, 16  ;;  %v16568_v63 = vrot.slane %v1634_v55, 7  ;;  %v1281_v58 = vrot.slane %v16549_v41, 1  ;;  %v16584_v55 = vld [vmem:[%s16194_s1 + $0x70] sm:$0xff]  ;;  %13295 = vmatpush3.bf16.msra.mxu1 %v15351_v20 }
  0x7c   : > { %v16562_v60 = vrot.slane %v1602_v37, 7  ;;  %v1177_v47 = vshrl.u32 %v16503_v34, 16  ;;  %v1181_v30 = vshll.u32 %v16553_v24, 16  ;;  %v16575_v40 = vrot.slane %v1618_v46, 7  ;;  %v15353_v34 = vld [vmem:[%s22079_s29 + $0x110] sm:$0xff]   ;;  %2486 = vmatprep.mubr.bf16.mxu0 %v16560_v0  ;;  %13296 = vmatprep.subr.bf16.mxu1 %v15354_v3 }
  0x7d   : > { %v960_v36 = vsel %vm16469_vm15, %v16512_v61, 0.0  ;;  %v1088_v37 = vsel %vm16475_vm4, %v16509_v21, 0.0  ;;  %vm22142_vm6 = vcmask 1046528   ;;  %13185 = vmatpush3.bf16.msra.mxu0 %v15353_v34  ;;  %vm22144_vm15 = vsmask.f32 7424 }
  0x7e   : > { %v1607_v48 = vor.u32 %v1605_v32, %v16562_v60  ;;  %v1639_v32 = vor.u32 %v1637_v38, %v16568_v63  ;;  %v1282_v59 = vsel %vm22142_vm6, %v1279_v31, %v1281_v58  ;;  %v1179_v41 = vor.u32 %v1177_v47, %v1175_v53  ;;  %vm22143_vm6 = vmmov %vm22141_vm5 }
  0x7f   : > { %v1183_v46 = vrot.slane %v1181_v30, 1  ;;  %v1623_v12 = vor.u32 %v1621_v28, %v16575_v40  ;;  %v1626_v18 = vshrl.u32 %v1282_v59, 16  ;;  %v1629_v50 = vshll.u32 %v1282_v59, 16  ;;  %v16636_v59 = vld [vmem:[%s16194_s1 + $0x88] sm:$0xff] }
  0x80   : > { %v16601_v20 = vsel %vm22141_vm5, %v16489_v29, %v1607_v48  ;;  %v16606_v53 = vsel %vm22143_vm6, %v16496_v52, %v1639_v32  ;;  %v986_v38 = vpack.c.bf16 %v960_v36, %v16509_v21  ;;  %v16611_v43 = vpack.c.bf16 %v16512_v61, %v1088_v37  ;;  %v15355_v29 = vld [vmem:[%s22079_s29 + $0x190] sm:$0xff]   ;;  %v15356_v21 = vld [vmem:[%s22079_s29 + $0x148] sm:$0xff]   ;;  %v16633_v32 = vld [vmem:[%s16194_s1 + $0x80] sm:$0xff]  ;;  %2487 = vmatmul.mubr.bf16.gmra.mxu0 %v16487_v6 }
  0x81   : > { %v1184_v31 = vsel %vm22144_vm15, %v1179_v41, %v1183_v46  ;;  %v16617_v28 = vsel %vm22141_vm5, %v1596_v10, %v1623_v12  ;;  %v1628_v47 = vrot.slane %v1626_v18, 7  ;;  %v1003_v36 = vpack.c.bf16 %v16587_v51, %v16584_v55  ;;  %13297 = vmatpush3.bf16.msra.mxu1 %v15355_v29  ;;  %v15357_v12 = vld [vmem:[%s22079_s29 + $0x108] sm:$0xff]   ;;  %13186 = vmatprep.subr.bf16.mxu0 %v15356_v21  ;;  %vm22146_vm6 = vmmov %vm22141_vm5 }
  0x82   : > { %v1642_v52 = vshrl.u32 %v1184_v31, 16  ;;  %v1645_v30 = vshll.u32 %v1184_v31, 16  ;;  %v1658_v48 = vshrl.u32 %v986_v38, 16  ;;  %v1661_v61 = vshll.u32 %v986_v38, 16  ;;  %v15358_v41 = vld [vmem:[%s22079_s29 + $0x1c8] sm:$0xff]   ;;  %2648 = vmatmul.mubr.bf16.gmra.mxu1 %v16601_v20  ;;  %13187 = vmatpush3.bf16.msra.mxu0 %v15357_v12 }
  0x83   : > { %v21876_v3 = vrot.slane %v16611_v43, 1  ;;  %v1631_v10 = vor.u32 %v1629_v50, %v1628_v47  ;;  %v1185_v37 = vshrl.u32 %v16553_v24, 16  ;;  %v737_v34 = vand.u32 15, %v16229_v42  ;;  %v15359_v38 = vld [vmem:[%s22079_s29 + $0x188] sm:$0xff]   ;;  %2655 = vmatprep.mubr.bf16.mxu1 %v16606_v53  ;;  %13298 = vmatprep.subr.bf16.mxu1 %v15358_v41 }
  0x84   : > { %v16628_v18 = vrot.slane %v1642_v52, 7  ;;  %v16642_v31 = vrot.slane %v1658_v48, 7  ;;  %vm22145_vm15 = vcmask 1046528   ;;  %v1189_v24 = vshll.u32 %v1003_v36, 16  ;;  %2494 = vmatprep.mubr.bf16.mxu0 %v16617_v28 }
  0x85   : > { %v1284_v50 = vsel %vm22145_vm15, %v1281_v58, %v21876_v3  ;;  %v704_v42 = vadd.s32 144, %v16022_v5  ;;  %v16654_v29 = vsel %vm22146_vm6, %v16562_v60, %v1631_v10  ;;  %v1187_v12 = vor.u32 %v1185_v37, %v1183_v46  ;;  %13299 = vmatpush3.bf16.msra.mxu1 %v15359_v38  ;;  %vm22150_vm15 = vmmov %vm22146_vm6  ;;  %v15360_v46 = vld [vmem:[%s22079_s29 + $0x140] sm:$0xff]  }
  0x86   : > { %v1647_v52 = vor.u32 %v1645_v30, %v16628_v18  ;;  %v1650_v21 = vshrl.u32 %v1284_v50, 16  ;;  %v1653_v48 = vshll.u32 %v1284_v50, 16  ;;  %v1663_v58 = vor.u32 %v1661_v61, %v16642_v31  ;;  %v16685_v50 = vld [vmem:[%s16194_s1 + $0x90] sm:$0xff]  ;;  %13188 = vmatprep.subr.bf16.mxu0 %v15360_v46  ;;  %v15362_v46 = vld [vmem:[%s22079_s29 + $0x1c0] sm:$0xff]  }
  0x87   : > { %v1191_v3 = vrot.slane %v1189_v24, 1  ;;  %vm16659_vm5 = vcmp.ne.s32.totalorder %v737_v34, 15  ;;  %v736_v10 = vand.u32 15, %v704_v42  ;;  %vm22151_vm4 = vsmask.f32 7424  ;;  %v16688_v24 = vld [vmem:[%s16194_s1 + $0x98] sm:$0xff]  ;;  %13300 = vmatprep.subr.bf16.mxu1 %v15362_v46 }
  0x88   : > { %v22148_v49 = vsel %vm16659_vm5, 4294967295, %v22147_v49  ;;  %v16666_v60 = vsel %vm22150_vm15, %v16575_v40, %v1647_v52  ;;  %v16668_v30 = vrot.slane %v1650_v21, 7  ;;  %v962_v61 = vsel %vm16659_vm5, %v16587_v51, 0.0  ;;  %2495 = vmatmul.mubr.bf16.gmra.mxu0 %v16536_v54 }
  0x89   : > { %22149 = vst [vmem:[#allocation35_spill] sm:$0xff] %v22148_v49  ;;  %v16678_v37 = vsel %vm22146_vm6, %v16568_v63, %v1663_v58  ;;  %v1192_v34 = vsel %vm22151_vm4, %v1187_v12, %v1191_v3  ;;  %v987_v40 = vpack.c.bf16 %v962_v61, %v16584_v55  ;;  %v1004_v41 = vpack.c.bf16 %v16636_v59, %v16633_v32  ;;  %v15361_v63 = vld [vmem:[%s22079_s29 + $0x100] sm:$0xff]   ;;  %vm22155_vm4 = vmmov %vm22146_vm6 }
  0x8a   : > { %v1655_v42 = vor.u32 %v1653_v48, %v16668_v30  ;;  %v1666_v38 = vshrl.u32 %v1192_v34, 16  ;;  %v1669_v52 = vshll.u32 %v1192_v34, 16  ;;  %vm16691_vm15 = vcmp.ne.s32.totalorder %v736_v10, 0  ;;  %13189 = vmatpush3.bf16.msra.mxu0 %v15361_v63  ;;  %2656 = vmatmul.mubr.bf16.gmra.mxu1 %v16654_v29  ;;  %vm22156_vm6 = vmmov %vm22155_vm4 }
  0x8b   : > { %v22152_v21 = vmov 0  ;;  %v1682_v58 = vshrl.u32 %v987_v40, 16  ;;  %v1685_v12 = vshll.u32 %v987_v40, 16  ;;  %v1090_v61 = vsel %vm16691_vm15, %v16584_v55, 0.0  ;;  %v15363_v40 = vld [vmem:[%s22079_s29 + $0x180] sm:$0xff]   ;;  %2663 = vmatprep.mubr.bf16.mxu1 %v16678_v37  ;;  %2502 = vmatprep.mubr.bf16.mxu0 %v16666_v60  ;;  %vm22160_vm5 = vmmov %vm22156_vm6 }
  0x8c   : > { %v22153_v21 = vsel %vm16691_vm15, 4294967295, %v22152_v21  ;;  %v1193_v49 = vshrl.u32 %v1003_v36, 16  ;;  %v16702_v48 = vsel %vm22155_vm4, %v1628_v47, %v1655_v42  ;;  %v1668_v34 = vrot.slane %v1666_v38, 7  ;;  %13301 = vmatpush3.bf16.msra.mxu1 %v15363_v40 }
  0x8d   : > { %22154 = vst [vmem:[#allocation36_spill] sm:$0xff] %v22153_v21  ;;  %v16705_v10 = vpack.c.bf16 %v16587_v51, %v1090_v61  ;;  %v1197_v56 = vshll.u32 %v1004_v41, 16  ;;  %v16714_v55 = vrot.slane %v1682_v58, 7  ;;  %v707_v36 = vadd.s32 168, %v16022_v5 }
  0x8e   : > { %v1195_v47 = vor.u32 %v1193_v49, %v1191_v3  ;;  %v706_v51 = vadd.s32 160, %v16022_v5  ;;  %v1671_v42 = vor.u32 %v1669_v52, %v1668_v34  ;;  %v16722_v61 = vpack.c.bf16 %v16688_v24, %v16685_v50 }
  0x8f   : > { %v1285_v38 = vrot.slane %v16705_v10, 1  ;;  %v1199_v63 = vrot.slane %v1197_v56, 1  ;;  %v1687_v49 = vor.u32 %v1685_v12, %v16714_v55  ;;  %v739_v3 = vand.u32 15, %v707_v36  ;;  %v16740_v12 = vld [vmem:[%s16194_s1 + $0xa8] sm:$0xff] }
  0x90   : > { %v738_v58 = vand.u32 15, %v706_v51  ;;  %v1201_v21 = vshrl.u32 %v1004_v41, 16  ;;  %v16729_v52 = vsel %vm22156_vm6, %v16628_v18, %v1671_v42  ;;  %v22157_v56 = vrot.slane %v16611_v43, 1  ;;  %2503 = vmatmul.mubr.bf16.gmra.mxu0 %v16606_v53 }
  0x91   : > { %vm22158_vm4 = vcmask 1046528   ;;  %vm22159_vm15 = vsmask.f32 7424  ;;  %v1205_v23 = vshll.u32 %v16722_v61, 16  ;;  %v16744_v41 = vsel %vm22160_vm5, %v16642_v31, %v1687_v49  ;;  %2510 = vmatprep.mubr.bf16.mxu0 %v16729_v52 }
  0x92   : > { %v1286_v10 = vsel %vm22158_vm4, %v22157_v56, %v1285_v38  ;;  %v1200_v46 = vsel %vm22159_vm15, %v1195_v47, %v1199_v63  ;;  %vm16746_vm6 = vcmp.ne.s32.totalorder %v739_v3, 15  ;;  %v22161_v43 = vmov 0  ;;  %2664 = vmatmul.mubr.bf16.gmra.mxu1 %v16702_v48  ;;  %vm22167_vm5 = vmmov %vm22159_vm15 }
  0x93   : > { %v1674_v40 = vshrl.u32 %v1286_v10, 16  ;;  %v1677_v36 = vshll.u32 %v1286_v10, 16  ;;  %v1690_v18 = vshrl.u32 %v1200_v46, 16  ;;  %v1693_v51 = vshll.u32 %v1200_v46, 16  ;;  %2671 = vmatprep.mubr.bf16.mxu1 %v16744_v41 }
  0x94   : > { %v22162_v43 = vsel %vm16746_vm6, 4294967295, %v22161_v43  ;;  %vm16750_vm4 = vcmp.ne.s32.totalorder %v738_v58, 0  ;;  %v22164_v47 = vmov 0  ;;  %v1203_v42 = vor.u32 %v1201_v21, %v1199_v63 }
  0x95   : > { %22163 = vst [vmem:[#allocation37_spill] sm:$0xff] %v22162_v43  ;;  %v22165_v47 = vsel %vm16750_vm4, 4294967295, %v22164_v47  ;;  %v1676_v56 = vrot.slane %v1674_v40, 7  ;;  %v1692_v15 = vrot.slane %v1690_v18, 7  ;;  %v964_v31 = vsel %vm16746_vm6, %v16636_v59, 0.0 }
  0x96   : > { %22166 = vst [vmem:[#allocation38_spill] sm:$0xff] %v22165_v47  ;;  %v1092_v49 = vsel %vm16750_vm4, %v16633_v32, 0.0  ;;  %v988_v3 = vpack.c.bf16 %v964_v31, %v16633_v32  ;;  %v1207_v46 = vrot.slane %v1205_v23, 1  ;;  %v709_v58 = vadd.s32 184, %v16022_v5 }
  0x97   : > { %v1116_v10 = vpack.c.bf16 %v16636_v59, %v1092_v49  ;;  %v1679_v21 = vor.u32 %v1677_v36, %v1676_v56  ;;  %v1695_v63 = vor.u32 %v1693_v51, %v1692_v15  ;;  %v708_v40 = vadd.s32 176, %v16022_v5 }
  0x98   : > { %v16767_v18 = vpack.c.bf16 %v16740_v12, %v16737_v25  ;;  %v1706_v43 = vshrl.u32 %v988_v3, 16  ;;  %v1709_v47 = vshll.u32 %v988_v3, 16  ;;  %v1208_v59 = vsel %vm22167_vm5, %v1203_v42, %v1207_v46  ;;  %2511 = vmatmul.mubr.bf16.gmra.mxu0 %v16678_v37 }
  0x99   : > { %v1287_v32 = vrot.slane %v1116_v10, 1  ;;  %vm22168_vm15 = vsmask.f32 256  ;;  %v1714_v51 = vshrl.u32 %v1208_v59, 16  ;;  %v1717_v31 = vshll.u32 %v1208_v59, 16 }
  0x9a   : > { %v16774_v23 = vsel %vm22168_vm15, %v16668_v30, %v1679_v21  ;;  %vm22169_vm6 = vmmov %vm22168_vm15  ;;  %v1708_v49 = vrot.slane %v1706_v43, 7  ;;  %vm22170_vm4 = vcmask 1046528   ;;  %v741_v10 = vand.u32 15, %v709_v58 }
  0x9b   : > { %v16777_v36 = vsel %vm22169_vm6, %v1668_v34, %v1695_v63  ;;  %v1288_v3 = vsel %vm22170_vm4, %v1285_v38, %v1287_v32  ;;  %v740_v42 = vand.u32 15, %v708_v40  ;;  %v1716_v13 = vrot.slane %v1714_v51, 7  ;;  %v16792_v38 = vld [vmem:[%s16194_s1 + $0xb0] sm:$0xff]  ;;  %vm22177_vm4 = vmmov %vm22168_vm15  ;;  %2672 = vmatmul.mubr.bf16.gmra.mxu1 %v16774_v23 }
  0x9c   : > { %v1698_v17 = vshrl.u32 %v1288_v3, 16  ;;  %v1701_v11 = vshll.u32 %v1288_v3, 16  ;;  %v1209_v30 = vshrl.u32 %v16722_v61, 16  ;;  %v1711_v21 = vor.u32 %v1709_v47, %v1708_v49  ;;  %v16801_v47 = vld [vmem:[%s16194_s1 + $0xb8] sm:$0xff]  ;;  %vm22179_vm15 = vmmov %vm22177_vm4  ;;  %2518 = vmatprep.mubr.bf16.mxu0 %v16777_v36 }
  0x9d   : > { %vm16782_vm5 = vcmp.ne.s32.totalorder %v741_v10, 15  ;;  %v22171_v34 = vmov 0  ;;  %vm16786_vm6 = vcmp.ne.s32.totalorder %v740_v42, 0  ;;  %v22174_v63 = vmov 0 }
  0x9e   : > { %v22172_v34 = vsel %vm16782_vm5, 4294967295, %v22171_v34  ;;  %v22175_v63 = vsel %vm16786_vm6, 4294967295, %v22174_v63  ;;  %v1213_v43 = vshll.u32 %v16767_v18, 16  ;;  %v1700_v58 = vrot.slane %v1698_v17, 7 }
  0x9f   : > { %22173 = vst [vmem:[#allocation39_spill] sm:$0xff] %v22172_v34  ;;  %22176 = vst [vmem:[#allocation40_spill] sm:$0xff] %v22175_v63  ;;  %v1719_v40 = vor.u32 %v1717_v31, %v1716_v13  ;;  %v966_v59 = vsel %vm16782_vm5, %v16688_v24, 0.0  ;;  %v1094_v61 = vsel %vm16786_vm6, %v16685_v50, 0.0  ;;  %v16805_v51 = vsel %vm22177_vm4, %v16714_v55, %v1711_v21 }
  0xa0   : > { %22178 = vst [vmem:[#allocation41_spill] sm:$0xff] %v16805_v51  ;;  %v989_v3 = vpack.c.bf16 %v966_v59, %v16685_v50  ;;  %v16809_v10 = vpack.c.bf16 %v16688_v24, %v1094_v61  ;;  %v1211_v17 = vor.u32 %v1209_v30, %v1207_v46  ;;  %v1703_v31 = vor.u32 %v1701_v11, %v1700_v58 }
  0xa1   : > { %v16813_v42 = vsel %vm22179_vm15, %v1692_v15, %v1719_v40  ;;  %v1215_v34 = vrot.slane %v1213_v43, 1  ;;  %v711_v63 = vadd.s32 200, %v16022_v5  ;;  %2679 = vmatprep.mubr.bf16.mxu1 %v16805_v51  ;;  %v710_v50 = vadd.s32 192, %v16022_v5  ;;  %2519 = vmatmul.mubr.bf16.gmra.mxu0 %v16744_v41 }
  0xa2   : > { %22180 = vst [vmem:[#allocation42_spill] sm:$0xff] %v16813_v42  ;;  %v1730_v35 = vshrl.u32 %v989_v3, 16  ;;  %v1733_v55 = vshll.u32 %v989_v3, 16  ;;  %v1289_v21 = vrot.slane %v16809_v10, 1  ;;  %v16821_v24 = vsel %vm22177_vm4, %v1676_v56, %v1703_v31  ;;  %2526 = vmatprep.mubr.bf16.mxu0 %v16813_v42 }
  0xa3   : > { %22181 = vst [vmem:[#allocation43_spill] sm:$0xff] %v16821_v24  ;;  %vm22182_vm5 = vsmask.f32 7424  ;;  %v743_v15 = vand.u32 15, %v711_v63  ;;  %v1007_v46 = vpack.c.bf16 %v16801_v47, %v16792_v38  ;;  %vm22183_vm15 = vcmask 1046528   ;;  %2680 = vmatmul.mubr.bf16.gmra.mxu1 %v16821_v24 }
  0xa4   : > { %v1216_v11 = vsel %vm22182_vm5, %v1211_v17, %v1215_v34  ;;  %v1732_v30 = vrot.slane %v1730_v35, 7  ;;  %v1290_v43 = vsel %vm22183_vm15, %v1287_v32, %v1289_v21  ;;  %v22184_v56 = vmov 0  ;;  %vm22190_vm15 = vmmov %vm22177_vm4 }
  0xa5   : > { %v1738_v40 = vshrl.u32 %v1216_v11, 16  ;;  %v1741_v59 = vshll.u32 %v1216_v11, 16  ;;  %v1722_v61 = vshrl.u32 %v1290_v43, 16  ;;  %v1725_v3 = vshll.u32 %v1290_v43, 16 }
  0xa6   : > { %vm16828_vm6 = vcmp.ne.s32.totalorder %v743_v15, 15  ;;  %v742_v10 = vand.u32 15, %v710_v50  ;;  %v1735_v63 = vor.u32 %v1733_v55, %v1732_v30  ;;  %v1217_v31 = vshrl.u32 %v16767_v18, 16 }
  0xa7   : > { %v22185_v56 = vsel %vm16828_vm6, 4294967295, %v22184_v56  ;;  %v16832_v17 = vrot.slane %v1738_v40, 7  ;;  %v968_v35 = vsel %vm16828_vm6, %v16740_v12, 0.0  ;;  %v16838_v32 = vrot.slane %v1722_v61, 7  ;;  %v16856_v61 = vld [vmem:[%s16194_s1 + $0xc8] sm:$0xff] }
  0xa8   : > { %22186 = vst [vmem:[#allocation44_spill] sm:$0xff] %v22185_v56  ;;  %v990_v11 = vpack.c.bf16 %v968_v35, %v16737_v25  ;;  %vm16841_vm5 = vcmp.ne.s32.totalorder %v742_v10, 0  ;;  %v22187_v43 = vmov 0  ;;  %v1221_v15 = vshll.u32 %v1007_v46, 16 }
  0xa9   : > { %v22188_v43 = vsel %vm16841_vm5, 4294967295, %v22187_v43  ;;  %v16849_v55 = vsel %vm22177_vm4, %v1708_v49, %v1735_v63  ;;  %v1743_v50 = vor.u32 %v1741_v59, %v16832_v17  ;;  %v1096_v18 = vsel %vm16841_vm5, %v16737_v25, 0.0  ;;  %2527 = vmatmul.mubr.bf16.gmra.mxu0 %v16805_v51 }
  0xaa   : > { %22189 = vst [vmem:[#allocation45_spill] sm:$0xff] %v22188_v43  ;;  %v1219_v40 = vor.u32 %v1217_v31, %v1215_v34  ;;  %v1727_v10 = vor.u32 %v1725_v3, %v16838_v32  ;;  %v1754_v35 = vshrl.u32 %v990_v11, 16  ;;  %v1757_v56 = vshll.u32 %v990_v11, 16  ;;  %2687 = vmatprep.mubr.bf16.mxu1 %v16849_v55 }
  0xab   : > { %v1118_v4 = vpack.c.bf16 %v16740_v12, %v1096_v18  ;;  %v16863_v49 = vsel %vm22190_vm15, %v1716_v13, %v1743_v50  ;;  %v1223_v59 = vrot.slane %v1221_v15, 1  ;;  %v713_v63 = vadd.s32 216, %v16022_v5 }
  0xac   : > { %22191 = vst [vmem:[#allocation46_spill] sm:$0xff] %v16863_v49  ;;  %v712_v25 = vadd.s32 208, %v16022_v5  ;;  %v16869_v34 = vsel %vm22177_vm4, %v1700_v58, %v1727_v10  ;;  %v1756_v3 = vrot.slane %v1754_v35, 7  ;;  %v16873_v12 = vpack.c.bf16 %v16856_v61, %v16846_v22  ;;  %2534 = vmatprep.mubr.bf16.mxu0 %v16863_v49 }
  0xad   : > { %22192 = vst [vmem:[#allocation47_spill] sm:$0xff] %v16869_v34  ;;  %v1291_v31 = vrot.slane %v1118_v4, 1  ;;  %vm22193_vm15 = vsmask.f32 7424  ;;  %v745_v11 = vand.u32 15, %v713_v63  ;;  %v1225_v50 = vshrl.u32 %v1007_v46, 16  ;;  %2688 = vmatmul.mubr.bf16.gmra.mxu1 %v16869_v34 }
  0xae   : > { %v1224_v13 = vsel %vm22193_vm15, %v1219_v40, %v1223_v59  ;;  %v744_v15 = vand.u32 15, %v712_v25  ;;  %v1759_v18 = vor.u32 %v1757_v56, %v1756_v3  ;;  %vm22194_vm6 = vcmask 1046528  }
  0xaf   : > { %v1292_v43 = vsel %vm22194_vm6, %v1289_v21, %v1291_v31  ;;  %v1762_v19 = vshrl.u32 %v1224_v13, 16  ;;  %v1765_v58 = vshll.u32 %v1224_v13, 16  ;;  %vm16878_vm4 = vcmp.ne.s32.totalorder %v745_v11, 15  ;;  %v16902_v11 = vld [vmem:[%s16194_s1 + $0xd0] sm:$0xff] }
  0xb0   : > { %v1746_v10 = vshrl.u32 %v1292_v43, 16  ;;  %v1749_v35 = vshll.u32 %v1292_v43, 16  ;;  %v22195_v4 = vmov 0  ;;  %vm16882_vm5 = vcmp.ne.s32.totalorder %v744_v15, 0 }
  0xb1   : > { %v22196_v4 = vsel %vm16878_vm4, 4294967295, %v22195_v4  ;;  %v22198_v24 = vmov 0  ;;  %vm22201_vm15 = vsmask.f32 256  ;;  %v16889_v46 = vrot.slane %v1762_v19, 7  ;;  %2535 = vmatmul.mubr.bf16.gmra.mxu0 %v16849_v55 }
  0xb2   : > { %22197 = vst [vmem:[#allocation48_spill] sm:$0xff] %v22196_v4  ;;  %v22199_v24 = vsel %vm16882_vm5, 4294967295, %v22198_v24  ;;  %v16887_v40 = vsel %vm22201_vm15, %v1732_v30, %v1759_v18  ;;  %v970_v21 = vsel %vm16878_vm4, %v16801_v47, 0.0  ;;  %v1098_v56 = vsel %vm16882_vm5, %v16792_v38, 0.0  ;;  %v16910_v4 = vld [vmem:[%s16194_s1 + $0xd8] sm:$0xff]  ;;  %vm22202_vm6 = vmmov %vm22201_vm15 }
  0xb3   : > { %22200 = vst [vmem:[#allocation49_spill] sm:$0xff] %v22199_v24  ;;  %v1748_v43 = vrot.slane %v1746_v10, 7  ;;  %v991_v63 = vpack.c.bf16 %v970_v21, %v16792_v38  ;;  %v16899_v25 = vpack.c.bf16 %v16801_v47, %v1098_v56  ;;  %v1227_v13 = vor.u32 %v1225_v50, %v1223_v59  ;;  %2695 = vmatprep.mubr.bf16.mxu1 %v16887_v40  ;;  %vm22204_vm15 = vmmov %vm22202_vm6 }
  0xb4   : > { %v1767_v19 = vor.u32 %v1765_v58, %v16889_v46  ;;  %v1229_v30 = vshll.u32 %v16873_v12, 16  ;;  %v715_v15 = vadd.s32 232, %v16022_v5  ;;  %v714_v18 = vadd.s32 224, %v16022_v5 }
  0xb5   : > { %v1751_v38 = vor.u32 %v1749_v35, %v1748_v43  ;;  %v1778_v47 = vshrl.u32 %v991_v63, 16  ;;  %v1781_v10 = vshll.u32 %v991_v63, 16  ;;  %v1293_v59 = vrot.slane %v16899_v25, 1 }
  0xb6   : > { %v16917_v50 = vsel %vm22202_vm6, %v16832_v17, %v1767_v19  ;;  %v1231_v58 = vrot.slane %v1229_v30, 1  ;;  %v747_v21 = vand.u32 15, %v715_v15  ;;  %v746_v56 = vand.u32 15, %v714_v18 }
  0xb7   : > { %22203 = vst [vmem:[#allocation50_spill] sm:$0xff] %v16917_v50  ;;  %v16922_v24 = vsel %vm22204_vm15, %v16838_v32, %v1751_v38  ;;  %v1780_v35 = vrot.slane %v1778_v47, 7  ;;  %vm22206_vm4 = vcmask 1046528   ;;  %v1009_v25 = vpack.c.bf16 %v16910_v4, %v16902_v11  ;;  %2542 = vmatprep.mubr.bf16.mxu0 %v16917_v50 }
  0xb8   : > { %22205 = vst [vmem:[#allocation51_spill] sm:$0xff] %v16922_v24  ;;  %v1294_v63 = vsel %vm22206_vm4, %v1291_v31, %v1293_v59  ;;  %vm22207_vm6 = vsmask.f32 7424  ;;  %vm16928_vm5 = vcmp.ne.s32.totalorder %v747_v21, 15  ;;  %v22208_v19 = vmov 0  ;;  %v16944_v21 = vld [vmem:[%s16194_s1 + $0xe0] sm:$0xff]  ;;  %2696 = vmatmul.mubr.bf16.gmra.mxu1 %v16922_v24 }
  0xb9   : > { %v1770_v34 = vshrl.u32 %v1294_v63, 16  ;;  %v1773_v51 = vshll.u32 %v1294_v63, 16  ;;  %v1232_v17 = vsel %vm22207_vm6, %v1227_v13, %v1231_v58  ;;  %v22209_v19 = vsel %vm16928_vm5, 4294967295, %v22208_v19  ;;  %vm22214_vm6 = vmmov %vm22204_vm15  ;;  %2543 = vmatmul.mubr.bf16.gmra.mxu0 %v16887_v40 }
  0xba   : > { %22210 = vst [vmem:[#allocation52_spill] sm:$0xff] %v22209_v19  ;;  %v1783_v30 = vor.u32 %v1781_v10, %v1780_v35  ;;  %v1786_v15 = vshrl.u32 %v1232_v17, 16  ;;  %v1789_v32 = vshll.u32 %v1232_v17, 16  ;;  %v972_v18 = vsel %vm16928_vm5, %v16856_v61, 0.0  ;;  %v16953_v19 = vld [vmem:[%s16194_s1 + $0xe8] sm:$0xff] }
  0xbb   : > { %v16935_v31 = vrot.slane %v1770_v34, 7  ;;  %v992_v38 = vpack.c.bf16 %v972_v18, %v16846_v22  ;;  %vm16938_vm4 = vcmp.ne.s32.totalorder %v746_v56, 0  ;;  %v22211_v47 = vmov 0 }
  0xbc   : > { %v22212_v47 = vsel %vm16938_vm4, 4294967295, %v22211_v47  ;;  %v1233_v13 = vshrl.u32 %v16873_v12, 16  ;;  %v16947_v10 = vsel %vm22204_vm15, %v1756_v3, %v1783_v30  ;;  %v1788_v63 = vrot.slane %v1786_v15, 7  ;;  %vm22216_vm15 = vmmov %vm22214_vm6 }
  0xbd   : > { %22213 = vst [vmem:[#allocation53_spill] sm:$0xff] %v22212_v47  ;;  %v1100_v17 = vsel %vm16938_vm4, %v16846_v22, 0.0  ;;  %v1237_v34 = vshll.u32 %v1009_v25, 16  ;;  %v1775_v56 = vor.u32 %v1773_v51, %v16935_v31  ;;  %v1802_v18 = vshrl.u32 %v992_v38, 16  ;;  %2703 = vmatprep.mubr.bf16.mxu1 %v16947_v10 }
  0xbe   : > { %v1805_v49 = vshll.u32 %v992_v38, 16  ;;  %v1120_v12 = vpack.c.bf16 %v16856_v61, %v1100_v17  ;;  %v1791_v3 = vor.u32 %v1789_v32, %v1788_v63  ;;  %v1235_v30 = vor.u32 %v1233_v13, %v1231_v58 }
  0xbf   : > { %v1239_v15 = vrot.slane %v1237_v34, 1  ;;  %v717_v42 = vadd.s32 248, %v16022_v5  ;;  %v16962_v22 = vsel %vm22214_vm6, %v1748_v43, %v1775_v56  ;;  %v1804_v47 = vrot.slane %v1802_v18, 7 }
  0xc0   : > { %22215 = vst [vmem:[#allocation54_spill] sm:$0xff] %v16962_v22  ;;  %v1295_v24 = vrot.slane %v1120_v12, 1  ;;  %v716_v51 = vadd.s32 240, %v16022_v5  ;;  %v16968_v61 = vsel %vm22216_vm15, %v16889_v46, %v1791_v3  ;;  %vm22218_vm5 = vsmask.f32 7424  ;;  %2704 = vmatmul.mubr.bf16.gmra.mxu1 %v16962_v22 }
  0xc1   : > { %22217 = vst [vmem:[#allocation55_spill] sm:$0xff] %v16968_v61  ;;  %v1240_v58 = vsel %vm22218_vm5, %v1235_v30, %v1239_v15  ;;  %v749_v32 = vand.u32 15, %v717_v42  ;;  %v1010_v38 = vpack.c.bf16 %v16953_v19, %v16944_v21  ;;  %v1807_v13 = vor.u32 %v1805_v49, %v1804_v47  ;;  %2550 = vmatprep.mubr.bf16.mxu0 %v16968_v61 }
  0xc2   : > { %vm22219_vm4 = vcmask 1046528   ;;  %v1810_v17 = vshrl.u32 %v1240_v58, 16  ;;  %v1813_v34 = vshll.u32 %v1240_v58, 16  ;;  %v22220_v12 = vmov 0  ;;  %2551 = vmatmul.mubr.bf16.gmra.mxu0 %v16947_v10 }
  0xc3   : > { %v1296_v43 = vsel %vm22219_vm4, %v1293_v59, %v1295_v24  ;;  %vm16974_vm6 = vcmp.ne.s32.totalorder %v749_v32, 15  ;;  %v748_v50 = vand.u32 15, %v716_v51  ;;  %v16979_v46 = vsel %vm22216_vm15, %v1780_v35, %v1807_v13  ;;  %vm22226_vm4 = vmmov %vm22216_vm15 }
  0xc4   : > { %v1794_v56 = vshrl.u32 %v1296_v43, 16  ;;  %v1797_v18 = vshll.u32 %v1296_v43, 16  ;;  %v22221_v12 = vsel %vm16974_vm6, 4294967295, %v22220_v12  ;;  %v16981_v3 = vrot.slane %v1810_v17, 7  ;;  %2711 = vmatprep.mubr.bf16.mxu1 %v16979_v46  ;;  %vm22228_vm15 = vmmov %vm22226_vm4 }
  0xc5   : > { %22222 = vst [vmem:[#allocation56_spill] sm:$0xff] %v22221_v12  ;;  %v974_v42 = vsel %vm16974_vm6, %v16910_v4, 0.0  ;;  %v1241_v49 = vshrl.u32 %v1009_v25, 16  ;;  %vm16987_vm5 = vcmp.ne.s32.totalorder %v748_v50, 0  ;;  %v22223_v58 = vmov 0 }
  0xc6   : > { %v1796_v59 = vrot.slane %v1794_v56, 7  ;;  %v993_v30 = vpack.c.bf16 %v974_v42, %v16902_v11  ;;  %v22224_v58 = vsel %vm16987_vm5, 4294967295, %v22223_v58  ;;  %v1245_v32 = vshll.u32 %v1010_v38, 16 }
  0xc7   : > { %22225 = vst [vmem:[#allocation57_spill] sm:$0xff] %v22224_v58  ;;  %v1815_v35 = vor.u32 %v1813_v34, %v16981_v3  ;;  %v1102_v51 = vsel %vm16987_vm5, %v16902_v11, 0.0  ;;  %v1243_v13 = vor.u32 %v1241_v49, %v1239_v15  ;;  %v719_v43 = vadd.s32 264, %v16022_v5 }
  0xc8   : > { %v1799_v25 = vor.u32 %v1797_v18, %v1796_v59  ;;  %v1826_v17 = vshrl.u32 %v993_v30, 16  ;;  %v1829_v50 = vshll.u32 %v993_v30, 16  ;;  %v1121_v56 = vpack.c.bf16 %v16910_v4, %v1102_v51 }
  0xc9   : > { %v17001_v42 = vsel %vm22226_vm4, %v1788_v63, %v1815_v35  ;;  %v1247_v34 = vrot.slane %v1245_v32, 1  ;;  %v751_v12 = vand.u32 15, %v719_v43  ;;  %v718_v58 = vadd.s32 256, %v16022_v5 }
  0xca   : > { %22227 = vst [vmem:[#allocation58_spill] sm:$0xff] %v17001_v42  ;;  %v17007_v11 = vsel %vm22228_vm15, %v16935_v31, %v1799_v25  ;;  %v1828_v15 = vrot.slane %v1826_v17, 7  ;;  %v1297_v18 = vrot.slane %v1121_v56, 1  ;;  %v1249_v49 = vshrl.u32 %v1010_v38, 16  ;;  %2558 = vmatprep.mubr.bf16.mxu0 %v17001_v42 }
  0xcb   : > { %22229 = vst [vmem:[#allocation59_spill] sm:$0xff] %v17007_v11  ;;  %vm22230_vm5 = vsmask.f32 7424  ;;  %vm17010_vm6 = vcmp.ne.s32.totalorder %v751_v12, 15  ;;  %v22231_v30 = vmov 0  ;;  %v750_v63 = vand.u32 15, %v718_v58  ;;  %2712 = vmatmul.mubr.bf16.gmra.mxu1 %v17007_v11  ;;  %2559 = vmatmul.mubr.bf16.gmra.mxu0 %v16979_v46 }
  0xcc   : > { %v1248_v4 = vsel %vm22230_vm5, %v1243_v13, %v1247_v34  ;;  %v22232_v30 = vsel %vm17010_vm6, 4294967295, %v22231_v30  ;;  %v720_v32 = vadd.s32 272, %v16022_v5  ;;  %v1831_v35 = vor.u32 %v1829_v50, %v1828_v15 }
  0xcd   : > { %22233 = vst [vmem:[#allocation60_spill] sm:$0xff] %v22232_v30  ;;  %vm22234_vm4 = vcmask 1046528   ;;  %v1834_v43 = vshrl.u32 %v1248_v4, 16  ;;  %v1837_v22 = vshll.u32 %v1248_v4, 16  ;;  %v976_v38 = vsel %vm17010_vm6, %v16953_v19, 0.0 }
  0xce   : > { %v1298_v51 = vsel %vm22234_vm4, %v1295_v24, %v1297_v18  ;;  %vm17019_vm15 = vcmp.ne.s32.totalorder %v750_v63, 0  ;;  %v22235_v13 = vmov 0  ;;  %vm22238_vm5 = vsmask.f32 256 }
  0xcf   : > { %v1818_v61 = vshrl.u32 %v1298_v51, 16  ;;  %v1821_v31 = vshll.u32 %v1298_v51, 16  ;;  %v22236_v13 = vsel %vm17019_vm15, 4294967295, %v22235_v13  ;;  %v17024_v12 = vsel %vm22238_vm5, %v1804_v47, %v1831_v35  ;;  %v17038_v47 = vld [vmem:[%s22079_s29 + $0x238] sm:$0xff]   ;;  %vm22246_vm11 = vmmov %vm22238_vm5 }
  0xd0   : > { %22237 = vst [vmem:[#allocation61_spill] sm:$0xff] %v22236_v13  ;;  %v17026_v58 = vrot.slane %v1834_v43, 7  ;;  %v994_v24 = vpack.c.bf16 %v976_v38, %v16944_v21  ;;  %v1104_v25 = vsel %vm17019_vm15, %v16944_v21, 0.0  ;;  %v1251_v56 = vor.u32 %v1249_v49, %v1247_v34  ;;  %2719 = vmatprep.mubr.bf16.mxu1 %v17024_v12  ;;  %v881_v43 = vld [vmem:[%s16194_s1 + $0xf0] sm:$0xff]  ;;  %14646 = vmatprep.subr.bf16.mxu0 %v17038_v47 }
  0xd1   : > { %v1820_v17 = vrot.slane %v1818_v61, 7  ;;  %v1122_v50 = vpack.c.bf16 %v16953_v19, %v1104_v25  ;;  %v721_v4 = vadd.s32 280, %v16022_v5  ;;  %v752_v51 = vand.u32 15, %v720_v32  ;;  %v882_v25 = vld [vmem:[%s16194_s1 + $0xf8] sm:$0xff] }
  0xd2   : > { %v1850_v63 = vshrl.u32 %v994_v24, 16  ;;  %v1853_v35 = vshll.u32 %v994_v24, 16  ;;  %v1839_v19 = vor.u32 %v1837_v22, %v17026_v58  ;;  %v22239_v38 = vmov 0 }
  0xd3   : > { %v1823_v21 = vor.u32 %v1821_v31, %v1820_v17  ;;  %v1299_v61 = vrot.slane %v1122_v50, 1  ;;  %v753_v49 = vand.u32 15, %v721_v4  ;;  %vm17046_vm4 = vcmp.ne.s32.totalorder %v752_v51, 0 }
  0xd4   : > { %v1852_v34 = vrot.slane %v1850_v63, 7  ;;  %v22240_v38 = vsel %vm17046_vm4, 4294967295, %v22239_v38  ;;  %vm22242_vm6 = vcmask 1046528   ;;  %v1898_v24 = vshrl.u32 %v1251_v56, 16 }
  0xd5   : > { %22241 = vst [vmem:[#allocation62_spill] sm:$0xff] %v22240_v38  ;;  %v17052_v32 = vsel %vm22238_vm5, %v1796_v59, %v1823_v21  ;;  %v1300_v31 = vsel %vm22242_vm6, %v1297_v18, %v1299_v61  ;;  %v1011_v50 = vpack.c.bf16 %v882_v25, %v881_v43  ;;  %vm17055_vm15 = vcmp.ne.s32.totalorder %v753_v49, 15  ;;  %vm22247_vm6 = vmmov %vm22238_vm5 }
  0xd6   : > { %v1855_v30 = vor.u32 %v1853_v35, %v1852_v34  ;;  %v1842_v13 = vshrl.u32 %v1300_v31, 16  ;;  %v1845_v5 = vshll.u32 %v1300_v31, 16  ;;  %v22243_v11 = vmov 0  ;;  %2720 = vmatmul.mubr.bf16.gmra.mxu1 %v17052_v32 }
  0xd7   : > { %v22244_v11 = vsel %vm17055_vm15, 4294967295, %v22243_v11  ;;  %v978_v22 = vsel %vm17055_vm15, %v882_v25, 0.0  ;;  %v1106_v4 = vsel %vm17046_vm4, %v881_v43, 0.0  ;;  %v17069_v35 = vsel %vm22247_vm6, %v16981_v3, %v1839_v19  ;;  %vm22250_vm6 = vmmov %vm22238_vm5 }
  0xd8   : > { %22245 = vst [vmem:[#allocation63_spill] sm:$0xff] %v22244_v11  ;;  %v17064_v59 = vsel %vm22246_vm11, %v1828_v15, %v1855_v30  ;;  %v1844_v63 = vrot.slane %v1842_v13, 7  ;;  %v995_v18 = vpack.c.bf16 %v978_v22, %v881_v43  ;;  %v1123_v51 = vpack.c.bf16 %v882_v25, %v1106_v4  ;;  %2566 = vmatprep.mubr.bf16.mxu0 %v17069_v35 }
  0xd9   : > { %v1900_v21 = vrot.slane %v1898_v24, 7  ;;  %v1901_v49 = vshll.u32 %v1251_v56, 16  ;;  %2727 = vmatprep.mubr.bf16.mxu1 %v17064_v59  ;;  %v1304_v15 = vshll.u32 %v1011_v50, 16  ;;  %vm22249_vm11 = vcmask 1046528   ;;  %2567 = vmatmul.mubr.bf16.gmra.mxu0 %v17024_v12 }
  0xda   : > { %v1847_v31 = vor.u32 %v1845_v5, %v1844_v63  ;;  %v1874_v11 = vshrl.u32 %v995_v18, 16  ;;  %v1877_v38 = vshll.u32 %v995_v18, 16  ;;  %v1301_v42 = vrot.slane %v1123_v51, 1 }
  0xdb   : > { %v1308_v43 = vshrl.u32 %v1011_v50, 16  ;;  %v1903_v3 = vor.u32 %v1901_v49, %v1900_v21  ;;  %v1514_v25 = vshrl.u32 %v16239_v62, 16  ;;  %v1306_v4 = vrot.slane %v1304_v15, 1 }
  0xdc   : > { %v17074_v30 = vrot.slane %v1874_v11, 7  ;;  %v1302_v13 = vsel %vm22249_vm11, %v1299_v61, %v1301_v42  ;;  %v17079_v24 = vsel %vm22238_vm5, %v1820_v17, %v1847_v31  ;;  %v1534_v51 = vshrl.u32 %v16260_v44, 16  ;;  %vm22252_vm11 = vmmov %vm22238_vm5 }
  0xdd   : > { %v1866_v19 = vshrl.u32 %v1302_v13, 16  ;;  %v1869_v22 = vshll.u32 %v1302_v13, 16  ;;  %vm22251_vm15 = vsmask.f32 7424  ;;  %v1310_v50 = vor.u32 %v1308_v43, %v1306_v4 }
  0xde   : > { %22248 = vst [vmem:[#allocation64_spill] sm:$0xff] %v17074_v30  ;;  %v1879_v5 = vor.u32 %v1877_v38, %v17074_v30  ;;  %v1307_v61 = vsel %vm22251_vm15, %v1251_v56, %v1306_v4  ;;  %2728 = vmatmul.mubr.bf16.gmra.mxu1 %v17079_v24  ;;  %v1904_v62 = vsel %vm22252_vm11, %v17026_v58, %v1903_v3  ;;  %v1516_v17 = vrot.slane %v1514_v25, 7  ;;  %vm22253_vm5 = vmmov %vm22251_vm15 }
  0xdf   : > { %v1868_v18 = vrot.slane %v1866_v19, 7  ;;  %v1858_v21 = vshrl.u32 %v1307_v61, 16  ;;  %v1861_v49 = vshll.u32 %v1307_v61, 16  ;;  %v1312_v44 = vsel %vm22253_vm5, %v1310_v50, %v16016_v2  ;;  %2574 = vmatprep.mubr.bf16.mxu0 %v1904_v62  ;;  %vm22255_vm15 = vmmov %vm22252_vm11 }
  0xe0   : > { %v17084_v11 = vsel %vm22250_vm6, %v1852_v34, %v1879_v5  ;;  %vm22254_vm6 = vcmask 1046528   ;;  %v1536_v56 = vrot.slane %v1534_v51, 7  ;;  %v1882_v15 = vshrl.u32 %v1312_v44, 16  ;;  %vm22256_vm5 = vmmov %vm22252_vm11 }
  0xe1   : > { %2735 = vmatprep.mubr.bf16.mxu1 %v17084_v11  ;;  %v1871_v38 = vor.u32 %v1869_v22, %v1868_v18  ;;  %v1311_v34 = vsel %vm22254_vm6, %v1301_v42, %v16028_v8  ;;  %v1860_v31 = vrot.slane %v1858_v21, 7  ;;  %v1885_v13 = vshll.u32 %v1312_v44, 16  ;;  %vm22257_vm6 = vmmov %vm22256_vm5  ;;  %2575 = vmatmul.mubr.bf16.gmra.mxu0 %v17064_v59 }
  0xe2   : > { %v1890_v43 = vshrl.u32 %v1311_v34, 16  ;;  %v1906_v3 = vshrl.u32 %v1310_v50, 16  ;;  %v1502_v19 = vshrl.u32 %v16241_v9, 16  ;;  %v17097_v5 = vrot.slane %v1882_v15, 7 }
  0xe3   : > { %v1863_v25 = vor.u32 %v1861_v49, %v1860_v31  ;;  %v1893_v22 = vshll.u32 %v1311_v34, 16  ;;  %v17100_v4 = vsel %vm22255_vm15, %v1844_v63, %v1871_v38  ;;  %v1909_v30 = vshll.u32 %v1310_v50, 16  ;;  %vm22258_vm15 = vmmov %vm22256_vm5 }
  0xe4   : > { %v17102_v61 = vrot.slane %v1890_v43, 7  ;;  %v1908_v42 = vrot.slane %v1906_v3, 7  ;;  %v1544_v51 = vsel %vm22252_vm11, %v1536_v56, %v16378_v33  ;;  %v1887_v9 = vor.u32 %v1885_v13, %v17097_v5  ;;  %vm22259_vm11 = vmmov %vm22256_vm5  ;;  %v22268_v56 = vld [vmem:[#allocation51_spill] sm:$0xff] }
  0xe5   : > { %v17108_v62 = vsel %vm22256_vm5, %v17026_v58, %v1863_v25  ;;  %v1524_v63 = vsel %vm22257_vm6, %v1516_v17, %v16356_v39  ;;  %v1504_v38 = vrot.slane %v1502_v19, 7  ;;  %v21954_v39 = vshll.u32 %v16016_v2, 16  ;;  %vm22260_vm6 = vmmov %vm22256_vm5 }
  0xe6   : > { %v1895_v21 = vor.u32 %v1893_v22, %v17102_v61  ;;  %v1911_v49 = vor.u32 %v1909_v30, %v1908_v42  ;;  %2736 = vmatmul.mubr.bf16.gmra.mxu1 %v17100_v4  ;;  %v17116_v50 = vsel %vm22258_vm15, %v1860_v31, %v1887_v9  ;;  %2776 = vmatprep.mubr.bf16.mxu0 %v1524_v63  ;;  %v15365_v30 = vld [vmem:[%s22079_s29 + $0x230] sm:$0xff]   ;;  %v1546_v17 = vshrl.u32 %v16272_v27, 16  ;;  %v15367_v27 = vld [vmem:[%s22079_s29 + $0x220] sm:$0xff]   ;;  %vm22275_vm15 = vmmov %vm22256_vm5 }
  0xe7   : > { %2937 = vmatprep.mubr.bf16.mxu1 %v1544_v51  ;;  %v1512_v44 = vsel %vm22260_vm6, %v1504_v38, %v16332_v16  ;;  %v15369_v16 = vld [vmem:[%s22079_s29 + $0x210] sm:$0xff]   ;;  %v22269_v51 = vld [vmem:[#allocation55_spill] sm:$0xff]  ;;  %vm22282_vm6 = vmmov %vm22256_vm5  ;;  %vm22371_vm8 = vcmask 1046528  }
  0xe8   : > { %v17119_v33 = vsel %vm22259_vm11, %v1868_v18, %v1895_v21  ;;  %v17122_v58 = vsel %vm22256_vm5, %v1860_v31, %v1911_v49  ;;  %v15366_v18 = vld [vmem:[%s22079_s29 + $0x228] sm:$0xff]   ;;  %v22270_v38 = vld [vmem:[#allocation54_spill] sm:$0xff]  ;;  %vm22278_vm11 = vmmov %vm22256_vm5 }
  0xe9   : > { %2777 = vmatmul.mubr.bf16.vlgmr.msra.gmra.mxu0 %v1512_v44 }
  0xea   : > { %2784 = vmatprep.mubr.bf16.mxu0 %v16465_v57  ;;  %14647 = vmatpush3.bf16.msra.mxu0 %v17038_v47  ;;  %v22262_v57 = vld [vmem:[#allocation43_spill] sm:$0xff] }
  0xeb   : > { %14648 = vmatprep.subr.bf16.mxu0 %v15365_v30 }
  0xee   : > { %2938 = vmatmul.mubr.bf16.vlgmr.msra.gmra.mxu1 %v16312_v7  ;;  %14649 = vmatpush3.bf16.msra.mxu0 %v15365_v30  ;;  %v15368_v7 = vld [vmem:[%s22079_s29 + $0x218] sm:$0xff]  }
  0xef   : > { %2945 = vmatprep.mubr.bf16.mxu1 %v16484_v1  ;;  %14650 = vmatprep.subr.bf16.mxu0 %v15366_v18 }
  0xf1   : > { %2785 = vmatmul.mubr.bf16.gmra.mxu0 %v16395_v26  ;;  %v15370_v26 = vld [vmem:[%s22079_s29 + $0x208] sm:$0xff]  }
  0xf2   : > { %2792 = vmatprep.mubr.bf16.mxu0 %v16529_v45  ;;  %14651 = vmatpush3.bf16.msra.mxu0 %v15366_v18 }
  0xf3   : > { %14652 = vmatprep.subr.bf16.mxu0 %v15367_v27 }
  0xf6   : > { %2946 = vmatmul.mubr.bf16.gmra.mxu1 %v16428_v14  ;;  %14653 = vmatpush3.bf16.msra.mxu0 %v15367_v27  ;;  %v15371_v14 = vld [vmem:[%s22079_s29 + $0x200] sm:$0xff]  }
  0xf7   : > { %2953 = vmatprep.mubr.bf16.mxu1 %v16560_v0  ;;  %14654 = vmatprep.subr.bf16.mxu0 %v15368_v7 }
  0xf9   : > { %2793 = vmatmul.mubr.bf16.gmra.mxu0 %v16484_v1  ;;  %v17178_v1 = vrot.slane %v1546_v17, 7 }
  0xfa   : > { %2800 = vmatprep.mubr.bf16.mxu0 %v16601_v20  ;;  %14655 = vmatpush3.bf16.msra.mxu0 %v15368_v7 }
  0xfb   : > { %14656 = vmatprep.subr.bf16.mxu0 %v15369_v16 }
  0xfe   : > { %2954 = vmatmul.mubr.bf16.gmra.mxu1 %v16487_v6  ;;  %14657 = vmatpush3.bf16.msra.mxu0 %v15369_v16  ;;  %v21953_v6 = vshll.u32 %v16028_v8, 16 }
  0xff   : > { %2961 = vmatprep.mubr.bf16.mxu1 %v16617_v28  ;;  %14658 = vmatprep.subr.bf16.mxu0 %v15370_v26 }
 0x101   : > { %2801 = vmatmul.mubr.bf16.gmra.mxu0 %v16560_v0  ;;  %v22263_v0 = vld [vmem:[#allocation41_spill] sm:$0xff] }
 0x102   : > { %2808 = vmatprep.mubr.bf16.mxu0 %v16654_v29  ;;  %14659 = vmatpush3.bf16.msra.mxu0 %v15370_v26 }
 0x103   : > { %14660 = vmatprep.subr.bf16.mxu0 %v15371_v14 }
 0x106   : > { %2962 = vmatmul.mubr.bf16.gmra.mxu1 %v16536_v54  ;;  %14661 = vmatpush3.bf16.msra.mxu0 %v15371_v14  ;;  %v22261_v54 = vld [vmem:[#allocation42_spill] sm:$0xff] }
 0x107   : > { %2969 = vmatprep.mubr.bf16.mxu1 %v16666_v60 }
 0x109   : > { %2809 = vmatmul.mubr.bf16.gmra.mxu0 %v16617_v28  ;;  %v22265_v28 = vld [vmem:[#allocation47_spill] sm:$0xff] }
 0x10a   : > { %2816 = vmatprep.mubr.bf16.mxu0 %v16702_v48 }
 0x10e   : > { %2970 = vmatmul.mubr.bf16.gmra.mxu1 %v16606_v53  ;;  %v22264_v53 = vld [vmem:[#allocation46_spill] sm:$0xff] }
 0x10f   : > { %2977 = vmatprep.mubr.bf16.mxu1 %v16729_v52 }
 0x111   : > { %2817 = vmatmul.mubr.bf16.gmra.mxu0 %v16666_v60 }
 0x112   : > { %2824 = vmatprep.mubr.bf16.mxu0 %v16774_v23 }
 0x116   : > { %2978 = vmatmul.mubr.bf16.gmra.mxu1 %v16678_v37  ;;  %v22266_v37 = vld [vmem:[#allocation50_spill] sm:$0xff] }
 0x117   : > { %2985 = vmatprep.mubr.bf16.mxu1 %v16777_v36 }
 0x119   : > { %2825 = vmatmul.mubr.bf16.gmra.mxu0 %v16729_v52 }
 0x11a   : > { %2832 = vmatprep.mubr.bf16.mxu0 %v22262_v57 }
 0x11c   : > { %v13078_v60 = vpop.f32.mrf.mxu1 }
 0x11e   : > { %2986 = vmatmul.mubr.bf16.gmra.mxu1 %v16744_v41  ;;  %v12966_v52 = vpop.f32.mrf.mxu0  ;;  %v17191_v41 = vld [vmem:[%s22267_s22] ss:$0 sm:$0xff]  ;;  %v13079_v47 = vpop.f32.mrf.mxu1 }
 0x11f   : > { %2993 = vmatprep.mubr.bf16.mxu1 %v22261_v54  ;;  %v13080_v34 = vadd.f32 %v13079_v47, %v13078_v60 }
 0x120   : > { %v13081_v31 = vpop.f32.mrf.mxu1 }
 0x121   : > { %2833 = vmatmul.mubr.bf16.gmra.mxu0 %v16777_v36  ;;  %v12967_v36 = vpop.f32.mrf.mxu0 }
 0x122   : > { %2840 = vmatprep.mubr.bf16.mxu0 %v22265_v28  ;;  %v12968_v15 = vadd.f32 %v12967_v36, %v12966_v52  ;;  %v13082_v43 = vpop.f32.mrf.mxu1  ;;  %v22272_v36 = vld [vmem:[#allocation59_spill] sm:$0xff] }
 0x123   : > { %v12969_v13 = vpop.f32.mrf.mxu0  ;;  %v13083_v3 = vadd.f32 %v13082_v43, %v13081_v31 }
 0x124   : > { %v13084_v25 = vpop.f32.mrf.mxu1 }
 0x125   : > { %v12970_v19 = vpop.f32.mrf.mxu0 }
 0x126   : > { %2994 = vmatmul.mubr.bf16.gmra.mxu1 %v22263_v0  ;;  %v12971_v42 = vadd.f32 %v12970_v19, %v12969_v13  ;;  %v13085_v21 = vpop.f32.mrf.mxu1 }
 0x127   : > { %3001 = vmatprep.mubr.bf16.mxu1 %v22264_v53  ;;  %v12972_v9 = vpop.f32.mrf.mxu0  ;;  %v13086_v63 = vadd.f32 %v13085_v21, %v13084_v25 }
 0x128   : > { %v2460_v49 = vadd.f32 %v12971_v42, %v17191_v41  ;;  %v13087_v17 = vpop.f32.mrf.mxu1 }
 0x129   : > { %2841 = vmatmul.mubr.bf16.gmra.mxu0 %v22261_v54  ;;  %v12973_v30 = vpop.f32.mrf.mxu0 }
 0x12a   : > { %2848 = vmatprep.mubr.bf16.mxu0 %v22268_v56  ;;  %v17202_v44 = vadd.f32 %v13083_v3, %v2460_v49  ;;  %v12974_v18 = vadd.f32 %v12973_v30, %v12972_v9  ;;  %v13088_v27 = vpop.f32.mrf.mxu1 }
 0x12b   : > { %v13089_v16 = vadd.f32 %v13088_v27, %v13087_v17 }
 0x12c   : > { %v2465_v7 = vadd.f32 %v12974_v18, %v17191_v41 }
 0x12e   : > { %3002 = vmatmul.mubr.bf16.gmra.mxu1 %v16849_v55  ;;  %v2457_v55 = vadd.f32 %v12968_v15, %v17191_v41  ;;  %v17206_v54 = vadd.f32 %v13086_v63, %v2465_v7 }
 0x12f   : > { %3009 = vmatprep.mubr.bf16.mxu1 %v22266_v37  ;;  %v13090_v14 = vpop.f32.mrf.mxu1 }
 0x130   : > { %v17196_v22 = vadd.f32 %v13080_v34, %v2457_v55 }
 0x131   : > { %2849 = vmatmul.mubr.bf16.gmra.mxu0 %v22264_v53  ;;  %v22271_v53 = vld [vmem:[#allocation58_spill] sm:$0xff]  ;;  %v13091_v52 = vpop.f32.mrf.mxu1 }
 0x132   : > { %2856 = vmatprep.mubr.bf16.mxu0 %v22270_v38  ;;  %v13092_v34 = vadd.f32 %v13091_v52, %v13090_v14 }
 0x133   : > { %v13093_v15 = vpop.f32.mrf.mxu1 }
 0x135   : > { %v13094_v55 = vpop.f32.mrf.mxu1 }
 0x136   : > { %3010 = vmatmul.mubr.bf16.gmra.mxu1 %v16887_v40  ;;  %v12975_v40 = vpop.f32.mrf.mxu0  ;;  %v13095_v19 = vadd.f32 %v13094_v55, %v13093_v15 }
 0x137   : > { %3017 = vmatprep.mubr.bf16.mxu1 %v22269_v51  ;;  %v13096_v42 = vpop.f32.mrf.mxu1 }
 0x138   : > { %v12976_v26 = vpop.f32.mrf.mxu0 }
 0x139   : > { %v12977_v0 = vadd.f32 %v12976_v26, %v12975_v40  ;;  %2857 = vmatmul.mubr.bf16.gmra.mxu0 %v22266_v37  ;;  %v13097_v49 = vpop.f32.mrf.mxu1 }
 0x13a   : > { %v12978_v60 = vpop.f32.mrf.mxu0  ;;  %2864 = vmatprep.mubr.bf16.mxu0 %v22272_v36  ;;  %v13098_v30 = vadd.f32 %v13097_v49, %v13096_v42 }
 0x13b   : > { %v2468_v47 = vadd.f32 %v12977_v0, %v17191_v41  ;;  %v13099_v18 = vpop.f32.mrf.mxu1 }
 0x13c   : > { %v12979_v31 = vpop.f32.mrf.mxu0 }
 0x13d   : > { %v17212_v13 = vadd.f32 %v13089_v16, %v2468_v47  ;;  %v12980_v43 = vadd.f32 %v12979_v31, %v12978_v60  ;;  %v13100_v7 = vpop.f32.mrf.mxu1 }
 0x13e   : > { %3018 = vmatmul.mubr.bf16.gmra.mxu1 %v16947_v10  ;;  %v12981_v10 = vpop.f32.mrf.mxu0  ;;  %v13101_v26 = vadd.f32 %v13100_v7, %v13099_v18 }
 0x13f   : > { %3025 = vmatprep.mubr.bf16.mxu1 %v22271_v53  ;;  %v2473_v3 = vadd.f32 %v12980_v43, %v17191_v41 }
 0x140   : > { %v12982_v25 = vpop.f32.mrf.mxu0 }
 0x141   : > { %v17216_v37 = vadd.f32 %v13092_v34, %v2473_v3  ;;  %v12983_v9 = vadd.f32 %v12982_v25, %v12981_v10  ;;  %2865 = vmatmul.mubr.bf16.gmra.mxu0 %v22269_v51 }
 0x142   : > { %v12984_v21 = vpop.f32.mrf.mxu0  ;;  %2872 = vmatprep.mubr.bf16.mxu0 %v17052_v32  ;;  %v13102_v0 = vpop.f32.mrf.mxu1 }
 0x143   : > { %v2476_v63 = vadd.f32 %v12983_v9, %v17191_v41 }
 0x144   : > { %v12985_v17 = vpop.f32.mrf.mxu0  ;;  %v13103_v47 = vpop.f32.mrf.mxu1 }
 0x145   : > { %v17222_v40 = vadd.f32 %v13095_v19, %v2476_v63  ;;  %v12986_v27 = vadd.f32 %v12985_v17, %v12984_v21  ;;  %v13104_v31 = vadd.f32 %v13103_v47, %v13102_v0 }
 0x146   : > { %3026 = vmatmul.mubr.bf16.gmra.mxu1 %v16979_v46  ;;  %v12987_v46 = vpop.f32.mrf.mxu0  ;;  %v13105_v43 = vpop.f32.mrf.mxu1 }
 0x147   : > { %3033 = vmatprep.mubr.bf16.mxu1 %v17069_v35  ;;  %v2481_v16 = vadd.f32 %v12986_v27, %v17191_v41 }
 0x148   : > { %v12988_v14 = vpop.f32.mrf.mxu0  ;;  %v13106_v3 = vpop.f32.mrf.mxu1 }
 0x149   : > { %v17226_v51 = vadd.f32 %v13098_v30, %v2481_v16  ;;  %v12989_v60 = vadd.f32 %v12988_v14, %v12987_v46  ;;  %2873 = vmatmul.mubr.bf16.gmra.mxu0 %v22271_v53  ;;  %v13107_v21 = vadd.f32 %v13106_v3, %v13105_v43  ;;  %v22273_v30 = vld [vmem:[#allocation16_spill] sm:$0xff] }
 0x14a   : > { %v12990_v52 = vpop.f32.mrf.mxu0  ;;  %2880 = vmatprep.mubr.bf16.mxu0 %v17079_v24  ;;  %v13108_v42 = vpop.f32.mrf.mxu1  ;;  %v17243_v17 = vor.u32 %v21954_v39, %v22273_v30 }
 0x14b   : > { %v2484_v34 = vadd.f32 %v12989_v60, %v17191_v41 }
 0x14c   : > { %v12991_v15 = vpop.f32.mrf.mxu0  ;;  %v13109_v63 = vpop.f32.mrf.mxu1  ;;  %22274 = vst [vmem:[#allocation42_spill] sm:$0xff] %v17243_v17 }
 0x14d   : > { %v17232_v10 = vadd.f32 %v13101_v26, %v2484_v34  ;;  %v12992_v55 = vadd.f32 %v12991_v15, %v12990_v52  ;;  %v13110_v27 = vadd.f32 %v13109_v63, %v13108_v42 }
 0x14e   : > { %3034 = vmatmul.mubr.bf16.gmra.mxu1 %v17024_v12  ;;  %v12993_v12 = vpop.f32.mrf.mxu0  ;;  %v13111_v46 = vpop.f32.mrf.mxu1 }
 0x14f   : > { %3041 = vmatprep.mubr.bf16.mxu1 %v17108_v62  ;;  %v2489_v19 = vadd.f32 %v12992_v55, %v17191_v41 }
 0x150   : > { %v12994_v25 = vpop.f32.mrf.mxu0  ;;  %v13112_v26 = vpop.f32.mrf.mxu1 }
 0x151   : > { %v17236_v53 = vadd.f32 %v13104_v31, %v2489_v19  ;;  %v12995_v9 = vadd.f32 %v12994_v25, %v12993_v12  ;;  %2881 = vmatmul.mubr.bf16.gmra.mxu0 %v17069_v35  ;;  %v1921_v35 = vsel %vm22275_vm15, %v17097_v5, %v17243_v17  ;;  %v13113_v34 = vadd.f32 %v13112_v26, %v13111_v46  ;;  %v22277_v25 = vld [vmem:[#allocation64_spill] sm:$0xff] }
 0x152   : > { %v12996_v49 = vpop.f32.mrf.mxu0  ;;  %2888 = vmatprep.mubr.bf16.mxu0 %v17100_v4  ;;  %v13114_v60 = vpop.f32.mrf.mxu1  ;;  %vm22294_vm15 = vcmask 1046528  }
 0x153   : > { %v2492_v18 = vadd.f32 %v12995_v9, %v17191_v41 }
 0x154   : > { %v13115_v15 = vpop.f32.mrf.mxu1 }
 0x155   : > { %v17247_v7 = vadd.f32 %v13107_v21, %v2492_v18  ;;  %v13116_v55 = vadd.f32 %v13115_v15, %v13114_v60  ;;  %v22279_v18 = vld [vmem:[#allocation32_spill] sm:$0xff] }
 0x156   : > { %3042 = vmatmul.mubr.bf16.gmra.mxu1 %v17064_v59  ;;  %v12997_v59 = vpop.f32.mrf.mxu0  ;;  %v13117_v12 = vpop.f32.mrf.mxu1 }
 0x157   : > { %3049 = vmatprep.mubr.bf16.mxu1 %v17116_v50  ;;  %v12998_v16 = vadd.f32 %v12997_v59, %v12996_v49 }
 0x158   : > { %v12999_v50 = vpop.f32.mrf.mxu0  ;;  %v13118_v21 = vpop.f32.mrf.mxu1 }
 0x159   : > { %v2497_v14 = vadd.f32 %v12998_v16, %v17191_v41  ;;  %2889 = vmatmul.mubr.bf16.gmra.mxu0 %v17108_v62  ;;  %v13119_v16 = vadd.f32 %v13118_v21, %v13117_v12 }
 0x15a   : > { %v13000_v0 = vpop.f32.mrf.mxu0  ;;  %2896 = vmatprep.mubr.bf16.mxu0 %v17119_v33 }
 0x15b   : > { %v17254_v52 = vadd.f32 %v13110_v27, %v2497_v14  ;;  %v13001_v47 = vadd.f32 %v13000_v0, %v12999_v50  ;;  %v13120_v63 = vpop.f32.mrf.mxu1  ;;  %v1556_v27 = vsel %vm22256_vm5, %v17178_v1, %v22279_v18 }
 0x15c   : > { %v13002_v31 = vpop.f32.mrf.mxu0 }
 0x15d   : > { %v2500_v43 = vadd.f32 %v13001_v47, %v17191_v41  ;;  %v13121_v26 = vpop.f32.mrf.mxu1 }
 0x15e   : > { %3050 = vmatmul.mubr.bf16.gmra.mxu1 %v17084_v11  ;;  %v13003_v5 = vpop.f32.mrf.mxu0  ;;  %v22276_v11 = vld [vmem:[#allocation9_spill] sm:$0xff]  ;;  %v13122_v14 = vadd.f32 %v13121_v26, %v13120_v63 }
 0x15f   : > { %3057 = vmatprep.mubr.bf16.mxu1 %v1921_v35  ;;  %v17259_v3 = vadd.f32 %v13113_v34, %v2500_v43  ;;  %v13004_v19 = vadd.f32 %v13003_v5, %v13002_v31  ;;  %v1913_v42 = vsel %vm22278_vm11, %v22277_v25, %v22276_v11  ;;  %v13123_v60 = vpop.f32.mrf.mxu1  ;;  %vm22295_vm11 = vmmov %vm22294_vm15 }
 0x160   : > { %v13005_v9 = vpop.f32.mrf.mxu0  ;;  %vm22296_vm5 = vmmov %vm22295_vm11 }
 0x161   : > { %v2505_v49 = vadd.f32 %v13004_v19, %v17191_v41  ;;  %2897 = vmatmul.mubr.bf16.gmra.mxu0 %v17122_v58  ;;  %v13124_v15 = vpop.f32.mrf.mxu1  ;;  %vm22328_vm4 = vmmov %vm22296_vm5 }
 0x162   : > { %v13006_v62 = vpop.f32.mrf.mxu0  ;;  %14662 = vmatprep.mubr.bf16.mxu0 %v1556_v27  ;;  %v13125_v58 = vadd.f32 %v13124_v15, %v13123_v60 }
 0x163   : > { %v17268_v59 = vadd.f32 %v13116_v55, %v2505_v49  ;;  %v13007_v46 = vadd.f32 %v13006_v62, %v13005_v9  ;;  %v13126_v55 = vpop.f32.mrf.mxu1 }
 0x164   : > { %v13008_v50 = vpop.f32.mrf.mxu0 }
 0x165   : > { %v2508_v35 = vadd.f32 %v13007_v46, %v17191_v41  ;;  %v13127_v25 = vpop.f32.mrf.mxu1 }
 0x166   : > { %3058 = vmatmul.mubr.bf16.gmra.mxu1 %v1913_v42  ;;  %v13009_v0 = vpop.f32.mrf.mxu0  ;;  %v13128_v9 = vadd.f32 %v13127_v25, %v13126_v55 }
 0x167   : > { %v17272_v47 = vadd.f32 %v13119_v16, %v2508_v35  ;;  %v13010_v34 = vadd.f32 %v13009_v0, %v13008_v50  ;;  %v13129_v49 = vpop.f32.mrf.mxu1 }
 0x168   : > { %v13011_v31 = vpop.f32.mrf.mxu0 }
 0x169   : > { %v2513_v1 = vadd.f32 %v13010_v34, %v17191_v41  ;;  %14663 = vmatmul.mubr.bf16.vlgmr.msra.gmra.mxu0 %v16529_v45  ;;  %v13130_v27 = vpop.f32.mrf.mxu1 }
 0x16a   : > { %v13012_v43 = vpop.f32.mrf.mxu0  ;;  %14666 = vmatprep.mubr.bf16.mxu0 %v16601_v20  ;;  %v13131_v35 = vadd.f32 %v13130_v27, %v13129_v49 }
 0x16b   : > { %v17275_v5 = vadd.f32 %v13122_v14, %v2513_v1  ;;  %v13013_v12 = vadd.f32 %v13012_v43, %v13011_v31 }
 0x16c   : > { %v13014_v19 = vpop.f32.mrf.mxu0 }
 0x16d   : > { %v2516_v42 = vadd.f32 %v13013_v12, %v17191_v41  ;;  %v13132_v50 = vpop.f32.mrf.mxu1 }
 0x16e   : > { %v13015_v21 = vpop.f32.mrf.mxu0 }
 0x16f   : > { %v17280_v62 = vadd.f32 %v13125_v58, %v2516_v42  ;;  %v13016_v63 = vadd.f32 %v13015_v21, %v13014_v19  ;;  %v13133_v0 = vpop.f32.mrf.mxu1 }
 0x170   : > { %v13017_v18 = vpop.f32.mrf.mxu0  ;;  %v13134_v60 = vadd.f32 %v13133_v0, %v13132_v50 }
 0x171   : > { %v2521_v46 = vadd.f32 %v13016_v63, %v17191_v41  ;;  %14667 = vmatmul.mubr.bf16.gmra.mxu0 %v16654_v29  ;;  %v13135_v31 = vpop.f32.mrf.mxu1 }
 0x172   : > { %v13018_v16 = vpop.f32.mrf.mxu0  ;;  %14670 = vmatprep.mubr.bf16.mxu0 %v16702_v48 }
 0x173   : > { %v17283_v26 = vadd.f32 %v13128_v9, %v2521_v46  ;;  %v13019_v45 = vadd.f32 %v13018_v16, %v13017_v18  ;;  %v13136_v55 = vpop.f32.mrf.mxu1 }
 0x174   : > { %v13020_v14 = vpop.f32.mrf.mxu0  ;;  %v13137_v42 = vadd.f32 %v13136_v55, %v13135_v31 }
 0x175   : > { %v2524_v20 = vadd.f32 %v13019_v45, %v17191_v41 }
 0x176   : > { %v13021_v34 = vpop.f32.mrf.mxu0 }
 0x177   : > { %v17288_v15 = vadd.f32 %v13131_v35, %v2524_v20  ;;  %v13022_v1 = vadd.f32 %v13021_v34, %v13020_v14 }
 0x178   : > { %v13023_v43 = vpop.f32.mrf.mxu0  ;;  %v13138_v19 = vpop.f32.mrf.mxu1 }
 0x179   : > { %v2529_v12 = vadd.f32 %v13022_v1, %v17191_v41  ;;  %14671 = vmatmul.mubr.bf16.gmra.mxu0 %v16774_v23 }
 0x17a   : > { %v13024_v58 = vpop.f32.mrf.mxu0  ;;  %v13139_v21 = vpop.f32.mrf.mxu1  ;;  %14674 = vmatprep.mubr.bf16.mxu0 %v22262_v57 }
 0x17b   : > { %v17291_v25 = vadd.f32 %v13134_v60, %v2529_v12  ;;  %v13025_v29 = vadd.f32 %v13024_v58, %v13023_v43  ;;  %v13140_v49 = vadd.f32 %v13139_v21, %v13138_v19 }
 0x17c   : > { %v13026_v9 = vpop.f32.mrf.mxu0  ;;  %v13141_v18 = vpop.f32.mrf.mxu1 }
 0x17d   : > { %v2532_v48 = vadd.f32 %v13025_v29, %v17191_v41 }
 0x17e   : > { %v13027_v63 = vpop.f32.mrf.mxu0  ;;  %v13142_v50 = vpop.f32.mrf.mxu1 }
 0x17f   : > { %v17296_v27 = vadd.f32 %v13137_v42, %v2532_v48  ;;  %v13028_v46 = vadd.f32 %v13027_v63, %v13026_v9  ;;  %v13143_v20 = vadd.f32 %v13142_v50, %v13141_v18 }
 0x180   : > { %v13029_v16 = vpop.f32.mrf.mxu0  ;;  %v13144_v14 = vpop.f32.mrf.mxu1 }
 0x181   : > { %v2537_v45 = vadd.f32 %v13028_v46, %v17191_v41  ;;  %14675 = vmatmul.mubr.bf16.gmra.mxu0 %v22265_v28 }
 0x182   : > { %v13030_v35 = vpop.f32.mrf.mxu0  ;;  %v13145_v34 = vpop.f32.mrf.mxu1  ;;  %14678 = vmatprep.mubr.bf16.mxu0 %v22268_v56  ;;  %v17313_v56 = vld [vmem:[%s22267_s22] ss:$0 sm:$0xff] }
 0x183   : > { %v17299_v0 = vadd.f32 %v13140_v49, %v2537_v45  ;;  %v13031_v23 = vadd.f32 %v13030_v35, %v13029_v16  ;;  %v13146_v31 = vadd.f32 %v13145_v34, %v13144_v14 }
 0x184   : > { %v13032_v60 = vpop.f32.mrf.mxu0  ;;  %v13147_v43 = vpop.f32.mrf.mxu1 }
 0x185   : > { %v2540_v57 = vadd.f32 %v13031_v23, %v17191_v41 }
 0x186   : > { %v13033_v1 = vpop.f32.mrf.mxu0  ;;  %v13148_v19 = vpop.f32.mrf.mxu1 }
 0x187   : > { %v17304_v55 = vadd.f32 %v13143_v20, %v2540_v57  ;;  %v13034_v12 = vadd.f32 %v13033_v1, %v13032_v60  ;;  %v13149_v48 = vadd.f32 %v13148_v19, %v13147_v43 }
 0x188   : > { %v13035_v58 = vpop.f32.mrf.mxu0 }
 0x189   : > { %v2545_v29 = vadd.f32 %v13034_v12, %v17191_v41  ;;  %14679 = vmatmul.mubr.bf16.gmra.mxu0 %v22270_v38 }
 0x18a   : > { %v13036_v42 = vpop.f32.mrf.mxu0  ;;  %14682 = vmatprep.mubr.bf16.mxu0 %v22272_v36 }
 0x18b   : > { %v13150_v9 = vpop.f32.mrf.mxu1  ;;  %v17307_v21 = vadd.f32 %v13146_v31, %v2545_v29  ;;  %v13037_v28 = vadd.f32 %v13036_v42, %v13035_v58 }
 0x18c   : > { %v13038_v49 = vpop.f32.mrf.mxu0 }
 0x18d   : > { %v13151_v63 = vpop.f32.mrf.mxu1  ;;  %v2548_v18 = vadd.f32 %v17313_v56, %v13037_v28 }
 0x18e   : > { %v13152_v46 = vadd.f32 %v13151_v63, %v13150_v9  ;;  %v13039_v41 = vpop.f32.mrf.mxu0 }
 0x18f   : > { %v13153_v16 = vpop.f32.mrf.mxu1  ;;  %v17317_v50 = vadd.f32 %v13149_v48, %v2548_v18  ;;  %v13040_v45 = vadd.f32 %v13039_v41, %v13038_v49 }
 0x190   : > { %v13041_v35 = vpop.f32.mrf.mxu0 }
 0x191   : > { %v13154_v14 = vpop.f32.mrf.mxu1  ;;  %v2553_v38 = vadd.f32 %v17313_v56, %v13040_v45  ;;  %14683 = vmatmul.mubr.bf16.gmra.mxu0 %v17052_v32  ;;  %v22280_v45 = vld [vmem:[#allocation19_spill] sm:$0xff] }
 0x192   : > { %v13042_v23 = vpop.f32.mrf.mxu0  ;;  %v13155_v57 = vadd.f32 %v13154_v14, %v13153_v16  ;;  %14686 = vmatprep.mubr.bf16.mxu0 %v17079_v24 }
 0x193   : > { %v17320_v60 = vadd.f32 %v13152_v46, %v2553_v38  ;;  %v13043_v34 = vadd.f32 %v13042_v23, %v13041_v35  ;;  %v17336_v35 = vor.u32 %v21953_v6, %v22280_v45 }
 0x194   : > { %v13044_v31 = vpop.f32.mrf.mxu0 }
 0x195   : > { %v2556_v36 = vadd.f32 %v17313_v56, %v13043_v34  ;;  %22281 = vst [vmem:[#allocation43_spill] sm:$0xff] %v17336_v35 }
 0x196   : > { %v13156_v20 = vpop.f32.mrf.mxu1  ;;  %v13045_v12 = vpop.f32.mrf.mxu0 }
 0x197   : > { %v17325_v19 = vadd.f32 %v13155_v57, %v2556_v36  ;;  %v13046_v29 = vadd.f32 %v13045_v12, %v13044_v31  ;;  %v1929_v31 = vsel %vm22282_vm6, %v17102_v61, %v17336_v35  ;;  %vm22297_vm6 = vmmov %vm22296_vm5 }
 0x198   : > { %v13157_v1 = vpop.f32.mrf.mxu1  ;;  %v13047_v42 = vpop.f32.mrf.mxu0 }
 0x199   : > { %v13158_v43 = vadd.f32 %v13157_v1, %v13156_v20  ;;  %v2561_v28 = vadd.f32 %v17313_v56, %v13046_v29  ;;  %14687 = vmatmul.mubr.bf16.gmra.mxu0 %v17100_v4 }
 0x19a   : > { %v13159_v58 = vpop.f32.mrf.mxu1  ;;  %v13048_v48 = vpop.f32.mrf.mxu0  ;;  %14690 = vmatprep.mubr.bf16.mxu0 %v17119_v33 }
 0x19b   : > { %v17328_v63 = vadd.f32 %v13158_v43, %v2561_v28  ;;  %v13049_v32 = vadd.f32 %v13048_v48, %v13047_v42 }
 0x19c   : > { %v13160_v9 = vpop.f32.mrf.mxu1  ;;  %v13050_v46 = vpop.f32.mrf.mxu0 }
 0x19d   : > { %v13161_v18 = vadd.f32 %v13160_v9, %v13159_v58  ;;  %v2564_v24 = vadd.f32 %v17313_v56, %v13049_v32 }
 0x19e   : > { %v13162_v49 = vpop.f32.mrf.mxu1  ;;  %v13051_v14 = vpop.f32.mrf.mxu0 }
 0x19f   : > { %v17338_v23 = vadd.f32 %v13161_v18, %v2564_v24  ;;  %v13052_v20 = vadd.f32 %v13051_v14, %v13050_v46 }
 0x1a0   : > { %v13163_v41 = vpop.f32.mrf.mxu1  ;;  %v13053_v34 = vpop.f32.mrf.mxu0 }
 0x1a1   : > { %v13164_v16 = vadd.f32 %v13163_v41, %v13162_v49  ;;  %v2569_v4 = vadd.f32 %v17313_v56, %v13052_v20  ;;  %14691 = vmatmul.mubr.bf16.gmra.mxu0 %v1929_v31 }
 0x1a2   : > { %v13165_v38 = vpop.f32.mrf.mxu1  ;;  %v13054_v1 = vpop.f32.mrf.mxu0 }
 0x1a3   : > { %v17344_v36 = vadd.f32 %v13164_v16, %v2569_v4  ;;  %v13055_v43 = vadd.f32 %v13054_v1, %v13053_v34 }
 0x1a4   : > { %v13166_v57 = vpop.f32.mrf.mxu1  ;;  %v13056_v58 = vpop.f32.mrf.mxu0 }
 0x1a5   : > { %v13167_v12 = vadd.f32 %v13166_v57, %v13165_v38  ;;  %v2572_v42 = vadd.f32 %v17313_v56, %v13055_v43 }
 0x1a6   : > { %v13168_v33 = vpop.f32.mrf.mxu1  ;;  %v13057_v28 = vpop.f32.mrf.mxu0 }
 0x1a7   : > { %v17347_v49 = vadd.f32 %v13167_v12, %v2572_v42  ;;  %v13058_v32 = vadd.f32 %v13057_v28, %v13056_v58 }
 0x1a8   : > { %v13169_v29 = vpop.f32.mrf.mxu1  ;;  %v13059_v18 = vpop.f32.mrf.mxu0 }
 0x1a9   : > { %v13170_v9 = vadd.f32 %v13169_v29, %v13168_v33  ;;  %v2577_v61 = vadd.f32 %v17313_v56, %v13058_v32 }
 0x1aa   : > { %v13171_v48 = vpop.f32.mrf.mxu1  ;;  %v13060_v41 = vpop.f32.mrf.mxu0 }
 0x1ab   : > { %v17350_v16 = vadd.f32 %v13170_v9, %v2577_v61  ;;  %v13061_v14 = vadd.f32 %v13060_v41, %v13059_v18 }
 0x1ac   : > { %v13172_v46 = vpop.f32.mrf.mxu1  ;;  %v13190_v20 = vpop.f32.mrf.mxu0 }
 0x1ad   : > { %22283 = vst [vmem:[#allocation41_spill] sm:$0xff] %v17350_v16  ;;  %v13173_v38 = vadd.f32 %v13172_v46, %v13171_v48  ;;  %v2580_v57 = vadd.f32 %v17313_v56, %v13061_v14 }
 0x1ae   : > { %v13302_v24 = vpop.f32.mrf.mxu1  ;;  %v13191_v31 = vpop.f32.mrf.mxu0 }
 0x1af   : > { %v17353_v33 = vadd.f32 %v13173_v38, %v2580_v57  ;;  %v13192_v43 = vadd.f32 %v13191_v31, %v13190_v20 }
 0x1b0   : > { %v13303_v34 = vpop.f32.mrf.mxu1  ;;  %v13193_v12 = vpop.f32.mrf.mxu0 }
 0x1b1   : > { %v13304_v4 = vadd.f32 %v13303_v34, %v13302_v24  ;;  %22284 = vst [vmem:[#allocation46_spill] sm:$0xff] %v17353_v33  ;;  %v2779_v29 = vadd.f32 %v13192_v43, %v17196_v22 }
 0x1b2   : > { %v13305_v1 = vpop.f32.mrf.mxu1  ;;  %v13194_v42 = vpop.f32.mrf.mxu0 }
 0x1b3   : > { %v13195_v9 = vadd.f32 %v13194_v42, %v13193_v12  ;;  %v17356_v18 = vadd.f32 %v13304_v4, %v2779_v29 }
 0x1b4   : > { %v13306_v58 = vpop.f32.mrf.mxu1  ;;  %v13196_v48 = vpop.f32.mrf.mxu0 }
 0x1b5   : > { %v13307_v32 = vadd.f32 %v13306_v58, %v13305_v1  ;;  %v2782_v56 = vadd.f32 %v13195_v9, %v17202_v44 }
 0x1b6   : > { %v13308_v28 = vpop.f32.mrf.mxu1  ;;  %v13197_v41 = vpop.f32.mrf.mxu0 }
 0x1b7   : > { %v13198_v14 = vadd.f32 %v13197_v41, %v13196_v48  ;;  %v17359_v38 = vadd.f32 %v13307_v32, %v2782_v56 }
 0x1b8   : > { %v13309_v46 = vpop.f32.mrf.mxu1  ;;  %v13199_v20 = vpop.f32.mrf.mxu0 }
 0x1b9   : > { %v13310_v61 = vadd.f32 %v13309_v46, %v13308_v28  ;;  %v2787_v22 = vadd.f32 %v13198_v14, %v17206_v54 }
 0x1ba   : > { %v13311_v24 = vpop.f32.mrf.mxu1  ;;  %v13200_v57 = vpop.f32.mrf.mxu0 }
 0x1bb   : > { %v13201_v43 = vadd.f32 %v13200_v57, %v13199_v20  ;;  %v17362_v4 = vadd.f32 %v13310_v61, %v2787_v22 }
 0x1bc   : > { %v13312_v34 = vpop.f32.mrf.mxu1  ;;  %v13202_v12 = vpop.f32.mrf.mxu0 }
 0x1bd   : > { %v13313_v1 = vadd.f32 %v13312_v34, %v13311_v24  ;;  %v2790_v44 = vadd.f32 %v13201_v43, %v17212_v13 }
 0x1be   : > { %v13314_v31 = vpop.f32.mrf.mxu1  ;;  %v13203_v42 = vpop.f32.mrf.mxu0 }
 0x1bf   : > { %v13204_v9 = vadd.f32 %v13203_v42, %v13202_v12  ;;  %v17365_v32 = vadd.f32 %v13313_v1, %v2790_v44 }
 0x1c0   : > { %v13315_v58 = vpop.f32.mrf.mxu1  ;;  %v13205_v48 = vpop.f32.mrf.mxu0 }
 0x1c1   : > { %v13316_v29 = vadd.f32 %v13315_v58, %v13314_v31  ;;  %v2795_v54 = vadd.f32 %v13204_v9, %v17216_v37 }
 0x1c2   : > { %v13317_v28 = vpop.f32.mrf.mxu1  ;;  %v13206_v56 = vpop.f32.mrf.mxu0 }
 0x1c3   : > { %v13207_v14 = vadd.f32 %v13206_v56, %v13205_v48  ;;  %v17368_v61 = vadd.f32 %v13316_v29, %v2795_v54 }
 0x1c4   : > { %v13318_v46 = vpop.f32.mrf.mxu1  ;;  %v13208_v20 = vpop.f32.mrf.mxu0 }
 0x1c5   : > { %v13319_v24 = vadd.f32 %v13318_v46, %v13317_v28  ;;  %v2798_v13 = vadd.f32 %v13207_v14, %v17222_v40 }
 0x1c6   : > { %v13320_v41 = vpop.f32.mrf.mxu1  ;;  %v13209_v57 = vpop.f32.mrf.mxu0 }
 0x1c7   : > { %v13210_v43 = vadd.f32 %v13209_v57, %v13208_v20  ;;  %v17371_v1 = vadd.f32 %v13319_v24, %v2798_v13 }
 0x1c8   : > { %v13321_v34 = vpop.f32.mrf.mxu1  ;;  %v13211_v12 = vpop.f32.mrf.mxu0 }
 0x1c9   : > { %v13322_v22 = vadd.f32 %v13321_v34, %v13320_v41  ;;  %v2803_v37 = vadd.f32 %v13210_v43, %v17226_v51 }
 0x1ca   : > { %v13323_v31 = vpop.f32.mrf.mxu1  ;;  %v13212_v44 = vpop.f32.mrf.mxu0 }
 0x1cb   : > { %v13213_v9 = vadd.f32 %v13212_v44, %v13211_v12  ;;  %v17374_v29 = vadd.f32 %v13322_v22, %v2803_v37 }
 0x1cc   : > { %v13324_v58 = vpop.f32.mrf.mxu1  ;;  %v13214_v48 = vpop.f32.mrf.mxu0 }
 0x1cd   : > { %v13325_v28 = vadd.f32 %v13324_v58, %v13323_v31  ;;  %v2806_v40 = vadd.f32 %v13213_v9, %v17232_v10 }
 0x1ce   : > { %v13326_v42 = vpop.f32.mrf.mxu1  ;;  %v13215_v56 = vpop.f32.mrf.mxu0 }
 0x1cf   : > { %v13216_v14 = vadd.f32 %v13215_v56, %v13214_v48  ;;  %v17377_v24 = vadd.f32 %v13325_v28, %v2806_v40 }
 0x1d0   : > { %v13327_v46 = vpop.f32.mrf.mxu1  ;;  %v13217_v20 = vpop.f32.mrf.mxu0 }
 0x1d1   : > { %v13328_v54 = vadd.f32 %v13327_v46, %v13326_v42  ;;  %v2811_v51 = vadd.f32 %v13216_v14, %v17236_v53 }
 0x1d2   : > { %v13329_v41 = vpop.f32.mrf.mxu1  ;;  %v13218_v13 = vpop.f32.mrf.mxu0 }
 0x1d3   : > { %v13219_v43 = vadd.f32 %v13218_v13, %v13217_v20  ;;  %v17380_v22 = vadd.f32 %v13328_v54, %v2811_v51 }
 0x1d4   : > { %v13330_v34 = vpop.f32.mrf.mxu1  ;;  %v13220_v12 = vpop.f32.mrf.mxu0 }
 0x1d5   : > { %v13331_v31 = vadd.f32 %v13330_v34, %v13329_v41  ;;  %v2814_v10 = vadd.f32 %v13219_v43, %v17247_v7 }
 0x1d6   : > { %v13332_v57 = vpop.f32.mrf.mxu1  ;;  %v13221_v44 = vpop.f32.mrf.mxu0 }
 0x1d7   : > { %v13222_v9 = vadd.f32 %v13221_v44, %v13220_v12  ;;  %v17383_v28 = vadd.f32 %v13331_v31, %v2814_v10 }
 0x1d8   : > { %v13333_v58 = vpop.f32.mrf.mxu1  ;;  %v13223_v48 = vpop.f32.mrf.mxu0 }
 0x1d9   : > { %v13334_v37 = vadd.f32 %v13333_v58, %v13332_v57  ;;  %v2819_v53 = vadd.f32 %v13222_v9, %v17254_v52 }
 0x1da   : > { %v13335_v42 = vpop.f32.mrf.mxu1  ;;  %v13224_v40 = vpop.f32.mrf.mxu0 }
 0x1db   : > { %v13225_v14 = vadd.f32 %v13224_v40, %v13223_v48  ;;  %v17386_v54 = vadd.f32 %v13334_v37, %v2819_v53 }
 0x1dc   : > { %v13336_v46 = vpop.f32.mrf.mxu1  ;;  %v13226_v20 = vpop.f32.mrf.mxu0 }
 0x1dd   : > { %v13337_v41 = vadd.f32 %v13336_v46, %v13335_v42  ;;  %v2822_v7 = vadd.f32 %v13225_v14, %v17259_v3 }
 0x1de   : > { %v13338_v56 = vpop.f32.mrf.mxu1  ;;  %v13227_v13 = vpop.f32.mrf.mxu0 }
 0x1df   : > { %v13228_v43 = vadd.f32 %v13227_v13, %v13226_v20  ;;  %v17389_v31 = vadd.f32 %v13337_v41, %v2822_v7 }
 0x1e0   : > { %v13339_v34 = vpop.f32.mrf.mxu1  ;;  %v13229_v12 = vpop.f32.mrf.mxu0 }
 0x1e1   : > { %v13340_v51 = vadd.f32 %v13339_v34, %v13338_v56  ;;  %v2827_v52 = vadd.f32 %v13228_v43, %v17268_v59 }
 0x1e2   : > { %v13341_v57 = vpop.f32.mrf.mxu1  ;;  %v13230_v10 = vpop.f32.mrf.mxu0 }
 0x1e3   : > { %v13231_v9 = vadd.f32 %v13230_v10, %v13229_v12  ;;  %v17392_v37 = vadd.f32 %v13340_v51, %v2827_v52 }
 0x1e4   : > { %v13342_v58 = vpop.f32.mrf.mxu1  ;;  %v13232_v48 = vpop.f32.mrf.mxu0 }
 0x1e5   : > { %v13343_v42 = vadd.f32 %v13342_v58, %v13341_v57  ;;  %v2830_v3 = vadd.f32 %v13231_v9, %v17272_v47 }
 0x1e6   : > { %v13344_v44 = vpop.f32.mrf.mxu1  ;;  %v13233_v40 = vpop.f32.mrf.mxu0 }
 0x1e7   : > { %v13234_v14 = vadd.f32 %v13233_v40, %v13232_v48  ;;  %v17395_v41 = vadd.f32 %v13343_v42, %v2830_v3 }
 0x1e8   : > { %v13345_v46 = vpop.f32.mrf.mxu1  ;;  %v13235_v20 = vpop.f32.mrf.mxu0 }
 0x1e9   : > { %v13346_v53 = vadd.f32 %v13345_v46, %v13344_v44  ;;  %v2835_v59 = vadd.f32 %v13234_v14, %v17275_v5 }
 0x1ea   : > { %v13347_v56 = vpop.f32.mrf.mxu1  ;;  %v13236_v7 = vpop.f32.mrf.mxu0 }
 0x1eb   : > { %v13237_v57 = vadd.f32 %v13236_v7, %v13235_v20  ;;  %v17400_v43 = vadd.f32 %v13346_v53, %v2835_v59 }
 0x1ec   : > { %v13348_v34 = vpop.f32.mrf.mxu1  ;;  %v13238_v12 = vpop.f32.mrf.mxu0 }
 0x1ed   : > { %v13349_v51 = vadd.f32 %v13348_v34, %v13347_v56  ;;  %v2838_v47 = vadd.f32 %v13237_v57, %v17280_v62 }
 0x1ee   : > { %v17398_v13 = vpop.f32.mrf.mxu1  ;;  %v13239_v52 = vpop.f32.mrf.mxu0 }
 0x1ef   : > { %v13240_v44 = vadd.f32 %v13239_v52, %v13238_v12  ;;  %v17407_v9 = vadd.f32 %v13349_v51, %v2838_v47 }
 0x1f0   : > { %v17402_v58 = vpop.f32.mrf.mxu1  ;;  %v13241_v42 = vpop.f32.mrf.mxu0 }
 0x1f1   : > { %v17412_v48 = vadd.f32 %v13240_v44, %v17283_v26 }
 0x1f2   : > { %v17405_v10 = vpop.f32.mrf.mxu1  ;;  %v13242_v46 = vpop.f32.mrf.mxu0 }
 0x1f3   : > { %v13243_v53 = vadd.f32 %v13242_v46, %v13241_v42 }
 0x1f4   : > { %v17409_v5 = vpop.f32.mrf.mxu1  ;;  %v13244_v40 = vpop.f32.mrf.mxu0 }
 0x1f5   : > { %v17419_v62 = vadd.f32 %v13243_v53, %v17288_v15 }
 0x1f6   : > { %v17414_v3 = vpop.f32.mrf.mxu1  ;;  %v13245_v14 = vpop.f32.mrf.mxu0 }
 0x1f7   : > { %v13246_v34 = vadd.f32 %v13245_v14, %v13244_v40 }
 0x1f8   : > { %v17416_v56 = vpop.f32.mrf.mxu1  ;;  %v13247_v59 = vpop.f32.mrf.mxu0 }
 0x1f9   : > { %v17422_v57 = vadd.f32 %v13246_v34, %v17291_v25 }
 0x1fa   : > { %v13359_v20 = vpop.f32.mrf.mxu1  ;;  %v13248_v26 = vpop.f32.mrf.mxu0 }
 0x1fb   : > { %v13249_v12 = vadd.f32 %v13248_v26, %v13247_v59 }
 0x1fc   : > { %v13360_v7 = vpop.f32.mrf.mxu1  ;;  %v13250_v52 = vpop.f32.mrf.mxu0 }
 0x1fd   : > { %v13361_v47 = vadd.f32 %v13360_v7, %v13359_v20  ;;  %v2854_v42 = vadd.f32 %v13249_v12, %v17296_v27 }
 0x1fe   : > { %v13362_v51 = vpop.f32.mrf.mxu1  ;;  %v13251_v46 = vpop.f32.mrf.mxu0 }
 0x1ff   : > { %v13252_v6 = vadd.f32 %v13251_v46, %v13250_v52  ;;  %v17425_v53 = vadd.f32 %v13361_v47, %v2854_v42 }
 0x200   : > { %v13363_v44 = vpop.f32.mrf.mxu1  ;;  %v13253_v39 = vpop.f32.mrf.mxu0 }
 0x201   : > { %v13364_v15 = vadd.f32 %v13363_v44, %v13362_v51  ;;  %v2859_v40 = vadd.f32 %v13252_v6, %v17299_v0 }
 0x202   : > { %v13254_v14 = vpop.f32.mrf.mxu0  ;;  %v17433_v27 = vpop.f32.mrf.mxu1 }
 0x203   : > { %v13255_v35 = vadd.f32 %v13254_v14, %v13253_v39  ;;  %v17428_v25 = vadd.f32 %v13364_v15, %v2859_v40  ;;  %v15374_v40 = vld [vmem:[%s21840_s13 + $0x4] ss:$8 sps:$4 sm:$0xff]  }
 0x204   : > { %v13256_v34 = vpop.f32.mrf.mxu0  ;;  %v17438_v6 = vpop.f32.mrf.mxu1  ;;  %3548 = vmatprep.mubr.bf16.mxu1 %v15374_v40 }
 0x205   : > { %22285 = vst [vmem:[#allocation47_spill] sm:$0xff] %v17428_v25  ;;  %v17431_v59 = vadd.f32 %v13255_v35, %v17304_v55 }
 0x206   : > { %v13257_v20 = vpop.f32.mrf.mxu0  ;;  %v17443_v35 = vpop.f32.mrf.mxu1 }
 0x207   : > { %v13258_v7 = vadd.f32 %v13257_v20, %v13256_v34 }
 0x208   : > { %v13259_v26 = vpop.f32.mrf.mxu0  ;;  %v17451_v14 = vpop.f32.mrf.mxu1 }
 0x209   : > { %v17436_v51 = vadd.f32 %v13258_v7, %v17307_v21 }
 0x20a   : > { %v13260_v12 = vpop.f32.mrf.mxu0 }
 0x20b   : > { %v13261_v47 = vadd.f32 %v13260_v12, %v13259_v26  ;;  %v17456_v26 = vpop.f32.mrf.mxu1 }
 0x20c   : > { %v13262_v52 = vpop.f32.mrf.mxu0 }
 0x20d   : > { %v17441_v39 = vadd.f32 %v13261_v47, %v17317_v50 }
 0x20e   : > { %v13263_v0 = vpop.f32.mrf.mxu0 }
 0x20f   : > { %v13264_v44 = vadd.f32 %v13263_v0, %v13262_v52  ;;  %v17461_v0 = vpop.f32.mrf.mxu1 }
 0x210   : > { %v13265_v55 = vpop.f32.mrf.mxu0 }
 0x211   : > { %v17446_v42 = vadd.f32 %v13264_v44, %v17320_v60 }
 0x212   : > { %v13266_v46 = vpop.f32.mrf.mxu0 }
 0x213   : > { %v13267_v15 = vadd.f32 %v13266_v46, %v13265_v55 }
 0x214   : > { %v13268_v21 = vpop.f32.mrf.mxu0 }
 0x215   : > { %v17454_v50 = vadd.f32 %v13267_v15, %v17325_v19  ;;  %v17466_v15 = vpop.f32.mrf.mxu1 }
 0x216   : > { %v13269_v34 = vpop.f32.mrf.mxu0 }
 0x217   : > { %v13270_v20 = vadd.f32 %v13269_v34, %v13268_v21 }
 0x218   : > { %v13271_v7 = vpop.f32.mrf.mxu0 }
 0x219   : > { %v17459_v60 = vadd.f32 %v13270_v20, %v17328_v63  ;;  %v17473_v20 = vpop.f32.mrf.mxu1 }
 0x21a   : > { %v13272_v12 = vpop.f32.mrf.mxu0 }
 0x21b   : > { %v13273_v47 = vadd.f32 %v13272_v12, %v13271_v7 }
 0x21c   : > { %v13274_v52 = vpop.f32.mrf.mxu0 }
 0x21d   : > { %v17464_v44 = vadd.f32 %v13273_v47, %v17338_v23  ;;  %v17482_v47 = vpop.f32.mrf.mxu1 }
 0x21e   : > { %v13275_v55 = vpop.f32.mrf.mxu0 }
 0x21f   : > { %22286 = vst [vmem:[#allocation50_spill] sm:$0xff] %v17464_v44  ;;  %v13276_v19 = vadd.f32 %v13275_v55, %v13274_v52 }
 0x220   : > { %v13277_v46 = vpop.f32.mrf.mxu0 }
 0x221   : > { %v17469_v21 = vadd.f32 %v13276_v19, %v17344_v36  ;;  %v17486_v36 = vpop.f32.mrf.mxu1 }
 0x222   : > { %v13278_v40 = vpop.f32.mrf.mxu0 }
 0x223   : > { %22287 = vst [vmem:[#allocation51_spill] sm:$0xff] %v17469_v21  ;;  %v13279_v34 = vadd.f32 %v13278_v40, %v13277_v46  ;;  %v17493_v17 = vpop.f32.mrf.mxu1 }
 0x224   : > { %v17471_v63 = vpop.f32.mrf.mxu0 }
 0x225   : > { %22288 = vst [vmem:[#allocation55_spill] sm:$0xff] %v17471_v63  ;;  %v17476_v7 = vadd.f32 %v13279_v34, %v17347_v49  ;;  %v15384_v49 = vld [vmem:[%s22293_s26 + $0xf8] sm:$0xff]  }
 0x226   : > { %v17478_v12 = vpop.f32.mrf.mxu0  ;;  %13502 = vmatprep.subr.bf16.mxu0 %v15384_v49 }
 0x227   : > { %22289 = vst [vmem:[#allocation54_spill] sm:$0xff] %v17476_v7  ;;  %22290 = vst [vmem:[#allocation58_spill] sm:$0xff] %v17478_v12 }
 0x228   : > { %v17480_v23 = vpop.f32.mrf.mxu0 }
 0x229   : > { %22291 = vst [vmem:[#allocation59_spill] sm:$0xff] %v17480_v23 }
 0x22a   : > { %v17484_v52 = vpop.f32.mrf.mxu0 }
 0x22b   : > { %22292 = vst [vmem:[#allocation64_spill] sm:$0xff] %v17484_v52 }
 0x22c   : > { %v14664_v55 = vpop.f32.mrf.mxu0 }
 0x22d   : > { %v3109_v19 = vadd.f32 %v14664_v55, %v17362_v4  ;;  %v17497_v55 = vpop.f32.mrf.mxu1 }
 0x22e   : > { %v3100_v46 = vpop.f32.mrf.mxu0 }
 0x22f   : > { %v3101_v40 = vadd.f32 %v3100_v46, %v17356_v18  ;;  %v3229_v30 = vmax.f32 %v3109_v19, 0.0 }
 0x230   : > { %v14665_v34 = vpop.f32.mrf.mxu0 }
 0x231   : > { %v3112_v45 = vadd.f32 %v14665_v34, %v17365_v32  ;;  %v3227_v2 = vmax.f32 %v3101_v40, 0.0  ;;  %v3295_v18 = vrot.slane %v3229_v30, 1  ;;  %v17504_v40 = vpop.f32.mrf.mxu1 }
 0x232   : > { %v3103_v11 = vpop.f32.mrf.mxu0 }
 0x233   : > { %v3230_v8 = vmax.f32 %v3112_v45, 0.0  ;;  %v3104_v7 = vadd.f32 %v3103_v11, %v17359_v38  ;;  %v3292_v23 = vrot.slane %v3227_v2, 1 }
 0x234   : > { %v14668_v4 = vpop.f32.mrf.mxu0 }
 0x235   : > { %v3297_v46 = vrot.slane %v3230_v8, 1  ;;  %v3228_v21 = vmax.f32 %v3104_v7, 0.0  ;;  %v3125_v33 = vadd.f32 %v14668_v4, %v17374_v29 }
 0x236   : > { %v3116_v52 = vpop.f32.mrf.mxu0 }
 0x237   : > { %v3298_v19 = vsel %vm22294_vm15, %v3295_v18, %v3297_v46  ;;  %v3293_v16 = vrot.slane %v3228_v21, 1  ;;  %v3117_v32 = vadd.f32 %v3116_v52, %v17368_v61  ;;  %v3233_v29 = vmax.f32 %v3125_v33, 0.0  ;;  %vm22298_vm15 = vmmov %vm22296_vm5 }
 0x238   : > { %v17502_v49 = vmax.f32 %v3229_v30, %v3298_v19  ;;  %v14669_v45 = vpop.f32.mrf.mxu0  ;;  %v13352_v30 = vadd.f32 %v17402_v58, %v17398_v13  ;;  %v13358_v58 = vadd.f32 %v17416_v56, %v17414_v3 }
 0x239   : > { %v3294_v11 = vsel %vm22295_vm11, %v3292_v23, %v3293_v16  ;;  %v3296_v38 = vsel %vm22296_vm5, %v3293_v16, %v3295_v18  ;;  %v3231_v34 = vmax.f32 %v3117_v32, 0.0  ;;  %v3128_v4 = vadd.f32 %v14669_v45, %v17377_v24  ;;  %v17513_v23 = vpop.f32.mrf.mxu1  ;;  %vm22299_vm11 = vmmov %vm22296_vm5 }
 0x23a   : > { %v3388_v7 = vmax.f32 %v3227_v2, %v3294_v11  ;;  %v3389_v44 = vmax.f32 %v3228_v21, %v3296_v38  ;;  %v3119_v25 = vpop.f32.mrf.mxu0  ;;  %v3303_v21 = vrot.slane %v3233_v29, 1 }
 0x23b   : > { %v3299_v12 = vrot.slane %v3231_v34, 1  ;;  %v3120_v63 = vadd.f32 %v3119_v25, %v17371_v1  ;;  %v3234_v61 = vmax.f32 %v3128_v4, 0.0  ;;  %v13355_v1 = vadd.f32 %v17409_v5, %v17405_v10 }
 0x23c   : > { %v14672_v52 = vpop.f32.mrf.mxu0  ;;  %v3420_v19 = vmax.f32 %v3388_v7, %v17502_v49 }
 0x23d   : > { %v3300_v16 = vsel %vm22297_vm6, %v3297_v46, %v3299_v12  ;;  %v3232_v2 = vmax.f32 %v3120_v63, 0.0  ;;  %v3141_v33 = vadd.f32 %v14672_v52, %v17386_v54  ;;  %v3305_v24 = vrot.slane %v3234_v61, 1  ;;  %v17526_v46 = vpop.f32.mrf.mxu1  ;;  %vm22300_vm6 = vmmov %vm22296_vm5 }
 0x23e   : > { %v3391_v18 = vmax.f32 %v3230_v8, %v3300_v16  ;;  %v3132_v32 = vpop.f32.mrf.mxu0  ;;  %v17524_v63 = vadd.f32 %v13352_v30, %v17412_v48  ;;  %v13367_v48 = vadd.f32 %v17438_v6, %v17433_v27  ;;  %v17545_v27 = vadd.f32 %v13355_v1, %v17419_v62 }
 0x23f   : > { %v3301_v25 = vrot.slane %v3232_v2, 1  ;;  %v3133_v13 = vadd.f32 %v3132_v32, %v17380_v22  ;;  %v3306_v45 = vsel %vm22298_vm15, %v3303_v21, %v3305_v24  ;;  %v3237_v5 = vmax.f32 %v3141_v33, 0.0  ;;  %vm22301_vm15 = vmmov %vm22296_vm5 }
 0x240   : > { %v14673_v11 = vpop.f32.mrf.mxu0  ;;  %v3421_v54 = vmax.f32 %v3389_v44, %v3391_v18  ;;  %v17528_v8 = vmax.f32 %v3233_v29, %v3306_v45  ;;  %v13370_v44 = vadd.f32 %v17451_v14, %v17443_v35  ;;  %v17552_v45 = vadd.f32 %v13367_v48, %v17431_v59 }
 0x241   : > { %v3302_v38 = vsel %vm22299_vm11, %v3299_v12, %v3301_v25  ;;  %v3304_v10 = vsel %vm22296_vm5, %v3301_v25, %v3303_v21  ;;  %v3235_v4 = vmax.f32 %v3133_v13, 0.0  ;;  %v3144_v3 = vadd.f32 %v14673_v11, %v17389_v31  ;;  %vm22302_vm11 = vmmov %vm22296_vm5 }
 0x242   : > { %v3392_v22 = vmax.f32 %v3231_v34, %v3302_v38  ;;  %v3393_v7 = vmax.f32 %v3232_v2, %v3304_v10  ;;  %v3135_v56 = vpop.f32.mrf.mxu0  ;;  %v17538_v30 = vpack.c.bf16 %v3421_v54, %v3420_v19  ;;  %v17541_v2 = vpop.f32.mrf.mxu1  ;;  %v3311_v35 = vrot.slane %v3237_v5, 1 }
 0x243   : > { %v3136_v29 = vadd.f32 %v3135_v56, %v17383_v28  ;;  %v3307_v52 = vrot.slane %v3235_v4, 1  ;;  %v3238_v16 = vmax.f32 %v3144_v3, 0.0  ;;  %v3028_v1 = vadd.f32 %v13370_v44, %v17436_v51 }
 0x244   : > { %v3423_v12 = vmax.f32 %v3391_v18, %v3393_v7  ;;  %v14676_v33 = vpop.f32.mrf.mxu0  ;;  %v3424_v34 = vmax.f32 %v3392_v22, %v17528_v8  ;;  %v3422_v6 = vmax.f32 %v17502_v49, %v3392_v22  ;;  %v3012_v18 = vadd.f32 %v13358_v58, %v17422_v57  ;;  %v17560_v11 = vpop.f32.mrf.mxu1 }
 0x245   : > { %v3236_v31 = vmax.f32 %v3136_v29, 0.0  ;;  %v3157_v21 = vadd.f32 %v14676_v33, %v17400_v43  ;;  %v3308_v28 = vsel %vm22300_vm6, %v3305_v24, %v3307_v52  ;;  %v3313_v14 = vrot.slane %v3238_v16, 1  ;;  %vm22303_vm6 = vmmov %vm22296_vm5 }
 0x246   : > { %v3148_v19 = vpop.f32.mrf.mxu0  ;;  %v3395_v25 = vmax.f32 %v3234_v61, %v3308_v28  ;;  %v13373_v43 = vadd.f32 %v17461_v0, %v17456_v26  ;;  %v17558_v24 = vpack.c.bf16 %v3423_v12, %v3422_v6  ;;  %v13376_v51 = vadd.f32 %v17473_v20, %v17466_v15  ;;  %v17573_v29 = vpop.f32.mrf.mxu1 }
 0x247   : > { %v3309_v32 = vrot.slane %v3236_v31, 1  ;;  %v3149_v13 = vadd.f32 %v3148_v19, %v17392_v37  ;;  %v3314_v62 = vsel %vm22301_vm15, %v3311_v35, %v3313_v14  ;;  %v3241_v59 = vmax.f32 %v3157_v21, 0.0  ;;  %vm22304_vm15 = vmmov %vm22296_vm5 }
 0x248   : > { %v14677_v49 = vpop.f32.mrf.mxu0  ;;  %v17562_v57 = vmax.f32 %v3237_v5, %v3314_v62  ;;  %v13379_v10 = vadd.f32 %v17486_v36, %v17482_v47  ;;  %v3425_v22 = vmax.f32 %v3393_v7, %v3395_v25  ;;  %v3031_v7 = vadd.f32 %v13373_v43, %v17441_v39  ;;  %v13392_v19 = vpop.f32.mrf.mxu1 }
 0x249   : > { %v3310_v61 = vsel %vm22302_vm11, %v3307_v52, %v3309_v32  ;;  %v3312_v37 = vsel %vm22296_vm5, %v3309_v32, %v3311_v35  ;;  %v3239_v38 = vmax.f32 %v3149_v13, 0.0  ;;  %v3160_v26 = vadd.f32 %v14677_v49, %v17407_v9  ;;  %vm22305_vm11 = vmmov %vm22296_vm5 }
 0x24a   : > { %v3396_v58 = vmax.f32 %v3235_v4, %v3310_v61  ;;  %v3397_v54 = vmax.f32 %v3236_v31, %v3312_v37  ;;  %v3151_v0 = vpop.f32.mrf.mxu0  ;;  %v17578_v15 = vpack.c.bf16 %v3425_v22, %v3424_v34  ;;  %v3319_v20 = vrot.slane %v3241_v59, 1 }
 0x24b   : > { %v3152_v5 = vadd.f32 %v3151_v0, %v17395_v41  ;;  %v3315_v56 = vrot.slane %v3239_v38, 1  ;;  %v3242_v48 = vmax.f32 %v3160_v26, 0.0  ;;  %v13382_v33 = vadd.f32 %v17497_v55, %v17493_v17 }
 0x24c   : > { %v3427_v3 = vmax.f32 %v3395_v25, %v3397_v54  ;;  %v14680_v44 = vpop.f32.mrf.mxu0  ;;  %v3428_v4 = vmax.f32 %v3396_v58, %v17562_v57  ;;  %v3426_v52 = vmax.f32 %v17528_v8, %v3396_v58  ;;  %v17587_v8 = vadd.f32 %v13376_v51, %v17446_v42 }
 0x24d   : > { %v3240_v12 = vmax.f32 %v3152_v5, 0.0  ;;  %v17575_v9 = vadd.f32 %v14680_v44, %v3012_v18  ;;  %v3316_v47 = vsel %vm22303_vm6, %v3313_v14, %v3315_v56  ;;  %v3321_v41 = vrot.slane %v3242_v48, 1  ;;  %vm22306_vm6 = vmmov %vm22296_vm5  ;;  %v22308_v5 = vld [vmem:[#allocation58_spill] sm:$0xff] }
 0x24e   : > { %v3164_v36 = vpop.f32.mrf.mxu0  ;;  %v3399_v21 = vmax.f32 %v3238_v16, %v3316_v47  ;;  %v17590_v34 = vadd.f32 %v13379_v10, %v17454_v50  ;;  %v17592_v14 = vpack.c.bf16 %v3427_v3, %v3426_v52  ;;  %v13385_v50 = vadd.f32 %v17513_v23, %v17504_v40  ;;  %v22307_v10 = vld [vmem:[#allocation55_spill] sm:$0xff] }
 0x24f   : > { %v3317_v31 = vrot.slane %v3240_v12, 1  ;;  %v3165_v6 = vadd.f32 %v3164_v36, %v17524_v63  ;;  %v3322_v35 = vsel %vm22304_vm15, %v3319_v20, %v3321_v41  ;;  %v3245_v63 = vmax.f32 %v17575_v9, 0.0  ;;  %vm22310_vm15 = vmmov %vm22296_vm5  ;;  %v22311_v9 = vld [vmem:[#allocation50_spill] sm:$0xff] }
 0x250   : > { %v14681_v28 = vpop.f32.mrf.mxu0  ;;  %v17594_v39 = vmax.f32 %v3241_v59, %v3322_v35  ;;  %v3044_v43 = vadd.f32 %v13382_v33, %v17459_v60  ;;  %v3429_v62 = vmax.f32 %v3397_v54, %v3399_v21  ;;  %v17612_v40 = vadd.f32 %v17541_v2, %v17526_v46  ;;  %v22313_v35 = vld [vmem:[#allocation41_spill] sm:$0xff] }
 0x251   : > { %v3318_v17 = vsel %vm22305_vm11, %v3315_v56, %v3317_v31  ;;  %v3320_v55 = vsel %vm22296_vm5, %v3317_v31, %v3319_v20  ;;  %v3243_v32 = vmax.f32 %v3165_v6, 0.0  ;;  %v3176_v42 = vadd.f32 %v14681_v28, %v17425_v53  ;;  %vm22312_vm11 = vmmov %vm22296_vm5 }
 0x252   : > { %v3400_v16 = vmax.f32 %v3239_v38, %v3318_v17  ;;  %v3401_v18 = vmax.f32 %v3240_v12, %v3320_v55  ;;  %v3167_v25 = vpop.f32.mrf.mxu0  ;;  %v13393_v38 = vpop.f32.mrf.mxu1  ;;  %v17608_v51 = vpack.c.bf16 %v3429_v62, %v3428_v4  ;;  %v3327_v60 = vrot.slane %v3245_v63, 1 }
 0x253   : > { %v3168_v13 = vadd.f32 %v3167_v25, %v17545_v27  ;;  %v3323_v61 = vrot.slane %v3243_v32, 1  ;;  %v3246_v37 = vmax.f32 %v3176_v42, 0.0  ;;  %v13282_v22 = vadd.f32 %v22308_v5, %v22307_v10 }
 0x254   : > { %v3431_v49 = vmax.f32 %v3399_v21, %v3401_v18  ;;  %v14684_v59 = vpop.f32.mrf.mxu0  ;;  %v3432_v58 = vmax.f32 %v3400_v16, %v17594_v39  ;;  %v3430_v53 = vmax.f32 %v17562_v57, %v3400_v16  ;;  %v13394_v12 = vadd.f32 %v13393_v38, %v13392_v19  ;;  %v13395_v2 = vpop.f32.mrf.mxu1 }
 0x255   : > { %v3244_v26 = vmax.f32 %v3168_v13, 0.0  ;;  %v17605_v0 = vadd.f32 %v14684_v59, %v3028_v1  ;;  %v3324_v23 = vsel %vm22306_vm6, %v3321_v41, %v3323_v61  ;;  %v3329_v27 = vrot.slane %v3246_v37, 1  ;;  %v22309_v1 = vld [vmem:[#allocation47_spill] sm:$0xff]  ;;  %vm22314_vm6 = vmmov %vm22296_vm5 }
 0x256   : > { %v3180_v54 = vpop.f32.mrf.mxu0  ;;  %v3403_v56 = vmax.f32 %v3242_v48, %v3324_v23  ;;  %v3047_v52 = vadd.f32 %v13385_v50, %v22311_v9  ;;  %v17620_v46 = vpack.c.bf16 %v3431_v49, %v3430_v53  ;;  %v2899_v28 = vadd.f32 %v13282_v22, %v22313_v35  ;;  %v13396_v62 = vpop.f32.mrf.mxu1  ;;  %v22316_v53 = vld [vmem:[#allocation64_spill] sm:$0xff] }
 0x257   : > { %v3325_v3 = vrot.slane %v3244_v26, 1  ;;  %v3181_v44 = vadd.f32 %v3180_v54, %v22309_v1  ;;  %v3330_v57 = vsel %vm22310_vm15, %v3327_v60, %v3329_v27  ;;  %v3249_v41 = vmax.f32 %v17605_v0, 0.0  ;;  %v22315_v0 = vld [vmem:[#allocation59_spill] sm:$0xff]  ;;  %vm22317_vm15 = vmmov %vm22296_vm5 }
 0x258   : > { %v14685_v4 = vpop.f32.mrf.mxu0  ;;  %v3433_v6 = vmax.f32 %v3401_v18, %v3403_v56  ;;  %v3406_v55 = vmax.f32 %v3245_v63, %v3330_v57  ;;  %v13391_v63 = vadd.f32 %v17573_v29, %v17560_v11  ;;  %v13397_v23 = vadd.f32 %v13396_v62, %v13395_v2  ;;  %v22319_v57 = vld [vmem:[#allocation46_spill] sm:$0xff] }
 0x259   : > { %v3326_v20 = vsel %vm22312_vm11, %v3323_v61, %v3325_v3  ;;  %v3328_v47 = vsel %vm22296_vm5, %v3325_v3, %v3327_v60  ;;  %v3247_v36 = vmax.f32 %v3181_v44, 0.0  ;;  %v3192_v31 = vadd.f32 %v14685_v4, %v3031_v7  ;;  %vm22318_vm11 = vmmov %vm22296_vm5 }
 0x25a   : > { %v3404_v33 = vmax.f32 %v3243_v32, %v3326_v20  ;;  %v3405_v48 = vmax.f32 %v3244_v26, %v3328_v47  ;;  %v3183_v21 = vpop.f32.mrf.mxu0  ;;  %v17628_v13 = vpack.c.bf16 %v3433_v6, %v3432_v58  ;;  %v3335_v18 = vrot.slane %v3249_v41, 1 }
 0x25b   : > { %v3331_v19 = vrot.slane %v3247_v36, 1  ;;  %v3184_v17 = vadd.f32 %v3183_v21, %v17552_v45  ;;  %v3250_v42 = vmax.f32 %v3192_v31, 0.0  ;;  %v3060_v54 = vadd.f32 %v13394_v12, %v2899_v28 }
 0x25c   : > { %v3435_v16 = vmax.f32 %v3403_v56, %v3405_v48  ;;  %v14688_v25 = vpop.f32.mrf.mxu0  ;;  %v3434_v50 = vmax.f32 %v17594_v39, %v3404_v33  ;;  %v3436_v61 = vmax.f32 %v3404_v33, %v3406_v55  ;;  %v13285_v39 = vadd.f32 %v22316_v53, %v22315_v0 }
 0x25d   : > { %v3332_v32 = vsel %vm22314_vm6, %v3329_v27, %v3331_v19  ;;  %v3248_v49 = vmax.f32 %v3184_v17, 0.0  ;;  %v3205_v7 = vadd.f32 %v14688_v25, %v3044_v43  ;;  %v3337_v59 = vrot.slane %v3250_v42, 1  ;;  %vm22320_vm6 = vmmov %vm22296_vm5 }
 0x25e   : > { %v3196_v38 = vpop.f32.mrf.mxu0  ;;  %v17631_v26 = vpack.c.bf16 %v3435_v16, %v3434_v50  ;;  %v3407_v45 = vmax.f32 %v3246_v37, %v3332_v32  ;;  %v2902_v4 = vadd.f32 %v13285_v39, %v22319_v57 }
 0x25f   : > { %v3333_v58 = vrot.slane %v3248_v49, 1  ;;  %v3197_v60 = vadd.f32 %v3196_v38, %v17587_v8  ;;  %v3338_v27 = vsel %vm22317_vm15, %v3335_v18, %v3337_v59  ;;  %v3253_v37 = vmax.f32 %v3205_v7, 0.0  ;;  %vm22322_vm15 = vmmov %vm22296_vm5 }
 0x260   : > { %v14689_v43 = vpop.f32.mrf.mxu0  ;;  %v3437_v10 = vmax.f32 %v3405_v48, %v3407_v45  ;;  %v3410_v1 = vmax.f32 %v3249_v41, %v3338_v27  ;;  %v3063_v50 = vadd.f32 %v13397_v23, %v2902_v4 }
 0x261   : > { %v3334_v5 = vsel %vm22318_vm11, %v3331_v19, %v3333_v58  ;;  %v3336_v22 = vsel %vm22296_vm5, %v3333_v58, %v3335_v18  ;;  %v3251_v3 = vmax.f32 %v3197_v60, 0.0  ;;  %v3208_v11 = vadd.f32 %v14689_v43, %v3047_v52  ;;  %v22321_v52 = vld [vmem:[#allocation51_spill] sm:$0xff]  ;;  %vm22324_vm11 = vmmov %vm22296_vm5 }
 0x262   : > { %v3409_v56 = vmax.f32 %v3248_v49, %v3336_v22  ;;  %v3199_v29 = vpop.f32.mrf.mxu0  ;;  %v3408_v44 = vmax.f32 %v3247_v36, %v3334_v5  ;;  %v17643_v2 = vpack.c.bf16 %v3437_v10, %v3436_v61  ;;  %v3052_v41 = vadd.f32 %v17612_v40, %v22321_v52 }
 0x263   : > { %v3339_v8 = vrot.slane %v3251_v3, 1  ;;  %v3200_v9 = vadd.f32 %v3199_v29, %v17590_v34  ;;  %v3254_v12 = vmax.f32 %v3208_v11, 0.0  ;;  %v3343_v36 = vrot.slane %v3253_v37, 1 }
 0x264   : > { %v14692_v20 = vpop.f32.mrf.mxu0  ;;  %v3440_v47 = vmax.f32 %v3408_v44, %v3410_v1  ;;  %v3438_v33 = vmax.f32 %v3406_v55, %v3408_v44  ;;  %v3439_v48 = vmax.f32 %v3407_v45, %v3409_v56  ;;  %v22323_v55 = vld [vmem:[#allocation54_spill] sm:$0xff] }
 0x265   : > { %v3340_v31 = vsel %vm22320_vm6, %v3337_v59, %v3339_v8  ;;  %v3252_v21 = vmax.f32 %v3200_v9, 0.0  ;;  %v3221_v6 = vadd.f32 %v14692_v20, %v3060_v54  ;;  %v3345_v35 = vrot.slane %v3254_v12, 1  ;;  %vm22325_vm6 = vmmov %vm22296_vm5 }
 0x266   : > { %v3212_v28 = vpop.f32.mrf.mxu0  ;;  %v3411_v19 = vmax.f32 %v3250_v42, %v3340_v31  ;;  %v3469_v17 = vpack.c.bf16 %v3439_v48, %v3438_v33  ;;  %v3055_v32 = vadd.f32 %v13391_v63, %v22323_v55  ;;  %v15397_v55 = vld [vmem:[%s22293_s26 + $0x60] sm:$0xff]  }
 0x267   : > { %v3341_v34 = vrot.slane %v3252_v21, 1  ;;  %v3213_v16 = vadd.f32 %v3212_v28, %v3052_v41  ;;  %v3346_v25 = vsel %vm22322_vm15, %v3343_v36, %v3345_v35  ;;  %v3257_v18 = vmax.f32 %v3221_v6, 0.0  ;;  %vm22326_vm15 = vmmov %vm22296_vm5  ;;  %v15389_v28 = vld [vmem:[%s22293_s26 + $0x70] sm:$0xff]  }
 0x268   : > { %v14693_v62 = vpop.f32.mrf.mxu0  ;;  %v3441_v49 = vmax.f32 %v3409_v56, %v3411_v19  ;;  %v3414_v42 = vmax.f32 %v3253_v37, %v3346_v25  ;;  %v15394_v25 = vld [vmem:[%s22293_s26 + $0xa8] sm:$0xff]  }
 0x269   : > { %v3342_v7 = vsel %vm22324_vm11, %v3339_v8, %v3341_v34  ;;  %v3344_v61 = vsel %vm22296_vm5, %v3341_v34, %v3343_v36  ;;  %v3255_v40 = vmax.f32 %v3213_v16, 0.0  ;;  %v3224_v38 = vadd.f32 %v14693_v62, %v3063_v50  ;;  %vm22327_vm11 = vmmov %vm22296_vm5  ;;  %v15387_v36 = vld [vmem:[%s22293_s26 + $0x38] sm:$0xff]   ;;  %v15392_v34 = vld [vmem:[%s22293_s26 + $0xe8] sm:$0xff]  }
 0x26a   : > { %v3413_v59 = vmax.f32 %v3252_v21, %v3344_v61  ;;  %v3215_v45 = vpop.f32.mrf.mxu0  ;;  %v3412_v0 = vmax.f32 %v3251_v3, %v3342_v7  ;;  %v3470_v58 = vpack.c.bf16 %v3441_v49, %v3440_v47  ;;  %v3351_v10 = vrot.slane %v3257_v18, 1  ;;  %v15393_v16 = vld [vmem:[%s22293_s26 + $0x68] sm:$0xff]   ;;  %v15396_v62 = vld [vmem:[%s22293_s26 + $0xe0] sm:$0xff]   ;;  %v15400_v7 = vld [vmem:[%s22293_s26 + $0xd8] sm:$0xff]  }
 0x26b   : > { %v3347_v53 = vrot.slane %v3255_v40, 1  ;;  %v3216_v39 = vadd.f32 %v3215_v45, %v3055_v32  ;;  %v3258_v60 = vmax.f32 %v3224_v38, 0.0  ;;  %v15395_v50 = vld [vmem:[%s22293_s26 + $0x28] sm:$0xff]   ;;  %v15398_v32 = vld [vmem:[%s22293_s26 + $0xa0] sm:$0xff]   ;;  %v15401_v61 = vld [vmem:[%s22293_s26 + $0x58] sm:$0xff]  }
 0x26c   : > { %v3444_v23 = vmax.f32 %v3412_v0, %v3414_v42  ;;  %v3442_v27 = vmax.f32 %v3410_v1, %v3412_v0  ;;  %v3443_v43 = vmax.f32 %v3411_v19, %v3413_v59  ;;  %v15390_v19 = vld [vmem:[%s22293_s26 + $0xb0] sm:$0xff]   ;;  %v15399_v49 = vld [vmem:[%s22293_s26 + $0x20] sm:$0xff]   ;;  %v15408_v0 = vld [vmem:[%s22293_s26 + $0xc8] sm:$0xff]  }
 0x26d   : > { %v3348_v63 = vsel %vm22325_vm6, %v3345_v35, %v3347_v53  ;;  %v3256_v54 = vmax.f32 %v3216_v39, 0.0  ;;  %v3353_v5 = vrot.slane %v3258_v60, 1  ;;  %v15388_v35 = vld [vmem:[%s22293_s26 + $0xf0] sm:$0xff]   ;;  %v15410_v39 = vld [vmem:[%s22293_s26 + $0x88] sm:$0xff]  }
 0x26e   : > { %v3415_v22 = vmax.f32 %v3254_v12, %v3348_v63  ;;  %v3471_v56 = vpack.c.bf16 %v3443_v43, %v3442_v27  ;;  %v15405_v38 = vld [vmem:[%s22293_s26 + $0x50] sm:$0xff]   ;;  %v15414_v27 = vld [vmem:[%s22293_s26 + $0x80] sm:$0xff]   ;;  %v15416_v63 = vld [vmem:[%s22293_s26 + $0x1f8] sm:$0xff]  }
 0x26f   : > { %v3349_v11 = vrot.slane %v3256_v54, 1  ;;  %v3354_v29 = vsel %vm22326_vm15, %v3351_v10, %v3353_v5  ;;  %v3387_v37 = vsel %vm22327_vm11, %v3353_v5, 0.0  ;;  %v15406_v45 = vld [vmem:[%s22293_s26 + $0x90] sm:$0xff]   ;;  %v15415_v43 = vld [vmem:[%s22293_s26] sm:$0xff]  }
 0x270   : > { %v3445_v3 = vmax.f32 %v3413_v59, %v3415_v22  ;;  %v3419_v44 = vmax.f32 %v3258_v60, %v3387_v37  ;;  %v3418_v1 = vmax.f32 %v3257_v18, %v3354_v29  ;;  %v15402_v18 = vld [vmem:[%s22293_s26 + $0x98] sm:$0xff]   ;;  %v15404_v59 = vld [vmem:[%s22293_s26 + $0xd0] sm:$0xff]   ;;  %v15412_v60 = vld [vmem:[%s22293_s26 + $0xc0] sm:$0xff]  }
 0x271   : > { %v3350_v57 = vsel %vm22296_vm5, %v3347_v53, %v3349_v11  ;;  %v3352_v4 = vsel %vm22328_vm4, %v3349_v11, %v3351_v10  ;;  %v15409_v53 = vld [vmem:[%s22293_s26 + $0x48] sm:$0xff]   ;;  %v22329_v10 = vld [vmem:[#allocation10_spill] sm:$0xff] }
 0x272   : > { %v3417_v8 = vmax.f32 %v3256_v54, %v3352_v4  ;;  %v3416_v9 = vmax.f32 %v3255_v40, %v3350_v57  ;;  %v3472_v20 = vpack.c.bf16 %v3445_v3, %v3444_v23  ;;  %v3451_v47 = vmax.f32 %v3419_v44, 0.0  ;;  %v15403_v40 = vld [vmem:[%s22293_s26 + $0x18] sm:$0xff]   ;;  %v15413_v23 = vld [vmem:[%s22293_s26 + $0x40] sm:$0xff]   ;;  %v22331_v3 = vld [vmem:[#allocation13_spill] sm:$0xff] }
 0x273   : > { %v3450_v33 = vmax.f32 %v3418_v1, 0.0  ;;  %v15417_v54 = vld [vmem:[%s22293_s26 + $0x178] sm:$0xff]   ;;  %v17787_v5 = vadd.s32 16, %v22329_v10 }
 0x274   : > { %v3448_v48 = vmax.f32 %v3416_v9, %v3418_v1  ;;  %v3449_v12 = vmax.f32 %v3417_v8, %v3419_v44  ;;  %v3446_v31 = vmax.f32 %v3414_v42, %v3416_v9  ;;  %v3447_v21 = vmax.f32 %v3415_v22, %v3417_v8  ;;  %v15407_v42 = vld [vmem:[%s22293_s26 + $0x10] sm:$0xff]   ;;  %v22332_v1 = vld [vmem:[#allocation12_spill] sm:$0xff] }
 0x275   : > { %v3475_v6 = vpack.c.bf16 %v3451_v47, %v3450_v33  ;;  %22330 = vst [vmem:[#allocation32_spill] sm:$0xff] %v17787_v5  ;;  %v819_v22 = vadd.s32 24, %v22329_v10  ;;  %v820_v11 = vand.u32 7, %v17787_v5  ;;  %v822_v44 = vand.u32 7, %v22331_v3 }
 0x276   : > { %v3474_v52 = vpack.c.bf16 %v3449_v12, %v3448_v48  ;;  %v3473_v41 = vpack.c.bf16 %v3447_v21, %v3446_v31  ;;  %v823_v8 = vand.u32 7, %v22332_v1  ;;  %v22333_v9 = vmov 0 }
 0x277   : > { %13422 = vmatprep.subr.bf16.mxu1 %v3475_v6  ;;  %v821_v37 = vand.u32 7, %v819_v22  ;;  %vm17793_vm4 = vcmp.ne.s32.totalorder %v820_v11, 7  ;;  %vm17797_vm6 = vcmp.ne.s32.totalorder %v820_v11, 0  ;;  %v22339_v47 = vmov 0 }
 0x278   : > { %13423 = vmatpush3.bf16.msra.mxu1 %v17631_v26  ;;  %v15385_v26 = vld [vmem:[%s22293_s26 + $0x78] sm:$0xff]   ;;  %v22334_v9 = vsel %vm17793_vm4, 4294967295, %v22333_v9  ;;  %v22342_v33 = vmov 0  ;;  %vm17809_vm5 = vcmp.ne.s32.totalorder %v822_v44, 7  ;;  %v22345_v12 = vmov 0 }
 0x279   : > { %13424 = vmatprep.subr.bf16.mxu1 %v3474_v52  ;;  %22335 = vst [vmem:[#allocation55_spill] sm:$0xff] %v22334_v9  ;;  %vm17801_vm15 = vcmp.ne.s32.totalorder %v821_v37, 7  ;;  %vm17805_vm11 = vcmp.ne.s32.totalorder %v821_v37, 0  ;;  %v22346_v12 = vsel %vm17809_vm5, 4294967295, %v22345_v12  ;;  %vm17813_vm12 = vcmp.ne.s32.totalorder %v822_v44, 0 }
 0x27a   : > { %v22340_v47 = vsel %vm17801_vm15, 4294967295, %v22339_v47  ;;  %v22343_v33 = vsel %vm17805_vm11, 4294967295, %v22342_v33  ;;  %22347 = vst [vmem:[#allocation41_spill] sm:$0xff] %v22346_v12  ;;  %v22348_v21 = vmov 0  ;;  %v22351_v6 = vmov 0.0|0.0  }
 0x27b   : > { %22341 = vst [vmem:[#allocation47_spill] sm:$0xff] %v22340_v47  ;;  %22344 = vst [vmem:[#allocation50_spill] sm:$0xff] %v22343_v33  ;;  %v22349_v21 = vsel %vm17813_vm12, 4294967295, %v22348_v21  ;;  %v17818_v52 = vrot.slane %v22351_v6, 4  ;;  %vm17822_vm13 = vcmp.ne.s32.totalorder %v823_v8, 7  ;;  %vm17840_vm14 = vcmp.ne.s32.totalorder %v823_v8, 0 }
 0x27c   : > { %13425 = vmatpush3.bf16.msra.mxu1 %v17628_v13  ;;  %v15372_v13 = vld [vmem:[%s21840_s13] ss:$8 sps:$4 sm:$0xff]   ;;  %22350 = vst [vmem:[#allocation59_spill] sm:$0xff] %v22349_v21 }
 0x27d   : > { %13426 = vmatprep.subr.bf16.mxu1 %v3473_v41  ;;  %22352 = vst [vmem:[#allocation64_spill] sm:$0xff] %v17818_v52 }
 0x280   : > { %13427 = vmatpush3.bf16.msra.mxu1 %v17620_v46  ;;  %v15381_v46 = vld [vmem:[%s21840_s13 + $0x30] ss:$8 sps:$4 sm:$0xff]  }
 0x281   : > { %13428 = vmatprep.subr.bf16.mxu1 %v3472_v20  ;;  %v22336_v20 = vmov 0 }
 0x282   : > { %v22337_v20 = vsel %vm17797_vm6, 4294967295, %v22336_v20 }
 0x283   : > { %22338 = vst [vmem:[#allocation58_spill] sm:$0xff] %v22337_v20 }
 0x284   : > { %13429 = vmatpush3.bf16.msra.mxu1 %v17608_v51  ;;  %v15377_v51 = vld [vmem:[%s21840_s13 + $0x14] ss:$8 sps:$4 sm:$0xff]  }
 0x285   : > { %13430 = vmatprep.subr.bf16.mxu1 %v3471_v56 }
 0x288   : > { %13431 = vmatpush3.bf16.msra.mxu1 %v17592_v14  ;;  %v15383_v14 = vld [vmem:[%s21840_s13 + $0x34] ss:$8 sps:$4 sm:$0xff]  }
 0x289   : > { %13432 = vmatprep.subr.bf16.mxu1 %v3470_v58  ;;  %v15411_v58 = vld [vmem:[%s22293_s26 + $0x8] sm:$0xff]  }
 0x28c   : > { %13433 = vmatpush3.bf16.msra.mxu1 %v17578_v15  ;;  %v15375_v15 = vld [vmem:[%s21840_s13 + $0x10] ss:$8 sps:$4 sm:$0xff]  }
 0x28d   : > { %13434 = vmatprep.subr.bf16.mxu1 %v3469_v17  ;;  %v15391_v17 = vld [vmem:[%s22293_s26 + $0x30] sm:$0xff]  }
 0x290   : > { %13435 = vmatpush3.bf16.msra.mxu1 %v17558_v24  ;;  %v15380_v24 = vld [vmem:[%s21840_s13 + $0x24] ss:$8 sps:$4 sm:$0xff]  }
 0x291   : > { %13436 = vmatprep.subr.bf16.mxu1 %v17643_v2  ;;  %v15386_v2 = vld [vmem:[%s22293_s26 + $0xb8] sm:$0xff]  }
 0x292   : > { %13503 = vmatpush3.bf16.msra.mxu0 %v15386_v2 }
 0x293   : > { %13504 = vmatprep.subr.bf16.mxu0 %v15388_v35 }
 0x294   : > { %13437 = vmatpush3.bf16.msra.mxu1 %v17538_v30  ;;  %v15378_v30 = vld [vmem:[%s21840_s13 + $0x20] ss:$8 sps:$4 sm:$0xff]  }
 0x295   : > { %13462 = vmatprep.subr.bf16.mxu1 %v15385_v26 }
 0x296   : > { %13505 = vmatpush3.bf16.msra.mxu0 %v15390_v19 }
 0x297   : > { %3549 = vmatmul.mubr.bf16.vlgmr.msra.gmra.mxu1 %v15372_v13  ;;  %13506 = vmatprep.subr.bf16.mxu0 %v15392_v34 }
 0x298   : > { %3556 = vmatprep.mubr.bf16.mxu1 %v15377_v51  ;;  %13463 = vmatpush3.bf16.msra.mxu1 %v15387_v36  ;;  %v22353_v51 = vmov 0 }
 0x299   : > { %13464 = vmatprep.subr.bf16.mxu1 %v15389_v28  ;;  %v22354_v51 = vsel %vm17822_vm13, 4294967295, %v22353_v51 }
 0x29a   : > { %13507 = vmatpush3.bf16.msra.mxu0 %v15394_v25  ;;  %22355 = vst [vmem:[#allocation46_spill] sm:$0xff] %v22354_v51 }
 0x29b   : > { %13508 = vmatprep.subr.bf16.mxu0 %v15396_v62 }
 0x29c   : > { %13465 = vmatpush3.bf16.msra.mxu1 %v15391_v17  ;;  %v22358_v17 = vmov 0  }
 0x29d   : > { %13466 = vmatprep.subr.bf16.mxu1 %v15393_v16  ;;  %v3879_v34 = vrot.slane %v22358_v17, 3  ;;  %v3880_v16 = vrot.slane %v22358_v17, 4 }
 0x29e   : > { %13509 = vmatpush3.bf16.msra.mxu0 %v15398_v32 }
 0x29f   : > { %3557 = vmatmul.mubr.bf16.gmra.mxu1 %v15375_v15  ;;  %13510 = vmatprep.subr.bf16.mxu0 %v15400_v7  ;;  %v22356_v15 = vld [vmem:[#allocation15_spill] sm:$0xff] }
 0x2a0   : > { %3564 = vmatprep.mubr.bf16.mxu1 %v15380_v24  ;;  %13467 = vmatpush3.bf16.msra.mxu1 %v15395_v50  ;;  %v824_v24 = vand.u32 7, %v22356_v15 }
 0x2a1   : > { %13468 = vmatprep.subr.bf16.mxu1 %v15397_v55  ;;  %v22359_v55 = vmov 0 }
 0x2a2   : > { %13511 = vmatpush3.bf16.msra.mxu0 %v15402_v18  ;;  %v22360_v55 = vsel %vm17840_vm14, 4294967295, %v22359_v55  ;;  %vm17847_vm7 = vcmp.ne.s32.totalorder %v824_v24, 7  ;;  %v22362_v18 = vmov 0  ;;  %vm17851_vm9 = vcmp.ne.s32.totalorder %v824_v24, 0 }
 0x2a3   : > { %13512 = vmatprep.subr.bf16.mxu0 %v15404_v59  ;;  %22361 = vst [vmem:[#allocation51_spill] sm:$0xff] %v22360_v55  ;;  %v22363_v18 = vsel %vm17847_vm7, 4294967295, %v22362_v18  ;;  %v22365_v59 = vmov 0 }
 0x2a4   : > { %13469 = vmatpush3.bf16.msra.mxu1 %v15399_v49  ;;  %22364 = vst [vmem:[#allocation54_spill] sm:$0xff] %v22363_v18  ;;  %v22366_v59 = vsel %vm17851_vm9, 4294967295, %v22365_v59 }
 0x2a5   : > { %13470 = vmatprep.subr.bf16.mxu1 %v15401_v61  ;;  %22367 = vst [vmem:[#allocation13_spill] sm:$0xff] %v22366_v59 }
 0x2a6   : > { %13513 = vmatpush3.bf16.msra.mxu0 %v15406_v45 }
 0x2a7   : > { %3565 = vmatmul.mubr.bf16.gmra.mxu1 %v15378_v30  ;;  %13514 = vmatprep.subr.bf16.mxu0 %v15408_v0  ;;  %v22357_v30 = vld [vmem:[#allocation14_spill] sm:$0xff] }
 0x2a8   : > { %3572 = vmatprep.mubr.bf16.mxu1 %v15383_v14  ;;  %13471 = vmatpush3.bf16.msra.mxu1 %v15403_v40  ;;  %v825_v14 = vand.u32 7, %v22357_v30 }
 0x2a9   : > { %13472 = vmatprep.subr.bf16.mxu1 %v15405_v38  ;;  %v22368_v38 = vld [vmem:[#allocation18_spill] sm:$0xff] }
 0x2aa   : > { %13515 = vmatpush3.bf16.msra.mxu0 %v15410_v39  ;;  %v826_v45 = vand.u32 7, %v22368_v38  ;;  %vm17864_vm10 = vcmp.ne.s32.totalorder %v825_v14, 7  ;;  %vm17868_vm2 = vcmp.ne.s32.totalorder %v825_v14, 0  ;;  %v22385_v38 = vmov 0 }
 0x2ab   : > { %13516 = vmatprep.subr.bf16.mxu0 %v15412_v60 }
 0x2ac   : > { %13473 = vmatpush3.bf16.msra.mxu1 %v15407_v42  ;;  %v22369_v42 = vld [vmem:[#allocation17_spill] sm:$0xff]  ;;  %vm17924_vm3 = vcmp.ne.s32.totalorder %v826_v45, 7 }
 0x2ad   : > { %13474 = vmatprep.subr.bf16.mxu1 %v15409_v53  ;;  %v827_v0 = vand.u32 7, %v22369_v42  ;;  %v22370_v53 = vld [vmem:[#allocation11_spill] sm:$0xff]  ;;  %v22388_v42 = vmov 0 }
 0x2ae   : > { %13517 = vmatpush3.bf16.msra.mxu0 %v15414_v27  ;;  %v22372_v27 = vmov 0 }
 0x2af   : > { %3573 = vmatmul.mubr.bf16.gmra.mxu1 %v15381_v46  ;;  %13582 = vmatprep.subr.bf16.mxu0 %v15416_v63  ;;  %v22373_v27 = vsel %vm17864_vm10, 4294967295, %v22372_v27  ;;  %v17872_v63 = vor.u32 %v3880_v16, %v3879_v34  ;;  %vm17916_vm0 = vcmp.ne.s32.totalorder %v827_v0, 0 }
 0x2b0   : > { %13475 = vmatpush3.bf16.msra.mxu1 %v15411_v58  ;;  %22374 = vst [vmem:[#allocation12_spill] sm:$0xff] %v22373_v27  ;;  %v22389_v42 = vsel %vm17916_vm0, 4294967295, %v22388_v42 }
 0x2b1   : > { %13476 = vmatprep.subr.bf16.mxu1 %v15413_v23  ;;  %22378 = vst [vmem:[#allocation14_spill] sm:$0xff] %v17872_v63  ;;  %22390 = vst [vmem:[#allocation65_spill] sm:$0xff] %v22389_v42 }
 0x2b4   : > { %13477 = vmatpush3.bf16.msra.mxu1 %v15415_v43  ;;  %v22375_v43 = vmov 0 }
 0x2b5   : > { %13542 = vmatprep.subr.bf16.mxu1 %v15417_v54  ;;  %v22376_v43 = vsel %vm17868_vm2, 4294967295, %v22375_v43 }
 0x2b6   : > { %22377 = vst [vmem:[#allocation15_spill] sm:$0xff] %v22376_v43 }
 0x357   : > { %v13438_v56 = vpop.f32.mrf.mxu1 }
 0x359   : > { %v13439_v29 = vpop.f32.mrf.mxu1 }
 0x35a   : > { %v13440_v57 = vadd.f32 %v13439_v29, %v13438_v56 }
 0x35b   : > { %v13441_v4 = vpop.f32.mrf.mxu1 }
 0x35c   : > { %v3597_v41 = vsel %vm17793_vm4, %v13440_v57, 0.0  ;;  %v3629_v46 = vsel %vm17797_vm6, %v13440_v57, 0.0  ;;  %vm22394_vm6 = vcmask 1043456   ;;  %vm22395_vm4 = vcmask 1046528  }
 0x35d   : > { %v13442_v48 = vpop.f32.mrf.mxu1 }
 0x35e   : > { %v13443_v31 = vadd.f32 %v13442_v48, %v13441_v4 }
 0x35f   : > { %v13444_v13 = vpop.f32.mrf.mxu1 }
 0x360   : > { %v3598_v26 = vsel %vm17801_vm15, %v13443_v31, 0.0  ;;  %v3609_v2 = vpack.c.bf16 %v13443_v31, %v13440_v57  ;;  %v3630_v36 = vsel %vm17805_vm11, %v13443_v31, 0.0  ;;  %v22380_v57 = vld [vmem:[#allocation8_spill] sm:$0xff]  ;;  %vm22011_vm11 = vsmask.f32 4352 }
 0x361   : > { %v17834_v35 = vpack.c.bf16 %v3598_v26, %v3597_v41  ;;  %v17836_v28 = vpack.c.bf16 %v3630_v36, %v3629_v46  ;;  %v13445_v19 = vpop.f32.mrf.mxu1 }
 0x362   : > { %v3642_v25 = vshll.u32 %v3609_v2, 16  ;;  %v3646_v50 = vshrl.u32 %v3609_v2, 16  ;;  %v13446_v62 = vadd.f32 %v13445_v19, %v13444_v13 }
 0x363   : > { %v3677_v32 = vrot.slane %v17836_v28, 1  ;;  %v3691_v49 = vrot.slane %v17834_v35, 4  ;;  %v3883_v7 = vshrl.u32 %v17834_v35, 16  ;;  %v13447_v61 = vpop.f32.mrf.mxu1  ;;  %v17862_v60 = vrot.slane %v17836_v28, 5 }
 0x364   : > { %v3644_v40 = vrot.slane %v3642_v25, 1  ;;  %v3700_v58 = vrot.slane %v3646_v50, 4  ;;  %v3701_v54 = vrot.slane %v3642_v25, 5  ;;  %v3886_v56 = vshll.u32 %v17834_v35, 16 }
 0x365   : > { %v17859_v39 = vsel %vm22371_vm8, %v22370_v53, %v3677_v32  ;;  %v13448_v23 = vpop.f32.mrf.mxu1  ;;  %v17874_v22 = vrot.slane %v3883_v7, 3  ;;  %v3599_v11 = vsel %vm17809_vm5, %v13446_v62, 0.0  ;;  %v3631_v29 = vsel %vm17813_vm12, %v13446_v62, 0.0 }
 0x366   : > { %v13449_v37 = vadd.f32 %v13448_v23, %v13447_v61  ;;  %vm22379_vm8 = vcmask 1043456   ;;  %v17885_v4 = vsel %vm22381_vm1, %v22380_v57, %v3644_v40  ;;  %v3648_v1 = vor.u32 %v3646_v50, %v3644_v40 }
 0x367   : > { %v13450_v3 = vpop.f32.mrf.mxu1  ;;  %v3692_v44 = vsel %vm22379_vm8, %v17818_v52, %v3691_v49  ;;  %v3909_v8 = vshrl.u32 %v17859_v39, 16  ;;  %v3892_v30 = vshrl.u32 %v17885_v4, 16  ;;  %v17893_v14 = vor.u32 %v3701_v54, %v3700_v58 }
 0x368   : > { %v3926_v48 = vshrl.u32 %v3692_v44, 16  ;;  %v3929_v31 = vshll.u32 %v3692_v44, 16  ;;  %v3600_v41 = vsel %vm17822_vm13, %v13449_v37, 0.0  ;;  %v3610_v13 = vpack.c.bf16 %v13449_v37, %v13446_v62 }
 0x369   : > { %v3632_v15 = vsel %vm17840_vm14, %v13449_v37, 0.0  ;;  %v13451_v24 = vpop.f32.mrf.mxu1  ;;  %v17895_v46 = vpack.c.bf16 %v3600_v41, %v3599_v11  ;;  %v17899_v36 = vrot.slane %v3886_v56, 4  ;;  %v3912_v35 = vshll.u32 %v17859_v39, 16 }
 0x36a   : > { %v17897_v26 = vpack.c.bf16 %v3632_v15, %v3631_v29  ;;  %v13452_v2 = vadd.f32 %v13451_v24, %v13450_v3  ;;  %v3650_v28 = vshll.u32 %v3610_v13, 16  ;;  %v3654_v19 = vshrl.u32 %v3610_v13, 16 }
 0x36b   : > { %v13453_v34 = vpop.f32.mrf.mxu1  ;;  %v21977_v25 = vrot.slane %v17895_v46, 4  ;;  %vm17904_vm1 = vcmp.ne.s32.totalorder %v826_v45, 0  ;;  %v22382_v50 = vmov 0  ;;  %v3895_v62 = vshll.u32 %v17885_v4, 16 }
 0x36c   : > { %v21976_v16 = vrot.slane %v17897_v26, 1  ;;  %v22383_v50 = vsel %vm17904_vm1, 4294967295, %v22382_v50  ;;  %v17909_v7 = vrot.slane %v3909_v8, 3  ;;  %vm17912_vm8 = vcmp.ne.s32.totalorder %v827_v0, 7 }
 0x36d   : > { %22384 = vst [vmem:[#allocation18_spill] sm:$0xff] %v22383_v50  ;;  %v13454_v40 = vpop.f32.mrf.mxu1  ;;  %v22386_v38 = vsel %vm17912_vm8, 4294967295, %v22385_v38  ;;  %v3928_v39 = vrot.slane %v3926_v48, 3  ;;  %v3931_v58 = vrot.slane %v3929_v31, 4  ;;  %v17920_v23 = vrot.slane %v3892_v30, 3 }
 0x36e   : > { %22387 = vst [vmem:[#allocation17_spill] sm:$0xff] %v22386_v38  ;;  %v3652_v54 = vrot.slane %v3650_v28, 1  ;;  %v3601_v56 = vsel %vm17847_vm7, %v13452_v2, 0.0  ;;  %v13455_v11 = vadd.f32 %v13454_v40, %v13453_v34  ;;  %v22391_v29 = vmov 0 }
 0x36f   : > { %v22392_v29 = vsel %vm17924_vm3, 4294967295, %v22391_v29  ;;  %v3694_v0 = vsel %vm22394_vm6, %v3691_v49, %v21977_v25  ;;  %v3680_v37 = vsel %vm22395_vm4, %v3677_v32, %v21976_v16  ;;  %v3703_v3 = vrot.slane %v3654_v19, 4  ;;  %v13456_v8 = vpop.f32.mrf.mxu1 }
 0x370   : > { %22393 = vst [vmem:[#allocation66_spill] sm:$0xff] %v22392_v29  ;;  %v3704_v44 = vrot.slane %v3650_v28, 5  ;;  %v3633_v4 = vsel %vm17851_vm9, %v13452_v2, 0.0  ;;  %v3602_v45 = vsel %vm17864_vm10, %v13455_v11, 0.0  ;;  %v3611_v48 = vpack.c.bf16 %v13455_v11, %v13452_v2 }
 0x371   : > { %v3634_v31 = vsel %vm17868_vm2, %v13455_v11, 0.0  ;;  %v3934_v41 = vshrl.u32 %v3694_v0, 16  ;;  %v17940_v49 = vpack.c.bf16 %v3602_v45, %v3601_v56  ;;  %v13457_v15 = vpop.f32.mrf.mxu1  ;;  %v3932_v32 = vor.u32 %v3931_v58, %v3928_v39 }
 0x372   : > { %v17942_v13 = vpack.c.bf16 %v3634_v31, %v3633_v4  ;;  %v3937_v24 = vshll.u32 %v3694_v0, 16  ;;  %v3658_v30 = vshll.u32 %v3611_v48, 16  ;;  %v3662_v28 = vshrl.u32 %v3611_v48, 16 }
 0x373   : > { %v3936_v34 = vrot.slane %v3934_v41, 3  ;;  %vm22396_vm4 = vsmask.f32 7424  ;;  %v3656_v61 = vor.u32 %v3654_v19, %v3652_v54  ;;  %v17945_v16 = vor.u32 %v3704_v44, %v3703_v3  ;;  %v13459_v25 = vpop.f32.mrf.mxu1 }
 0x374   : > { %v3653_v40 = vsel %vm22396_vm4, %v3648_v1, %v3652_v54  ;;  %v13458_v2 = vadd.f32 %v13457_v15, %v13456_v8  ;;  %v3939_v17 = vrot.slane %v3937_v24, 4  ;;  %v3917_v11 = vshrl.u32 %v3680_v37, 16 }
 0x375   : > { %v3920_v52 = vshll.u32 %v3680_v37, 16  ;;  %v21982_v4 = vrot.slane %v17940_v49, 4  ;;  %v13460_v58 = vpop.f32.mrf.mxu1  ;;  %v3897_v45 = vrot.slane %v3895_v62, 4  ;;  %v3900_v48 = vshrl.u32 %v3653_v40, 16 }
 0x376   : > { %v17950_v0 = vor.u32 %v3939_v17, %v3936_v34  ;;  %v3660_v1 = vrot.slane %v3658_v30, 1  ;;  %v17952_v19 = vrot.slane %v3662_v28, 4  ;;  %v13461_v54 = vadd.f32 %v13460_v58, %v13459_v25 }
 0x377   : > { %v3903_v3 = vshll.u32 %v3653_v40, 16  ;;  %v3635_v44 = vsel %vm17904_vm1, %v13458_v2, 0.0  ;;  %v3902_v8 = vrot.slane %v3900_v48, 3  ;;  %v3914_v31 = vrot.slane %v3912_v35, 4 }
 0x378   : > { %v3941_v37 = vsel %vm22011_vm11, %v3932_v32, %v17950_v0  ;;  %v3604_v41 = vsel %vm17912_vm8, %v13461_v54, 0.0  ;;  %v17960_v17 = vpack.c.bf16 %v13461_v54, %v13458_v2  ;;  %v3636_v62 = vsel %vm17916_vm0, %v13461_v54, 0.0 }
 0x379   : > { %4725 = vmatprep.mubr.bf16.mxu0 %v3941_v37  ;;  %v3905_v15 = vrot.slane %v3903_v3, 4  ;;  %v3603_v25 = vsel %vm17924_vm3, %v13458_v2, 0.0  ;;  %v17966_v24 = vpack.c.bf16 %v3636_v62, %v3635_v44  ;;  %v3898_v34 = vor.u32 %v3897_v45, %v17920_v23  ;;  %v15419_v23 = vld [vmem:[%s22293_s26 + $0x138] sm:$0xff]  }
 0x37a   : > { %v3919_v32 = vrot.slane %v3917_v11, 3  ;;  %v17969_v40 = vpack.c.bf16 %v3604_v41, %v3603_v25  ;;  %v21980_v35 = vshll.u32 %v17960_v17, 16  ;;  %v3922_v48 = vrot.slane %v3920_v52, 4  ;;  %v15420_v41 = vld [vmem:[%s22293_s26 + $0x1f0] sm:$0xff]  }
 0x37b   : > { %v17972_v58 = vor.u32 %v3905_v15, %v3902_v8  ;;  %v3664_v39 = vor.u32 %v3662_v28, %v3660_v1  ;;  %v17974_v56 = vrot.slane %v3658_v30, 5  ;;  %v3915_v54 = vor.u32 %v3914_v31, %v17909_v7  ;;  %v15418_v28 = vld [vmem:[%s22293_s26 + $0x1b8] sm:$0xff]  }
 0x37c   : > { %v17979_v2 = vor.u32 %v17899_v36, %v17874_v22  ;;  %v3668_v11 = vrot.slane %v21980_v35, 1  ;;  %v21981_v45 = vshrl.u32 %v17960_v17, 16  ;;  %v17988_v52 = vrot.slane %v17966_v24, 1  ;;  %v15421_v22 = vld [vmem:[%s22293_s26 + $0x170] sm:$0xff]  }
 0x37d   : > { %v3907_v30 = vsel %vm22011_vm11, %v3898_v34, %v17972_v58  ;;  %v3923_v36 = vor.u32 %v3922_v48, %v3919_v32  ;;  %v22397_v3 = vrot.slane %v17895_v46, 4  ;;  %v3661_v37 = vsel %vm22396_vm4, %v3656_v61, %v3660_v1  ;;  %v15423_v61 = vld [vmem:[%s22293_s26 + $0x130] sm:$0xff]  }
 0x37e   : > { %4660 = vmatprep.mubr.bf16.mxu1 %v3907_v30  ;;  %v3890_v7 = vsel %vm22011_vm11, %v17872_v63, %v17979_v2  ;;  %v18009_v8 = vor.u32 %v21981_v45, %v3668_v11  ;;  %v18012_v31 = vrot.slane %v17969_v40, 4  ;;  %v3986_v1 = vshrl.u32 %v3661_v37, 16 }
 0x37f   : > { %v3696_v44 = vsel %vm22394_vm6, %v22397_v3, %v21982_v4  ;;  %4661 = vmatmul.mubr.bf16.vlgmr.msra.gmra.mxu1 %v3890_v7  ;;  %v3924_v25 = vsel %vm22011_vm11, %v3915_v54, %v3923_v36  ;;  %v3989_v34 = vshll.u32 %v3661_v37, 16  ;;  %v22398_v32 = vrot.slane %v17942_v13, 1  ;;  %v15425_v54 = vld [vmem:[%s22293_s26 + $0x168] sm:$0xff]  }
 0x380   : > { %v4004_v62 = vshrl.u32 %v3696_v44, 16  ;;  %v4007_v15 = vshll.u32 %v3696_v44, 16  ;;  %13543 = vmatpush3.bf16.msra.mxu1 %v15419_v23  ;;  %v22399_v48 = vrot.slane %v17897_v26, 1  ;;  %vm22400_vm6 = vcmask 1046528   ;;  %4726 = vmatmul.mubr.bf16.vlgmr.msra.gmra.mxu0 %v3924_v25  ;;  %v15422_v23 = vld [vmem:[%s22293_s26 + $0x1b0] sm:$0xff]  }
 0x381   : > { %13544 = vmatprep.subr.bf16.mxu1 %v15421_v22  ;;  %13583 = vmatpush3.bf16.msra.mxu0 %v15418_v28  ;;  %v3988_v37 = vrot.slane %v3986_v1, 3  ;;  %v3991_v45 = vrot.slane %v3989_v34, 4  ;;  %v3977_v4 = vshrl.u32 %v17895_v46, 16  ;;  %v3980_v25 = vshll.u32 %v17895_v46, 16  ;;  %v15427_v46 = vld [vmem:[%s22293_s26 + $0x128] sm:$0xff]  }
 0x382   : > { %v3682_v30 = vsel %vm22400_vm6, %v22399_v48, %v22398_v32  ;;  %v4006_v7 = vrot.slane %v4004_v62, 3  ;;  %v4009_v3 = vrot.slane %v4007_v15, 4  ;;  %13584 = vmatprep.subr.bf16.mxu0 %v15420_v41  ;;  %v15424_v32 = vld [vmem:[%s22293_s26 + $0x1e8] sm:$0xff]   ;;  %v22401_v28 = vrot.slane %v17940_v49, 4 }
 0x383   : > { %v3995_v44 = vshrl.u32 %v3682_v30, 16  ;;  %v3998_v35 = vshll.u32 %v3682_v30, 16  ;;  %vm22402_vm4 = vcmask 1043456   ;;  %v3992_v1 = vor.u32 %v3991_v45, %v3988_v37 }
 0x384   : > { %v4010_v22 = vor.u32 %v4009_v3, %v4006_v7  ;;  %v3698_v48 = vsel %vm22402_vm4, %v22401_v28, %v18012_v31  ;;  %13545 = vmatpush3.bf16.msra.mxu1 %v15423_v61  ;;  %v3979_v34 = vrot.slane %v3977_v4, 3  ;;  %v3982_v30 = vrot.slane %v3980_v25, 4  ;;  %v15426_v61 = vld [vmem:[%s22293_s26 + $0x1a8] sm:$0xff]  }
 0x385   : > { %v3997_v62 = vrot.slane %v3995_v44, 3  ;;  %v4000_v15 = vrot.slane %v3998_v35, 4  ;;  %v4058_v41 = vshrl.u32 %v3698_v48, 16  ;;  %13546 = vmatprep.subr.bf16.mxu1 %v15425_v54  ;;  %v4061_v3 = vshll.u32 %v3698_v48, 16  ;;  %13585 = vmatpush3.bf16.msra.mxu0 %v15422_v23 }
 0x386   : > { %v4011_v35 = vsel %vm22011_vm11, %v17950_v0, %v4010_v22  ;;  %vm22403_vm6 = vsmask.f32 7424  ;;  %vm22015_vm9 = vcmask 1042432   ;;  %v18049_v4 = vsel %vm22011_vm11, %v17972_v58, %v3992_v1  ;;  %v15429_v0 = vld [vmem:[%s22293_s26 + $0x160] sm:$0xff]   ;;  %13586 = vmatprep.subr.bf16.mxu0 %v15424_v32 }
 0x387   : > { %v4001_v7 = vor.u32 %v4000_v15, %v3997_v62  ;;  %v3669_v44 = vsel %vm22403_vm6, %v3664_v39, %v3668_v11  ;;  %4733 = vmatprep.mubr.bf16.mxu0 %v4011_v35  ;;  %v3983_v45 = vor.u32 %v3982_v30, %v3979_v34  ;;  %v4060_v54 = vrot.slane %v4058_v41, 3  ;;  %4668 = vmatprep.mubr.bf16.mxu1 %v18049_v4  ;;  %v15428_v58 = vld [vmem:[%s22293_s26 + $0x1e0] sm:$0xff]  }
 0x388   : > { %v4040_v37 = vshrl.u32 %v3669_v44, 16  ;;  %v4063_v11 = vrot.slane %v4061_v3, 4  ;;  %v4043_v23 = vshll.u32 %v3669_v44, 16  ;;  %v22404_v25 = vrot.slane %v17942_v13, 1  ;;  %13547 = vmatpush3.bf16.msra.mxu1 %v15427_v46  ;;  %v15433_v46 = vld [vmem:[%s22293_s26 + $0x158] sm:$0xff]   ;;  %v15430_v35 = vld [vmem:[%s22293_s26 + $0x1a0] sm:$0xff]  }
 0x389   : > { %v18059_v39 = vsel %vm22011_vm11, %v3923_v36, %v4001_v7  ;;  %vm22405_vm4 = vcmask 1046528   ;;  %v18070_v15 = vsel %vm22011_vm11, %v17979_v2, %v3983_v45  ;;  %v15431_v36 = vld [vmem:[%s22293_s26 + $0x120] sm:$0xff]   ;;  %vm22014_vm6 = vsmask.f32 3328  ;;  %13587 = vmatpush3.bf16.msra.mxu0 %v15426_v61  ;;  %13548 = vmatprep.subr.bf16.mxu1 %v15429_v0  ;;  %v15432_v61 = vld [vmem:[%s22293_s26 + $0x1d8] sm:$0xff]  }
 0x38a   : > { %v3684_v62 = vsel %vm22405_vm4, %v22404_v25, %v17988_v52  ;;  %v4042_v32 = vrot.slane %v4040_v37, 3  ;;  %4734 = vmatmul.mubr.bf16.gmra.mxu0 %v18059_v39  ;;  %4669 = vmatmul.mubr.bf16.gmra.mxu1 %v18070_v15  ;;  %v4064_v34 = vor.u32 %v4063_v11, %v4060_v54  ;;  %v4045_v30 = vrot.slane %v4043_v23, 4 }
 0x38b   : > { %v4049_v28 = vshrl.u32 %v3684_v62, 16  ;;  %v4052_v48 = vshll.u32 %v3684_v62, 16  ;;  %v4031_v41 = vshrl.u32 %v17940_v49, 16  ;;  %v4034_v2 = vshll.u32 %v17940_v49, 16  ;;  %13588 = vmatprep.subr.bf16.mxu0 %v15428_v58  ;;  %v15435_v62 = vld [vmem:[%s22293_s26 + $0x118] sm:$0xff]  }
 0x38c   : > { %v4130_v37 = vshrl.u32 %v18012_v31, 16  ;;  %v4133_v54 = vshll.u32 %v18012_v31, 16  ;;  %v4065_v11 = vsel %vm22011_vm11, %v4010_v22, %v4064_v34  ;;  %v18088_v49 = vor.u32 %v4045_v30, %v4042_v32  ;;  %13549 = vmatpush3.bf16.msra.mxu1 %v15431_v36 }
 0x38d   : > { %v4051_v3 = vrot.slane %v4049_v28, 3  ;;  %v4054_v44 = vrot.slane %v4052_v48, 4  ;;  %v4033_v0 = vrot.slane %v4031_v41, 3  ;;  %v4036_v23 = vrot.slane %v4034_v2, 4  ;;  %4741 = vmatprep.mubr.bf16.mxu0 %v4065_v11  ;;  %13550 = vmatprep.subr.bf16.mxu1 %v15433_v46  ;;  %v15434_v41 = vld [vmem:[%s22293_s26 + $0x198] sm:$0xff]   ;;  %v15439_v11 = vld [vmem:[%s22293_s26 + $0x110] sm:$0xff]  }
 0x38e   : > { %v4132_v31 = vrot.slane %v4130_v37, 3  ;;  %v4135_v58 = vrot.slane %v4133_v54, 4  ;;  %v4112_v22 = vshrl.u32 %v18009_v8, 16  ;;  %v18101_v32 = vsel %vm22011_vm11, %v3992_v1, %v18088_v49  ;;  %13589 = vmatpush3.bf16.msra.mxu0 %v15430_v35  ;;  %v15437_v1 = vld [vmem:[%s22293_s26 + $0x150] sm:$0xff]  }
 0x38f   : > { %v18093_v25 = vor.u32 %v4054_v44, %v4051_v3  ;;  %v18103_v28 = vor.u32 %v4036_v23, %v4033_v0  ;;  %v4115_v36 = vshll.u32 %v18009_v8, 16  ;;  %v4121_v48 = vshrl.u32 %v17988_v52, 16  ;;  %4676 = vmatprep.mubr.bf16.mxu1 %v18101_v32  ;;  %13590 = vmatprep.subr.bf16.mxu0 %v15432_v61 }
 0x390   : > { %v4136_v2 = vor.u32 %v4135_v58, %v4132_v31  ;;  %v4114_v46 = vrot.slane %v4112_v22, 3  ;;  %v4124_v3 = vshll.u32 %v17988_v52, 16  ;;  %v4085_v54 = vshrl.u32 %v17969_v40, 16  ;;  %13551 = vmatpush3.bf16.msra.mxu1 %v15435_v62  ;;  %v15441_v22 = vld [vmem:[%s22293_s26 + $0x148] sm:$0xff]  }
 0x391   : > { %v18110_v30 = vsel %vm22011_vm11, %v4001_v7, %v18093_v25  ;;  %v18121_v35 = vsel %vm22011_vm11, %v3983_v45, %v18103_v28  ;;  %v15436_v7 = vld [vmem:[%s22293_s26 + $0x1d0] sm:$0xff]   ;;  %v4117_v44 = vrot.slane %v4115_v36, 4  ;;  %v4123_v37 = vrot.slane %v4121_v48, 3  ;;  %13552 = vmatprep.subr.bf16.mxu1 %v15437_v1 }
 0x392   : > { %v4137_v0 = vsel %vm22011_vm11, %v4064_v34, %v4136_v2  ;;  %v4126_v61 = vrot.slane %v4124_v3, 4  ;;  %v4088_v23 = vshll.u32 %v17969_v40, 16  ;;  %v22406_v45 = vrot.slane %v17897_v26, 5  ;;  %4742 = vmatmul.mubr.bf16.gmra.mxu0 %v18110_v30  ;;  %4677 = vmatmul.mubr.bf16.gmra.mxu1 %v18121_v35  ;;  %v15438_v40 = vld [vmem:[%s22293_s26 + $0x190] sm:$0xff]  }
 0x393   : > { %v4118_v58 = vor.u32 %v4117_v44, %v4114_v46  ;;  %v4087_v62 = vrot.slane %v4085_v54, 3  ;;  %v3960_v34 = vshrl.u32 %v17862_v60, 16  ;;  %v3963_v36 = vshll.u32 %v17862_v60, 16  ;;  %13591 = vmatpush3.bf16.msra.mxu0 %v15434_v41  ;;  %4749 = vmatprep.mubr.bf16.mxu0 %v4137_v0  ;;  %v15440_v44 = vld [vmem:[%s22293_s26 + $0x1c8] sm:$0xff]  }
 0x394   : > { %v3718_v31 = vsel %vm22015_vm9, %v17862_v60, %v22406_v45  ;;  %v4127_v48 = vor.u32 %v4126_v61, %v4123_v37  ;;  %v4090_v2 = vrot.slane %v4088_v23, 4  ;;  %13592 = vmatprep.subr.bf16.mxu0 %v15436_v7  ;;  %v3706_v1 = vsel %vm22014_vm6, %v17893_v14, %v17945_v16  ;;  %13553 = vmatpush3.bf16.msra.mxu1 %v15439_v11  ;;  %v15443_v54 = vld [vmem:[%s22293_s26 + $0x108] sm:$0xff]  }
 0x395   : > { %v3968_v3 = vshrl.u32 %v3718_v31, 16  ;;  %v3971_v45 = vshll.u32 %v3718_v31, 16  ;;  %v4119_v46 = vsel %vm22011_vm11, %v18088_v49, %v4118_v58  ;;  %v3962_v60 = vrot.slane %v3960_v34, 3  ;;  %13554 = vmatprep.subr.bf16.mxu1 %v15441_v22  ;;  %v15442_v11 = vld [vmem:[%s22293_s26 + $0x188] sm:$0xff]  }
 0x396   : > { %v3965_v41 = vrot.slane %v3963_v36, 4  ;;  %v18156_v37 = vor.u32 %v17974_v56, %v17952_v19  ;;  %4684 = vmatprep.mubr.bf16.mxu1 %v4119_v46  ;;  %v18158_v7 = vor.u32 %v4090_v2, %v4087_v62  ;;  %v3721_v23 = vrot.slane %v17966_v24, 5  ;;  %v15444_v46 = vld [vmem:[%s22293_s26 + $0x1c0] sm:$0xff]  }
 0x397   : > { %v3970_v0 = vrot.slane %v3968_v3, 3  ;;  %v3973_v61 = vrot.slane %v3971_v45, 4  ;;  %v3943_v31 = vshrl.u32 %v17893_v14, 16  ;;  %v3946_v58 = vshll.u32 %v17893_v14, 16  ;;  %13593 = vmatpush3.bf16.msra.mxu0 %v15438_v40 }
 0x398   : > { %v3951_v34 = vshrl.u32 %v3706_v1, 16  ;;  %v22407_v56 = vshrl.u32 %v17960_v17, 16  ;;  %v3954_v36 = vshll.u32 %v3706_v1, 16  ;;  %v22408_v2 = vrot.slane %v17942_v13, 5  ;;  %13594 = vmatprep.subr.bf16.mxu0 %v15440_v44  ;;  %13555 = vmatpush3.bf16.msra.mxu1 %v15443_v54 }
 0x399   : > { %v3974_v62 = vor.u32 %v3973_v61, %v3970_v0  ;;  %v22409_v3 = vrot.slane %v17897_v26, 5  ;;  %v4128_v14 = vsel %vm22011_vm11, %v18093_v25, %v4127_v48  ;;  %v18181_v40 = vsel %vm22011_vm11, %v18103_v28, %v18158_v7  ;;  %v15445_v26 = vld [vmem:[%s22293_s26 + $0x140] sm:$0xff]  }
 0x39a   : > { %v3711_v19 = vrot.slane %v22407_v56, 4  ;;  %v3966_v45 = vor.u32 %v3965_v41, %v3962_v60  ;;  %v3953_v0 = vrot.slane %v3951_v34, 3  ;;  %v3956_v61 = vrot.slane %v3954_v36, 4  ;;  %4750 = vmatmul.mubr.bf16.gmra.mxu0 %v4128_v14  ;;  %4685 = vmatmul.mubr.bf16.gmra.mxu1 %v18181_v40  ;;  %v15447_v41 = vld [vmem:[%s22293_s26 + $0x100] sm:$0xff]  }
 0x39b   : > { %v3720_v22 = vsel %vm22015_vm9, %v22409_v3, %v22408_v2  ;;  %v3710_v44 = vsel %vm22014_vm6, %v17945_v16, %v18156_v37  ;;  %v22410_v28 = vshll.u32 %v17960_v17, 16  ;;  %v3945_v54 = vrot.slane %v3943_v31, 3  ;;  %13595 = vmatpush3.bf16.msra.mxu0 %v15442_v11  ;;  %4855 = vmatprep.mubr.bf16.mxu0 %v18049_v4  ;;  %v15446_v16 = vld [vmem:[%s22293_s26 + $0x180] sm:$0xff]   ;;  %v15448_v17 = vld [vmem:[%s22293_s26 + $0x238] sm:$0xff]  }
 0x39c   : > { %v4022_v1 = vshrl.u32 %v3720_v22, 16  ;;  %v4025_v48 = vshll.u32 %v3720_v22, 16  ;;  %v3948_v56 = vrot.slane %v3946_v58, 4  ;;  %v3975_v34 = vsel %vm22011_vm11, %v3966_v45, %v3974_v62  ;;  %13596 = vmatprep.subr.bf16.mxu0 %v15444_v46  ;;  %13556 = vmatprep.subr.bf16.mxu1 %v15445_v26  ;;  %v15449_v26 = vld [vmem:[%s22293_s26 + $0x230] sm:$0xff]  }
 0x39d   : > { %v3712_v60 = vrot.slane %v22410_v28, 5  ;;  %vm22411_vm4 = vsmask.f32 7424  ;;  %v22412_v58 = vrot.slane %v17942_v13, 5  ;;  %4790 = vmatprep.mubr.bf16.mxu1 %v3975_v34  ;;  %v4013_v11 = vshrl.u32 %v3710_v44, 16  ;;  %13557 = vmatpush3.bf16.msra.mxu1 %v15447_v41 }
 0x39e   : > { %v4024_v2 = vrot.slane %v4022_v1, 3  ;;  %v4027_v36 = vrot.slane %v4025_v48, 4  ;;  %v3725_v31 = vsel %vm22411_vm4, %v18009_v8, %v22380_v57  ;;  %v3957_v3 = vor.u32 %v3956_v61, %v3953_v0  ;;  %14694 = vmatprep.subr.bf16.mxu1 %v15448_v17 }
 0x39f   : > { %v3722_v4 = vsel %vm22015_vm9, %v22412_v58, %v3721_v23  ;;  %v4016_v22 = vshll.u32 %v3710_v44, 16  ;;  %v4094_v14 = vshrl.u32 %v3725_v31, 16  ;;  %v4097_v45 = vshll.u32 %v3725_v31, 16  ;;  %13597 = vmatpush3.bf16.msra.mxu0 %v15446_v16 }
 0x3a0   : > { %v18214_v1 = vor.u32 %v3712_v60, %v3711_v19  ;;  %v4028_v48 = vor.u32 %v4027_v36, %v4024_v2  ;;  %v4076_v28 = vshrl.u32 %v3722_v4, 16  ;;  %v4079_v8 = vshll.u32 %v3722_v4, 16 }
 0x3a1   : > { %v3949_v59 = vor.u32 %v3948_v56, %v3945_v54  ;;  %v18217_v13 = vrot.slane %v22351_v6, 5  ;;  %v4015_v34 = vrot.slane %v4013_v11, 3  ;;  %v4018_v0 = vrot.slane %v4016_v22, 4 }
 0x3a2   : > { %v4096_v19 = vrot.slane %v4094_v14, 3  ;;  %v4099_v61 = vrot.slane %v4097_v45, 4  ;;  %4856 = vmatmul.mubr.bf16.vlgmr.msra.gmra.mxu0 %v18070_v15  ;;  %v4029_v44 = vsel %vm22011_vm11, %v3974_v62, %v4028_v48  ;;  %v4078_v60 = vrot.slane %v4076_v28, 3  ;;  %v15450_v62 = vld [vmem:[%s22293_s26 + $0x228] sm:$0xff]  }
 0x3a3   : > { %22413 = vst [vmem:[#allocation67_spill] sm:$0xff] %v18217_v13  ;;  %v3958_v46 = vsel %vm22011_vm11, %v3949_v59, %v3957_v3  ;;  %v4081_v41 = vrot.slane %v4079_v8, 4  ;;  %v3714_v6 = vsel %vm22014_vm6, %v18156_v37, %v18214_v1  ;;  %4863 = vmatprep.mubr.bf16.mxu0 %v18101_v32  ;;  %v3724_v59 = vsel %vm22015_vm9, %v3721_v23, %v18217_v13  ;;  %v15451_v23 = vld [vmem:[%s22293_s26 + $0x220] sm:$0xff]   ;;  %v15452_v8 = vld [vmem:[%s22293_s26 + $0x218] sm:$0xff]  }
 0x3a4   : > { %4791 = vmatmul.mubr.bf16.vlgmr.msra.gmra.mxu1 %v3958_v46  ;;  %v4019_v15 = vor.u32 %v4018_v0, %v4015_v34  ;;  %v4067_v54 = vshrl.u32 %v3714_v6, 16  ;;  %v4070_v56 = vshll.u32 %v3714_v6, 16  ;;  %v4100_v2 = vor.u32 %v4099_v61, %v4096_v19 }
 0x3a5   : > { %4798 = vmatprep.mubr.bf16.mxu1 %v4029_v44  ;;  %14695 = vmatpush3.bf16.msra.mxu1 %v15448_v17  ;;  %v4082_v16 = vor.u32 %v4081_v41, %v4078_v60  ;;  %v4148_v37 = vshrl.u32 %v3724_v59, 16  ;;  %v4151_v36 = vshll.u32 %v3724_v59, 16  ;;  %v22414_v32 = vshrl.u32 %v22380_v57, 16  ;;  %v15454_v41 = vld [vmem:[%s22293_s26 + $0x208] sm:$0xff]  }
 0x3a6   : > { %14696 = vmatprep.subr.bf16.mxu1 %v15449_v26  ;;  %v4020_v24 = vsel %vm22011_vm11, %v3957_v3, %v4019_v15  ;;  %v4069_v17 = vrot.slane %v4067_v54, 3  ;;  %v4072_v58 = vrot.slane %v4070_v56, 4  ;;  %v22415_v4 = vshll.u32 %v22380_v57, 16 }
 0x3a7   : > { %v4157_v31 = vrot.slane %v22414_v32, 3  ;;  %v4101_v22 = vsel %vm22011_vm11, %v18088_v49, %v4100_v2  ;;  %v4083_v14 = vsel %vm22011_vm11, %v4028_v48, %v4082_v16  ;;  %v4150_v45 = vrot.slane %v4148_v37, 3 }
 0x3a8   : > { %v4158_v11 = vrot.slane %v22415_v4, 4  ;;  %v4153_v3 = vrot.slane %v4151_v36, 4  ;;  %v4073_v28 = vor.u32 %v4072_v58, %v4069_v17  ;;  %v4139_v34 = vshrl.u32 %v18214_v1, 16  ;;  %v15467_v17 = vld [vmem:[%s22421_s4 + $0x68] sm:$0xff]  }
 0x3a9   : > { %14697 = vmatpush3.bf16.msra.mxu1 %v15449_v26  ;;  %v15453_v26 = vld [vmem:[%s22293_s26 + $0x210] sm:$0xff]   ;;  %vm22417_vm4 = vcmask 1046528   ;;  %v4156_v59 = vsel %vm22011_vm11, %v18158_v7, %v17872_v63  ;;  %v15468_v58 = vld [vmem:[%s22421_s4 + $0x28] sm:$0xff]   ;;  %vm22024_vm7 = vsmask.f32 6400  ;;  %vm22445_vm1 = vcmask 1046528  }
 0x3aa   : > { %14698 = vmatprep.subr.bf16.mxu1 %v15450_v62  ;;  %4864 = vmatmul.mubr.bf16.gmra.mxu0 %v18121_v35  ;;  %v4142_v35 = vshll.u32 %v18214_v1, 16  ;;  %v18253_v46 = vor.u32 %v4158_v11, %v4157_v31  ;;  %v4154_v49 = vor.u32 %v4153_v3, %v4150_v45  ;;  %v4074_v48 = vsel %vm22011_vm11, %v4019_v15, %v4073_v28 }
 0x3ab   : > { %4871 = vmatprep.mubr.bf16.mxu0 %v4101_v22  ;;  %v4141_v0 = vrot.slane %v4139_v34, 3  ;;  %v3726_v44 = vsel %vm22417_vm4, %v17988_v52, %v22370_v53  ;;  %v15455_v52 = vld [vmem:[%s22293_s26 + $0x200] sm:$0xff]   ;;  %v21985_v31 = vmov 0.0   ;;  %vm22012_vm4 = vmmov 0  }
 0x3ac   : > { %4799 = vmatmul.mubr.bf16.gmra.mxu1 %v4020_v24  ;;  %22416 = vst [vmem:[#allocation68_spill] sm:$0xff] %v18253_v46  ;;  %v4144_v19 = vrot.slane %v4142_v35, 4  ;;  %v4160_v61 = vsel %vm22011_vm11, %v4100_v2, %v18253_v46  ;;  %v4155_v1 = vsel %vm22011_vm11, %v4082_v16, %v4154_v49  ;;  %v4106_v6 = vshll.u32 %v3726_v44, 16  ;;  %v15463_v24 = vld [vmem:[%s22421_s4 + $0x70] sm:$0xff]   ;;  %v18312_v22 = vld [vmem:[%s22422_s3] ss:$0 sm:$0xff] }
 0x3ad   : > { %4806 = vmatprep.mubr.bf16.mxu1 %v4083_v14  ;;  %14699 = vmatpush3.bf16.msra.mxu1 %v15450_v62  ;;  %v22418_v2 = vshrl.u32 %v22370_v53, 16  ;;  %v22419_v16 = vshll.u32 %v22370_v53, 16  ;;  %vm22446_vm3 = vcmask 1042432   ;;  %vm22447_vm10 = vcmask 1045504  }
 0x3ae   : > { %14700 = vmatprep.subr.bf16.mxu1 %v15451_v23  ;;  %v4145_v60 = vor.u32 %v4144_v19, %v4141_v0  ;;  %v4108_v54 = vrot.slane %v4106_v6, 4  ;;  %vm6110_vm0 = vcmask 130048  }
 0x3af   : > { %v4161_v7 = vrot.slane %v22418_v2, 3  ;;  %v4164_v37 = vrot.slane %v22419_v16, 4 }
 0x3b0   : > { %v4146_v15 = vsel %vm22011_vm11, %v4073_v28, %v4145_v60 }
 0x3b1   : > { %14701 = vmatpush3.bf16.msra.mxu1 %v15451_v23  ;;  %v18284_v32 = vor.u32 %v4164_v37, %v4161_v7  ;;  %v15464_v23 = vld [vmem:[%s22421_s4 + $0x30] sm:$0xff]  }
 0x3b2   : > { %14702 = vmatprep.subr.bf16.mxu1 %v15452_v8  ;;  %4872 = vmatmul.mubr.bf16.gmra.mxu0 %v18181_v40  ;;  %v4103_v40 = vshrl.u32 %v3726_v44, 16 }
 0x3b3   : > { %4879 = vmatprep.mubr.bf16.mxu0 %v4160_v61  ;;  %22420 = vst [vmem:[#allocation69_spill] sm:$0xff] %v18284_v32 }
 0x3b4   : > { %4807 = vmatmul.mubr.bf16.gmra.mxu1 %v4074_v48  ;;  %v4105_v62 = vrot.slane %v4103_v40, 3 }
 0x3b5   : > { %4814 = vmatprep.mubr.bf16.mxu1 %v4155_v1  ;;  %14703 = vmatpush3.bf16.msra.mxu1 %v15452_v8 }
 0x3b6   : > { %14704 = vmatprep.subr.bf16.mxu1 %v15453_v26  ;;  %v4109_v56 = vor.u32 %v4108_v54, %v4105_v62 }
 0x3b8   : > { %v4110_v36 = vsel %vm22011_vm11, %v18093_v25, %v4109_v56  ;;  %v15460_v25 = vld [vmem:[%s22421_s4 + $0x38] sm:$0xff]  }
 0x3b9   : > { %14705 = vmatpush3.bf16.msra.mxu1 %v15453_v26 }
 0x3ba   : > { %14706 = vmatprep.subr.bf16.mxu1 %v15454_v41  ;;  %4880 = vmatmul.mubr.bf16.gmra.mxu0 %v4156_v59 }
 0x3bc   : > { %4815 = vmatmul.mubr.bf16.gmra.mxu1 %v4146_v15 }
 0x3bd   : > { %14710 = vmatprep.mubr.bf16.mxu1 %v18059_v39  ;;  %14707 = vmatpush3.bf16.msra.mxu1 %v15454_v41  ;;  %v4166_v39 = vsel %vm22011_vm11, %v4109_v56, %v18284_v32  ;;  %vm22427_vm11 = vcmask 1046528  }
 0x3be   : > { %14708 = vmatprep.subr.bf16.mxu1 %v15455_v52 }
 0x3c1   : > { %14709 = vmatpush3.bf16.msra.mxu1 %v15455_v52 }
 0x3c2   : > { %14718 = vmatprep.subr.bf16.mxu1 %v21985_v31 }
 0x3c4   : > { %14711 = vmatmul.mubr.bf16.vlgmr.msra.gmra.mxu1 %v18110_v30  ;;  %v15459_v30 = vld [vmem:[%s22421_s4 + $0x78] sm:$0xff]  }
 0x3c5   : > { %14714 = vmatprep.mubr.bf16.mxu1 %v4110_v36  ;;  %13639 = vmatprep.subr.bf16.mxu0 %v15459_v30 }
 0x3c6   : > { %13640 = vmatpush3.bf16.msra.mxu0 %v15460_v25 }
 0x3c7   : > { %13641 = vmatprep.subr.bf16.mxu0 %v15463_v24 }
 0x3ca   : > { %13642 = vmatpush3.bf16.msra.mxu0 %v15464_v23 }
 0x3cb   : > { %13643 = vmatprep.subr.bf16.mxu0 %v15467_v17 }
 0x3cc   : > { %14715 = vmatmul.mubr.bf16.gmra.mxu1 %v4166_v39 }
 0x3cd   : > { %14726 = vmatprep.mubr.msk.bf16.mxu1 %vm22012_vm4, %v21985_v31  ;;  %vm22428_vm4 = vmmov %vm22427_vm11 }
 0x3ce   : > { %13644 = vmatpush3.bf16.msra.mxu0 %v15468_v58  ;;  %vm22429_vm6 = vmmov %vm22428_vm4 }
 0x3cf   : > { %vm22432_vm9 = vmmov %vm22428_vm4 }
 0x3d0   : > { %vm22433_vm2 = vmmov %vm22428_vm4 }
 0x43f   : > { %v13478_v4 = vpop.f32.mrf.mxu1 }
 0x440   : > { %v13518_v11 = vpop.f32.mrf.mxu0 }
 0x441   : > { %v13479_v14 = vpop.f32.mrf.mxu1 }
 0x442   : > { %v13480_v45 = vadd.f32 %v13479_v14, %v13478_v4  ;;  %v13519_v3 = vpop.f32.mrf.mxu0 }
 0x443   : > { %v13481_v28 = vpop.f32.mrf.mxu1  ;;  %v13520_v8 = vadd.f32 %v13519_v3, %v13518_v11 }
 0x444   : > { %v4663_v34 = vadd.f32 %v13480_v45, %v18312_v22  ;;  %v13521_v35 = vpop.f32.mrf.mxu0 }
 0x445   : > { %v13482_v49 = vpop.f32.mrf.mxu1 }
 0x446   : > { %v13483_v48 = vadd.f32 %v13482_v49, %v13481_v28  ;;  %v18315_v26 = vadd.f32 %v13520_v8, %v4663_v34  ;;  %v13522_v0 = vpop.f32.mrf.mxu0 }
 0x447   : > { %v13523_v19 = vadd.f32 %v13522_v0, %v13521_v35 }
 0x448   : > { %v4666_v61 = vadd.f32 %v13483_v48, %v18312_v22 }
 0x44a   : > { %v13524_v1 = vpop.f32.mrf.mxu0  ;;  %v13484_v44 = vpop.f32.mrf.mxu1  ;;  %v18318_v60 = vadd.f32 %v13523_v19, %v4666_v61 }
 0x44c   : > { %v13525_v41 = vpop.f32.mrf.mxu0  ;;  %v13485_v40 = vpop.f32.mrf.mxu1 }
 0x44d   : > { %v13486_v6 = vadd.f32 %v13485_v40, %v13484_v44  ;;  %v13526_v27 = vadd.f32 %v13525_v41, %v13524_v1 }
 0x44e   : > { %v13527_v59 = vpop.f32.mrf.mxu0  ;;  %v13487_v15 = vpop.f32.mrf.mxu1 }
 0x44f   : > { %v4671_v18 = vadd.f32 %v13486_v6, %v18312_v22 }
 0x450   : > { %v13528_v52 = vpop.f32.mrf.mxu0  ;;  %v13488_v62 = vpop.f32.mrf.mxu1 }
 0x451   : > { %v13489_v50 = vadd.f32 %v13488_v62, %v13487_v15  ;;  %v4736_v21 = vadd.f32 %v13526_v27, %v4671_v18  ;;  %v13529_v51 = vadd.f32 %v13528_v52, %v13527_v59 }
 0x452   : > { %v18320_v54 = vpop.f32.mrf.mxu0  ;;  %v13490_v56 = vpop.f32.mrf.mxu1 }
 0x453   : > { %v4674_v9 = vadd.f32 %v13489_v50, %v18312_v22 }
 0x454   : > { %v18322_v2 = vpop.f32.mrf.mxu0  ;;  %v13491_v7 = vpop.f32.mrf.mxu1 }
 0x455   : > { %v13492_v12 = vadd.f32 %v13491_v7, %v13490_v56  ;;  %v4739_v62 = vadd.f32 %v13529_v51, %v4674_v9 }
 0x456   : > { %v18324_v16 = vpop.f32.mrf.mxu0  ;;  %v13493_v37 = vpop.f32.mrf.mxu1 }
 0x458   : > { %v18326_v36 = vpop.f32.mrf.mxu0  ;;  %v13494_v39 = vpop.f32.mrf.mxu1 }
 0x459   : > { %v13495_v50 = vadd.f32 %v13494_v39, %v13493_v37 }
 0x45a   : > { %v13536_v30 = vpop.f32.mrf.mxu0  ;;  %v13496_v25 = vpop.f32.mrf.mxu1 }
 0x45b   : > { %v4682_v37 = vadd.f32 %v13495_v50, %v18312_v22 }
 0x45c   : > { %v13537_v24 = vpop.f32.mrf.mxu0  ;;  %v13497_v23 = vpop.f32.mrf.mxu1 }
 0x45d   : > { %v13498_v33 = vadd.f32 %v13497_v23, %v13496_v25  ;;  %v4679_v25 = vadd.f32 %v13492_v12, %v18312_v22  ;;  %v13538_v23 = vadd.f32 %v13537_v24, %v13536_v30  ;;  %v13535_v12 = vadd.f32 %v18326_v36, %v18324_v16 }
 0x45e   : > { %v18328_v17 = vpop.f32.mrf.mxu0  ;;  %v13499_v58 = vpop.f32.mrf.mxu1 }
 0x45f   : > { %v4687_v6 = vadd.f32 %v13498_v33, %v18312_v22 }
 0x460   : > { %v18330_v4 = vpop.f32.mrf.mxu0  ;;  %v13500_v11 = vpop.f32.mrf.mxu1 }
 0x461   : > { %v13501_v18 = vadd.f32 %v13500_v11, %v13499_v58  ;;  %v4752_v52 = vadd.f32 %v13538_v23, %v4687_v6 }
 0x462   : > { %v13598_v14 = vpop.f32.mrf.mxu0 }
 0x464   : > { %v13558_v45 = vpop.f32.mrf.mxu1  ;;  %v13599_v3 = vpop.f32.mrf.mxu0 }
 0x465   : > { %v13600_v27 = vadd.f32 %v13599_v3, %v13598_v14 }
 0x466   : > { %v13559_v28 = vpop.f32.mrf.mxu1  ;;  %v18332_v8 = vpop.f32.mrf.mxu0 }
 0x467   : > { %v13560_v47 = vadd.f32 %v13559_v28, %v13558_v45  ;;  %v4747_v45 = vadd.f32 %v13535_v12, %v4682_v37 }
 0x468   : > { %v13561_v34 = vpop.f32.mrf.mxu1  ;;  %v13602_v35 = vpop.f32.mrf.mxu0 }
 0x469   : > { %v4793_v1 = vadd.f32 %v13560_v47, %v18315_v26 }
 0x46a   : > { %v13562_v49 = vpop.f32.mrf.mxu1  ;;  %v13604_v48 = vpop.f32.mrf.mxu0 }
 0x46b   : > { %v13563_v41 = vadd.f32 %v13562_v49, %v13561_v34  ;;  %v4858_v7 = vadd.f32 %v13600_v27, %v4793_v1 }
 0x46c   : > { %v13564_v0 = vpop.f32.mrf.mxu1  ;;  %v13605_v19 = vpop.f32.mrf.mxu0 }
 0x46d   : > { %v13606_v15 = vadd.f32 %v13605_v19, %v13604_v48  ;;  %v4796_v26 = vadd.f32 %v13563_v41, %v18318_v60 }
 0x46e   : > { %v13565_v61 = vpop.f32.mrf.mxu1  ;;  %v13607_v44 = vpop.f32.mrf.mxu0 }
 0x46f   : > { %v13566_v42 = vadd.f32 %v13565_v61, %v13564_v0 }
 0x470   : > { %v13567_v40 = vpop.f32.mrf.mxu1  ;;  %v13608_v31 = vpop.f32.mrf.mxu0 }
 0x471   : > { %v4801_v5 = vadd.f32 %v13566_v42, %v4736_v21  ;;  %v13609_v9 = vadd.f32 %v13608_v31, %v13607_v44  ;;  %v13541_v31 = vadd.f32 %v18330_v4, %v18328_v17 }
 0x472   : > { %v13568_v32 = vpop.f32.mrf.mxu1  ;;  %v18334_v46 = vpop.f32.mrf.mxu0 }
 0x473   : > { %v13569_v10 = vadd.f32 %v13568_v32, %v13567_v40  ;;  %v4866_v42 = vadd.f32 %v13606_v15, %v4801_v5  ;;  %v13532_v32 = vadd.f32 %v18322_v2, %v18320_v54 }
 0x474   : > { %v13570_v13 = vpop.f32.mrf.mxu1  ;;  %v18336_v63 = vpop.f32.mrf.mxu0 }
 0x475   : > { %22423 = vst [vmem:[#allocation70_spill] sm:$0xff] %v18336_v63  ;;  %v4804_v56 = vadd.f32 %v13569_v10, %v4739_v62  ;;  %v4690_v10 = vadd.f32 %v13501_v18, %v18312_v22 }
 0x476   : > { %v13571_v57 = vpop.f32.mrf.mxu1  ;;  %v18338_v53 = vpop.f32.mrf.mxu0 }
 0x477   : > { %22424 = vst [vmem:[#allocation71_spill] sm:$0xff] %v18338_v53  ;;  %v13572_v33 = vadd.f32 %v13571_v57, %v13570_v13  ;;  %v4869_v2 = vadd.f32 %v13609_v9, %v4804_v56  ;;  %v4755_v3 = vadd.f32 %v13541_v31, %v4690_v10 }
 0x478   : > { %v13573_v43 = vpop.f32.mrf.mxu1  ;;  %v18341_v38 = vpop.f32.mrf.mxu0 }
 0x47a   : > { %v13574_v29 = vpop.f32.mrf.mxu1  ;;  %v13616_v53 = vpop.f32.mrf.mxu0 }
 0x47b   : > { %v13575_v39 = vadd.f32 %v13574_v29, %v13573_v43 }
 0x47c   : > { %v13576_v20 = vpop.f32.mrf.mxu1  ;;  %v13617_v59 = vpop.f32.mrf.mxu0  ;;  %v22425_v11 = vld [vmem:[#allocation70_spill] sm:$0xff] }
 0x47d   : > { %v13618_v16 = vadd.f32 %v13617_v59, %v13616_v53  ;;  %v13612_v14 = vadd.f32 %v22425_v11, %v18334_v46  ;;  %v4812_v43 = vadd.f32 %v13575_v39, %v4747_v45 }
 0x47e   : > { %v13577_v55 = vpop.f32.mrf.mxu1  ;;  %v13619_v57 = vpop.f32.mrf.mxu0  ;;  %v22426_v44 = vld [vmem:[#allocation71_spill] sm:$0xff] }
 0x47f   : > { %v13578_v21 = vadd.f32 %v13577_v55, %v13576_v20  ;;  %v4744_v20 = vadd.f32 %v13532_v32, %v4679_v25  ;;  %v13603_v55 = vadd.f32 %v13602_v35, %v18332_v8  ;;  %v13615_v46 = vadd.f32 %v18341_v38, %v22426_v44  ;;  %v15476_v44 = vld [vmem:[%s22421_s4 + $0x18] sm:$0xff]  }
 0x480   : > { %v13579_v63 = vpop.f32.mrf.mxu1  ;;  %v13620_v8 = vpop.f32.mrf.mxu0 }
 0x481   : > { %v4817_v54 = vadd.f32 %v13578_v21, %v4752_v52  ;;  %v4809_v60 = vadd.f32 %v13572_v33, %v4744_v20  ;;  %v4861_v22 = vadd.f32 %v13603_v55, %v4796_v26  ;;  %v13621_v40 = vadd.f32 %v13620_v8, %v13619_v57  ;;  %v15456_v8 = vld [vmem:[%s21841_s14] sm:$0xff]  }
 0x482   : > { %v13580_v0 = vpop.f32.mrf.mxu1  ;;  %v4877_v27 = vadd.f32 %v13615_v46, %v4812_v43  ;;  %v15466_v43 = vld [vmem:[%s22421_s4 + $0xa8] sm:$0xff]   ;;  %v15477_v46 = vld [vmem:[%s22421_s4 + $0xd0] sm:$0xff]  }
 0x483   : > { %v13581_v30 = vadd.f32 %v13580_v0, %v13579_v63  ;;  %v4882_v4 = vadd.f32 %v13618_v16, %v4817_v54  ;;  %v4874_v53 = vadd.f32 %v13612_v14, %v4809_v60 }
 0x484   : > { %v14712_v47 = vpop.f32.mrf.mxu1 }
 0x485   : > { %v4931_v51 = vadd.f32 %v14712_v47, %v4866_v42  ;;  %v4820_v63 = vadd.f32 %v13581_v30, %v4755_v3 }
 0x486   : > { %v4922_v5 = vpop.f32.mrf.mxu1 }
 0x487   : > { %v4923_v13 = vadd.f32 %v4922_v5, %v4858_v7  ;;  %v4955_v36 = vmax.f32 %v4931_v51, 0.0  ;;  %v4885_v0 = vadd.f32 %v13621_v40, %v4820_v63  ;;  %v15469_v63 = vld [vmem:[%s22421_s4 + $0xe0] sm:$0xff]   ;;  %v15478_v40 = vld [vmem:[%s22421_s4 + $0x90] sm:$0xff]  }
 0x488   : > { %v14713_v24 = vpop.f32.mrf.mxu1 }
 0x489   : > { %v18357_v58 = vadd.f32 %v14713_v24, %v4869_v2  ;;  %v4953_v34 = vmax.f32 %v4923_v13, 0.0  ;;  %v4972_v49 = vrot.slane %v4955_v36, 1 }
 0x48a   : > { %v4925_v28 = vpop.f32.mrf.mxu1 }
 0x48b   : > { %v4956_v35 = vmax.f32 %v18357_v58, 0.0  ;;  %v4926_v17 = vadd.f32 %v4925_v28, %v4861_v22  ;;  %v4969_v1 = vrot.slane %v4953_v34, 1  ;;  %v22434_v22 = vmov 0.0   ;;  %v15457_v28 = vld [vmem:[%s22421_s4 + $0xf8] sm:$0xff]  }
 0x48c   : > { %v14716_v29 = vpop.f32.mrf.mxu1 }
 0x48d   : > { %v4974_v48 = vrot.slane %v4956_v35, 1  ;;  %v4954_v19 = vmax.f32 %v4926_v17, 0.0  ;;  %v4947_v61 = vadd.f32 %v14716_v29, %v4882_v4  ;;  %v15462_v17 = vld [vmem:[%s22421_s4 + $0xb0] sm:$0xff]   ;;  %v15465_v4 = vld [vmem:[%s22421_s4 + $0xe8] sm:$0xff]   ;;  %v15470_v29 = vld [vmem:[%s22421_s4 + $0xa0] sm:$0xff]  }
 0x48e   : > { %v4938_v6 = vpop.f32.mrf.mxu1 }
 0x48f   : > { %v4975_v41 = vsel %vm22427_vm11, %v4972_v49, %v4974_v48  ;;  %v4970_v15 = vrot.slane %v4954_v19, 1  ;;  %v4939_v62 = vadd.f32 %v4938_v6, %v4874_v53  ;;  %v4959_v18 = vmax.f32 %v4947_v61, 0.0  ;;  %vm22430_vm11 = vmmov %vm22428_vm4  ;;  %v15471_v53 = vld [vmem:[%s22421_s4 + $0x60] sm:$0xff]   ;;  %v15475_v61 = vld [vmem:[%s22421_s4 + $0x58] sm:$0xff]  }
 0x490   : > { %v14717_v25 = vpop.f32.mrf.mxu1  ;;  %v4995_v21 = vmax.f32 %v4955_v36, %v4975_v41  ;;  %13645 = vmatprep.subr.bf16.mxu0 %v15471_v53  ;;  %v15479_v6 = vld [vmem:[%s22421_s4 + $0x50] sm:$0xff]  }
 0x491   : > { %v4971_v50 = vsel %vm22428_vm4, %v4969_v1, %v4970_v15  ;;  %v4973_v23 = vsel %vm22429_vm6, %v4970_v15, %v4972_v49  ;;  %v4950_v42 = vadd.f32 %v14717_v25, %v4885_v0  ;;  %v4957_v32 = vmax.f32 %v4939_v62, 0.0  ;;  %vm22431_vm6 = vmmov %vm22428_vm4  ;;  %v15472_v49 = vld [vmem:[%s22421_s4 + $0x20] sm:$0xff]   ;;  %v15481_v1 = vld [vmem:[%s22421_s4 + $0xc8] sm:$0xff]  }
 0x492   : > { %v4993_v56 = vmax.f32 %v4953_v34, %v4971_v50  ;;  %v4994_v59 = vmax.f32 %v4954_v19, %v4973_v23  ;;  %v4941_v38 = vpop.f32.mrf.mxu1  ;;  %v4980_v51 = vrot.slane %v4959_v18, 1  ;;  %v15458_v34 = vld [vmem:[%s22421_s4 + $0xb8] sm:$0xff]   ;;  %13646 = vmatpush3.bf16.msra.mxu0 %v15472_v49  ;;  %v15480_v41 = vld [vmem:[%s22421_s4 + $0x10] sm:$0xff]   ;;  %v15482_v15 = vld [vmem:[%s22421_s4 + $0x88] sm:$0xff]  }
 0x493   : > { %v4942_v33 = vadd.f32 %v4941_v38, %v4877_v27  ;;  %v4960_v26 = vmax.f32 %v4950_v42, 0.0  ;;  %v4976_v37 = vrot.slane %v4957_v32, 1  ;;  %v15474_v19 = vld [vmem:[%s22421_s4 + $0x98] sm:$0xff]   ;;  %13647 = vmatprep.subr.bf16.mxu0 %v15475_v61  ;;  %v15483_v62 = vld [vmem:[%s22421_s4 + $0x48] sm:$0xff]   ;;  %v15485_v0 = vld [vmem:[%s22421_s4 + $0xc0] sm:$0xff]  }
 0x494   : > { %v5001_v52 = vmax.f32 %v4993_v56, %v4994_v59  ;;  %v5002_v47 = vmax.f32 %v4994_v59, %v4995_v21  ;;  %v15484_v25 = vld [vmem:[%s22421_s4 + $0x8] sm:$0xff]   ;;  %v15486_v50 = vld [vmem:[%s22421_s4 + $0x80] sm:$0xff]   ;;  %v15491_v56 = vld [vmem:[%s22421_s4 + $0x178] sm:$0xff]  }
 0x495   : > { %v4958_v9 = vmax.f32 %v4942_v33, 0.0  ;;  %v4982_v7 = vrot.slane %v4960_v26, 1  ;;  %v4977_v30 = vsel %vm22433_vm2, %v4974_v48, %v4976_v37  ;;  %vm22017_vm2 = vcmask 523264   ;;  %v15473_v48 = vld [vmem:[%s22421_s4 + $0xd8] sm:$0xff]   ;;  %v15487_v23 = vld [vmem:[%s22421_s4 + $0x40] sm:$0xff]   ;;  %v22435_v59 = vld [vmem:[#allocation10_spill] sm:$0xff] }
 0x496   : > { %v5011_v12 = vpack.c.bf16 %v5002_v47, %v5001_v52  ;;  %v4996_v58 = vmax.f32 %v4956_v35, %v4977_v30  ;;  %v15461_v35 = vld [vmem:[%s22421_s4 + $0xf0] sm:$0xff]   ;;  %13648 = vmatpush3.bf16.msra.mxu0 %v15476_v44  ;;  %v15488_v27 = vld [vmem:[%s22421_s4] sm:$0xff]  }
 0x497   : > { %v4978_v10 = vrot.slane %v4958_v9, 1  ;;  %v4983_v20 = vsel %vm22430_vm11, %v4980_v51, %v4982_v7  ;;  %v4992_v5 = vsel %vm22431_vm6, %v4982_v7, 0.0  ;;  %13649 = vmatprep.subr.bf16.mxu0 %v15479_v6  ;;  %v22440_v52 = vld [vmem:[#allocation32_spill] sm:$0xff] }
 0x498   : > { %v4999_v55 = vmax.f32 %v4959_v18, %v4983_v20  ;;  %v5000_v54 = vmax.f32 %v4960_v26, %v4992_v5  ;;  %v5003_v45 = vmax.f32 %v4995_v21, %v4996_v58  ;;  %v15489_v18 = vld [vmem:[%s22421_s4 + $0x1f8] sm:$0xff]   ;;  %v844_v21 = vadd.s32 8, %v22435_v59 }
 0x499   : > { %v4979_v57 = vsel %vm22428_vm4, %v4976_v37, %v4978_v10  ;;  %v4981_v13 = vsel %vm22432_vm9, %v4978_v10, %v4980_v51  ;;  %v846_v47 = vand.u32 3, %v22440_v52 }
 0x49a   : > { %v4997_v2 = vmax.f32 %v4957_v32, %v4979_v57  ;;  %v4998_v31 = vmax.f32 %v4958_v9, %v4981_v13  ;;  %v5007_v60 = vmax.f32 %v4999_v55, %v5000_v54  ;;  %v5008_v39 = vmax.f32 %v5000_v54, 0.0  ;;  %13650 = vmatpush3.bf16.msra.mxu0 %v15480_v41 }
 0x49b   : > { %13651 = vmatprep.subr.bf16.mxu0 %v15483_v62  ;;  %v845_v42 = vand.u32 3, %v844_v21  ;;  %vm18488_vm6 = vcmp.ne.s32.totalorder %v846_v47, 3  ;;  %vm18494_vm4 = vcmp.ne.s32.totalorder %v846_v47, 0 }
 0x49c   : > { %v5014_v24 = vpack.c.bf16 %v5008_v39, %v5007_v60  ;;  %v5005_v16 = vmax.f32 %v4997_v2, %v4998_v31  ;;  %v5006_v36 = vmax.f32 %v4998_v31, %v4999_v55  ;;  %v5004_v14 = vmax.f32 %v4996_v58, %v4997_v2 }
 0x49d   : > { %vm18464_vm9 = vcmp.ne.s32.totalorder %v845_v42, 3  ;;  %vm18468_vm11 = vcmp.ne.s32.totalorder %v845_v42, 0 }
 0x49e   : > { %14719 = vmatpush3.bf16.msra.mxu1 %v5014_v24  ;;  %v5013_v11 = vpack.c.bf16 %v5006_v36, %v5005_v16  ;;  %v5012_v3 = vpack.c.bf16 %v5004_v14, %v5003_v45  ;;  %13652 = vmatpush3.bf16.msra.mxu0 %v15484_v25 }
 0x49f   : > { %14720 = vmatprep.subr.bf16.mxu1 %v22434_v22  ;;  %13653 = vmatprep.subr.bf16.mxu0 %v15487_v23 }
 0x4a2   : > { %14721 = vmatpush3.bf16.msra.mxu1 %v5013_v11  ;;  %13654 = vmatpush3.bf16.msra.mxu0 %v15488_v27 }
 0x4a3   : > { %14722 = vmatprep.subr.bf16.mxu1 %v22434_v22  ;;  %13683 = vmatprep.subr.bf16.mxu0 %v15491_v56 }
 0x4a6   : > { %14723 = vmatpush3.bf16.msra.mxu1 %v5012_v3 }
 0x4a7   : > { %14724 = vmatprep.subr.bf16.mxu1 %v22434_v22 }
 0x4aa   : > { %14725 = vmatpush3.bf16.msra.mxu1 %v5011_v12 }
 0x4ab   : > { %13661 = vmatprep.subr.bf16.mxu1 %v15457_v28 }
 0x4ad   : > { %14727 = vmatmul.mubr.msk.bf16.vlgmr.msra.gmra.mxu1 %vm22017_vm2, %v15456_v8  ;;  %vm22023_vm2 = vcmask 1044480  }
 0x4ae   : > { %13662 = vmatpush3.bf16.msra.mxu1 %v15458_v34 }
 0x4af   : > { %13663 = vmatprep.subr.bf16.mxu1 %v15461_v35 }
 0x4b2   : > { %13664 = vmatpush3.bf16.msra.mxu1 %v15462_v17 }
 0x4b3   : > { %13665 = vmatprep.subr.bf16.mxu1 %v15465_v4 }
 0x4b6   : > { %13666 = vmatpush3.bf16.msra.mxu1 %v15466_v43 }
 0x4b7   : > { %13667 = vmatprep.subr.bf16.mxu1 %v15469_v63 }
 0x4ba   : > { %13668 = vmatpush3.bf16.msra.mxu1 %v15470_v29 }
 0x4bb   : > { %13669 = vmatprep.subr.bf16.mxu1 %v15473_v48 }
 0x4be   : > { %13670 = vmatpush3.bf16.msra.mxu1 %v15474_v19 }
 0x4bf   : > { %13671 = vmatprep.subr.bf16.mxu1 %v15477_v46 }
 0x4c2   : > { %13672 = vmatpush3.bf16.msra.mxu1 %v15478_v40 }
 0x4c3   : > { %13673 = vmatprep.subr.bf16.mxu1 %v15481_v1 }
 0x4c6   : > { %13674 = vmatpush3.bf16.msra.mxu1 %v15482_v15 }
 0x4c7   : > { %13675 = vmatprep.subr.bf16.mxu1 %v15485_v0 }
 0x4ca   : > { %13676 = vmatpush3.bf16.msra.mxu1 %v15486_v50 }
 0x4cb   : > { %13705 = vmatprep.subr.bf16.mxu1 %v15489_v18 }
 0x56d   : > { %v5058_v33 = vpop.f32.mrf.mxu1 }
 0x56e   : > { %v5069_v26 = vsel %vm18464_vm9, %v5058_v33, 0.0  ;;  %v5073_v9 = vpack.c.bf16 %v5058_v33, %v22434_v22  ;;  %v5079_v51 = vsel %vm18468_vm11, %v5058_v33, 0.0 }
 0x56f   : > { %v14728_v7 = vpop.f32.mrf.mxu1  ;;  %v18479_v12 = vpack.c.bf16 %v5069_v26, %v22434_v22  ;;  %v18486_v20 = vpack.c.bf16 %v5079_v51, %v22434_v22 }
 0x570   : > { %v18481_v37 = vshrl.u32 %v5073_v9, 16  ;;  %v18483_v10 = vshll.u32 %v5073_v9, 16 }
 0x571   : > { %v5061_v55 = vpop.f32.mrf.mxu1  ;;  %v5287_v60 = vshrl.u32 %v18479_v12, 16  ;;  %v5100_v24 = vrot.slane %v18486_v20, 1  ;;  %v5106_v16 = vrot.slane %v18479_v12, 2  ;;  %v5290_v36 = vshll.u32 %v18479_v12, 16 }
 0x572   : > { %v5088_v54 = vrot.slane %v18483_v10, 1  ;;  %v5124_v57 = vrot.slane %v18481_v37, 4  ;;  %v5125_v31 = vrot.slane %v18483_v10, 5  ;;  %v5070_v39 = vsel %vm18488_vm6, %v5061_v55, 0.0 }
 0x573   : > { %v14729_v2 = vpop.f32.mrf.mxu1  ;;  %v5074_v30 = vpack.c.bf16 %v22434_v22, %v5061_v55  ;;  %v18507_v58 = vpack.c.bf16 %v22434_v22, %v5070_v39  ;;  %v5118_v11 = vrot.slane %v18486_v20, 3  ;;  %v5080_v14 = vsel %vm18494_vm4, %v5061_v55, 0.0 }
 0x574   : > { %v5131_v28 = vrot.slane %v18486_v20, 5  ;;  %v5082_v8 = vpack.c.bf16 %v22434_v22, %v5080_v14  ;;  %v5089_v17 = vor.u32 %v5088_v54, %v18481_v37  ;;  %v18521_v4 = vor.u32 %v5125_v31, %v5124_v57 }
 0x575   : > { %v18512_v45 = vshll.u32 %v5074_v30, 16  ;;  %v18514_v3 = vshrl.u32 %v5074_v30, 16  ;;  %v5107_v34 = vrot.slane %v18507_v58, 2  ;;  %v5295_v35 = vshrl.u32 %v18507_v58, 16  ;;  %v15490_v30 = vld [vmem:[%s22421_s4 + $0x1b8] sm:$0xff]  }
 0x576   : > { %v18523_v43 = vrot.slane %v5287_v60, 1  ;;  %v18526_v29 = vrot.slane %v5290_v36, 2  ;;  %v5101_v53 = vrot.slane %v5082_v8, 1  ;;  %v18529_v48 = vrot.slane %v5082_v8, 5 }
 0x577   : > { %v5093_v63 = vrot.slane %v18512_v45, 1  ;;  %v5127_v49 = vrot.slane %v18514_v3, 4  ;;  %v18532_v61 = vrot.slane %v5082_v8, 3  ;;  %v5128_v44 = vrot.slane %v18512_v45, 5 }
 0x578   : > { %v5298_v46 = vshll.u32 %v18507_v58, 16  ;;  %v5102_v40 = vsel %vm22445_vm1, %v5100_v24, %v5101_v53  ;;  %v18539_v6 = vsel %vm22446_vm3, %v5131_v28, %v18529_v48  ;;  %v18541_v1 = vrot.slane %v5295_v35, 1 }
 0x579   : > { %v5097_v19 = vor.u32 %v18514_v3, %v5093_v63  ;;  %v5108_v41 = vsel %vm22447_vm10, %v5106_v16, %v5107_v34  ;;  %v5346_v25 = vshrl.u32 %v5107_v34, 16  ;;  %v5349_v50 = vshll.u32 %v5107_v34, 16  ;;  %v15493_v34 = vld [vmem:[%s22421_s4 + $0x1f0] sm:$0xff]  }
 0x57a   : > { %v18544_v15 = vrot.slane %v5298_v46, 2  ;;  %v5338_v62 = vshrl.u32 %v5108_v41, 16  ;;  %v5341_v0 = vshll.u32 %v5108_v41, 16  ;;  %v5321_v23 = vshrl.u32 %v5102_v40, 16  ;;  %v15494_v46 = vld [vmem:[%s22421_s4 + $0x1b0] sm:$0xff]   ;;  %v15492_v41 = vld [vmem:[%s22421_s4 + $0x138] sm:$0xff]  }
 0x57b   : > { %v5324_v18 = vshll.u32 %v5102_v40, 16  ;;  %v5329_v27 = vshrl.u32 %v5101_v53, 16  ;;  %v5348_v21 = vrot.slane %v5346_v25, 1  ;;  %v5332_v42 = vshll.u32 %v5101_v53, 16 }
 0x57c   : > { %v5340_v56 = vrot.slane %v5338_v62, 1  ;;  %v5343_v59 = vrot.slane %v5341_v0, 2  ;;  %v5351_v33 = vrot.slane %v5349_v50, 2  ;;  %v5323_v52 = vrot.slane %v5321_v23, 1 }
 0x57d   : > { %v5326_v47 = vrot.slane %v5324_v18, 2  ;;  %v5331_v26 = vrot.slane %v5329_v27, 1  ;;  %v5334_v51 = vrot.slane %v5332_v42, 2  ;;  %vm22448_vm3 = vsmask.f32 7424  ;;  %v15498_v42 = vld [vmem:[%s22421_s4 + $0x1a8] sm:$0xff]  }
 0x57e   : > { %v5344_v9 = vor.u32 %v5343_v59, %v5340_v56  ;;  %v5094_v7 = vsel %vm22448_vm3, %v5089_v17, %v5093_v63  ;;  %v5312_v55 = vshrl.u32 %v5097_v19, 16  ;;  %v5352_v54 = vor.u32 %v5351_v33, %v5348_v21 }
 0x57f   : > { %v5327_v57 = vor.u32 %v5326_v47, %v5323_v52  ;;  %v5304_v2 = vshrl.u32 %v5094_v7, 16  ;;  %v5307_v31 = vshll.u32 %v5094_v7, 16  ;;  %v5129_v60 = vor.u32 %v5128_v44, %v5127_v49  ;;  %v15499_v7 = vld [vmem:[%s22421_s4 + $0x168] sm:$0xff]  }
 0x580   : > { %v5335_v39 = vor.u32 %v5334_v51, %v5331_v26  ;;  %v5314_v24 = vrot.slane %v5312_v55, 1  ;;  %v5315_v16 = vshll.u32 %v5097_v19, 16  ;;  %v5353_v36 = vsel %vm22024_vm7, %v5344_v9, %v5352_v54  ;;  %v15496_v26 = vld [vmem:[%s22421_s4 + $0x130] sm:$0xff]   ;;  %v15501_v9 = vld [vmem:[%s22421_s4 + $0x1e0] sm:$0xff]  }
 0x581   : > { %v5306_v14 = vrot.slane %v5304_v2, 1  ;;  %v5309_v28 = vrot.slane %v5307_v31, 2  ;;  %v5293_v8 = vor.u32 %v18526_v29, %v18523_v43  ;;  %5953 = vmatprep.mubr.bf16.mxu1 %v5353_v36  ;;  %v5120_v63 = vsel %vm22023_vm2, %v5118_v11, %v18532_v61  ;;  %v15500_v31 = vld [vmem:[%s22421_s4 + $0x128] sm:$0xff]  }
 0x582   : > { %v5336_v35 = vsel %vm22024_vm7, %v5327_v57, %v5335_v39  ;;  %v5317_v17 = vrot.slane %v5315_v16, 2  ;;  %v5380_v53 = vshrl.u32 %v18532_v61, 16  ;;  %v5301_v43 = vor.u32 %v18544_v15, %v18541_v1  ;;  %v15497_v1 = vld [vmem:[%s22421_s4 + $0x1e8] sm:$0xff]   ;;  %v15502_v57 = vld [vmem:[%s22421_s4 + $0x1a0] sm:$0xff]  }
 0x583   : > { %5954 = vmatmul.mubr.bf16.vlgmr.msra.gmra.mxu1 %v5336_v35  ;;  %v5310_v49 = vor.u32 %v5309_v28, %v5306_v14  ;;  %v5372_v29 = vshrl.u32 %v5120_v63, 16  ;;  %v5375_v19 = vshll.u32 %v5120_v63, 16  ;;  %v5383_v20 = vshll.u32 %v18532_v61, 16  ;;  %v15495_v61 = vld [vmem:[%s22421_s4 + $0x170] sm:$0xff]  }
 0x584   : > { %13706 = vmatpush3.bf16.msra.mxu1 %v15490_v30  ;;  %v5318_v44 = vor.u32 %v5317_v17, %v5314_v24  ;;  %v5382_v40 = vrot.slane %v5380_v53, 1  ;;  %vm22449_vm10 = vsmask.f32 3328  ;;  %v5414_v23 = vshrl.u32 %v5129_v60, 16  ;;  %v15503_v30 = vld [vmem:[%s22421_s4 + $0x160] sm:$0xff]   ;;  %v15506_v17 = vld [vmem:[%s22421_s4 + $0x198] sm:$0xff]  }
 0x585   : > { %v5130_v11 = vsel %vm22449_vm10, %v18521_v4, %v5129_v60  ;;  %13707 = vmatprep.subr.bf16.mxu1 %v15493_v34  ;;  %v5374_v15 = vrot.slane %v5372_v29, 1  ;;  %v5377_v62 = vrot.slane %v5375_v19, 2  ;;  %v5385_v4 = vrot.slane %v5383_v20, 2  ;;  %v15507_v53 = vld [vmem:[%s22421_s4 + $0x158] sm:$0xff]   ;;  %v15510_v29 = vld [vmem:[%s22421_s4 + $0x190] sm:$0xff]  }
 0x586   : > { %v5406_v0 = vshrl.u32 %v5130_v11, 16  ;;  %v5409_v25 = vshll.u32 %v5130_v11, 16  ;;  %v5319_v50 = vsel %vm22024_vm7, %v5310_v49, %v5318_v44  ;;  %v5417_v18 = vshll.u32 %v5129_v60, 16  ;;  %v15505_v60 = vld [vmem:[%s22421_s4 + $0x1d8] sm:$0xff]   ;;  %v15511_v20 = vld [vmem:[%s22421_s4 + $0x150] sm:$0xff]  }
 0x587   : > { %5912 = vmatprep.mubr.bf16.mxu0 %v5319_v50  ;;  %v5302_v27 = vsel %vm22024_vm7, %v5293_v8, %v5301_v43  ;;  %v5378_v56 = vor.u32 %v5377_v62, %v5374_v15  ;;  %v5386_v33 = vor.u32 %v5385_v4, %v5382_v40  ;;  %v5416_v52 = vrot.slane %v5414_v23, 1  ;;  %v15508_v44 = vld [vmem:[%s22421_s4 + $0x118] sm:$0xff]   ;;  %v15514_v62 = vld [vmem:[%s22421_s4 + $0x188] sm:$0xff]   ;;  %v15517_v50 = vld [vmem:[%s22421_s4 + $0x1c0] sm:$0xff]  }
 0x588   : > { %v5408_v59 = vrot.slane %v5406_v0, 1  ;;  %v5411_v21 = vrot.slane %v5409_v25, 2  ;;  %5913 = vmatmul.mubr.bf16.vlgmr.msra.gmra.mxu0 %v5302_v27  ;;  %13708 = vmatpush3.bf16.msra.mxu1 %v15494_v46  ;;  %v5419_v47 = vrot.slane %v5417_v18, 2  ;;  %v5423_v39 = vshrl.u32 %v18539_v6, 16  ;;  %v15513_v46 = vld [vmem:[%s22421_s4 + $0x1c8] sm:$0xff]   ;;  %v15512_v25 = vld [vmem:[%s22421_s4 + $0x110] sm:$0xff]  }
 0x589   : > { %13684 = vmatpush3.bf16.msra.mxu0 %v15492_v41  ;;  %13709 = vmatprep.subr.bf16.mxu1 %v15497_v1  ;;  %v5387_v55 = vsel %vm22024_vm7, %v5378_v56, %v5386_v33  ;;  %v5426_v24 = vshll.u32 %v18539_v6, 16  ;;  %v5122_v16 = vrot.slane %v18507_v58, 4  ;;  %v5431_v14 = vshrl.u32 %v18529_v48, 16  ;;  %v15518_v33 = vld [vmem:[%s22421_s4 + $0x180] sm:$0xff]  }
 0x58a   : > { %v5412_v51 = vor.u32 %v5411_v21, %v5408_v59  ;;  %13685 = vmatprep.subr.bf16.mxu0 %v15495_v61  ;;  %v5420_v54 = vor.u32 %v5419_v47, %v5416_v52  ;;  %5994 = vmatprep.mubr.bf16.mxu0 %v5387_v55  ;;  %v5425_v36 = vrot.slane %v5423_v39, 1  ;;  %v5434_v28 = vshll.u32 %v18529_v48, 16  ;;  %v15504_v48 = vld [vmem:[%s22421_s4 + $0x120] sm:$0xff]   ;;  %v15515_v61 = vld [vmem:[%s22421_s4 + $0x148] sm:$0xff]   ;;  %v15521_v39 = vld [vmem:[%s22421_s4 + $0x238] sm:$0xff]  }
 0x58b   : > { %v5121_v8 = vrot.slane %v18479_v12, 4  ;;  %v5113_v34 = vrot.slane %v18514_v3, 2  ;;  %v5114_v35 = vrot.slane %v18512_v45, 3  ;;  %v5428_v63 = vrot.slane %v5426_v24, 2  ;;  %v15509_v12 = vld [vmem:[%s22421_s4 + $0x1d0] sm:$0xff]   ;;  %v15516_v52 = vld [vmem:[%s22421_s4 + $0x108] sm:$0xff]  }
 0x58c   : > { %13710 = vmatpush3.bf16.msra.mxu1 %v15498_v42  ;;  %v5421_v2 = vsel %vm22024_vm7, %v5412_v51, %v5420_v54  ;;  %v5110_v6 = vrot.slane %v18481_v37, 2  ;;  %v5111_v58 = vrot.slane %v18483_v10, 3  ;;  %v5433_v45 = vrot.slane %v5431_v14, 1  ;;  %v15519_v47 = vld [vmem:[%s22421_s4 + $0x140] sm:$0xff]   ;;  %v15522_v24 = vld [vmem:[%s22421_s4 + $0x230] sm:$0xff]   ;;  %v15525_v14 = vld [vmem:[%s22421_s4 + $0x218] sm:$0xff]  }
 0x58d   : > { %13686 = vmatpush3.bf16.msra.mxu0 %v15496_v26  ;;  %13711 = vmatprep.subr.bf16.mxu1 %v15501_v9  ;;  %v5436_v3 = vrot.slane %v5434_v28, 2  ;;  %v5429_v37 = vor.u32 %v5428_v63, %v5425_v36  ;;  %vm22450_vm1 = vcmask 1043456   ;;  %v5115_v43 = vor.u32 %v5114_v35, %v5113_v34  ;;  %v15524_v36 = vld [vmem:[%s22421_s4 + $0x220] sm:$0xff]   ;;  %v15526_v28 = vld [vmem:[%s22421_s4 + $0x210] sm:$0xff]  }
 0x58e   : > { %13687 = vmatprep.subr.bf16.mxu0 %v15499_v7  ;;  %6035 = vmatprep.mubr.bf16.mxu1 %v5421_v2  ;;  %v5123_v10 = vsel %vm22450_vm1, %v5121_v8, %v5122_v16  ;;  %v5112_v19 = vor.u32 %v5111_v58, %v5110_v6  ;;  %vm22022_vm3 = vsmask.f32 5376  ;;  %v5397_v1 = vshrl.u32 %v5122_v16, 16  ;;  %v15527_v8 = vld [vmem:[%s22421_s4 + $0x208] sm:$0xff]   ;;  %v15528_v34 = vld [vmem:[%s22421_s4 + $0x200] sm:$0xff]  }
 0x58f   : > { %v5437_v49 = vor.u32 %v5436_v3, %v5433_v45  ;;  %v5389_v11 = vshrl.u32 %v5123_v10, 16  ;;  %v5392_v41 = vshll.u32 %v5123_v10, 16  ;;  %v5400_v15 = vshll.u32 %v5122_v16, 16  ;;  %v15523_v16 = vld [vmem:[%s22421_s4 + $0x228] sm:$0xff]   ;;  %v12604_v10 = vld [vmem:[%s21833_s6] ss:$0 sm:$0xff] }
 0x590   : > { %13712 = vmatpush3.bf16.msra.mxu1 %v15502_v57  ;;  %v5116_v0 = vsel %vm22022_vm3, %v5112_v19, %v5115_v43  ;;  %v5399_v18 = vrot.slane %v5397_v1, 1  ;;  %v5363_v21 = vshrl.u32 %v5115_v43, 16  ;;  %v5366_v42 = vshll.u32 %v5115_v43, 16  ;;  %v15520_v57 = vld [vmem:[%s22421_s4 + $0x100] sm:$0xff]   ;;  %s686_s4 = scalar_lea.vmem %s21848_s21, %s12949_s28 }
 0x591   : > { %13688 = vmatpush3.bf16.msra.mxu0 %v15500_v31  ;;  %13713 = vmatprep.subr.bf16.mxu1 %v15505_v60  ;;  %v18640_v40 = vsel %vm22024_vm7, %v5429_v37, %v5437_v49  ;;  %v5391_v4 = vrot.slane %v5389_v11, 1  ;;  %v5394_v23 = vrot.slane %v5392_v41, 2  ;;  %v5402_v27 = vrot.slane %v5400_v15, 2 }
 0x592   : > { %13689 = vmatprep.subr.bf16.mxu0 %v15503_v30  ;;  %v5355_v56 = vshrl.u32 %v5116_v0, 16  ;;  %v5358_v59 = vshll.u32 %v5116_v0, 16  ;;  %v5365_v55 = vrot.slane %v5363_v21, 1  ;;  %v5368_v54 = vrot.slane %v5366_v42, 2 }
 0x593   : > { %v5395_v26 = vor.u32 %v5394_v23, %v5391_v4  ;;  %v5403_v9 = vor.u32 %v5402_v27, %v5399_v18  ;;  %vm22451_vm10 = vmmov 0   ;;  %vm22452_vm1 = vcmask 1046528  }
 0x594   : > { %13714 = vmatpush3.bf16.msra.mxu1 %v15506_v17  ;;  %v5357_v51 = vrot.slane %v5355_v56, 1  ;;  %v5360_v7 = vrot.slane %v5358_v59, 2  ;;  %v5369_v60 = vor.u32 %v5368_v54, %v5365_v55  ;;  %vm22453_vm3 = vmmov %vm22452_vm1  ;;  %vm22454_vm2 = vcmask 1043456  }
 0x595   : > { %13690 = vmatpush3.bf16.msra.mxu0 %v15504_v48  ;;  %13715 = vmatprep.subr.bf16.mxu1 %v15509_v12  ;;  %v5404_v2 = vsel %vm22024_vm7, %v5395_v26, %v5403_v9 }
 0x596   : > { %13691 = vmatprep.subr.bf16.mxu0 %v15507_v53  ;;  %v5361_v31 = vor.u32 %v5360_v7, %v5357_v51 }
 0x598   : > { %13716 = vmatpush3.bf16.msra.mxu1 %v15510_v29  ;;  %v5370_v30 = vsel %vm22024_vm7, %v5361_v31, %v5369_v60  ;;  %vm22455_vm7 = vmmov %vm22454_vm2 }
 0x599   : > { %13692 = vmatpush3.bf16.msra.mxu0 %v15508_v44  ;;  %13717 = vmatprep.subr.bf16.mxu1 %v15513_v46 }
 0x59a   : > { %13693 = vmatprep.subr.bf16.mxu0 %v15511_v20 }
 0x59c   : > { %13718 = vmatpush3.bf16.msra.mxu1 %v15514_v62 }
 0x59d   : > { %13694 = vmatpush3.bf16.msra.mxu0 %v15512_v25  ;;  %13719 = vmatprep.subr.bf16.mxu1 %v15517_v50 }
 0x59e   : > { %13695 = vmatprep.subr.bf16.mxu0 %v15515_v61 }
 0x5a0   : > { %13720 = vmatpush3.bf16.msra.mxu1 %v15518_v33 }
 0x5a1   : > { %13696 = vmatpush3.bf16.msra.mxu0 %v15516_v52  ;;  %14750 = vmatprep.subr.bf16.mxu1 %v22434_v22 }
 0x5a2   : > { %13697 = vmatprep.subr.bf16.mxu0 %v15519_v47 }
 0x5a3   : > { %6036 = vmatmul.mubr.bf16.vlgmr.msra.gmra.mxu1 %v5404_v2 }
 0x5a4   : > { %14752 = vmatprep.mubr.msk.bf16.mxu1 %vm22451_vm10, %v22434_v22 }
 0x5a5   : > { %13698 = vmatpush3.bf16.msra.mxu0 %v15520_v57 }
 0x5a6   : > { %14730 = vmatprep.subr.bf16.mxu0 %v22434_v22 }
 0x5a8   : > { %5995 = vmatmul.mubr.bf16.vlgmr.msra.gmra.mxu0 %v5370_v30 }
 0x5a9   : > { %14731 = vmatpush3.bf16.msra.mxu0 %v15521_v39  ;;  %14746 = vmatprep.mubr.msk.bf16.mxu0 %vm22451_vm10, %v22434_v22 }
 0x5aa   : > { %14732 = vmatprep.subr.bf16.mxu0 %v22434_v22 }
 0x5ad   : > { %14733 = vmatpush3.bf16.msra.mxu0 %v15522_v24 }
 0x5ae   : > { %14734 = vmatprep.subr.bf16.mxu0 %v22434_v22 }
 0x5b1   : > { %14735 = vmatpush3.bf16.msra.mxu0 %v15523_v16 }
 0x5b2   : > { %14736 = vmatprep.subr.bf16.mxu0 %v22434_v22 }
 0x5b5   : > { %14737 = vmatpush3.bf16.msra.mxu0 %v15524_v36  ;;  %v6108_v36 = vld [vmem:[%s21842_s15] sm:$0x3] }
 0x5b6   : > { %14738 = vmatprep.subr.bf16.mxu0 %v22434_v22 }
 0x5b9   : > { %14739 = vmatpush3.bf16.msra.mxu0 %v15525_v14  ;;  %v15532_v14 = vld [vmem:[%s21834_s7 + $0x78] sm:$0xff]  }
 0x5ba   : > { %14740 = vmatprep.subr.bf16.mxu0 %v22434_v22 }
 0x5bd   : > { %14741 = vmatpush3.bf16.msra.mxu0 %v15526_v28  ;;  %v15533_v28 = vld [vmem:[%s21834_s7 + $0x38] sm:$0xff]  }
 0x5be   : > { %14742 = vmatprep.subr.bf16.mxu0 %v22434_v22 }
 0x5c1   : > { %14743 = vmatpush3.bf16.msra.mxu0 %v15527_v8  ;;  %v15536_v8 = vld [vmem:[%s21834_s7 + $0x70] sm:$0xff]  }
 0x5c2   : > { %14744 = vmatprep.subr.bf16.mxu0 %v22434_v22 }
 0x5c5   : > { %14745 = vmatpush3.bf16.msra.mxu0 %v15528_v34  ;;  %v15537_v34 = vld [vmem:[%s21834_s7 + $0x30] sm:$0xff]  }
 0x5c6   : > { %13740 = vmatprep.subr.bf16.mxu0 %v15532_v14 }
 0x5c8   : > { %14747 = vmatmul.mubr.bf16.vlgmr.msra.gmra.mxu0 %v18640_v40 }
 0x5c9   : > { %13741 = vmatpush3.bf16.msra.mxu0 %v15533_v28 }
 0x5ca   : > { %13742 = vmatprep.subr.bf16.mxu0 %v15536_v8 }
 0x5cd   : > { %13743 = vmatpush3.bf16.msra.mxu0 %v15537_v34 }
 0x643   : > { %v13677_v63 = vpop.f32.mrf.mxu1 }
 0x645   : > { %v13678_v58 = vpop.f32.mrf.mxu1 }
 0x646   : > { %v13679_v46 = vadd.f32 %v13678_v58, %v13677_v63  ;;  %v15530_v58 = vld [vmem:[%s21834_s7 + $0xf8] sm:$0xff]  }
 0x647   : > { %v13680_v12 = vpop.f32.mrf.mxu1 }
 0x648   : > { %v13655_v35 = vpop.f32.mrf.mxu0 }
 0x649   : > { %v13681_v3 = vpop.f32.mrf.mxu1 }
 0x64a   : > { %v13656_v17 = vpop.f32.mrf.mxu0  ;;  %v13682_v15 = vadd.f32 %v13681_v3, %v13680_v12 }
 0x64b   : > { %v13657_v37 = vadd.f32 %v13656_v17, %v13655_v35  ;;  %v15540_v35 = vld [vmem:[%s21834_s7 + $0x68] sm:$0xff]  }
 0x64c   : > { %v13658_v6 = vpop.f32.mrf.mxu0  ;;  %v15541_v17 = vld [vmem:[%s21834_s7 + $0x28] sm:$0xff]   ;;  %13744 = vmatprep.subr.bf16.mxu0 %v15540_v35 }
 0x64d   : > { %v5915_v29 = vadd.f32 %v13657_v37, %v12604_v10  ;;  %13745 = vmatpush3.bf16.msra.mxu0 %v15541_v17  ;;  %v15534_v37 = vld [vmem:[%s21834_s7 + $0xf0] sm:$0xff]  }
 0x64e   : > { %v13659_v48 = vpop.f32.mrf.mxu0 }
 0x64f   : > { %v13660_v19 = vadd.f32 %v13659_v48, %v13658_v6  ;;  %v5956_v11 = vadd.f32 %v13679_v46, %v5915_v29  ;;  %v15539_v29 = vld [vmem:[%s21834_s7 + $0xa8] sm:$0xff]   ;;  %v15544_v46 = vld [vmem:[%s21834_s7 + $0x60] sm:$0xff]  }
 0x650   : > { %13746 = vmatprep.subr.bf16.mxu0 %v15544_v46 }
 0x651   : > { %v5918_v41 = vadd.f32 %v13660_v19, %v12604_v10  ;;  %v15542_v19 = vld [vmem:[%s21834_s7 + $0xe0] sm:$0xff]  }
 0x653   : > { %v5959_v25 = vadd.f32 %v13682_v15, %v5918_v41  ;;  %v15548_v41 = vld [vmem:[%s21834_s7 + $0x58] sm:$0xff]   ;;  %v15550_v15 = vld [vmem:[%s21834_s7 + $0xd0] sm:$0xff]  }
 0x663   : > { %v13721_v49 = vpop.f32.mrf.mxu1 }
 0x665   : > { %v13722_v44 = vpop.f32.mrf.mxu1 }
 0x666   : > { %v13723_v50 = vadd.f32 %v13722_v44, %v13721_v49  ;;  %v15535_v49 = vld [vmem:[%s21834_s7 + $0xb0] sm:$0xff]   ;;  %v15543_v44 = vld [vmem:[%s21834_s7 + $0xa0] sm:$0xff]  }
 0x667   : > { %v13724_v1 = vpop.f32.mrf.mxu1 }
 0x668   : > { %v13699_v45 = vpop.f32.mrf.mxu0 }
 0x669   : > { %v13725_v61 = vpop.f32.mrf.mxu1 }
 0x66a   : > { %v13700_v53 = vpop.f32.mrf.mxu0  ;;  %v13726_v27 = vadd.f32 %v13725_v61, %v13724_v1  ;;  %v15549_v1 = vld [vmem:[%s21834_s7 + $0x18] sm:$0xff]   ;;  %v15555_v61 = vld [vmem:[%s21834_s7 + $0x88] sm:$0xff]  }
 0x66b   : > { %v13701_v40 = vadd.f32 %v13700_v53, %v13699_v45  ;;  %v15529_v45 = vld [vmem:[%s21843_s16] sm:$0xff]   ;;  %v15531_v53 = vld [vmem:[%s21834_s7 + $0xb8] sm:$0xff]  }
 0x66c   : > { %v13702_v43 = vpop.f32.mrf.mxu0 }
 0x66d   : > { %v5997_v62 = vadd.f32 %v13701_v40, %v5956_v11  ;;  %v15545_v40 = vld [vmem:[%s21834_s7 + $0x20] sm:$0xff]   ;;  %v15547_v11 = vld [vmem:[%s21834_s7 + $0x98] sm:$0xff]  }
 0x66e   : > { %v13703_v20 = vpop.f32.mrf.mxu0  ;;  %13747 = vmatpush3.bf16.msra.mxu0 %v15545_v40 }
 0x66f   : > { %v13704_v0 = vadd.f32 %v13703_v20, %v13702_v43  ;;  %v6038_v23 = vadd.f32 %v13723_v50, %v5997_v62  ;;  %v15538_v43 = vld [vmem:[%s21834_s7 + $0xe8] sm:$0xff]   ;;  %v15546_v20 = vld [vmem:[%s21834_s7 + $0xd8] sm:$0xff]   ;;  %v15551_v62 = vld [vmem:[%s21834_s7 + $0x90] sm:$0xff]   ;;  %13748 = vmatprep.subr.bf16.mxu0 %v15548_v41 }
 0x670   : > { %v15553_v50 = vld [vmem:[%s21834_s7 + $0x10] sm:$0xff]  }
 0x671   : > { %v6000_v4 = vadd.f32 %v13704_v0, %v5959_v25  ;;  %v15552_v0 = vld [vmem:[%s21834_s7 + $0x50] sm:$0xff]   ;;  %v15554_v25 = vld [vmem:[%s21834_s7 + $0xc8] sm:$0xff]  }
 0x672   : > { %13749 = vmatpush3.bf16.msra.mxu0 %v15549_v1 }
 0x673   : > { %v6041_v21 = vadd.f32 %v13726_v27, %v6000_v4  ;;  %13750 = vmatprep.subr.bf16.mxu0 %v15552_v0  ;;  %v15556_v4 = vld [vmem:[%s21834_s7 + $0x48] sm:$0xff]   ;;  %v15559_v27 = vld [vmem:[%s21834_s7 + $0x80] sm:$0xff]  }
 0x676   : > { %13751 = vmatpush3.bf16.msra.mxu0 %v15553_v50 }
 0x677   : > { %13752 = vmatprep.subr.bf16.mxu0 %v15556_v4 }
 0x688   : > { %v6078_v18 = vpop.f32.mrf.mxu0 }
 0x689   : > { %v6079_v56 = vadd.f32 %v6078_v18, %v6038_v23  ;;  %v15558_v23 = vld [vmem:[%s21834_s7 + $0xc0] sm:$0xff]   ;;  %v15557_v18 = vld [vmem:[%s21834_s7 + $0x8] sm:$0xff]  }
 0x68a   : > { %v14748_v59 = vpop.f32.mrf.mxu0  ;;  %13753 = vmatpush3.bf16.msra.mxu0 %v15557_v18 }
 0x68b   : > { %v6085_v33 = vmax.f32 %v6079_v56, 0.0  ;;  %v15560_v56 = vld [vmem:[%s21834_s7 + $0x40] sm:$0xff]   ;;  %v15562_v59 = vld [vmem:[%s21834_s7 + $0x1f8] sm:$0xff]  }
 0x68c   : > { %v6081_v42 = vpop.f32.mrf.mxu0  ;;  %13754 = vmatprep.subr.bf16.mxu0 %v15560_v56 }
 0x68d   : > { %v6082_v52 = vadd.f32 %v6081_v42, %v6041_v21  ;;  %v6089_v9 = vrot.slane %v6085_v33, 1  ;;  %v15561_v21 = vld [vmem:[%s21834_s7] sm:$0xff]   ;;  %v15564_v42 = vld [vmem:[%s21834_s7 + $0x178] sm:$0xff]  }
 0x68e   : > { %v14749_v47 = vpop.f32.mrf.mxu0  ;;  %13755 = vmatpush3.bf16.msra.mxu0 %v15561_v21 }
 0x68f   : > { %v6086_v26 = vmax.f32 %v6082_v52, 0.0  ;;  %13784 = vmatprep.subr.bf16.mxu0 %v15564_v42 }
 0x691   : > { %v6090_v51 = vrot.slane %v6086_v26, 1 }
 0x693   : > { %v6091_v7 = vsel %vm22452_vm1, %v6089_v9, %v6090_v51  ;;  %v6094_v55 = vsel %vm22453_vm3, %v6090_v51, 0.0  ;;  %vm22460_vm3 = vsmask.f32 6400 }
 0x694   : > { %v6095_v54 = vmax.f32 %v6085_v33, %v6091_v7  ;;  %v6096_v57 = vmax.f32 %v6086_v26, %v6094_v55 }
 0x696   : > { %v6100_v2 = vrot.slane %v6095_v54, 4  ;;  %v6101_v31 = vrot.slane %v6096_v57, 4 }
 0x698   : > { %v6102_v60 = vsel %vm22454_vm2, %v6100_v2, %v6101_v31  ;;  %v6105_v39 = vsel %vm22455_vm7, %v6101_v31, 0.0  ;;  %vm6166_vm7 = vcmask 1041408   ;;  %vm6162_vm2 = vcmask 31744  }
 0x699   : > { %v6106_v30 = vmax.f32 %v6095_v54, %v6102_v60  ;;  %v6107_v24 = vmax.f32 %v6096_v57, %v6105_v39 }
 0x69b   : > { %v6109_v16 = vpack.c.bf16 %v6107_v24, %v6106_v30 }
 0x69d   : > { %14751 = vmatpush3.bf16.msra.mxu1 %v6109_v16 }
 0x69e   : > { %14756 = vmatprep.subr.bf16.mxu1 %v22434_v22 }
 0x6a0   : > { %14753 = vmatmul.mubr.msk.bf16.vlgmr.msra.gmra.mxu1 %vm6110_vm0, %v6108_v36 }
 0x6a1   : > { %14758 = vmatprep.mubr.msk.bf16.mxu1 %vm22451_vm10, %v22434_v22 }
 0x760   : > { %v6148_v63 = vpop.f32.mrf.mxu1 }
 0x761   : > { %v6156_v6 = vpack.c.bf16 %v6148_v63, %v6148_v63 }
 0x762   : > { %v14754_v48 = vpop.f32.mrf.mxu1 }
 0x763   : > { %v6168_v12 = vsel %vm6166_vm7, %v6156_v6, 0  ;;  %vm22462_vm7 = vcmask 1044480  }
 0x764   : > { %14757 = vmatpush3.bf16.msra.mxu1 %v6168_v12  ;;  %v6151_v3 = vpop.f32.mrf.mxu1 }
 0x765   : > { %13762 = vmatprep.subr.bf16.mxu1 %v15530_v58 }
 0x766   : > { %v14755_v10 = vpop.f32.mrf.mxu1 }
 0x767   : > { %14759 = vmatmul.mubr.msk.bf16.vlgmr.msra.gmra.mxu1 %vm6162_vm2, %v15529_v45  ;;  %vm22463_vm2 = vsmask.f32 3328 }
 0x768   : > { %13763 = vmatpush3.bf16.msra.mxu1 %v15531_v53 }
 0x769   : > { %13764 = vmatprep.subr.bf16.mxu1 %v15534_v37 }
 0x76c   : > { %13765 = vmatpush3.bf16.msra.mxu1 %v15535_v49 }
 0x76d   : > { %13766 = vmatprep.subr.bf16.mxu1 %v15538_v43 }
 0x770   : > { %13767 = vmatpush3.bf16.msra.mxu1 %v15539_v29 }
 0x771   : > { %13768 = vmatprep.subr.bf16.mxu1 %v15542_v19 }
 0x774   : > { %13769 = vmatpush3.bf16.msra.mxu1 %v15543_v44 }
 0x775   : > { %13770 = vmatprep.subr.bf16.mxu1 %v15546_v20 }
 0x778   : > { %13771 = vmatpush3.bf16.msra.mxu1 %v15547_v11 }
 0x779   : > { %13772 = vmatprep.subr.bf16.mxu1 %v15550_v15 }
 0x77c   : > { %13773 = vmatpush3.bf16.msra.mxu1 %v15551_v62 }
 0x77d   : > { %13774 = vmatprep.subr.bf16.mxu1 %v15554_v25 }
 0x780   : > { %13775 = vmatpush3.bf16.msra.mxu1 %v15555_v61 }
 0x781   : > { %13776 = vmatprep.subr.bf16.mxu1 %v15558_v23 }
 0x784   : > { %13777 = vmatpush3.bf16.msra.mxu1 %v15559_v27 }
 0x785   : > { %13806 = vmatprep.subr.bf16.mxu1 %v15562_v59 }
 0x827   : > { %v6204_v33 = vpop.f32.mrf.mxu1 }
 0x828   : > { %v6211_v52 = vsel %vm18464_vm9, %v6204_v33, 0.0  ;;  %v6215_v47 = vpack.c.bf16 %v6204_v33, %v22434_v22  ;;  %v6217_v26 = vsel %vm18468_vm11, %v6204_v33, 0.0  ;;  %vm22456_vm9 = vmmov %vm22452_vm1  ;;  %vm22457_vm11 = vcmask 1045504  }
 0x829   : > { %v18835_v9 = vpack.c.bf16 %v6211_v52, %v22434_v22  ;;  %v14760_v51 = vpop.f32.mrf.mxu1  ;;  %v18838_v7 = vpack.c.bf16 %v6217_v26, %v22434_v22  ;;  %vm22461_vm1 = vmmov %vm22460_vm3 }
 0x82a   : > { %v18840_v55 = vshrl.u32 %v6215_v47, 16  ;;  %v18842_v54 = vshll.u32 %v6215_v47, 16 }
 0x82b   : > { %v6207_v57 = vpop.f32.mrf.mxu1  ;;  %v6421_v32 = vshrl.u32 %v18835_v9, 16  ;;  %v6238_v39 = vrot.slane %v18838_v7, 1  ;;  %v6424_v30 = vshll.u32 %v18835_v9, 16  ;;  %v6243_v36 = vrot.slane %v18835_v9, 2 }
 0x82c   : > { %v6226_v38 = vrot.slane %v18842_v54, 1  ;;  %v6259_v2 = vrot.slane %v18840_v55, 4  ;;  %v6260_v31 = vrot.slane %v18842_v54, 5  ;;  %v6212_v24 = vsel %vm18488_vm6, %v6207_v57, 0.0 }
 0x82d   : > { %v14761_v60 = vpop.f32.mrf.mxu1  ;;  %v6216_v16 = vpack.c.bf16 %v22434_v22, %v6207_v57  ;;  %v6253_v14 = vrot.slane %v18838_v7, 3  ;;  %v18856_v28 = vpack.c.bf16 %v22434_v22, %v6212_v24  ;;  %v6218_v8 = vsel %vm18494_vm4, %v6207_v57, 0.0  ;;  %v15563_v57 = vld [vmem:[%s21834_s7 + $0x1b8] sm:$0xff]   ;;  %v15566_v24 = vld [vmem:[%s21834_s7 + $0x1f0] sm:$0xff]  }
 0x82e   : > { %v6266_v34 = vrot.slane %v18838_v7, 5  ;;  %v6220_v35 = vpack.c.bf16 %v22434_v22, %v6218_v8  ;;  %v6227_v63 = vor.u32 %v6226_v38, %v18840_v55  ;;  %v18867_v6 = vor.u32 %v6260_v31, %v6259_v2  ;;  %v15570_v7 = vld [vmem:[%s21834_s7 + $0x1e8] sm:$0xff]  }
 0x82f   : > { %v18862_v17 = vshll.u32 %v6216_v16, 16  ;;  %v18864_v5 = vshrl.u32 %v6216_v16, 16  ;;  %v6244_v58 = vrot.slane %v18856_v28, 2  ;;  %v18870_v48 = vrot.slane %v6421_v32, 1 }
 0x830   : > { %v6239_v13 = vrot.slane %v6220_v35, 1  ;;  %v6429_v45 = vshrl.u32 %v18856_v28, 16  ;;  %v18874_v3 = vrot.slane %v6424_v30, 2  ;;  %v18878_v10 = vrot.slane %v6220_v35, 5 }
 0x831   : > { %v6231_v12 = vrot.slane %v18862_v17, 1  ;;  %v6262_v53 = vrot.slane %v18864_v5, 4  ;;  %v6263_v37 = vrot.slane %v18862_v17, 5  ;;  %v6432_v49 = vshll.u32 %v18856_v28, 16 }
 0x832   : > { %v6240_v29 = vsel %vm22456_vm9, %v6238_v39, %v6239_v13  ;;  %v6254_v19 = vrot.slane %v6220_v35, 3  ;;  %v6245_v44 = vsel %vm22457_vm11, %v6243_v36, %v6244_v58  ;;  %vm22458_vm6 = vcmask 1042432   ;;  %vm22464_vm9 = vmmov %vm22461_vm1 }
 0x833   : > { %v6235_v43 = vor.u32 %v18864_v5, %v6231_v12  ;;  %v18884_v46 = vor.u32 %v6263_v37, %v6262_v53  ;;  %v18888_v40 = vsel %vm22458_vm6, %v6266_v34, %v18878_v10  ;;  %v6472_v20 = vshrl.u32 %v6245_v44, 16  ;;  %v15565_v37 = vld [vmem:[%s21834_s7 + $0x138] sm:$0xff]   ;;  %vm22465_vm11 = vmmov %vm22461_vm1 }
 0x834   : > { %v6475_v11 = vshll.u32 %v6245_v44, 16  ;;  %v6480_v41 = vshrl.u32 %v6244_v58, 16  ;;  %v6483_v1 = vshll.u32 %v6244_v58, 16  ;;  %v6455_v15 = vshrl.u32 %v6240_v29, 16  ;;  %v15568_v44 = vld [vmem:[%s21834_s7 + $0x170] sm:$0xff]   ;;  %vm22466_vm6 = vmmov %vm22461_vm1 }
 0x835   : > { %v6458_v62 = vshll.u32 %v6240_v29, 16  ;;  %v6474_v0 = vrot.slane %v6472_v20, 1  ;;  %v6463_v50 = vshrl.u32 %v6239_v13, 16  ;;  %v6466_v61 = vshll.u32 %v6239_v13, 16 }
 0x836   : > { %v6477_v25 = vrot.slane %v6475_v11, 2  ;;  %v6482_v4 = vrot.slane %v6480_v41, 1  ;;  %v6485_v23 = vrot.slane %v6483_v1, 2  ;;  %v6457_v18 = vrot.slane %v6455_v15, 1 }
 0x837   : > { %v6460_v27 = vrot.slane %v6458_v62, 2  ;;  %v6465_v59 = vrot.slane %v6463_v50, 1  ;;  %v6468_v21 = vrot.slane %v6466_v61, 2  ;;  %vm22459_vm4 = vsmask.f32 7424  ;;  %v15569_v61 = vld [vmem:[%s21834_s7 + $0x130] sm:$0xff]  }
 0x838   : > { %v6478_v56 = vor.u32 %v6477_v25, %v6474_v0  ;;  %v6232_v42 = vsel %vm22459_vm4, %v6227_v63, %v6231_v12  ;;  %v6486_v33 = vor.u32 %v6485_v23, %v6482_v4  ;;  %v6446_v38 = vshrl.u32 %v6235_v43, 16  ;;  %v15574_v4 = vld [vmem:[%s21834_s7 + $0x1e0] sm:$0xff]   ;;  %vm22467_vm4 = vmmov %vm22461_vm1 }
 0x839   : > { %v6461_v52 = vor.u32 %v6460_v27, %v6457_v18  ;;  %v6438_v47 = vshrl.u32 %v6232_v42, 16  ;;  %v6441_v26 = vshll.u32 %v6232_v42, 16  ;;  %v6469_v51 = vor.u32 %v6468_v21, %v6465_v59  ;;  %v15572_v27 = vld [vmem:[%s21834_s7 + $0x168] sm:$0xff]   ;;  %v15575_v21 = vld [vmem:[%s21834_s7 + $0x1a0] sm:$0xff]  }
 0x83a   : > { %v6449_v2 = vshll.u32 %v6235_v43, 16  ;;  %v6427_v31 = vor.u32 %v18874_v3, %v18870_v48  ;;  %v6487_v32 = vsel %vm22460_vm3, %v6478_v56, %v6486_v33  ;;  %v6431_v30 = vrot.slane %v6429_v45, 1  ;;  %v15567_v45 = vld [vmem:[%s21834_s7 + $0x1b0] sm:$0xff]   ;;  %v15573_v33 = vld [vmem:[%s21834_s7 + $0x128] sm:$0xff]  }
 0x83b   : > { %v6440_v60 = vrot.slane %v6438_v47, 1  ;;  %v6443_v39 = vrot.slane %v6441_v26, 2  ;;  %7087 = vmatprep.mubr.bf16.mxu1 %v6487_v32  ;;  %v6470_v16 = vsel %vm22461_vm1, %v6461_v52, %v6469_v51  ;;  %v6448_v36 = vrot.slane %v6446_v38, 1  ;;  %v15578_v52 = vld [vmem:[%s21834_s7 + $0x1d8] sm:$0xff]   ;;  %v15576_v26 = vld [vmem:[%s21834_s7 + $0x160] sm:$0xff]  }
 0x83c   : > { %v6451_v8 = vrot.slane %v6449_v2, 2  ;;  %v6434_v34 = vrot.slane %v6432_v49, 2  ;;  %7088 = vmatmul.mubr.bf16.vlgmr.msra.gmra.mxu1 %v6470_v16  ;;  %v6255_v63 = vsel %vm22462_vm7, %v6253_v14, %v6254_v19  ;;  %v6514_v58 = vshrl.u32 %v6254_v19, 16 }
 0x83d   : > { %v6444_v35 = vor.u32 %v6443_v39, %v6440_v60  ;;  %v6517_v48 = vshll.u32 %v6254_v19, 16  ;;  %13807 = vmatpush3.bf16.msra.mxu1 %v15563_v57  ;;  %v6506_v3 = vshrl.u32 %v6255_v63, 16  ;;  %v6509_v53 = vshll.u32 %v6255_v63, 16  ;;  %v15579_v60 = vld [vmem:[%s21834_s7 + $0x198] sm:$0xff]  }
 0x83e   : > { %v6452_v12 = vor.u32 %v6451_v8, %v6448_v36  ;;  %v6435_v13 = vor.u32 %v6434_v34, %v6431_v30  ;;  %13808 = vmatprep.subr.bf16.mxu1 %v15566_v24  ;;  %v6516_v14 = vrot.slane %v6514_v58, 1  ;;  %v6265_v43 = vsel %vm22463_vm2, %v18867_v6, %v18884_v46  ;;  %v15571_v6 = vld [vmem:[%s21834_s7 + $0x1a8] sm:$0xff]   ;;  %v15583_v34 = vld [vmem:[%s21834_s7 + $0x190] sm:$0xff]   ;;  %v15581_v58 = vld [vmem:[%s21834_s7 + $0x118] sm:$0xff]  }
 0x83f   : > { %v6519_v49 = vrot.slane %v6517_v48, 2  ;;  %v6548_v29 = vshrl.u32 %v18884_v46, 16  ;;  %v6508_v20 = vrot.slane %v6506_v3, 1  ;;  %v6511_v11 = vrot.slane %v6509_v53, 2  ;;  %v15586_v48 = vld [vmem:[%s21834_s7 + $0x1c8] sm:$0xff]   ;;  %vm22470_vm2 = vmmov %vm22461_vm1 }
 0x840   : > { %v6453_v19 = vsel %vm22464_vm9, %v6444_v35, %v6452_v12  ;;  %v6436_v41 = vsel %vm22465_vm11, %v6427_v31, %v6435_v13  ;;  %v6540_v15 = vshrl.u32 %v6265_v43, 16  ;;  %v6543_v62 = vshll.u32 %v6265_v43, 16  ;;  %v15584_v13 = vld [vmem:[%s21834_s7 + $0x150] sm:$0xff]   ;;  %v15590_v43 = vld [vmem:[%s21834_s7 + $0x1c0] sm:$0xff]   ;;  %vm22471_vm9 = vmmov %vm22461_vm1 }
 0x841   : > { %7046 = vmatprep.mubr.bf16.mxu0 %v6453_v19  ;;  %v6520_v1 = vor.u32 %v6519_v49, %v6516_v14  ;;  %13809 = vmatpush3.bf16.msra.mxu1 %v15567_v45  ;;  %v6512_v0 = vor.u32 %v6511_v11, %v6508_v20  ;;  %v6550_v25 = vrot.slane %v6548_v29, 1  ;;  %v6551_v50 = vshll.u32 %v18884_v46, 16  ;;  %v15585_v49 = vld [vmem:[%s21834_s7 + $0x110] sm:$0xff]   ;;  %v15588_v29 = vld [vmem:[%s21834_s7 + $0x148] sm:$0xff]  }
 0x842   : > { %7047 = vmatmul.mubr.bf16.vlgmr.msra.gmra.mxu0 %v6436_v41  ;;  %13810 = vmatprep.subr.bf16.mxu1 %v15570_v7  ;;  %v6542_v23 = vrot.slane %v6540_v15, 1  ;;  %v6545_v18 = vrot.slane %v6543_v62, 2  ;;  %v6557_v47 = vshrl.u32 %v18888_v40, 16  ;;  %v6257_v57 = vrot.slane %v18856_v28, 4  ;;  %v15587_v7 = vld [vmem:[%s21834_s7 + $0x188] sm:$0xff]  }
 0x843   : > { %13785 = vmatpush3.bf16.msra.mxu0 %v15565_v37  ;;  %v6521_v56 = vsel %vm22466_vm6, %v6512_v0, %v6520_v1  ;;  %v6553_v46 = vrot.slane %v6551_v50, 2  ;;  %v6560_v2 = vshll.u32 %v18888_v40, 16  ;;  %v6249_v31 = vrot.slane %v18864_v5, 2  ;;  %v15582_v5 = vld [vmem:[%s21834_s7 + $0x1d0] sm:$0xff]   ;;  %v15589_v0 = vld [vmem:[%s21834_s7 + $0x108] sm:$0xff]  }
 0x844   : > { %13786 = vmatprep.subr.bf16.mxu0 %v15568_v44  ;;  %7128 = vmatprep.mubr.bf16.mxu0 %v6521_v56  ;;  %v6546_v59 = vor.u32 %v6545_v18, %v6542_v23  ;;  %v6559_v38 = vrot.slane %v6557_v47, 1  ;;  %v6250_v32 = vrot.slane %v18862_v17, 3  ;;  %v6565_v39 = vshrl.u32 %v18878_v10, 16  ;;  %v15577_v17 = vld [vmem:[%s21834_s7 + $0x120] sm:$0xff]   ;;  %v15596_v47 = vld [vmem:[%s21834_s7 + $0x228] sm:$0xff]  }
 0x845   : > { %13811 = vmatpush3.bf16.msra.mxu1 %v15571_v6  ;;  %v6554_v42 = vor.u32 %v6553_v46, %v6550_v25  ;;  %v6568_v30 = vshll.u32 %v18878_v10, 16  ;;  %v6246_v24 = vrot.slane %v18840_v55, 2  ;;  %v6247_v28 = vrot.slane %v18842_v54, 3  ;;  %v15580_v55 = vld [vmem:[%s21834_s7 + $0x158] sm:$0xff]   ;;  %v15591_v6 = vld [vmem:[%s21834_s7 + $0x180] sm:$0xff]  }
 0x846   : > { %13812 = vmatprep.subr.bf16.mxu1 %v15574_v4  ;;  %v6256_v16 = vrot.slane %v18835_v9, 4  ;;  %v6562_v40 = vrot.slane %v6560_v2, 2  ;;  %v6567_v10 = vrot.slane %v6565_v39, 1  ;;  %vm22468_vm3 = vcmask 1043456   ;;  %v15592_v25 = vld [vmem:[%s21834_s7 + $0x140] sm:$0xff]   ;;  %v15610_v39 = vld [vmem:[#allocation2 + $0xf0] sm:$0xff]  }
 0x847   : > { %13787 = vmatpush3.bf16.msra.mxu0 %v15569_v61  ;;  %v6555_v51 = vsel %vm22467_vm4, %v6546_v59, %v6554_v42  ;;  %v6570_v54 = vrot.slane %v6568_v30, 2  ;;  %v6251_v8 = vor.u32 %v6250_v32, %v6249_v31  ;;  %v6248_v63 = vor.u32 %v6247_v28, %v6246_v24  ;;  %v15593_v56 = vld [vmem:[%s21834_s7 + $0x100] sm:$0xff]   ;;  %v15594_v42 = vld [vmem:[%s21834_s7 + $0x238] sm:$0xff]   ;;  %v15611_v30 = vld [vmem:[#allocation2 + $0xb0] sm:$0xff]  }
 0x848   : > { %13788 = vmatprep.subr.bf16.mxu0 %v15572_v27  ;;  %7169 = vmatprep.mubr.bf16.mxu1 %v6555_v51  ;;  %v6258_v9 = vsel %vm22468_vm3, %v6256_v16, %v6257_v57  ;;  %v6563_v36 = vor.u32 %v6562_v40, %v6559_v38  ;;  %v6531_v12 = vshrl.u32 %v6257_v57, 16  ;;  %v6534_v53 = vshll.u32 %v6257_v57, 16  ;;  %v15598_v51 = vld [vmem:[%s21834_s7 + $0x218] sm:$0xff]   ;;  %v15599_v57 = vld [vmem:[%s21834_s7 + $0x210] sm:$0xff]   ;;  %v15600_v38 = vld [vmem:[%s21834_s7 + $0x208] sm:$0xff]  }
 0x849   : > { %13813 = vmatpush3.bf16.msra.mxu1 %v15575_v21  ;;  %v6571_v35 = vor.u32 %v6570_v54, %v6567_v10  ;;  %v6523_v45 = vshrl.u32 %v6258_v9, 16  ;;  %v6526_v3 = vshll.u32 %v6258_v9, 16  ;;  %vm22469_vm7 = vsmask.f32 5376  ;;  %v15601_v2 = vld [vmem:[%s21834_s7 + $0x200] sm:$0xff]   ;;  %v15606_v32 = vld [vmem:[#allocation2 + $0xf8] sm:$0xff]  }
 0x84a   : > { %13814 = vmatprep.subr.bf16.mxu1 %v15578_v52  ;;  %v6252_v14 = vsel %vm22469_vm7, %v6248_v63, %v6251_v8  ;;  %v6533_v20 = vrot.slane %v6531_v12, 1  ;;  %v6536_v11 = vrot.slane %v6534_v53, 2  ;;  %v6497_v15 = vshrl.u32 %v6251_v8, 16  ;;  %v15595_v52 = vld [vmem:[%s21834_s7 + $0x230] sm:$0xff]   ;;  %v15602_v31 = vld [vmem:[%s21844_s17] sm:$0xff]   ;;  %v15614_v24 = vld [vmem:[#allocation2 + $0xe8] sm:$0xff]  }
 0x84b   : > { %13789 = vmatpush3.bf16.msra.mxu0 %v15573_v33  ;;  %v18985_v37 = vsel %vm22461_vm1, %v6563_v36, %v6571_v35  ;;  %v6525_v19 = vrot.slane %v6523_v45, 1  ;;  %v6528_v44 = vrot.slane %v6526_v3, 2  ;;  %v6489_v41 = vshrl.u32 %v6252_v14, 16  ;;  %v15615_v28 = vld [vmem:[#allocation2 + $0xa8] sm:$0xff]   ;;  %v12680_v35 = vld [vmem:[%s21835_s8] ss:$0 sm:$0xff] }
 0x84c   : > { %13790 = vmatprep.subr.bf16.mxu0 %v15576_v26  ;;  %v6492_v1 = vshll.u32 %v6252_v14, 16  ;;  %v6500_v62 = vshll.u32 %v6251_v8, 16  ;;  %v6537_v61 = vor.u32 %v6536_v11, %v6533_v20  ;;  %v6499_v18 = vrot.slane %v6497_v15, 1  ;;  %v15597_v26 = vld [vmem:[%s21834_s7 + $0x220] sm:$0xff]  }
 0x84d   : > { %13815 = vmatpush3.bf16.msra.mxu1 %v15579_v60  ;;  %v6529_v50 = vor.u32 %v6528_v44, %v6525_v19  ;;  %v6491_v4 = vrot.slane %v6489_v41, 1  ;;  %v15607_v60 = vld [vmem:[#allocation2 + $0xb8] sm:$0xff]   ;;  %vm22497_vm6 = vcmask 1046528   ;;  %vm22502_vm1 = vcmask 1043456  }
 0x84e   : > { %13816 = vmatprep.subr.bf16.mxu1 %v15582_v5  ;;  %v6494_v23 = vrot.slane %v6492_v1, 2  ;;  %v6502_v27 = vrot.slane %v6500_v62, 2  ;;  %vm22500_vm3 = vmmov %vm22497_vm6 }
 0x84f   : > { %13791 = vmatpush3.bf16.msra.mxu0 %v15577_v17  ;;  %v6538_v46 = vsel %vm22470_vm2, %v6529_v50, %v6537_v61  ;;  %vm22503_vm7 = vmmov %vm22502_vm1  ;;  %vm22505_vm2 = vsmask.f32 7424 }
 0x850   : > { %13792 = vmatprep.subr.bf16.mxu0 %v15580_v55  ;;  %v6495_v59 = vor.u32 %v6494_v23, %v6491_v4  ;;  %v6503_v21 = vor.u32 %v6502_v27, %v6499_v18  ;;  %v15608_v18 = vld [vmem:[#allocation2 + $0x78] sm:$0xff]   ;;  %v15603_v27 = vld [vmem:[%s21844_s17 + $0x8] sm:$0xff]  }
 0x851   : > { %13817 = vmatpush3.bf16.msra.mxu1 %v15583_v34 }
 0x852   : > { %13818 = vmatprep.subr.bf16.mxu1 %v15586_v48  ;;  %v6504_v33 = vsel %vm22471_vm9, %v6495_v59, %v6503_v21  ;;  %v15612_v59 = vld [vmem:[#allocation2 + $0x70] sm:$0xff]   ;;  %vm22506_vm9 = vmmov %vm22505_vm2 }
 0x853   : > { %13793 = vmatpush3.bf16.msra.mxu0 %v15581_v58  ;;  %v15613_v21 = vld [vmem:[#allocation2 + $0x30] sm:$0xff]  }
 0x854   : > { %13794 = vmatprep.subr.bf16.mxu0 %v15584_v13 }
 0x855   : > { %13819 = vmatpush3.bf16.msra.mxu1 %v15587_v7 }
 0x856   : > { %13820 = vmatprep.subr.bf16.mxu1 %v15590_v43 }
 0x857   : > { %13795 = vmatpush3.bf16.msra.mxu0 %v15585_v49 }
 0x858   : > { %13796 = vmatprep.subr.bf16.mxu0 %v15588_v29 }
 0x859   : > { %13821 = vmatpush3.bf16.msra.mxu1 %v15591_v6 }
 0x85b   : > { %13797 = vmatpush3.bf16.msra.mxu0 %v15589_v0 }
 0x85c   : > { %13798 = vmatprep.subr.bf16.mxu0 %v15592_v25  ;;  %7170 = vmatmul.mubr.bf16.vlgmr.msra.gmra.mxu1 %v6538_v46  ;;  %v15609_v46 = vld [vmem:[#allocation2 + $0x38] sm:$0xff]  }
 0x85d   : > { %14784 = vmatprep.mubr.msk.bf16.mxu1 %vm6110_vm0, %v15602_v31  ;;  %v15624_v31 = vld [vmem:[#allocation2 + $0x58] sm:$0xff]  }
 0x85f   : > { %13799 = vmatpush3.bf16.msra.mxu0 %v15593_v56  ;;  %v15604_v56 = vld [vmem:[%s21844_s17 + $0x10] sm:$0xff]  }
 0x860   : > { %14762 = vmatprep.subr.bf16.mxu0 %v22434_v22 }
 0x862   : > { %7129 = vmatmul.mubr.bf16.vlgmr.msra.gmra.mxu0 %v6504_v33  ;;  %v15616_v33 = vld [vmem:[#allocation2 + $0x68] sm:$0xff]  }
 0x863   : > { %14763 = vmatpush3.bf16.msra.mxu0 %v15594_v42  ;;  %14778 = vmatprep.mubr.msk.bf16.mxu0 %vm22451_vm10, %v22434_v22  ;;  %v15605_v42 = vld [vmem:[%s21844_s17 + $0x18] sm:$0xff]  }
 0x864   : > { %14764 = vmatprep.subr.bf16.mxu0 %v22434_v22 }
 0x867   : > { %14765 = vmatpush3.bf16.msra.mxu0 %v15595_v52  ;;  %v15617_v52 = vld [vmem:[#allocation2 + $0x28] sm:$0xff]  }
 0x868   : > { %14766 = vmatprep.subr.bf16.mxu0 %v22434_v22 }
 0x86b   : > { %14767 = vmatpush3.bf16.msra.mxu0 %v15596_v47  ;;  %v15618_v47 = vld [vmem:[#allocation2 + $0xe0] sm:$0xff]  }
 0x86c   : > { %14768 = vmatprep.subr.bf16.mxu0 %v22434_v22 }
 0x86f   : > { %14769 = vmatpush3.bf16.msra.mxu0 %v15597_v26  ;;  %v15619_v26 = vld [vmem:[#allocation2 + $0xa0] sm:$0xff]  }
 0x870   : > { %14770 = vmatprep.subr.bf16.mxu0 %v22434_v22 }
 0x873   : > { %14771 = vmatpush3.bf16.msra.mxu0 %v15598_v51  ;;  %v15620_v51 = vld [vmem:[#allocation2 + $0x60] sm:$0xff]  }
 0x874   : > { %14772 = vmatprep.subr.bf16.mxu0 %v22434_v22 }
 0x877   : > { %14773 = vmatpush3.bf16.msra.mxu0 %v15599_v57  ;;  %v15621_v57 = vld [vmem:[#allocation2 + $0x20] sm:$0xff]  }
 0x878   : > { %14774 = vmatprep.subr.bf16.mxu0 %v22434_v22 }
 0x87b   : > { %14775 = vmatpush3.bf16.msra.mxu0 %v15600_v38  ;;  %v15622_v38 = vld [vmem:[#allocation2 + $0xd8] sm:$0xff]  }
 0x87c   : > { %14776 = vmatprep.subr.bf16.mxu0 %v22434_v22 }
 0x87f   : > { %14777 = vmatpush3.bf16.msra.mxu0 %v15601_v2  ;;  %v15623_v2 = vld [vmem:[#allocation2 + $0x98] sm:$0xff]  }
 0x880   : > { %13882 = vmatprep.subr.bf16.mxu0 %v15606_v32  ;;  %v15625_v32 = vld [vmem:[#allocation2 + $0x18] sm:$0xff]  }
 0x882   : > { %14779 = vmatmul.mubr.bf16.vlgmr.msra.gmra.mxu0 %v18985_v37 }
 0x883   : > { %13883 = vmatpush3.bf16.msra.mxu0 %v15607_v60  ;;  %v15626_v60 = vld [vmem:[#allocation2 + $0xd0] sm:$0xff]  }
 0x884   : > { %13884 = vmatprep.subr.bf16.mxu0 %v15610_v39  ;;  %v15627_v39 = vld [vmem:[#allocation2 + $0x90] sm:$0xff]  }
 0x887   : > { %13885 = vmatpush3.bf16.msra.mxu0 %v15611_v30  ;;  %v15628_v30 = vld [vmem:[#allocation2 + $0x50] sm:$0xff]  }
 0x888   : > { %13886 = vmatprep.subr.bf16.mxu0 %v15614_v24  ;;  %v15629_v24 = vld [vmem:[#allocation2 + $0x10] sm:$0xff]  }
 0x88b   : > { %13887 = vmatpush3.bf16.msra.mxu0 %v15615_v28  ;;  %v15630_v28 = vld [vmem:[#allocation2 + $0xc8] sm:$0xff]  }
 0x88c   : > { %13888 = vmatprep.subr.bf16.mxu0 %v15618_v47 }
 0x88f   : > { %13889 = vmatpush3.bf16.msra.mxu0 %v15619_v26 }
 0x890   : > { %13890 = vmatprep.subr.bf16.mxu0 %v15622_v38 }
 0x893   : > { %13891 = vmatpush3.bf16.msra.mxu0 %v15623_v2 }
 0x894   : > { %13892 = vmatprep.subr.bf16.mxu0 %v15626_v60 }
 0x897   : > { %13893 = vmatpush3.bf16.msra.mxu0 %v15627_v39 }
 0x898   : > { %13894 = vmatprep.subr.bf16.mxu0 %v15630_v28  ;;  %v22484_v28 = vld [vmem:[#allocation65_spill] sm:$0xff] }
 0x8fc   : > { %v13778_v17 = vpop.f32.mrf.mxu1 }
 0x8fe   : > { %v13779_v40 = vpop.f32.mrf.mxu1 }
 0x8ff   : > { %v13780_v45 = vadd.f32 %v13779_v40, %v13778_v17  ;;  %v15633_v17 = vld [vmem:[#allocation2 + $0x8] sm:$0xff]   ;;  %v15636_v40 = vld [vmem:[#allocation2 + $0x40] sm:$0xff]  }
 0x900   : > { %v13781_v10 = vpop.f32.mrf.mxu1 }
 0x902   : > { %v13756_v22 = vpop.f32.mrf.mxu0  ;;  %v13782_v9 = vpop.f32.mrf.mxu1 }
 0x903   : > { %v13783_v14 = vadd.f32 %v13782_v9, %v13781_v10  ;;  %v15637_v10 = vld [vmem:[#allocation2] sm:$0xff]   ;;  %v15640_v9 = vld [vmem:[#allocation2 + $0x178] sm:$0xff]  }
 0x904   : > { %v13757_v16 = vpop.f32.mrf.mxu0 }
 0x905   : > { %v13758_v34 = vadd.f32 %v13757_v16, %v13756_v22  ;;  %v15631_v22 = vld [vmem:[#allocation2 + $0x88] sm:$0xff]  }
 0x906   : > { %v13759_v5 = vpop.f32.mrf.mxu0  ;;  %v15632_v16 = vld [vmem:[#allocation2 + $0x48] sm:$0xff]   ;;  %13895 = vmatpush3.bf16.msra.mxu0 %v15631_v22 }
 0x907   : > { %v7049_v12 = vadd.f32 %v13758_v34, %v12680_v35 }
 0x908   : > { %v13760_v55 = vpop.f32.mrf.mxu0 }
 0x909   : > { %v13761_v58 = vadd.f32 %v13760_v55, %v13759_v5  ;;  %v7090_v7 = vadd.f32 %v13780_v45, %v7049_v12  ;;  %v15634_v5 = vld [vmem:[#allocation2 + $0xc0] sm:$0xff]  }
 0x90a   : > { %v15635_v55 = vld [vmem:[#allocation2 + $0x80] sm:$0xff]   ;;  %13896 = vmatprep.subr.bf16.mxu0 %v15634_v5 }
 0x90b   : > { %v7052_v3 = vadd.f32 %v13761_v58, %v12680_v35  ;;  %13897 = vmatpush3.bf16.msra.mxu0 %v15635_v55  ;;  %v22486_v5 = vld [vmem:[#allocation12_spill] sm:$0xff]  ;;  %v22492_v35 = vld [vmem:[#allocation54_spill] sm:$0xff] }
 0x90d   : > { %v7093_v43 = vadd.f32 %v13783_v14, %v7052_v3 }
 0x91c   : > { %v13822_v8 = vpop.f32.mrf.mxu1 }
 0x91e   : > { %v13823_v48 = vpop.f32.mrf.mxu1 }
 0x91f   : > { %v13824_v44 = vadd.f32 %v13823_v48, %v13822_v8 }
 0x920   : > { %v13825_v37 = vpop.f32.mrf.mxu1 }
 0x922   : > { %v13800_v54 = vpop.f32.mrf.mxu0  ;;  %v13826_v19 = vpop.f32.mrf.mxu1 }
 0x923   : > { %v13827_v41 = vadd.f32 %v13826_v19, %v13825_v37 }
 0x924   : > { %v13801_v36 = vpop.f32.mrf.mxu0 }
 0x925   : > { %v13802_v53 = vadd.f32 %v13801_v36, %v13800_v54  ;;  %v15638_v54 = vld [vmem:[#allocation2 + $0x1f8] sm:$0xff]  }
 0x926   : > { %v13803_v63 = vpop.f32.mrf.mxu0  ;;  %13962 = vmatprep.subr.bf16.mxu0 %v15638_v54  ;;  %v22488_v54 = vld [vmem:[#allocation66_spill] sm:$0xff] }
 0x927   : > { %v7131_v29 = vadd.f32 %v13802_v53, %v7090_v7 }
 0x928   : > { %v13804_v13 = vpop.f32.mrf.mxu0 }
 0x929   : > { %v13805_v49 = vadd.f32 %v13804_v13, %v13803_v63  ;;  %v7172_v1 = vadd.f32 %v13824_v44, %v7131_v29 }
 0x92b   : > { %v7134_v20 = vadd.f32 %v13805_v49, %v7093_v43 }
 0x92d   : > { %v7175_v6 = vadd.f32 %v13827_v41, %v7134_v20  ;;  %v22477_v20 = vld [vmem:[#allocation55_spill] sm:$0xff] }
 0x942   : > { %v7212_v11 = vpop.f32.mrf.mxu0 }
 0x943   : > { %v7213_v62 = vadd.f32 %v7212_v11, %v7172_v1  ;;  %v22479_v1 = vld [vmem:[#allocation50_spill] sm:$0xff] }
 0x944   : > { %v14780_v15 = vpop.f32.mrf.mxu0 }
 0x945   : > { %v7219_v61 = vmax.f32 %v7213_v62, 0.0 }
 0x946   : > { %v7215_v0 = vpop.f32.mrf.mxu0 }
 0x947   : > { %v7216_v25 = vadd.f32 %v7215_v0, %v7175_v6  ;;  %v22481_v0 = vld [vmem:[#allocation58_spill] sm:$0xff] }
 0x948   : > { %v14781_v50 = vpop.f32.mrf.mxu0 }
 0x949   : > { %v7220_v4 = vmax.f32 %v7216_v25, 0.0 }
 0x94b   : > { %v7229_v23 = vpack.c.bf16 %v7220_v4, %v7219_v61 }
 0x94d   : > { %14782 = vmatprep.subr.bf16.mxu1 %v7229_v23 }
 0x94e   : > { %14783 = vmatpush3.bf16.msra.mxu1 %v7229_v23 }
 0x94f   : > { %13842 = vmatprep.subr.bf16.mxu1 %v15608_v18 }
 0x951   : > { %14785 = vmatmul.mubr.msk.bf16.vlgmr.msra.gmra.mxu1 %vm6110_vm0, %v15603_v27 }
 0x952   : > { %14788 = vmatprep.mubr.msk.bf16.mxu1 %vm6110_vm0, %v15604_v56  ;;  %13843 = vmatpush3.bf16.msra.mxu1 %v15609_v46 }
 0x953   : > { %13844 = vmatprep.subr.bf16.mxu1 %v15612_v59 }
 0x956   : > { %13845 = vmatpush3.bf16.msra.mxu1 %v15613_v21 }
 0x957   : > { %13846 = vmatprep.subr.bf16.mxu1 %v15616_v33 }
 0x959   : > { %14789 = vmatmul.mubr.msk.bf16.gmra.mxu1 %vm6110_vm0, %v15605_v42  ;;  %vm22478_vm0 = vnez %v22477_v20 }
 0x95a   : > { %13847 = vmatpush3.bf16.msra.mxu1 %v15617_v52 }
 0x95b   : > { %13848 = vmatprep.subr.bf16.mxu1 %v15620_v51 }
 0x95e   : > { %13849 = vmatpush3.bf16.msra.mxu1 %v15621_v57 }
 0x95f   : > { %13850 = vmatprep.subr.bf16.mxu1 %v15624_v31 }
 0x962   : > { %13851 = vmatpush3.bf16.msra.mxu1 %v15625_v32 }
 0x963   : > { %13852 = vmatprep.subr.bf16.mxu1 %v15628_v30 }
 0x966   : > { %13853 = vmatpush3.bf16.msra.mxu1 %v15629_v24 }
 0x967   : > { %13854 = vmatprep.subr.bf16.mxu1 %v15632_v16 }
 0x96a   : > { %13855 = vmatpush3.bf16.msra.mxu1 %v15633_v17 }
 0x96b   : > { %13856 = vmatprep.subr.bf16.mxu1 %v15636_v40 }
 0x96e   : > { %13857 = vmatpush3.bf16.msra.mxu1 %v15637_v10 }
 0x96f   : > { %13922 = vmatprep.subr.bf16.mxu1 %v15640_v9 }
 0xa11   : > { %v14786_v36 = vpop.f32.mrf.mxu1 }
 0xa12   : > { %v7329_v12 = vsel %vm17809_vm5, %v14786_v36, 0.0  ;;  %v7345_v49 = vsel %vm17813_vm12, %v14786_v36, 0.0  ;;  %vm22485_vm12 = vnez %v22484_v28  ;;  %vm22489_vm5 = vnez %v22488_v54 }
 0xa13   : > { %v7296_v8 = vpop.f32.mrf.mxu1 }
 0xa14   : > { %v7327_v11 = vsel %vm22478_vm0, %v7296_v8, 0.0  ;;  %vm22507_vm0 = vsmask.f32 4352 }
 0xa15   : > { %v14787_v34 = vpop.f32.mrf.mxu1 }
 0xa16   : > { %v7330_v63 = vsel %vm17822_vm13, %v14787_v34, 0.0  ;;  %v7340_v58 = vpack.c.bf16 %v14787_v34, %v14786_v36  ;;  %v7346_v45 = vsel %vm17840_vm14, %v14787_v34, 0.0  ;;  %vm22480_vm13 = vnez %v22479_v1  ;;  %v22490_v36 = vld [vmem:[#allocation18_spill] sm:$0xff] }
 0xa17   : > { %v7299_v3 = vpop.f32.mrf.mxu1  ;;  %v19074_v53 = vpack.c.bf16 %v7330_v63, %v7329_v12  ;;  %v19078_v29 = vpack.c.bf16 %v7346_v45, %v7345_v49  ;;  %vm22482_vm14 = vnez %v22481_v0  ;;  %vm22491_vm10 = vnez %v22490_v36  ;;  %v22494_v12 = vld [vmem:[#allocation15_spill] sm:$0xff] }
 0xa18   : > { %v7364_v37 = vshll.u32 %v7340_v58, 16  ;;  %v7339_v7 = vpack.c.bf16 %v7299_v3, %v7296_v8  ;;  %v7328_v44 = vsel %vm17801_vm15, %v7299_v3, 0.0  ;;  %v7368_v41 = vshrl.u32 %v7340_v58, 16  ;;  %v22496_v45 = vld [vmem:[#allocation11_spill] sm:$0xff] }
 0xa19   : > { %v14790_v43 = vpop.f32.mrf.mxu1  ;;  %v7344_v15 = vsel %vm22480_vm13, %v7299_v3, 0.0  ;;  %v7343_v25 = vsel %vm22482_vm14, %v7296_v8, 0.0  ;;  %v7682_v61 = vshrl.u32 %v19074_v53, 16  ;;  %v7685_v4 = vshll.u32 %v19074_v53, 16  ;;  %vm22508_vm13 = vmmov %vm22502_vm1 }
 0xa1a   : > { %v7356_v62 = vshll.u32 %v7339_v7, 16  ;;  %v19088_v50 = vrot.slane %v7364_v37, 1  ;;  %v7335_v23 = vpack.c.bf16 %v7328_v44, %v7327_v11  ;;  %v7351_v18 = vpack.c.bf16 %v7344_v15, %v7343_v25  ;;  %v22501_v15 = vld [vmem:[#allocation64_spill] sm:$0xff]  ;;  %vm22509_vm14 = vmmov %vm22507_vm0 }
 0xa1b   : > { %v7312_v6 = vpop.f32.mrf.mxu1  ;;  %v7393_v56 = vrot.slane %v19078_v29, 1  ;;  %v7405_v46 = vrot.slane %v19074_v53, 4  ;;  %v19094_v59 = vrot.slane %v7368_v41, 4  ;;  %v19096_v21 = vrot.slane %v7364_v37, 5  ;;  %v22498_v37 = vld [vmem:[#allocation13_spill] sm:$0xff] }
 0xa1c   : > { %v7427_v42 = vrot.slane %v19078_v29, 5  ;;  %v7358_v33 = vrot.slane %v7356_v62, 1  ;;  %v19100_v52 = vor.u32 %v7368_v41, %v19088_v50  ;;  %v19102_v47 = vrot.slane %v7682_v61, 3 }
 0xa1d   : > { %v14791_v27 = vpop.f32.mrf.mxu1  ;;  %v19104_v26 = vrot.slane %v7685_v4, 4  ;;  %v7360_v51 = vshrl.u32 %v7339_v7, 16  ;;  %v7391_v38 = vrot.slane %v7351_v18, 1  ;;  %v7403_v2 = vrot.slane %v7335_v23, 4 }
 0xa1e   : > { %v7412_v31 = vrot.slane %v7356_v62, 5  ;;  %v19106_v32 = vrot.slane %v7351_v18, 5  ;;  %v7588_v60 = vshrl.u32 %v7335_v23, 16  ;;  %v7334_v30 = vsel %vm17912_vm8, %v14791_v27, 0.0 }
 0xa1f   : > { %v7315_v57 = vpop.f32.mrf.mxu1  ;;  %v19110_v24 = vpack.c.bf16 %v14791_v27, %v14790_v43  ;;  %v7350_v22 = vsel %vm22485_vm12, %v14791_v27, 0.0  ;;  %v7362_v16 = vor.u32 %v7360_v51, %v7358_v33  ;;  %v7591_v17 = vshll.u32 %v7335_v23, 16  ;;  %vm22510_vm12 = vmmov %vm22500_vm3 }
 0xa20   : > { %vm22487_vm15 = vnez %v22486_v5  ;;  %v19116_v55 = vpack.c.bf16 %v7315_v57, %v7312_v6  ;;  %v7411_v10 = vrot.slane %v7360_v51, 4  ;;  %v7333_v9 = vsel %vm22489_vm5, %v14790_v43, 0.0  ;;  %vm22513_vm5 = vmmov %vm22507_vm0 }
 0xa21   : > { %v7332_v40 = vsel %vm22487_vm15, %v7315_v57, 0.0  ;;  %v7349_v8 = vsel %vm22491_vm10, %v14790_v43, 0.0  ;;  %v7380_v34 = vshll.u32 %v19110_v24, 16  ;;  %vm22493_vm8 = vnez %v22492_v35  ;;  %vm22511_vm15 = vmmov %vm22505_vm2 }
 0xa22   : > { %v7331_v63 = vsel %vm22493_vm8, %v7312_v6, 0.0  ;;  %v19125_v58 = vpack.c.bf16 %v7334_v30, %v7333_v9  ;;  %v19127_v48 = vpack.c.bf16 %v7350_v22, %v7349_v8  ;;  %vm22495_vm11 = vnez %v22494_v12  ;;  %v22504_v9 = vld [vmem:[#allocation8_spill] sm:$0xff]  ;;  %vm22514_vm10 = vmmov %vm22507_vm0 }
 0xa23   : > { %v7348_v13 = vsel %vm22495_vm11, %v7315_v57, 0.0  ;;  %v7392_v3 = vsel %vm22497_vm6, %v22496_v45, %v7391_v38  ;;  %vm22499_vm4 = vnez %v22498_v37  ;;  %v19137_v14 = vrot.slane %v7380_v34, 1  ;;  %vm22515_vm8 = vmmov %vm22502_vm1 }
 0xa24   : > { %v7347_v7 = vsel %vm22499_vm4, %v7312_v6, 0.0  ;;  %v19139_v49 = vpack.c.bf16 %v7332_v40, %v7331_v63  ;;  %v7394_v43 = vsel %vm22500_vm3, %v7391_v38, %v7393_v56  ;;  %v7384_v19 = vshrl.u32 %v19110_v24, 16  ;;  %vm22516_vm11 = vmmov %vm22505_vm2 }
 0xa25   : > { %v19145_v44 = vpack.c.bf16 %v7348_v13, %v7347_v7  ;;  %v7372_v20 = vshll.u32 %v19116_v55, 16  ;;  %v19148_v11 = vor.u32 %v7412_v31, %v7411_v10  ;;  %v7590_v41 = vrot.slane %v7588_v60, 3  ;;  %vm22517_vm6 = vmmov %vm22507_vm0 }
 0xa26   : > { %v7593_v1 = vrot.slane %v7591_v17, 4  ;;  %v7404_v62 = vsel %vm22502_vm1, %v22501_v15, %v7403_v2  ;;  %v19155_v6 = vor.u32 %v7384_v19, %v19137_v14  ;;  %v19158_v0 = vrot.slane %v19127_v48, 1  ;;  %vm22518_vm4 = vmmov %vm22507_vm0 }
 0xa27   : > { %v19161_v25 = vrot.slane %v19125_v58, 4  ;;  %v7376_v61 = vshrl.u32 %v19116_v55, 16  ;;  %v7407_v4 = vrot.slane %v19139_v49, 4  ;;  %v7406_v23 = vsel %vm22503_vm7, %v7403_v2, %v7405_v46  ;;  %vm22519_vm1 = vmmov %vm22507_vm0 }
 0xa28   : > { %v7631_v18 = vshrl.u32 %v7404_v62, 16  ;;  %v7634_v27 = vshll.u32 %v7404_v62, 16  ;;  %v7374_v51 = vrot.slane %v7372_v20, 1  ;;  %v7395_v57 = vrot.slane %v19145_v44, 1  ;;  %vm22520_vm7 = vmmov %vm22507_vm0 }
 0xa29   : > { %v7639_v38 = vshrl.u32 %v7406_v23, 16  ;;  %v7642_v31 = vshll.u32 %v7406_v23, 16  ;;  %v7614_v30 = vshrl.u32 %v7392_v3, 16  ;;  %v7617_v28 = vshll.u32 %v7392_v3, 16 }
 0xa2a   : > { %v7633_v60 = vrot.slane %v7631_v18, 3  ;;  %v7636_v39 = vrot.slane %v7634_v27, 4  ;;  %v7622_v5 = vshrl.u32 %v7394_v43, 16  ;;  %v7625_v40 = vshll.u32 %v7394_v43, 16  ;;  %v15639_v43 = vld [vmem:[#allocation2 + $0x1b8] sm:$0xff]  }
 0xa2b   : > { %v7641_v22 = vrot.slane %v7639_v38, 3  ;;  %v7644_v17 = vrot.slane %v7642_v31, 4  ;;  %v7616_v54 = vrot.slane %v7614_v30, 3  ;;  %v7619_v2 = vrot.slane %v7617_v28, 4  ;;  %v15642_v31 = vld [vmem:[#allocation2 + $0x1f0] sm:$0xff]  }
 0xa2c   : > { %v7637_v10 = vor.u32 %v7636_v39, %v7633_v60  ;;  %v7359_v36 = vsel %vm22505_vm2, %v22504_v9, %v7358_v33  ;;  %v7624_v35 = vrot.slane %v7622_v5, 3  ;;  %v7627_v63 = vrot.slane %v7625_v40, 4  ;;  %vm22521_vm2 = vmmov %vm22507_vm0 }
 0xa2d   : > { %v7645_v8 = vor.u32 %v7644_v17, %v7641_v22  ;;  %v7367_v12 = vsel %vm22506_vm9, %v7362_v16, %v19088_v50  ;;  %v7620_v13 = vor.u32 %v7619_v2, %v7616_v54  ;;  %v7597_v37 = vshrl.u32 %v7359_v36, 16  ;;  %v15643_v22 = vld [vmem:[#allocation2 + $0x1b0] sm:$0xff]   ;;  %v15641_v2 = vld [vmem:[#allocation2 + $0x138] sm:$0xff]   ;;  %vm22522_vm9 = vmmov %vm22507_vm0 }
 0xa2e   : > { %v7600_v7 = vshll.u32 %v7359_v36, 16  ;;  %v7605_v3 = vshrl.u32 %v7367_v12, 16  ;;  %v7628_v62 = vor.u32 %v7627_v63, %v7624_v35  ;;  %v7608_v23 = vshll.u32 %v7367_v12, 16  ;;  %v15646_v35 = vld [vmem:[#allocation2 + $0x1e8] sm:$0xff]  }
 0xa2f   : > { %v7646_v15 = vsel %vm22507_vm0, %v7637_v10, %v7645_v8  ;;  %v19176_v18 = vor.u32 %v7593_v1, %v7590_v41  ;;  %v7599_v27 = vrot.slane %v7597_v37, 3  ;;  %v7408_v50 = vsel %vm22508_vm13, %v7405_v46, %v7407_v4  ;;  %v22512_v10 = vld [vmem:[#allocation14_spill] sm:$0xff]  ;;  %vm22523_vm13 = vmmov %vm22507_vm0 }
 0xa30   : > { %8422 = vmatprep.mubr.bf16.mxu0 %v7646_v15  ;;  %v7602_v33 = vrot.slane %v7600_v7, 4  ;;  %v7607_v38 = vrot.slane %v7605_v3, 3  ;;  %v7378_v16 = vor.u32 %v7376_v61, %v7374_v51  ;;  %v7629_v60 = vsel %vm22509_vm14, %v7620_v13, %v7628_v62  ;;  %v15644_v13 = vld [vmem:[#allocation2 + $0x170] sm:$0xff]  }
 0xa31   : > { %v7610_v39 = vrot.slane %v7608_v23, 4  ;;  %v7709_v30 = vshrl.u32 %v7408_v50, 16  ;;  %8423 = vmatmul.mubr.bf16.vlgmr.msra.gmra.mxu0 %v7629_v60  ;;  %v7712_v1 = vshll.u32 %v7408_v50, 16  ;;  %v7396_v28 = vsel %vm22510_vm12, %v7393_v56, %v7395_v57  ;;  %v15645_v50 = vld [vmem:[#allocation2 + $0x130] sm:$0xff]  }
 0xa32   : > { %v7603_v41 = vor.u32 %v7602_v33, %v7599_v27  ;;  %v7375_v53 = vsel %vm22511_vm15, %v19100_v52, %v7374_v51  ;;  %13963 = vmatpush3.bf16.msra.mxu0 %v15639_v43  ;;  %v7700_v5 = vshrl.u32 %v7396_v28, 16  ;;  %v7703_v40 = vshll.u32 %v7396_v28, 16  ;;  %v15647_v27 = vld [vmem:[#allocation2 + $0x1a8] sm:$0xff]   ;;  %vm22526_vm15 = vmmov %vm22507_vm0 }
 0xa33   : > { %v7611_v46 = vor.u32 %v7610_v39, %v7607_v38  ;;  %v7711_v17 = vrot.slane %v7709_v30, 3  ;;  %v7595_v54 = vsel %vm22513_vm5, %v22512_v10, %v19176_v18  ;;  %13964 = vmatprep.subr.bf16.mxu0 %v15642_v31  ;;  %v7714_v36 = vrot.slane %v7712_v1, 4  ;;  %v15650_v39 = vld [vmem:[#allocation2 + $0x1e0] sm:$0xff]   ;;  %vm22527_vm5 = vmmov %vm22507_vm0 }
 0xa34   : > { %v7691_v63 = vshrl.u32 %v7375_v53, 16  ;;  %v7694_v12 = vshll.u32 %v7375_v53, 16  ;;  %v7702_v52 = vrot.slane %v7700_v5, 3  ;;  %v7705_v51 = vrot.slane %v7703_v40, 4 }
 0xa35   : > { %v7612_v56 = vsel %vm22514_vm10, %v7603_v41, %v7611_v46  ;;  %v7410_v37 = vsel %vm22515_vm8, %v7407_v4, %v19161_v25  ;;  %v7715_v7 = vor.u32 %v7714_v36, %v7711_v17  ;;  %v19203_v43 = vor.u32 %v19104_v26, %v19102_v47  ;;  %v15648_v41 = vld [vmem:[#allocation2 + $0x168] sm:$0xff]   ;;  %vm22529_vm8 = vmmov %vm22507_vm0 }
 0xa36   : > { %8357 = vmatprep.mubr.bf16.mxu1 %v7612_v56  ;;  %v7693_v3 = vrot.slane %v7691_v63, 3  ;;  %v7696_v15 = vrot.slane %v7694_v12, 4  ;;  %13965 = vmatpush3.bf16.msra.mxu0 %v15643_v22  ;;  %v19205_v23 = vor.u32 %v7705_v51, %v7702_v52  ;;  %v7763_v33 = vshrl.u32 %v7410_v37, 16  ;;  %v15652_v12 = vld [vmem:[#allocation2 + $0x160] sm:$0xff]  }
 0xa37   : > { %8358 = vmatmul.mubr.bf16.vlgmr.msra.gmra.mxu1 %v7595_v54  ;;  %v7766_v38 = vshll.u32 %v7410_v37, 16  ;;  %v7383_v31 = vsel %vm22516_vm11, %v7378_v16, %v19137_v14  ;;  %v7716_v4 = vsel %vm22517_vm6, %v7645_v8, %v7715_v7  ;;  %13966 = vmatprep.subr.bf16.mxu0 %v15646_v35  ;;  %v7398_v14 = vsel %vm22500_vm3, %v7395_v57, %v19158_v0  ;;  %v15649_v57 = vld [vmem:[#allocation2 + $0x128] sm:$0xff]   ;;  %vm22530_vm11 = vmmov %vm22507_vm0 }
 0xa38   : > { %13923 = vmatpush3.bf16.msra.mxu1 %v15641_v2  ;;  %v7697_v60 = vor.u32 %v7696_v15, %v7693_v3  ;;  %v7745_v30 = vshrl.u32 %v7383_v31, 16  ;;  %v7748_v47 = vshll.u32 %v7383_v31, 16  ;;  %8430 = vmatprep.mubr.bf16.mxu0 %v7716_v4  ;;  %v19212_v26 = vsel %vm22518_vm4, %v7628_v62, %v19205_v23  ;;  %v15651_v62 = vld [vmem:[#allocation2 + $0x1a0] sm:$0xff]   ;;  %vm22532_vm4 = vmmov %vm22507_vm0 }
 0xa39   : > { %13924 = vmatprep.subr.bf16.mxu1 %v15644_v13  ;;  %v7765_v1 = vrot.slane %v7763_v33, 3  ;;  %v7768_v28 = vrot.slane %v7766_v38, 4  ;;  %8431 = vmatmul.mubr.bf16.gmra.mxu0 %v19212_v26  ;;  %v7754_v22 = vshrl.u32 %v7398_v14, 16  ;;  %v7757_v5 = vshll.u32 %v7398_v14, 16  ;;  %v15654_v13 = vld [vmem:[#allocation2 + $0x1d8] sm:$0xff]   ;;  %v15653_v4 = vld [vmem:[#allocation2 + $0x120] sm:$0xff]  }
 0xa3a   : > { %v19220_v8 = vsel %vm22519_vm1, %v7611_v46, %v7697_v60  ;;  %v7747_v16 = vrot.slane %v7745_v30, 3  ;;  %v7750_v53 = vrot.slane %v7748_v47, 4  ;;  %13967 = vmatpush3.bf16.msra.mxu0 %v15647_v27  ;;  %v7736_v40 = vshrl.u32 %v19139_v49, 16  ;;  %v15655_v27 = vld [vmem:[#allocation2 + $0x198] sm:$0xff]  }
 0xa3b   : > { %8365 = vmatprep.mubr.bf16.mxu1 %v19220_v8  ;;  %v7769_v17 = vor.u32 %v7768_v28, %v7765_v1  ;;  %v7739_v54 = vshll.u32 %v19139_v49, 16  ;;  %13968 = vmatprep.subr.bf16.mxu0 %v15650_v39  ;;  %v7756_v46 = vrot.slane %v7754_v22, 3  ;;  %v7835_v36 = vshrl.u32 %v19161_v25, 16 }
 0xa3c   : > { %13925 = vmatpush3.bf16.msra.mxu1 %v15645_v50  ;;  %v19225_v2 = vor.u32 %v7750_v53, %v7747_v16  ;;  %v7838_v35 = vshll.u32 %v19161_v25, 16  ;;  %v7759_v56 = vrot.slane %v7757_v5, 4  ;;  %v7738_v52 = vrot.slane %v7736_v40, 3  ;;  %v15658_v50 = vld [vmem:[#allocation2 + $0x1d0] sm:$0xff]  }
 0xa3d   : > { %13926 = vmatprep.subr.bf16.mxu1 %v15648_v41  ;;  %v7770_v63 = vsel %vm22520_vm7, %v7715_v7, %v7769_v17  ;;  %v7741_v51 = vrot.slane %v7739_v54, 4  ;;  %v19233_v49 = vsel %vm22521_vm2, %v19176_v18, %v19203_v43  ;;  %v7837_v37 = vrot.slane %v7835_v36, 3  ;;  %v15656_v41 = vld [vmem:[#allocation2 + $0x158] sm:$0xff]   ;;  %vm22535_vm7 = vmmov %vm22507_vm0 }
 0xa3e   : > { %8438 = vmatprep.mubr.bf16.mxu0 %v7770_v63  ;;  %v7840_v3 = vrot.slane %v7838_v35, 4  ;;  %v7826_v15 = vshrl.u32 %v19158_v0, 16  ;;  %13969 = vmatpush3.bf16.msra.mxu0 %v15651_v62  ;;  %v19239_v25 = vsel %vm22522_vm9, %v7697_v60, %v19225_v2  ;;  %v19241_v7 = vor.u32 %v7759_v56, %v7756_v46  ;;  %v15657_v54 = vld [vmem:[#allocation2 + $0x118] sm:$0xff]   ;;  %vm22537_vm9 = vmmov %vm22507_vm0 }
 0xa3f   : > { %8366 = vmatmul.mubr.bf16.gmra.mxu1 %v19233_v49  ;;  %v7829_v33 = vshll.u32 %v19158_v0, 16  ;;  %v7817_v18 = vshrl.u32 %v19155_v6, 16  ;;  %v7790_v38 = vshrl.u32 %v19125_v58, 16  ;;  %v7793_v31 = vshll.u32 %v19125_v58, 16  ;;  %13970 = vmatprep.subr.bf16.mxu0 %v15654_v13 }
 0xa40   : > { %13927 = vmatpush3.bf16.msra.mxu1 %v15649_v57  ;;  %8373 = vmatprep.mubr.bf16.mxu1 %v19239_v25  ;;  %v7841_v39 = vor.u32 %v7840_v3, %v7837_v37  ;;  %v7820_v60 = vshll.u32 %v19155_v6, 16  ;;  %v19252_v30 = vsel %vm22507_vm0, %v19205_v23, %v19241_v7  ;;  %v19254_v47 = vor.u32 %v7741_v51, %v7738_v52  ;;  %v15659_v23 = vld [vmem:[#allocation2 + $0x190] sm:$0xff]   ;;  %v15662_v57 = vld [vmem:[#allocation2 + $0x1c8] sm:$0xff]  }
 0xa41   : > { %13928 = vmatprep.subr.bf16.mxu1 %v15652_v12  ;;  %v7828_v1 = vrot.slane %v7826_v15, 3  ;;  %v7831_v58 = vrot.slane %v7829_v33, 4  ;;  %8439 = vmatmul.mubr.bf16.gmra.mxu0 %v19252_v30  ;;  %v7819_v14 = vrot.slane %v7817_v18, 3  ;;  %vm22524_vm14 = vcmask 1042432   ;;  %v15660_v12 = vld [vmem:[#allocation2 + $0x150] sm:$0xff]   ;;  %v15666_v15 = vld [vmem:[#allocation2 + $0x1c0] sm:$0xff]  }
 0xa42   : > { %v7842_v28 = vsel %vm22523_vm13, %v7769_v17, %v7841_v39  ;;  %v7822_v16 = vrot.slane %v7820_v60, 4  ;;  %v7428_v53 = vsel %vm22524_vm14, %v19106_v32, %v7427_v42  ;;  %13971 = vmatpush3.bf16.msra.mxu0 %v15655_v27  ;;  %v7665_v22 = vshrl.u32 %v19106_v32, 16  ;;  %v15661_v37 = vld [vmem:[#allocation2 + $0x110] sm:$0xff]   ;;  %vm22528_vm10 = vmmov %vm22524_vm14  ;;  %v15667_v60 = vld [vmem:[#allocation2 + $0x180] sm:$0xff]  }
 0xa43   : > { %8446 = vmatprep.mubr.bf16.mxu0 %v7842_v28  ;;  %v7668_v62 = vshll.u32 %v19106_v32, 16  ;;  %v7673_v5 = vshrl.u32 %v7428_v53, 16  ;;  %v19266_v40 = vor.u32 %v19096_v21, %v19094_v59  ;;  %v7429_v17 = vrot.slane %v19145_v44, 5  ;;  %13972 = vmatprep.subr.bf16.mxu0 %v15658_v50  ;;  %vm22534_vm1 = vmmov %vm22528_vm10  ;;  %v15671_v44 = vld [vmem:[#allocation2 + $0x230] sm:$0xff]  }
 0xa44   : > { %13929 = vmatpush3.bf16.msra.mxu1 %v15653_v4  ;;  %v7676_v46 = vshll.u32 %v7428_v53, 16  ;;  %v7792_v36 = vrot.slane %v7790_v38, 3  ;;  %v7795_v35 = vrot.slane %v7793_v31, 4  ;;  %v7418_v63 = vrot.slane %v7376_v61, 4  ;;  %v15663_v61 = vld [vmem:[#allocation2 + $0x188] sm:$0xff]   ;;  %vm22539_vm13 = vmmov %vm22534_vm1 }
 0xa45   : > { %v7419_v32 = vrot.slane %v7372_v20, 5  ;;  %13930 = vmatprep.subr.bf16.mxu1 %v15656_v41  ;;  %vm22525_vm12 = vsmask.f32 3328  ;;  %v19279_v21 = vsel %vm22526_vm15, %v19203_v43, %v19254_v47  ;;  %v7832_v56 = vor.u32 %v7831_v58, %v7828_v1  ;;  %v15664_v38 = vld [vmem:[#allocation2 + $0x148] sm:$0xff]   ;;  %vm22540_vm14 = vmmov %vm22507_vm0 }
 0xa46   : > { %v7417_v59 = vsel %vm22525_vm12, %v19148_v11, %v19266_v40  ;;  %v7823_v13 = vor.u32 %v7822_v16, %v7819_v14  ;;  %13973 = vmatpush3.bf16.msra.mxu0 %v15659_v23  ;;  %v7667_v52 = vrot.slane %v7665_v22, 3  ;;  %v7670_v55 = vrot.slane %v7668_v62, 4  ;;  %v15665_v58 = vld [vmem:[#allocation2 + $0x108] sm:$0xff]   ;;  %vm22533_vm3 = vmmov %vm22525_vm12 }
 0xa47   : > { %8374 = vmatmul.mubr.bf16.gmra.mxu1 %v19279_v21  ;;  %v7675_v20 = vrot.slane %v7673_v5, 3  ;;  %v7678_v51 = vrot.slane %v7676_v46, 4  ;;  %13974 = vmatprep.subr.bf16.mxu0 %v15662_v57  ;;  %v7430_v43 = vsel %vm22528_vm10, %v7427_v42, %v7429_v17  ;;  %v19289_v27 = vor.u32 %v7419_v32, %v7418_v63  ;;  %vm22536_vm2 = vmmov %vm22533_vm3 }
 0xa48   : > { %13931 = vmatpush3.bf16.msra.mxu1 %v15657_v54  ;;  %v7824_v3 = vsel %vm22527_vm5, %v19225_v2, %v7823_v13  ;;  %v7833_v33 = vsel %vm22529_vm8, %v19241_v7, %v7832_v56  ;;  %v19293_v18 = vor.u32 %v7795_v35, %v7792_v36  ;;  %v7648_v31 = vshrl.u32 %v19148_v11, 16  ;;  %v15670_v35 = vld [vmem:[#allocation2 + $0x238] sm:$0xff]   ;;  %vm22541_vm12 = vmmov %vm22507_vm0 }
 0xa49   : > { %13932 = vmatprep.subr.bf16.mxu1 %v15660_v12  ;;  %8381 = vmatprep.mubr.bf16.mxu1 %v7824_v3  ;;  %v7651_v4 = vshll.u32 %v19148_v11, 16  ;;  %v7656_v50 = vshrl.u32 %v7417_v59, 16  ;;  %v7659_v39 = vshll.u32 %v7417_v59, 16  ;;  %v7671_v29 = vor.u32 %v7670_v55, %v7667_v52  ;;  %v15672_v3 = vld [vmem:[#allocation2 + $0x228] sm:$0xff]   ;;  %vm22543_vm15 = vmmov %vm22507_vm0 }
 0xa4a   : > { %8447 = vmatmul.mubr.bf16.gmra.mxu0 %v7833_v33  ;;  %v7679_v42 = vor.u32 %v7678_v51, %v7675_v20  ;;  %v7727_v41 = vshrl.u32 %v7430_v43, 16  ;;  %v7730_v1 = vshll.u32 %v7430_v43, 16  ;;  %v7422_v28 = vrot.slane %v7384_v19, 4  ;;  %vm22544_vm5 = vmmov %vm22507_vm0 }
 0xa4b   : > { %13975 = vmatpush3.bf16.msra.mxu0 %v15663_v61  ;;  %8552 = vmatprep.mubr.bf16.mxu0 %v19220_v8  ;;  %v7431_v14 = vrot.slane %v19127_v48, 5  ;;  %v19304_v11 = vsel %vm22530_vm11, %v19254_v47, %v19293_v18  ;;  %v15668_v8 = vld [vmem:[#allocation2 + $0x140] sm:$0xff]   ;;  %vm22531_vm6 = vsmask.f32 7424  ;;  %v7650_v53 = vrot.slane %v7648_v31, 3  ;;  %v22538_v31 = vld [vmem:[#allocation67_spill] sm:$0xff]  ;;  %vm22545_vm10 = vmmov %vm22507_vm0 }
 0xa4c   : > { %13933 = vmatpush3.bf16.msra.mxu1 %v15661_v37  ;;  %13976 = vmatprep.subr.bf16.mxu0 %v15666_v15  ;;  %v7434_v16 = vsel %vm22531_vm6, %v19155_v6, %v22504_v9  ;;  %v7653_v23 = vrot.slane %v7651_v4, 4  ;;  %v7658_v22 = vrot.slane %v7656_v50, 3  ;;  %v7661_v62 = vrot.slane %v7659_v39, 4  ;;  %v15669_v6 = vld [vmem:[#allocation2 + $0x100] sm:$0xff]   ;;  %vm22546_vm8 = vmmov %vm22507_vm0 }
 0xa4d   : > { %13934 = vmatprep.subr.bf16.mxu1 %v15664_v38  ;;  %v7680_v19 = vsel %vm22532_vm4, %v7671_v29, %v7679_v42  ;;  %v7729_v48 = vrot.slane %v7727_v41, 3  ;;  %v7732_v5 = vrot.slane %v7730_v1, 4  ;;  %v7421_v47 = vsel %vm22533_vm3, %v19266_v40, %v19289_v27  ;;  %v15673_v50 = vld [vmem:[#allocation2 + $0x220] sm:$0xff]   ;;  %vm22548_vm6 = vmmov %vm22507_vm0 }
 0xa4e   : > { %v7423_v54 = vrot.slane %v7380_v34, 5  ;;  %v7799_v57 = vshrl.u32 %v7434_v16, 16  ;;  %v7802_v46 = vshll.u32 %v7434_v16, 16  ;;  %v7432_v36 = vsel %vm22534_vm1, %v7429_v17, %v7431_v14  ;;  %vm22549_vm4 = vmmov %vm22507_vm0 }
 0xa4f   : > { %8382 = vmatmul.mubr.bf16.gmra.mxu1 %v19304_v11  ;;  %13977 = vmatpush3.bf16.msra.mxu0 %v15667_v60  ;;  %v7654_v63 = vor.u32 %v7653_v23, %v7650_v53  ;;  %v7662_v32 = vor.u32 %v7661_v62, %v7658_v22  ;;  %v7718_v12 = vshrl.u32 %v7421_v47, 16  ;;  %v7721_v40 = vshll.u32 %v7421_v47, 16  ;;  %v15675_v22 = vld [vmem:[#allocation2 + $0x210] sm:$0xff]   ;;  %v15676_v47 = vld [vmem:[#allocation2 + $0x208] sm:$0xff]   ;;  %vm22551_vm3 = vmmov %vm22507_vm0 }
 0xa50   : > { %13935 = vmatpush3.bf16.msra.mxu1 %v15665_v58  ;;  %8487 = vmatprep.mubr.bf16.mxu1 %v7680_v19  ;;  %v7733_v24 = vor.u32 %v7732_v5, %v7729_v48  ;;  %v7781_v34 = vshrl.u32 %v7432_v36, 16  ;;  %v7784_v59 = vshll.u32 %v7432_v36, 16  ;;  %v7424_v56 = vor.u32 %v7423_v54, %v7422_v28  ;;  %v22542_v28 = vld [vmem:[#allocation68_spill] sm:$0xff] }
 0xa51   : > { %13936 = vmatprep.subr.bf16.mxu1 %v15668_v8  ;;  %v7801_v13 = vrot.slane %v7799_v57, 3  ;;  %v7804_v61 = vrot.slane %v7802_v46, 4  ;;  %v7663_v17 = vsel %vm22535_vm7, %v7654_v63, %v7662_v32  ;;  %v7720_v52 = vrot.slane %v7718_v12, 3  ;;  %v15677_v57 = vld [vmem:[#allocation2 + $0x200] sm:$0xff]  }
 0xa52   : > { %8553 = vmatmul.mubr.bf16.vlgmr.msra.gmra.mxu0 %v19233_v49  ;;  %v7723_v55 = vrot.slane %v7721_v40, 4  ;;  %v7425_v49 = vsel %vm22536_vm2, %v19289_v27, %v7424_v56  ;;  %v7734_v20 = vsel %vm22537_vm9, %v7679_v42, %v7733_v24  ;;  %v7786_v51 = vrot.slane %v7784_v59, 4  ;;  %v15678_v40 = vld [vmem:[%s21845_s18] sm:$0xff]  }
 0xa53   : > { %8560 = vmatprep.mubr.bf16.mxu0 %v19239_v25  ;;  %v7783_v25 = vrot.slane %v7781_v34, 3  ;;  %v7805_v37 = vor.u32 %v7804_v61, %v7801_v13  ;;  %v7772_v15 = vshrl.u32 %v7425_v49, 16  ;;  %v7775_v38 = vshll.u32 %v7425_v49, 16 }
 0xa54   : > { %13937 = vmatpush3.bf16.msra.mxu1 %v15669_v6  ;;  %v7724_v33 = vor.u32 %v7723_v55, %v7720_v52  ;;  %v7433_v27 = vsel %vm22539_vm13, %v7431_v14, %v22538_v31  ;;  %v7844_v16 = vshrl.u32 %v7424_v56, 16  ;;  %v7847_v53 = vshll.u32 %v7424_v56, 16 }
 0xa55   : > { %14792 = vmatprep.subr.bf16.mxu1 %v15670_v35  ;;  %v7806_v43 = vsel %vm22507_vm0, %v19225_v2, %v7805_v37  ;;  %v7787_v4 = vor.u32 %v7786_v51, %v7783_v25  ;;  %v7853_v39 = vshrl.u32 %v7433_v27, 16  ;;  %v7856_v29 = vshll.u32 %v7433_v27, 16  ;;  %v15674_v2 = vld [vmem:[#allocation2 + $0x218] sm:$0xff]  }
 0xa56   : > { %v7725_v42 = vsel %vm22540_vm14, %v7662_v32, %v7724_v33  ;;  %v7774_v60 = vrot.slane %v7772_v15, 3  ;;  %v7777_v41 = vrot.slane %v7775_v38, 4  ;;  %v7862_v14 = vsel %vm22543_vm15, %v7805_v37, %v22542_v28  ;;  %v22550_v32 = vld [vmem:[#allocation69_spill] sm:$0xff] }
 0xa57   : > { %8488 = vmatmul.mubr.bf16.vlgmr.msra.gmra.mxu1 %v7663_v17  ;;  %v7855_v1 = vrot.slane %v7853_v39, 3  ;;  %v7858_v58 = vrot.slane %v7856_v29, 4  ;;  %v7846_v48 = vrot.slane %v7844_v16, 3  ;;  %v7861_v5 = vsel %vm22546_vm8, %v19293_v18, %v22512_v10 }
 0xa58   : > { %8495 = vmatprep.mubr.bf16.mxu1 %v7734_v20  ;;  %14793 = vmatpush3.bf16.msra.mxu1 %v15670_v35  ;;  %v7778_v8 = vor.u32 %v7777_v41, %v7774_v60  ;;  %vm22547_vm11 = vcmask 1046528   ;;  %vm22552_vm1 = vcmask 523264  }
 0xa59   : > { %14794 = vmatprep.subr.bf16.mxu1 %v15671_v44  ;;  %v7859_v23 = vor.u32 %v7858_v58, %v7855_v1  ;;  %v7435_v54 = vsel %vm22547_vm11, %v19158_v0, %v22496_v45  ;;  %vm22559_vm7 = vmmov %vm22552_vm1 }
 0xa5a   : > { %8561 = vmatmul.mubr.bf16.gmra.mxu0 %v19279_v21  ;;  %v7788_v21 = vsel %vm22541_vm12, %v7733_v24, %v7787_v4  ;;  %v7779_v62 = vsel %vm22544_vm5, %v7724_v33, %v7778_v8  ;;  %v7808_v46 = vshrl.u32 %v7435_v54, 16  ;;  %v7811_v36 = vshll.u32 %v7435_v54, 16  ;;  %vm22560_vm2 = vmmov %vm22552_vm1 }
 0xa5b   : > { %8568 = vmatprep.mubr.bf16.mxu0 %v7806_v43  ;;  %v7860_v19 = vsel %vm22545_vm10, %v7787_v4, %v7859_v23  ;;  %vm22561_vm9 = vmmov %vm22552_vm1 }
 0xa5c   : > { %14795 = vmatpush3.bf16.msra.mxu1 %v15671_v44  ;;  %v7810_v10 = vrot.slane %v7808_v46, 3  ;;  %v7813_v18 = vrot.slane %v7811_v36, 4  ;;  %v15705_v46 = vld [vmem:[%s21838_s11 + $0x28] sm:$0xff]   ;;  %vm22562_vm0 = vmmov %vm22552_vm1 }
 0xa5d   : > { %14796 = vmatprep.subr.bf16.mxu1 %v15672_v3  ;;  %vm22563_vm13 = vmmov %vm22562_vm0 }
 0xa5e   : > { %v7814_v63 = vor.u32 %v7813_v18, %v7810_v10  ;;  %vm22564_vm14 = vmmov %vm22562_vm0 }
 0xa5f   : > { %8496 = vmatmul.mubr.bf16.gmra.mxu1 %v7725_v42  ;;  %vm22565_vm12 = vmmov %vm22562_vm0 }
 0xa60   : > { %8503 = vmatprep.mubr.bf16.mxu1 %v7788_v21  ;;  %14797 = vmatpush3.bf16.msra.mxu1 %v15672_v3  ;;  %v7815_v0 = vsel %vm22549_vm4, %v19241_v7, %v7814_v63  ;;  %v7863_v12 = vsel %vm22551_vm3, %v7814_v63, %v22550_v32  ;;  %v19357_v7 = vld [vmem:[%s21837_s10] ss:$0 sm:$0xff]  ;;  %vm22566_vm15 = vmmov %vm22562_vm0 }
 0xa61   : > { %14798 = vmatprep.subr.bf16.mxu1 %v15673_v50  ;;  %vm22567_vm5 = vmmov %vm22562_vm0 }
 0xa62   : > { %8569 = vmatmul.mubr.bf16.gmra.mxu0 %v19304_v11  ;;  %v7849_v11 = vrot.slane %v7847_v53, 4  ;;  %v15696_v53 = vld [vmem:[%s21838_s11 + $0x78] sm:$0xff]   ;;  %vm22568_vm10 = vmmov %vm22562_vm0 }
 0xa63   : > { %8576 = vmatprep.mubr.bf16.mxu0 %v7862_v14  ;;  %14034 = vmatprep.subr.bf16.mxu0 %v15696_v53  ;;  %vm22569_vm8 = vmmov %vm22562_vm0 }
 0xa64   : > { %14799 = vmatpush3.bf16.msra.mxu1 %v15673_v50  ;;  %v7850_v6 = vor.u32 %v7849_v11, %v7846_v48  ;;  %v15701_v11 = vld [vmem:[%s21838_s11 + $0x30] sm:$0xff]   ;;  %vm22570_vm11 = vmmov %vm22562_vm0 }
 0xa65   : > { %14800 = vmatprep.subr.bf16.mxu1 %v15674_v2  ;;  %vm22572_vm4 = vmmov %vm22562_vm0 }
 0xa66   : > { %v7851_v35 = vsel %vm22548_vm6, %v7778_v8, %v7850_v6  ;;  %vm22571_vm6 = vmmov %vm22562_vm0 }
 0xa67   : > { %8504 = vmatmul.mubr.bf16.gmra.mxu1 %v7779_v62  ;;  %vm22573_vm3 = vmmov %vm22562_vm0 }
 0xa68   : > { %8511 = vmatprep.mubr.bf16.mxu1 %v7860_v19  ;;  %14801 = vmatpush3.bf16.msra.mxu1 %v15674_v2  ;;  %v15700_v19 = vld [vmem:[%s21838_s11 + $0x70] sm:$0xff]  }
 0xa69   : > { %14802 = vmatprep.subr.bf16.mxu1 %v15675_v22 }
 0xa6a   : > { %8577 = vmatmul.mubr.bf16.gmra.mxu0 %v7861_v5 }
 0xa6c   : > { %14803 = vmatpush3.bf16.msra.mxu1 %v15675_v22  ;;  %v15697_v22 = vld [vmem:[%s21838_s11 + $0x38] sm:$0xff]  }
 0xa6d   : > { %14804 = vmatprep.subr.bf16.mxu1 %v15676_v47  ;;  %14035 = vmatpush3.bf16.msra.mxu0 %v15697_v22 }
 0xa6e   : > { %14036 = vmatprep.subr.bf16.mxu0 %v15700_v19 }
 0xa6f   : > { %8512 = vmatmul.mubr.bf16.gmra.mxu1 %v7851_v35 }
 0xa70   : > { %14805 = vmatpush3.bf16.msra.mxu1 %v15676_v47  ;;  %14808 = vmatprep.mubr.bf16.mxu1 %v19212_v26  ;;  %v15704_v47 = vld [vmem:[%s21838_s11 + $0x68] sm:$0xff]  }
 0xa71   : > { %14806 = vmatprep.subr.bf16.mxu1 %v15677_v57  ;;  %14037 = vmatpush3.bf16.msra.mxu0 %v15701_v11 }
 0xa72   : > { %14038 = vmatprep.subr.bf16.mxu0 %v15704_v47 }
 0xa74   : > { %14807 = vmatpush3.bf16.msra.mxu1 %v15677_v57 }
 0xa75   : > { %14039 = vmatpush3.bf16.msra.mxu0 %v15705_v46 }
 0xa77   : > { %14809 = vmatmul.mubr.bf16.vlgmr.msra.gmra.mxu1 %v19252_v30 }
 0xa78   : > { %14812 = vmatprep.mubr.bf16.mxu1 %v7815_v0 }
 0xa7f   : > { %14813 = vmatmul.mubr.bf16.gmra.mxu1 %v7863_v12 }
 0xa80   : > { %14824 = vmatprep.mubr.msk.bf16.mxu1 %vm22552_vm1, %v15678_v40 }
 0xaf1   : > { %v13898_v26 = vpop.f32.mrf.mxu0 }
 0xaf3   : > { %v13899_v24 = vpop.f32.mrf.mxu0 }
 0xaf4   : > { %v13900_v34 = vadd.f32 %v13899_v24, %v13898_v26 }
 0xaf5   : > { %v13901_v59 = vpop.f32.mrf.mxu0 }
 0xaf7   : > { %v13858_v56 = vpop.f32.mrf.mxu1  ;;  %v13902_v30 = vpop.f32.mrf.mxu0 }
 0xaf8   : > { %v13903_v3 = vadd.f32 %v13902_v30, %v13901_v59 }
 0xaf9   : > { %v13859_v13 = vpop.f32.mrf.mxu1  ;;  %v19359_v44 = vpop.f32.mrf.mxu0 }
 0xafa   : > { %v13860_v61 = vadd.f32 %v13859_v13, %v13858_v56 }
 0xafb   : > { %v13861_v17 = vpop.f32.mrf.mxu1  ;;  %v19362_v55 = vpop.f32.mrf.mxu0 }
 0xafc   : > { %v8360_v52 = vadd.f32 %v13860_v61, %v19357_v7 }
 0xafd   : > { %v13862_v49 = vpop.f32.mrf.mxu1  ;;  %v19364_v25 = vpop.f32.mrf.mxu0 }
 0xafe   : > { %v13863_v20 = vadd.f32 %v13862_v49, %v13861_v17  ;;  %v19366_v51 = vadd.f32 %v13900_v34, %v8360_v52 }
 0xaff   : > { %v19368_v37 = vpop.f32.mrf.mxu1  ;;  %v19371_v43 = vpop.f32.mrf.mxu0 }
 0xb00   : > { %v8363_v15 = vadd.f32 %v13863_v20, %v19357_v7 }
 0xb01   : > { %v13865_v33 = vpop.f32.mrf.mxu1  ;;  %v19373_v38 = vpop.f32.mrf.mxu0 }
 0xb02   : > { %v19375_v31 = vadd.f32 %v13903_v3, %v8363_v15  ;;  %v13866_v53 = vadd.f32 %v13865_v33, %v19368_v37 }
 0xb03   : > { %v19377_v27 = vpop.f32.mrf.mxu1  ;;  %v19379_v4 = vpop.f32.mrf.mxu0 }
 0xb04   : > { %v13912_v37 = vadd.f32 %v19379_v4, %v19373_v38 }
 0xb05   : > { %v13868_v50 = vpop.f32.mrf.mxu1  ;;  %v19381_v39 = vpop.f32.mrf.mxu0 }
 0xb06   : > { %v13869_v46 = vadd.f32 %v13868_v50, %v19377_v27 }
 0xb07   : > { %v13870_v29 = vpop.f32.mrf.mxu1  ;;  %v19383_v42 = vpop.f32.mrf.mxu0 }
 0xb09   : > { %v13871_v60 = vpop.f32.mrf.mxu1 }
 0xb0a   : > { %v19385_v41 = vpop.f32.mrf.mxu0  ;;  %v13872_v22 = vadd.f32 %v13871_v60, %v13870_v29 }
 0xb0b   : > { %v13873_v21 = vpop.f32.mrf.mxu1 }
 0xb0c   : > { %v19387_v2 = vpop.f32.mrf.mxu0  ;;  %v8376_v33 = vadd.f32 %v13872_v22, %v19357_v7 }
 0xb0d   : > { %v13874_v1 = vpop.f32.mrf.mxu1  ;;  %v13918_v27 = vadd.f32 %v19387_v2, %v19385_v41 }
 0xb0e   : > { %v19389_v58 = vpop.f32.mrf.mxu0  ;;  %v13875_v9 = vadd.f32 %v13874_v1, %v13873_v21 }
 0xb0f   : > { %v13876_v28 = vpop.f32.mrf.mxu1 }
 0xb10   : > { %v19391_v14 = vpop.f32.mrf.mxu0 }
 0xb11   : > { %v13877_v8 = vpop.f32.mrf.mxu1  ;;  %v13921_v38 = vadd.f32 %v19391_v14, %v19389_v58  ;;  %v13906_v58 = vadd.f32 %v19362_v55, %v19359_v44 }
 0xb12   : > { %v13978_v16 = vpop.f32.mrf.mxu0  ;;  %v13878_v49 = vadd.f32 %v13877_v8, %v13876_v28  ;;  %v8368_v8 = vadd.f32 %v13866_v53, %v19357_v7 }
 0xb13   : > { %v13879_v23 = vpop.f32.mrf.mxu1 }
 0xb14   : > { %v13979_v62 = vpop.f32.mrf.mxu0  ;;  %v8384_v45 = vadd.f32 %v13878_v49, %v19357_v7 }
 0xb15   : > { %v13880_v48 = vpop.f32.mrf.mxu1  ;;  %v13980_v60 = vadd.f32 %v13979_v62, %v13978_v16  ;;  %v13915_v16 = vadd.f32 %v19383_v42, %v19381_v39  ;;  %v8433_v42 = vadd.f32 %v13906_v58, %v8368_v8  ;;  %v15686_v58 = vld [vmem:[%s21845_s18 + $0x40] sm:$0xff]  }
 0xb16   : > { %v13981_v5 = vpop.f32.mrf.mxu0  ;;  %v13881_v11 = vadd.f32 %v13880_v48, %v13879_v23  ;;  %v8449_v1 = vadd.f32 %v13918_v27, %v8384_v45 }
 0xb17   : > { %v13938_v54 = vpop.f32.mrf.mxu1 }
 0xb18   : > { %v13982_v6 = vpop.f32.mrf.mxu0  ;;  %v8387_v29 = vadd.f32 %v13881_v11, %v19357_v7 }
 0xb19   : > { %v13939_v57 = vpop.f32.mrf.mxu1  ;;  %v13983_v48 = vadd.f32 %v13982_v6, %v13981_v5 }
 0xb1a   : > { %v19411_v36 = vpop.f32.mrf.mxu0  ;;  %v13940_v15 = vadd.f32 %v13939_v57, %v13938_v54 }
 0xb1b   : > { %22553 = vst [vmem:[#allocation70_spill] sm:$0xff] %v19411_v36  ;;  %v13941_v35 = vpop.f32.mrf.mxu1 }
 0xb1c   : > { %v19413_v10 = vpop.f32.mrf.mxu0  ;;  %v8490_v28 = vadd.f32 %v13940_v15, %v19366_v51  ;;  %v8371_v51 = vadd.f32 %v13869_v46, %v19357_v7 }
 0xb1d   : > { %22554 = vst [vmem:[#allocation71_spill] sm:$0xff] %v19413_v10  ;;  %v13942_v18 = vpop.f32.mrf.mxu1 }
 0xb1e   : > { %v19415_v63 = vpop.f32.mrf.mxu0  ;;  %v13943_v47 = vadd.f32 %v13942_v18, %v13941_v35  ;;  %v8555_v54 = vadd.f32 %v13980_v60, %v8490_v28 }
 0xb1f   : > { %v13944_v0 = vpop.f32.mrf.mxu1 }
 0xb20   : > { %v19417_v32 = vpop.f32.mrf.mxu0  ;;  %v8493_v21 = vadd.f32 %v13943_v47, %v19375_v31  ;;  %v8441_v31 = vadd.f32 %v13912_v37, %v8376_v33 }
 0xb21   : > { %v13945_v12 = vpop.f32.mrf.mxu1 }
 0xb22   : > { %v19419_v40 = vpop.f32.mrf.mxu0  ;;  %v13946_v45 = vadd.f32 %v13945_v12, %v13944_v0  ;;  %v13989_v0 = vadd.f32 %v19417_v32, %v19415_v63  ;;  %v22557_v47 = vld [vmem:[#allocation70_spill] sm:$0xff] }
 0xb23   : > { %v13947_v26 = vpop.f32.mrf.mxu1 }
 0xb24   : > { %v19421_v34 = vpop.f32.mrf.mxu0  ;;  %v8498_v55 = vadd.f32 %v13946_v45, %v8433_v42  ;;  %v15687_v45 = vld [vmem:[%s21845_s18 + $0x48] sm:$0xff]   ;;  %v15709_v42 = vld [vmem:[%s21838_s11 + $0x20] sm:$0xff]  }
 0xb25   : > { %v13948_v24 = vpop.f32.mrf.mxu1 }
 0xb26   : > { %v19423_v56 = vpop.f32.mrf.mxu0  ;;  %v13949_v62 = vadd.f32 %v13948_v24, %v13947_v26  ;;  %v13992_v24 = vadd.f32 %v19421_v34, %v19419_v40  ;;  %v22558_v40 = vld [vmem:[#allocation71_spill] sm:$0xff] }
 0xb27   : > { %v13950_v59 = vpop.f32.mrf.mxu1  ;;  %v13986_v34 = vadd.f32 %v22558_v40, %v22557_v47  ;;  %v15728_v47 = vld [vmem:[%s21838_s11 + $0x178] sm:$0xff]  }
 0xb28   : > { %v19425_v61 = vpop.f32.mrf.mxu0 }
 0xb29   : > { %v13951_v30 = vpop.f32.mrf.mxu1  ;;  %22555 = vst [vmem:[#allocation10_spill] sm:$0xff] %v19425_v61  ;;  %v13909_v61 = vadd.f32 %v19371_v43, %v19364_v25  ;;  %v8379_v43 = vadd.f32 %v13875_v9, %v19357_v7  ;;  %v8558_v7 = vadd.f32 %v13983_v48, %v8493_v21  ;;  %v8563_v27 = vadd.f32 %v13986_v34, %v8498_v55  ;;  %v15694_v48 = vld [vmem:[%s21838_s11 + $0xf8] sm:$0xff]   ;;  %v15717_v55 = vld [vmem:[%s21838_s11 + $0x10] sm:$0xff]  }
 0xb2a   : > { %v13996_v20 = vpop.f32.mrf.mxu0  ;;  %v13952_v41 = vadd.f32 %v13951_v30, %v13950_v59 }
 0xb2b   : > { %v13953_v13 = vpop.f32.mrf.mxu1  ;;  %v8436_v14 = vadd.f32 %v13909_v61, %v8371_v51  ;;  %v8444_v5 = vadd.f32 %v13915_v16, %v8379_v43  ;;  %v15699_v16 = vld [vmem:[%s21838_s11 + $0xb0] sm:$0xff]  }
 0xb2c   : > { %v13997_v10 = vpop.f32.mrf.mxu0  ;;  %v8506_v59 = vadd.f32 %v13952_v41, %v8441_v31  ;;  %v15680_v41 = vld [vmem:[%s21845_s18 + $0x10] sm:$0xff]   ;;  %v15681_v31 = vld [vmem:[%s21845_s18 + $0x18] sm:$0xff]  }
 0xb2d   : > { %v13954_v17 = vpop.f32.mrf.mxu1  ;;  %v13998_v30 = vadd.f32 %v13997_v10, %v13996_v20  ;;  %v8501_v26 = vadd.f32 %v13949_v62, %v8436_v14  ;;  %v15702_v62 = vld [vmem:[%s21838_s11 + $0xe8] sm:$0xff]   ;;  %v15688_v14 = vld [vmem:[%s21845_s18 + $0x50] sm:$0xff]  }
 0xb2e   : > { %v13999_v4 = vpop.f32.mrf.mxu0  ;;  %v13955_v57 = vadd.f32 %v13954_v17, %v13953_v13  ;;  %v8571_v22 = vadd.f32 %v13992_v24, %v8506_v59  ;;  %v15692_v59 = vld [vmem:[%s21845_s18 + $0x70] sm:$0xff]   ;;  %v15711_v24 = vld [vmem:[%s21838_s11 + $0x98] sm:$0xff]  }
 0xb2f   : > { %v13956_v52 = vpop.f32.mrf.mxu1  ;;  %v8566_v28 = vadd.f32 %v13989_v0, %v8501_v26  ;;  %v15710_v26 = vld [vmem:[%s21838_s11 + $0xd8] sm:$0xff]   ;;  %v15719_v0 = vld [vmem:[%s21838_s11 + $0x88] sm:$0xff]  }
 0xb30   : > { %v14000_v6 = vpop.f32.mrf.mxu0  ;;  %v8509_v13 = vadd.f32 %v13955_v57, %v8444_v5  ;;  %v22556_v12 = vld [vmem:[#allocation10_spill] sm:$0xff]  ;;  %v15682_v57 = vld [vmem:[%s21845_s18 + $0x20] sm:$0xff]   ;;  %v15689_v5 = vld [vmem:[%s21845_s18 + $0x58] sm:$0xff]  }
 0xb31   : > { %v13957_v3 = vpop.f32.mrf.mxu1  ;;  %v13995_v10 = vadd.f32 %v22556_v12, %v19423_v56  ;;  %v15720_v12 = vld [vmem:[%s21838_s11 + $0x48] sm:$0xff]  }
 0xb32   : > { %v13958_v25 = vadd.f32 %v13957_v3, %v13956_v52  ;;  %v8452_v52 = vadd.f32 %v13921_v38, %v8387_v29  ;;  %v14001_v3 = vadd.f32 %v14000_v6, %v13999_v4  ;;  %v15690_v6 = vld [vmem:[%s21845_s18 + $0x60] sm:$0xff]  }
 0xb33   : > { %v13959_v19 = vpop.f32.mrf.mxu1  ;;  %v8574_v33 = vadd.f32 %v13995_v10, %v8509_v13  ;;  %v15712_v13 = vld [vmem:[%s21838_s11 + $0x58] sm:$0xff]   ;;  %v15722_v10 = vld [vmem:[%s21838_s11 + $0xc0] sm:$0xff]  }
 0xb34   : > { %v8514_v18 = vadd.f32 %v13958_v25, %v8449_v1 }
 0xb35   : > { %v13960_v36 = vpop.f32.mrf.mxu1 }
 0xb36   : > { %v13961_v2 = vadd.f32 %v13960_v36, %v13959_v19  ;;  %v8579_v44 = vadd.f32 %v13998_v30, %v8514_v18  ;;  %v15706_v18 = vld [vmem:[%s21838_s11 + $0xe0] sm:$0xff]   ;;  %v15693_v30 = vld [vmem:[%s21845_s18 + $0x78] sm:$0xff]  }
 0xb37   : > { %v19439_v50 = vpop.f32.mrf.mxu1 }
 0xb38   : > { %v8517_v49 = vadd.f32 %v13961_v2, %v8452_v52  ;;  %v8628_v56 = vadd.f32 %v19439_v50, %v8563_v27  ;;  %v15679_v50 = vld [vmem:[%s21845_s18 + $0x8] sm:$0xff]   ;;  %v15695_v2 = vld [vmem:[%s21838_s11 + $0xb8] sm:$0xff]   ;;  %v22576_v27 = vld [vmem:[#allocation20_spill] sm:$0xff] }
 0xb39   : > { %v8619_v23 = vpop.f32.mrf.mxu1  ;;  %v15683_v52 = vld [vmem:[%s21845_s18 + $0x28] sm:$0xff]  }
 0xb3a   : > { %v8620_v9 = vadd.f32 %v8619_v23, %v8555_v54  ;;  %v8582_v19 = vadd.f32 %v14001_v3, %v8517_v49  ;;  %v8652_v1 = vmax.f32 %v8628_v56, 0.0  ;;  %v15698_v54 = vld [vmem:[%s21838_s11 + $0xf0] sm:$0xff]   ;;  %v15707_v49 = vld [vmem:[%s21838_s11 + $0xa0] sm:$0xff]  }
 0xb3b   : > { %v14811_v35 = vpop.f32.mrf.mxu1  ;;  %v15714_v3 = vld [vmem:[%s21838_s11 + $0xd0] sm:$0xff]  }
 0xb3c   : > { %v8650_v15 = vmax.f32 %v8620_v9, 0.0  ;;  %v8631_v60 = vadd.f32 %v14811_v35, %v8566_v28  ;;  %v15703_v35 = vld [vmem:[%s21838_s11 + $0xa8] sm:$0xff]   ;;  %v15684_v9 = vld [vmem:[%s21845_s18 + $0x30] sm:$0xff]   ;;  %v22574_v28 = vld [vmem:[#allocation23_spill] sm:$0xff] }
 0xb3d   : > { %v8622_v36 = vpop.f32.mrf.mxu1  ;;  %vm22575_vm1 = vnez %v22574_v28 }
 0xb3e   : > { %v8623_v39 = vadd.f32 %v8622_v36, %v8558_v7  ;;  %v8653_v38 = vmax.f32 %v8631_v60, 0.0  ;;  %v15685_v7 = vld [vmem:[%s21845_s18 + $0x38] sm:$0xff]   ;;  %v15691_v36 = vld [vmem:[%s21845_s18 + $0x68] sm:$0xff]  }
 0xb3f   : > { %v14814_v17 = vpop.f32.mrf.mxu1  ;;  %v22578_v60 = vld [vmem:[#allocation21_spill] sm:$0xff] }
 0xb40   : > { %v8651_v53 = vmax.f32 %v8623_v39, 0.0  ;;  %v8644_v20 = vadd.f32 %v14814_v17, %v8579_v44  ;;  %v8691_v23 = vpack.c.bf16 %v8653_v38, %v8652_v1  ;;  %v15708_v39 = vld [vmem:[%s21838_s11 + $0x60] sm:$0xff]   ;;  %v15713_v17 = vld [vmem:[%s21838_s11 + $0x18] sm:$0xff]   ;;  %v15718_v44 = vld [vmem:[%s21838_s11 + $0xc8] sm:$0xff]  }
 0xb41   : > { %v8635_v61 = vpop.f32.mrf.mxu1  ;;  %14040 = vmatprep.subr.bf16.mxu0 %v15708_v39 }
 0xb42   : > { %v8690_v11 = vpack.c.bf16 %v8651_v53, %v8650_v15  ;;  %v8636_v8 = vadd.f32 %v8635_v61, %v8571_v22  ;;  %v8656_v63 = vmax.f32 %v8644_v20, 0.0  ;;  %14041 = vmatpush3.bf16.msra.mxu0 %v15709_v42  ;;  %v15715_v15 = vld [vmem:[%s21838_s11 + $0x90] sm:$0xff]   ;;  %v15721_v61 = vld [vmem:[%s21838_s11 + $0x8] sm:$0xff]   ;;  %v15723_v20 = vld [vmem:[%s21838_s11 + $0x80] sm:$0xff]  }
 0xb43   : > { %v14815_v46 = vpop.f32.mrf.mxu1  ;;  %v15716_v53 = vld [vmem:[%s21838_s11 + $0x50] sm:$0xff]   ;;  %14042 = vmatprep.subr.bf16.mxu0 %v15712_v13  ;;  %v15724_v22 = vld [vmem:[%s21838_s11 + $0x40] sm:$0xff]  }
 0xb44   : > { %v8647_v37 = vadd.f32 %v14815_v46, %v8582_v19  ;;  %v8654_v25 = vmax.f32 %v8636_v8, 0.0  ;;  %v15725_v19 = vld [vmem:[%s21838_s11] sm:$0xff]  }
 0xb45   : > { %v8638_v29 = vpop.f32.mrf.mxu1 }
 0xb46   : > { %v8657_v32 = vmax.f32 %v8647_v37, 0.0  ;;  %v8639_v21 = vadd.f32 %v8638_v29, %v8574_v33  ;;  %14043 = vmatpush3.bf16.msra.mxu0 %v15713_v17  ;;  %v22591_v17 = vld [vmem:[#allocation24_spill] sm:$0xff] }
 0xb47   : > { %14044 = vmatprep.subr.bf16.mxu0 %v15716_v53 }
 0xb48   : > { %v8693_v51 = vpack.c.bf16 %v8657_v32, %v8656_v63  ;;  %v8655_v43 = vmax.f32 %v8639_v21, 0.0 }
 0xb4a   : > { %14816 = vmatprep.subr.bf16.mxu1 %v8693_v51  ;;  %v8692_v4 = vpack.c.bf16 %v8655_v43, %v8654_v25  ;;  %14045 = vmatpush3.bf16.msra.mxu0 %v15717_v55  ;;  %v22580_v25 = vld [vmem:[#allocation22_spill] sm:$0xff] }
 0xb4b   : > { %14817 = vmatpush3.bf16.msra.mxu1 %v8693_v51  ;;  %14046 = vmatprep.subr.bf16.mxu0 %v15720_v12 }
 0xb4c   : > { %14818 = vmatprep.subr.bf16.mxu1 %v8692_v4 }
 0xb4e   : > { %14047 = vmatpush3.bf16.msra.mxu0 %v15721_v61 }
 0xb4f   : > { %14819 = vmatpush3.bf16.msra.mxu1 %v8692_v4  ;;  %14048 = vmatprep.subr.bf16.mxu0 %v15724_v22 }
 0xb50   : > { %14820 = vmatprep.subr.bf16.mxu1 %v8691_v23 }
 0xb52   : > { %14049 = vmatpush3.bf16.msra.mxu0 %v15725_v19 }
 0xb53   : > { %14821 = vmatpush3.bf16.msra.mxu1 %v8691_v23  ;;  %14258 = vmatprep.subr.bf16.mxu0 %v15728_v47  ;;  %v22594_v47 = vld [vmem:[#allocation8_spill] sm:$0xff] }
 0xb54   : > { %14822 = vmatprep.subr.bf16.mxu1 %v8690_v11 }
 0xb57   : > { %14823 = vmatpush3.bf16.msra.mxu1 %v8690_v11  ;;  %v15726_v11 = vld [vmem:[%s21838_s11 + $0x1f8] sm:$0xff]  }
 0xb58   : > { %14146 = vmatprep.subr.bf16.mxu1 %v15694_v48 }
 0xb5a   : > { %14825 = vmatmul.mubr.msk.bf16.vlgmr.msra.gmra.mxu1 %vm22559_vm7, %v15679_v50  ;;  %vm22577_vm7 = vnez %v22576_v27 }
 0xb5b   : > { %14828 = vmatprep.mubr.msk.bf16.mxu1 %vm22560_vm2, %v15680_v41  ;;  %14147 = vmatpush3.bf16.msra.mxu1 %v15695_v2  ;;  %vm22579_vm2 = vnez %v22578_v60  ;;  %v15730_v60 = vld [vmem:[%s21838_s11 + $0x1f0] sm:$0xff]  }
 0xb5c   : > { %14148 = vmatprep.subr.bf16.mxu1 %v15698_v54 }
 0xb5f   : > { %14149 = vmatpush3.bf16.msra.mxu1 %v15699_v16 }
 0xb60   : > { %14150 = vmatprep.subr.bf16.mxu1 %v15702_v62  ;;  %v22582_v62 = vld [vmem:[#allocation11_spill] sm:$0xff] }
 0xb62   : > { %14829 = vmatmul.mubr.msk.bf16.gmra.mxu1 %vm22561_vm9, %v15681_v31  ;;  %vm22581_vm9 = vnez %v22580_v25 }
 0xb63   : > { %14832 = vmatprep.mubr.msk.bf16.mxu1 %vm22562_vm0, %v15682_v57  ;;  %14151 = vmatpush3.bf16.msra.mxu1 %v15703_v35  ;;  %vm22583_vm0 = vcmask 1046528  }
 0xb64   : > { %14152 = vmatprep.subr.bf16.mxu1 %v15706_v18 }
 0xb67   : > { %14153 = vmatpush3.bf16.msra.mxu1 %v15707_v49 }
 0xb68   : > { %14154 = vmatprep.subr.bf16.mxu1 %v15710_v26  ;;  %v22589_v26 = vld [vmem:[#allocation26_spill] sm:$0xff] }
 0xb6a   : > { %14833 = vmatmul.mubr.msk.bf16.gmra.mxu1 %vm22563_vm13, %v15683_v52 }
 0xb6b   : > { %14836 = vmatprep.mubr.msk.bf16.mxu1 %vm22564_vm14, %v15684_v9  ;;  %14155 = vmatpush3.bf16.msra.mxu1 %v15711_v24 }
 0xb6c   : > { %14156 = vmatprep.subr.bf16.mxu1 %v15714_v3 }
 0xb6f   : > { %14157 = vmatpush3.bf16.msra.mxu1 %v15715_v15 }
 0xb70   : > { %14158 = vmatprep.subr.bf16.mxu1 %v15718_v44 }
 0xb72   : > { %14837 = vmatmul.mubr.msk.bf16.gmra.mxu1 %vm22565_vm12, %v15685_v7  ;;  %vm22590_vm12 = vnez %v22589_v26 }
 0xb73   : > { %14840 = vmatprep.mubr.msk.bf16.mxu1 %vm22566_vm15, %v15686_v58  ;;  %14159 = vmatpush3.bf16.msra.mxu1 %v15719_v0  ;;  %v22585_v58 = vld [vmem:[#allocation27_spill] sm:$0xff]  ;;  %vm22592_vm15 = vnez %v22591_v17 }
 0xb74   : > { %14160 = vmatprep.subr.bf16.mxu1 %v15722_v10  ;;  %vm22586_vm13 = vnez %v22585_v58 }
 0xb77   : > { %14161 = vmatpush3.bf16.msra.mxu1 %v15723_v20 }
 0xb78   : > { %14370 = vmatprep.subr.bf16.mxu1 %v15726_v11 }
 0xb7a   : > { %14841 = vmatmul.mubr.msk.bf16.gmra.mxu1 %vm22567_vm5, %v15687_v45  ;;  %vm22593_vm5 = vmmov %vm22583_vm0 }
 0xb7b   : > { %14844 = vmatprep.mubr.msk.bf16.mxu1 %vm22568_vm10, %v15688_v14  ;;  %v22587_v14 = vld [vmem:[#allocation25_spill] sm:$0xff]  ;;  %vm22595_vm10 = vsmask.f32 7424 }
 0xb7c   : > { %vm22588_vm14 = vnez %v22587_v14 }
 0xb82   : > { %14845 = vmatmul.mubr.msk.bf16.gmra.mxu1 %vm22569_vm8, %v15689_v5  ;;  %vm22597_vm8 = vsmask.f32 256 }
 0xb83   : > { %14848 = vmatprep.mubr.msk.bf16.mxu1 %vm22570_vm11, %v15690_v6  ;;  %vm22599_vm11 = vmmov %vm22597_vm8 }
 0xb8a   : > { %14849 = vmatmul.mubr.msk.bf16.gmra.mxu1 %vm22571_vm6, %v15691_v36  ;;  %vm22600_vm6 = vmmov %vm22597_vm8 }
 0xb8b   : > { %14852 = vmatprep.mubr.msk.bf16.mxu1 %vm22572_vm4, %v15692_v59  ;;  %vm22601_vm4 = vmmov %vm22595_vm10 }
 0xb92   : > { %14853 = vmatmul.mubr.msk.bf16.gmra.mxu1 %vm22573_vm3, %v15693_v30  ;;  %vm22602_vm3 = vmmov %vm22583_vm0 }
 0xc1a   : > { %v14826_v40 = vpop.f32.mrf.mxu1 }
 0xc1b   : > { %v9049_v51 = vsel %vm22581_vm9, %v14826_v40, 0.0 }
 0xc1c   : > { %v8856_v34 = vpop.f32.mrf.mxu1 }
 0xc1d   : > { %v9047_v63 = vsel %vm22579_vm2, %v8856_v34, 0.0 }
 0xc1e   : > { %v14827_v46 = vpop.f32.mrf.mxu1 }
 0xc1f   : > { %v8986_v8 = vsel %vm22575_vm1, %v14827_v46, 0.0  ;;  %v19612_v43 = vpack.c.bf16 %v14827_v46, %v14826_v40  ;;  %v9080_v4 = vpack.c.bf16 %v14827_v46, %v9049_v51  ;;  %v15727_v46 = vld [vmem:[%s21838_s11 + $0x1b8] sm:$0xff]   ;;  %vm22604_vm1 = vmmov %vm22600_vm6 }
 0xc20   : > { %v9016_v37 = vpack.c.bf16 %v8986_v8, %v14826_v40  ;;  %v8859_v33 = vpop.f32.mrf.mxu1  ;;  %v22596_v8 = vld [vmem:[#allocation9_spill] sm:$0xff]  ;;  %vm22607_vm2 = vmmov %vm22604_vm1 }
 0xc21   : > { %v8984_v29 = vsel %vm22577_vm7, %v8859_v33, 0.0  ;;  %v9031_v21 = vpack.c.bf16 %v8859_v33, %v8856_v34  ;;  %v9079_v38 = vpack.c.bf16 %v8859_v33, %v9047_v63  ;;  %v9104_v54 = vshll.u32 %v19612_v43, 16  ;;  %v22598_v33 = vld [vmem:[#allocation19_spill] sm:$0xff] }
 0xc22   : > { %v9015_v32 = vpack.c.bf16 %v8984_v29, %v8856_v34  ;;  %v14830_v56 = vpop.f32.mrf.mxu1  ;;  %v9473_v1 = vshrl.u32 %v9016_v37, 16  ;;  %v9108_v16 = vshrl.u32 %v19612_v43, 16  ;;  %v19621_v57 = vrot.slane %v9080_v4, 1 }
 0xc23   : > { %v9096_v48 = vshll.u32 %v9031_v21, 16  ;;  %v19614_v50 = vrot.slane %v9079_v38, 1  ;;  %v9476_v18 = vshll.u32 %v9016_v37, 16  ;;  %v9053_v45 = vsel %vm22586_vm13, %v14830_v56, 0.0 }
 0xc24   : > { %v8872_v23 = vpop.f32.mrf.mxu1  ;;  %v9441_v41 = vshrl.u32 %v9015_v32, 16  ;;  %22584 = vst [vmem:[#allocation32_spill] sm:$0xff] %v19621_v57  ;;  %v19623_v35 = vrot.slane %v9473_v1, 7  ;;  %v9100_v36 = vshrl.u32 %v9031_v21, 16  ;;  %v9444_v49 = vshll.u32 %v9015_v32, 16 }
 0xc25   : > { %v9232_v31 = vsel %vm22583_vm0, %v22582_v62, %v19614_v50  ;;  %v19625_v7 = vrot.slane %v9096_v48, 1  ;;  %v9051_v5 = vsel %vm22588_vm14, %v8872_v23, 0.0  ;;  %v19643_v15 = vrot.slane %v9104_v54, 1  ;;  %vm22610_vm0 = vmmov %vm22604_vm1 }
 0xc26   : > { %v14831_v2 = vpop.f32.mrf.mxu1  ;;  %v9433_v52 = vshrl.u32 %v9232_v31, 16  ;;  %v9443_v6 = vrot.slane %v9441_v41, 7  ;;  %v9436_v42 = vshll.u32 %v9232_v31, 16  ;;  %v9478_v55 = vor.u32 %v9476_v18, %v19623_v35  ;;  %vm22613_vm14 = vmmov %vm22602_vm3 }
 0xc27   : > { %v8990_v24 = vsel %vm22590_vm12, %v14831_v2, 0.0  ;;  %v19639_v13 = vpack.c.bf16 %v14831_v2, %v14830_v56  ;;  %v9102_v12 = vor.u32 %v9100_v36, %v19625_v7  ;;  %v9234_v10 = vsel %vm22593_vm5, %v19614_v50, %v19621_v57  ;;  %vm22614_vm12 = vmmov %vm22610_vm0 }
 0xc28   : > { %v8875_v9 = vpop.f32.mrf.mxu1  ;;  %v19631_v59 = vrot.slane %v9433_v52, 7  ;;  %v9446_v61 = vor.u32 %v9444_v49, %v9443_v6  ;;  %v19656_v22 = vpack.c.bf16 %v8990_v24, %v14830_v56  ;;  %v19658_v19 = vpack.c.bf16 %v14831_v2, %v9053_v45  ;;  %v15731_v2 = vld [vmem:[%s21838_s11 + $0x1b0] sm:$0xff]   ;;  %v22603_v49 = vld [vmem:[#allocation16_spill] sm:$0xff]  ;;  %vm22617_vm5 = vmmov %vm22601_vm4 }
 0xc29   : > { %v19633_v30 = vpack.c.bf16 %v8875_v9, %v8872_v23  ;;  %v8988_v3 = vsel %vm22592_vm15, %v8875_v9, 0.0  ;;  %v19645_v53 = vpack.c.bf16 %v8875_v9, %v9051_v5  ;;  %v9099_v40 = vsel %vm22595_vm10, %v22594_v47, %v19625_v7  ;;  %v15734_v9 = vld [vmem:[%s21838_s11 + $0x1e8] sm:$0xff]   ;;  %vm22618_vm10 = vmmov %vm22601_vm4 }
 0xc2a   : > { %v19635_v39 = vpop.f32.mrf.mxu1  ;;  %v9438_v20 = vor.u32 %v9436_v42, %v19631_v59  ;;  %v9017_v11 = vpack.c.bf16 %v8988_v3, %v8872_v23  ;;  %v9120_v28 = vshll.u32 %v19639_v13, 16  ;;  %v19671_v37 = vsel %vm22597_vm8, %v22596_v8, %v9446_v61  ;;  %vm22620_vm8 = vmmov %vm22610_vm0 }
 0xc2b   : > { %v9112_v44 = vshll.u32 %v19633_v30, 16  ;;  %v9425_v29 = vshrl.u32 %v9099_v40, 16  ;;  %v9116_v32 = vshrl.u32 %v19633_v30, 16  ;;  %v9235_v21 = vrot.slane %v19645_v53, 1  ;;  %10547 = vmatprep.mubr.bf16.mxu1 %v19671_v37 }
 0xc2c   : > { %v19649_v0 = vpop.f32.mrf.mxu1  ;;  %v9439_v27 = vsel %vm22599_vm11, %v22598_v33, %v9438_v20  ;;  %v9465_v56 = vshrl.u32 %v9234_v10, 16  ;;  %v9428_v51 = vshll.u32 %v9099_v40, 16  ;;  %v19684_v43 = vsel %vm22600_vm6, %v9443_v6, %v9478_v55  ;;  %v22611_v33 = vld [vmem:[#allocation29_spill] sm:$0xff]  ;;  %vm22621_vm11 = vmmov %vm22610_vm0 }
 0xc2d   : > { %v19678_v63 = vrot.slane %v9112_v44, 1  ;;  %10548 = vmatmul.mubr.bf16.vlgmr.msra.gmra.mxu1 %v9439_v27  ;;  %v9427_v25 = vrot.slane %v9425_v29, 7  ;;  %v9107_v38 = vsel %vm22601_vm4, %v9102_v12, %v19643_v15  ;;  %v9468_v23 = vshll.u32 %v9234_v10, 16  ;;  %v15732_v44 = vld [vmem:[%s21838_s11 + $0x170] sm:$0xff]   ;;  %vm22622_vm6 = vmmov %vm22610_vm0 }
 0xc2e   : > { %v19663_v34 = vpop.f32.mrf.mxu1  ;;  %10555 = vmatprep.mubr.bf16.mxu1 %v19684_v43  ;;  %v19691_v1 = vrot.slane %v9465_v56, 7  ;;  %v9453_v48 = vshrl.u32 %v9107_v38, 16  ;;  %v9509_v41 = vshrl.u32 %v9017_v11, 16  ;;  %14371 = vmatpush3.bf16.msra.mxu1 %v15727_v46  ;;  %v9110_v54 = vor.u32 %v9108_v16, %v19643_v15  ;;  %v15729_v16 = vld [vmem:[%s21838_s11 + $0x138] sm:$0xff]   ;;  %v22605_v10 = vld [vmem:[#allocation30_spill] sm:$0xff]  ;;  %vm22623_vm4 = vmmov %vm22602_vm3 }
 0xc2f   : > { %v9533_v31 = vshrl.u32 %v19656_v22, 16  ;;  %v9430_v18 = vor.u32 %v9428_v51, %v9427_v25  ;;  %v9512_v52 = vshll.u32 %v9017_v11, 16  ;;  %14372 = vmatprep.subr.bf16.mxu1 %v15730_v60  ;;  %v9456_v14 = vshll.u32 %v9107_v38, 16  ;;  %v15735_v11 = vld [vmem:[%s21838_s11 + $0x1a8] sm:$0xff]   ;;  %v15733_v29 = vld [vmem:[%s21838_s11 + $0x130] sm:$0xff]  }
 0xc30   : > { %v19688_v4 = vpop.f32.mrf.mxu1  ;;  %v19702_v58 = vor.u32 %v9468_v23, %v19691_v1  ;;  %v19704_v45 = vrot.slane %v9453_v48, 7  ;;  %v19706_v5 = vrot.slane %v9509_v41, 7  ;;  %v9124_v6 = vshrl.u32 %v19639_v13, 16  ;;  %v15736_v38 = vld [vmem:[%s21838_s11 + $0x168] sm:$0xff]   ;;  %v22615_v23 = vld [vmem:[#allocation28_spill] sm:$0xff]  ;;  %v22624_v13 = vld [vmem:[#allocation35_spill] sm:$0xff] }
 0xc31   : > { %v9237_v36 = vrot.slane %v19658_v19, 1  ;;  %v9236_v30 = vsel %vm22602_vm3, %v19621_v57, %v9235_v21  ;;  %v9431_v42 = vsel %vm22604_vm1, %v22603_v49, %v9430_v18  ;;  %v19719_v24 = vrot.slane %v9120_v28, 1  ;;  %vm22626_vm1 = vmmov %vm22623_vm4 }
 0xc32   : > { %v19717_v26 = vpop.f32.mrf.mxu1  ;;  %v9118_v17 = vor.u32 %v9116_v32, %v19678_v63  ;;  %10386 = vmatprep.mubr.bf16.mxu0 %v9431_v42  ;;  %v19723_v3 = vor.u32 %v9456_v14, %v19704_v45  ;;  %v9514_v53 = vor.u32 %v9512_v52, %v19706_v5  ;;  %14373 = vmatpush3.bf16.msra.mxu1 %v15731_v2  ;;  %v19729_v55 = vrot.slane %v9533_v31, 7  ;;  %v15739_v52 = vld [vmem:[%s21838_s11 + $0x1a0] sm:$0xff]  }
 0xc33   : > { %v9536_v12 = vshll.u32 %v19656_v22, 16  ;;  %10387 = vmatmul.mubr.bf16.vlgmr.msra.gmra.mxu0 %v22596_v8  ;;  %vm22606_vm7 = vnez %v22605_v10  ;;  %v19738_v20 = vpack.c.bf16 %v19663_v34, %v19635_v39  ;;  %14374 = vmatprep.subr.bf16.mxu1 %v15734_v9  ;;  %v9505_v40 = vsel %vm22607_vm2, %v19631_v59, %v19702_v58  ;;  %v22608_v22 = vld [vmem:[#allocation31_spill] sm:$0xff]  ;;  %v15738_v59 = vld [vmem:[%s21838_s11 + $0x1e0] sm:$0xff]  }
 0xc34   : > { %v8994_v61 = vsel %vm22606_vm7, %v19663_v34, 0.0  ;;  %vm22609_vm9 = vnez %v22608_v22  ;;  %v9504_v28 = vsel %vm22610_vm0, %v9427_v25, %v19723_v3  ;;  %vm22612_vm13 = vnez %v22611_v33  ;;  %14259 = vmatpush3.bf16.msra.mxu0 %v15729_v16  ;;  %v19773_v51 = vpop.f32.mrf.mxu1  ;;  %vm22627_vm7 = vmmov %vm22610_vm0 }
 0xc35   : > { %v9057_v46 = vsel %vm22609_vm9, %v19635_v39, 0.0  ;;  %v9055_v27 = vsel %vm22612_vm13, %v19649_v0, 0.0  ;;  %v19763_v60 = vsel %vm22613_vm14, %v9235_v21, %v9237_v36  ;;  %10556 = vmatmul.mubr.bf16.gmra.mxu1 %v9505_v40  ;;  %10394 = vmatprep.mubr.bf16.mxu0 %v9504_v28  ;;  %v19767_v32 = vsel %vm22614_vm12, %v19623_v35, %v9514_v53  ;;  %vm22634_vm13 = vmmov %vm22617_vm5 }
 0xc36   : > { %v19771_v56 = vpack.c.bf16 %v19688_v4, %v19649_v0  ;;  %v9497_v25 = vshrl.u32 %v9236_v30, 16  ;;  %10563 = vmatprep.mubr.bf16.mxu1 %v19767_v32  ;;  %v19780_v21 = vpack.c.bf16 %v8994_v61, %v19635_v39  ;;  %vm22616_vm15 = vnez %v22615_v23  ;;  %14260 = vmatprep.subr.bf16.mxu0 %v15732_v44  ;;  %v19810_v53 = vpop.f32.mrf.mxu1  ;;  %v15744_v23 = vld [vmem:[%s21838_s11 + $0x158] sm:$0xff]   ;;  %vm22635_vm14 = vmmov %vm22622_vm6 }
 0xc37   : > { %v8992_v35 = vsel %vm22616_vm15, %v19688_v4, 0.0  ;;  %v9115_v48 = vsel %vm22617_vm5, %v9110_v54, %v19678_v63  ;;  %v9123_v41 = vsel %vm22618_vm10, %v9118_v17, %v19719_v24  ;;  %v19790_v2 = vpack.c.bf16 %v19663_v34, %v9057_v46  ;;  %14375 = vmatpush3.bf16.msra.mxu1 %v15735_v11  ;;  %v15737_v34 = vld [vmem:[%s21838_s11 + $0x128] sm:$0xff]   ;;  %v15743_v46 = vld [vmem:[%s21838_s11 + $0x198] sm:$0xff]   ;;  %vm22636_vm12 = vmmov %vm22622_vm6 }
 0xc38   : > { %v9136_v31 = vshll.u32 %v19738_v20, 16  ;;  %v19794_v18 = vpack.c.bf16 %v19688_v4, %v9055_v27  ;;  %v9485_v39 = vshrl.u32 %v9115_v48, 16  ;;  %v9128_v63 = vshll.u32 %v19771_v56, 16  ;;  %14261 = vmatpush3.bf16.msra.mxu0 %v15733_v29  ;;  %14376 = vmatprep.subr.bf16.mxu1 %v15738_v59  ;;  %v15742_v4 = vld [vmem:[%s21838_s11 + $0x1d8] sm:$0xff]   ;;  %v15741_v29 = vld [vmem:[%s21838_s11 + $0x120] sm:$0xff]   ;;  %v15746_v59 = vld [vmem:[%s21838_s11 + $0x1d0] sm:$0xff]  }
 0xc39   : > { %v19800_v54 = vrot.slane %v9497_v25, 7  ;;  %v9500_v9 = vshll.u32 %v9236_v30, 16  ;;  %v9517_v14 = vshrl.u32 %v9123_v41, 16  ;;  %v9019_v16 = vpack.c.bf16 %v8992_v35, %v19649_v0  ;;  %14262 = vmatprep.subr.bf16.mxu0 %v15736_v38  ;;  %v15740_v30 = vld [vmem:[%s21838_s11 + $0x160] sm:$0xff]   ;;  %v8907_v38 = vpop.f32.mrf.mxu1  ;;  %vm22637_vm15 = vmmov %vm22617_vm5 }
 0xc3a   : > { %v9487_v49 = vrot.slane %v9485_v39, 7  ;;  %v9488_v42 = vshll.u32 %v9115_v48, 16  ;;  %v9538_v17 = vor.u32 %v9536_v12, %v19729_v55  ;;  %v9581_v44 = vshrl.u32 %v19780_v21, 16  ;;  %v15747_v39 = vld [vmem:[%s21838_s11 + $0x190] sm:$0xff]   ;;  %vm22638_vm5 = vmmov %vm22622_vm6 }
 0xc3b   : > { %v19817_v10 = vor.u32 %v9500_v9, %v19800_v54  ;;  %v19819_v61 = vrot.slane %v9517_v14, 7  ;;  %v9525_v0 = vshrl.u32 %v19763_v60, 16  ;;  %10395 = vmatmul.mubr.bf16.gmra.mxu0 %v19671_v37  ;;  %v9132_v12 = vshrl.u32 %v19771_v56, 16  ;;  %14377 = vmatpush3.bf16.msra.mxu1 %v15739_v52  ;;  %vm22639_vm10 = vmmov %vm22638_vm5 }
 0xc3c   : > { %v9239_v11 = vrot.slane %v19794_v18, 1  ;;  %v19825_v40 = vor.u32 %v9488_v42, %v9487_v49  ;;  %v9520_v22 = vshll.u32 %v9123_v41, 16  ;;  %v9130_v28 = vrot.slane %v9128_v63, 1  ;;  %14263 = vmatpush3.bf16.msra.mxu0 %v15737_v34  ;;  %14378 = vmatprep.subr.bf16.mxu1 %v15742_v4  ;;  %v19867_v18 = vpop.f32.mrf.mxu1  ;;  %v22628_v42 = vld [vmem:[#allocation36_spill] sm:$0xff] }
 0xc3d   : > { %22619 = vst [vmem:[#allocation46_spill] sm:$0xff] %v19817_v10  ;;  %v19833_v33 = vsel %vm22620_vm8, %v19691_v1, %v19817_v10  ;;  %v19835_v27 = vrot.slane %v9525_v0, 7  ;;  %v9528_v37 = vshll.u32 %v19763_v60, 16  ;;  %v19852_v1 = vsel %vm22622_vm6, %v19706_v5, %v9538_v17  ;;  %14264 = vmatprep.subr.bf16.mxu0 %v15740_v30  ;;  %v22630_v17 = vld [vmem:[#allocation34_spill] sm:$0xff]  ;;  %vm22640_vm8 = vmmov %vm22626_vm1 }
 0xc3e   : > { %v19847_v56 = vsel %vm22621_vm11, %v19704_v45, %v19825_v40  ;;  %10564 = vmatmul.mubr.bf16.gmra.mxu1 %v19833_v33  ;;  %v9557_v60 = vshrl.u32 %v9019_v16, 16  ;;  %v9560_v25 = vshll.u32 %v9019_v16, 16  ;;  %v9241_v35 = vrot.slane %v19790_v2, 1  ;;  %vm22641_vm11 = vmmov %vm22638_vm5 }
 0xc3f   : > { %10402 = vmatprep.mubr.bf16.mxu0 %v19847_v56  ;;  %v9522_v45 = vor.u32 %v9520_v22, %v19819_v61  ;;  %10571 = vmatprep.mubr.bf16.mxu1 %v19852_v1  ;;  %v9126_v5 = vor.u32 %v9124_v6, %v19719_v24  ;;  %v9140_v48 = vshrl.u32 %v19738_v20, 16  ;;  %v9138_v52 = vrot.slane %v9136_v31, 1  ;;  %v15745_v24 = vld [vmem:[%s21838_s11 + $0x118] sm:$0xff]   ;;  %vm22643_vm6 = vmmov %vm22634_vm13 }
 0xc40   : > { %v19865_v41 = vrot.slane %v9557_v60, 7  ;;  %14379 = vmatpush3.bf16.msra.mxu1 %v15743_v46  ;;  %v9240_v63 = vsel %vm22623_vm4, %v9237_v36, %v9239_v11  ;;  %v9530_v9 = vor.u32 %v9528_v37, %v19835_v27  ;;  %vm22625_vm3 = vnez %v22624_v13  ;;  %14265 = vmatpush3.bf16.msra.mxu0 %v15741_v29  ;;  %v15748_v36 = vld [vmem:[%s21838_s11 + $0x150] sm:$0xff]   ;;  %v19913_v46 = vpop.f32.mrf.mxu1  ;;  %v15751_v37 = vld [vmem:[%s21838_s11 + $0x188] sm:$0xff]   ;;  %vm22644_vm4 = vmmov %vm22626_vm1 }
 0xc41   : > { %v8998_v6 = vsel %vm22625_vm3, %v19810_v53, 0.0  ;;  %14380 = vmatprep.subr.bf16.mxu1 %v15746_v59  ;;  %v19882_v14 = vrot.slane %v9581_v44, 7  ;;  %v9584_v31 = vshll.u32 %v19780_v21, 16  ;;  %v9134_v34 = vor.u32 %v9132_v12, %v9130_v28  ;;  %14266 = vmatprep.subr.bf16.mxu0 %v15744_v23  ;;  %v15750_v44 = vld [vmem:[%s21838_s11 + $0x1c8] sm:$0xff]   ;;  %v15754_v23 = vld [vmem:[%s21838_s11 + $0x1c0] sm:$0xff]  }
 0xc42   : > { %v9562_v19 = vor.u32 %v9560_v25, %v19865_v41  ;;  %v19892_v4 = vsel %vm22626_vm1, %v9239_v11, %v9241_v35  ;;  %v19895_v16 = vsel %vm22627_vm7, %v9487_v49, %v9522_v45  ;;  %vm22629_vm2 = vnez %v22628_v42  ;;  %v22632_v12 = vld [vmem:[#allocation33_spill] sm:$0xff]  ;;  %v15749_v25 = vld [vmem:[%s21838_s11 + $0x110] sm:$0xff]  }
 0xc43   : > { %v9061_v21 = vsel %vm22629_vm2, %v19717_v26, 0.0  ;;  %vm22631_vm9 = vnez %v22630_v17  ;;  %10403 = vmatmul.mubr.bf16.gmra.mxu0 %v19684_v43  ;;  %v19908_v0 = vpack.c.bf16 %v8998_v6, %v19717_v26  ;;  %vm22633_vm0 = vnez %v22632_v12  ;;  %vm22651_vm2 = vmmov %vm22638_vm5 }
 0xc44   : > { %v9059_v30 = vsel %vm22631_vm9, %v19773_v51, 0.0  ;;  %v8996_v49 = vsel %vm22633_vm0, %v8907_v38, 0.0  ;;  %v9131_v11 = vsel %vm22634_vm13, %v9126_v5, %v9130_v28  ;;  %v9549_v22 = vshrl.u32 %v9240_v63, 16  ;;  %14381 = vmatpush3.bf16.msra.mxu1 %v15747_v39  ;;  %10410 = vmatprep.mubr.bf16.mxu0 %v19895_v16  ;;  %v15752_v39 = vld [vmem:[%s21838_s11 + $0x148] sm:$0xff]   ;;  %vm22652_vm9 = vmmov %vm22651_vm2 }
 0xc45   : > { %v19921_v29 = vsel %vm22635_vm14, %v19800_v54, %v9530_v9  ;;  %v19925_v59 = vpack.c.bf16 %v19810_v53, %v19717_v26  ;;  %v19928_v28 = vpack.c.bf16 %v8907_v38, %v19773_v51  ;;  %v9541_v60 = vshrl.u32 %v9131_v11, 16  ;;  %14267 = vmatpush3.bf16.msra.mxu0 %v15745_v24  ;;  %14382 = vmatprep.subr.bf16.mxu1 %v15750_v44  ;;  %v15756_v44 = vld [vmem:[%s21838_s11 + $0x140] sm:$0xff]   ;;  %vm22654_vm0 = vmmov %vm22643_vm6 }
 0xc46   : > { %10572 = vmatmul.mubr.bf16.gmra.mxu1 %v19921_v29  ;;  %v19939_v54 = vsel %vm22636_vm12, %v19729_v55, %v9562_v19  ;;  %v19941_v26 = vpack.c.bf16 %v8907_v38, %v9059_v30  ;;  %v19943_v45 = vrot.slane %v9549_v22, 7  ;;  %v9139_v5 = vsel %vm22637_vm15, %v9134_v34, %v9138_v52  ;;  %14268 = vmatprep.subr.bf16.mxu0 %v15748_v36  ;;  %v19956_v19 = vpop.f32.mrf.mxu1  ;;  %v15755_v34 = vld [vmem:[%s21838_s11 + $0x180] sm:$0xff]   ;;  %vm22655_vm13 = vmmov %vm22651_vm2 }
 0xc47   : > { %10579 = vmatprep.mubr.bf16.mxu1 %v19939_v54  ;;  %v9021_v9 = vpack.c.bf16 %v8996_v49, %v19773_v51  ;;  %v19951_v13 = vrot.slane %v9541_v60, 7  ;;  %v9544_v6 = vshll.u32 %v9131_v11, 16  ;;  %v9552_v55 = vshll.u32 %v9240_v63, 16  ;;  %vm22659_vm12 = vmmov %vm22651_vm2 }
 0xc48   : > { %v19954_v38 = vpack.c.bf16 %v19810_v53, %v9061_v21  ;;  %v9565_v24 = vshrl.u32 %v9139_v5, 16  ;;  %14383 = vmatpush3.bf16.msra.mxu1 %v15751_v37  ;;  %v9144_v36 = vshll.u32 %v19928_v28, 16  ;;  %v9573_v63 = vshrl.u32 %v19892_v4, 16  ;;  %v15753_v53 = vld [vmem:[%s21838_s11 + $0x108] sm:$0xff]   ;;  %v8923_v37 = vpop.f32.mrf.mxu1  ;;  %vm22660_vm15 = vmmov %vm22651_vm2 }
 0xc49   : > { %v9546_v51 = vor.u32 %v9544_v6, %v19951_v13  ;;  %v9554_v42 = vor.u32 %v9552_v55, %v19943_v45  ;;  %14269 = vmatpush3.bf16.msra.mxu0 %v15749_v25  ;;  %14384 = vmatprep.subr.bf16.mxu1 %v15754_v23  ;;  %v9142_v21 = vor.u32 %v9140_v48, %v9138_v52  ;;  %v9243_v17 = vrot.slane %v19941_v26, 1 }
 0xc4a   : > { %v9586_v30 = vor.u32 %v9584_v31, %v19882_v14  ;;  %14270 = vmatprep.subr.bf16.mxu0 %v15752_v39  ;;  %v9152_v12 = vshll.u32 %v19925_v59, 16  ;;  %v9629_v49 = vshrl.u32 %v19908_v0, 16  ;;  %v9568_v11 = vshll.u32 %v9139_v5, 16 }
 0xc4b   : > { %v9605_v22 = vshrl.u32 %v9021_v9, 16  ;;  %10411 = vmatmul.mubr.bf16.gmra.mxu0 %v19767_v32  ;;  %v19980_v20 = vsel %vm22638_vm5, %v19819_v61, %v9546_v51  ;;  %v19982_v48 = vrot.slane %v9565_v24, 7  ;;  %v19984_v52 = vrot.slane %v9573_v63, 7  ;;  %v15757_v61 = vld [vmem:[%s21838_s11 + $0x100] sm:$0xff]   ;;  %vm22662_vm5 = vmmov %vm22644_vm4 }
 0xc4c   : > { %v9576_v31 = vshll.u32 %v19892_v4, 16  ;;  %14385 = vmatpush3.bf16.msra.mxu1 %v15755_v34  ;;  %v9245_v60 = vrot.slane %v19954_v38, 1  ;;  %v9146_v25 = vrot.slane %v9144_v36, 1  ;;  %v9148_v23 = vshrl.u32 %v19928_v28, 16  ;;  %10418 = vmatprep.mubr.bf16.mxu0 %v19980_v20  ;;  %v22645_v63 = vld [vmem:[#allocation40_spill] sm:$0xff] }
 0xc4d   : > { %v19992_v26 = vsel %vm22639_vm10, %v19835_v27, %v9554_v42  ;;  %14271 = vmatpush3.bf16.msra.mxu0 %v15753_v53  ;;  %v9244_v4 = vsel %vm22640_vm8, %v9241_v35, %v9243_v17  ;;  %v20003_v28 = vsel %vm22641_vm11, %v19865_v41, %v9586_v30  ;;  %v20005_v5 = vrot.slane %v9605_v22, 7  ;;  %v20007_v27 = vpop.f32.mrf.mxu1  ;;  %vm22663_vm10 = vmmov %vm22651_vm2 }
 0xc4e   : > { %10580 = vmatmul.mubr.bf16.gmra.mxu1 %v19992_v26  ;;  %22642 = vst [vmem:[#allocation41_spill] sm:$0xff] %v20003_v28  ;;  %v9608_v39 = vshll.u32 %v9021_v9, 16  ;;  %14272 = vmatprep.subr.bf16.mxu0 %v15756_v44  ;;  %v9570_v6 = vor.u32 %v9568_v11, %v19982_v48  ;;  %v9578_v2 = vor.u32 %v9576_v31, %v19984_v52  ;;  %v9154_v55 = vrot.slane %v9152_v12, 1  ;;  %v22649_v44 = vld [vmem:[#allocation37_spill] sm:$0xff]  ;;  %vm22665_vm8 = vmmov %vm22654_vm0 }
 0xc4f   : > { %10587 = vmatprep.mubr.bf16.mxu1 %v20003_v28  ;;  %v9150_v35 = vor.u32 %v9148_v23, %v9146_v25  ;;  %v9147_v24 = vsel %vm22643_vm6, %v9142_v21, %v9146_v25  ;;  %v9597_v34 = vshrl.u32 %v9244_v4, 16  ;;  %v20013_v41 = vrot.slane %v9629_v49, 7  ;;  %v20022_v42 = vpop.f32.mrf.mxu1  ;;  %v22647_v21 = vld [vmem:[#allocation38_spill] sm:$0xff]  ;;  %vm22667_vm11 = vmmov %vm22644_vm4 }
 0xc50   : > { %v9632_v36 = vshll.u32 %v19908_v0, 16  ;;  %v20019_v9 = vsel %vm22644_vm4, %v9243_v17, %v9245_v60  ;;  %v9610_v51 = vor.u32 %v9608_v39, %v20005_v5  ;;  %vm22646_vm3 = vnez %v22645_v63 }
 0xc51   : > { %14273 = vmatpush3.bf16.msra.mxu0 %v15757_v61  ;;  %v9065_v53 = vsel %vm22646_vm3, %v19867_v18, 0.0  ;;  %vm22648_vm1 = vnez %v22647_v21  ;;  %vm22650_vm7 = vnez %v22649_v44  ;;  %v9589_v12 = vshrl.u32 %v9147_v24, 16 }
 0xc52   : > { %v9063_v30 = vsel %vm22648_vm1, %v19913_v46, 0.0  ;;  %v9000_v0 = vsel %vm22650_vm7, %v8923_v37, 0.0  ;;  %v20035_v17 = vsel %vm22651_vm2, %v19951_v13, %v9570_v6  ;;  %v20039_v49 = vsel %vm22652_vm9, %v19943_v45, %v9578_v2  ;;  %v22657_v45 = vld [vmem:[#allocation39_spill] sm:$0xff]  ;;  %vm22674_vm1 = vmmov %vm22651_vm2 }
 0xc53   : > { %10419 = vmatmul.mubr.bf16.gmra.mxu0 %v19852_v1  ;;  %22653 = vst [vmem:[#allocation51_spill] sm:$0xff] %v20039_v49  ;;  %v9039_v11 = vpack.c.bf16 %v8923_v37, %v19913_v46  ;;  %v9592_v22 = vshll.u32 %v9147_v24, 16  ;;  %v20043_v31 = vrot.slane %v9589_v12, 7  ;;  %v20045_v25 = vrot.slane %v9597_v34, 7  ;;  %v20057_v24 = vpop.f32.mrf.mxu1  ;;  %vm22676_vm7 = vmmov %vm22654_vm0 }
 0xc54   : > { %10426 = vmatprep.mubr.bf16.mxu0 %v20035_v17  ;;  %v9600_v23 = vshll.u32 %v9244_v4, 16  ;;  %v9155_v61 = vsel %vm22654_vm0, %v9150_v35, %v9154_v55  ;;  %v20051_v13 = vsel %vm22655_vm13, %v19882_v14, %v9610_v51  ;;  %vm22658_vm14 = vnez %v22657_v45  ;;  %vm22677_vm2 = vmmov %vm22674_vm1 }
 0xc55   : > { %22656 = vst [vmem:[#allocation59_spill] sm:$0xff] %v20051_v13  ;;  %v9002_v39 = vsel %vm22658_vm14, %v19956_v19, 0.0  ;;  %v9023_v6 = vpack.c.bf16 %v9000_v0, %v19913_v46  ;;  %v9087_v2 = vpack.c.bf16 %v8923_v37, %v9063_v30  ;;  %v9156_v34 = vshrl.u32 %v19925_v59, 16  ;;  %v8939_v0 = vpop.f32.mrf.mxu1  ;;  %vm22679_vm9 = vmmov %vm22674_vm1 }
 0xc56   : > { %10588 = vmatmul.mubr.bf16.gmra.mxu1 %v20039_v49  ;;  %v20063_v4 = vpack.c.bf16 %v19956_v19, %v19867_v18  ;;  %v20066_v14 = vpack.c.bf16 %v19956_v19, %v9065_v53  ;;  %v9160_v35 = vshll.u32 %v9039_v11, 16  ;;  %v9594_v51 = vor.u32 %v9592_v22, %v20043_v31  ;;  %vm22683_vm13 = vmmov %vm22674_vm1 }
 0xc57   : > { %10595 = vmatprep.mubr.bf16.mxu1 %v20051_v13  ;;  %v9613_v63 = vshrl.u32 %v9155_v61, 16  ;;  %v20070_v46 = vpack.c.bf16 %v9002_v39, %v19867_v18  ;;  %v9602_v37 = vor.u32 %v9600_v23, %v20045_v25  ;;  %v9621_v59 = vshrl.u32 %v20019_v9, 16  ;;  %vm22685_vm14 = vmmov %vm22674_vm1 }
 0xc58   : > { %v9247_v21 = vrot.slane %v9087_v2, 1  ;;  %v9634_v30 = vor.u32 %v9632_v36, %v20013_v41  ;;  %v9653_v44 = vshrl.u32 %v9023_v6, 16  ;;  %v9158_v12 = vor.u32 %v9156_v34, %v9154_v55  ;;  %v20084_v2 = vpop.f32.mrf.mxu1 }
 0xc59   : > { %v9168_v19 = vshll.u32 %v20063_v4, 16  ;;  %v9164_v45 = vshrl.u32 %v9039_v11, 16  ;;  %v9162_v22 = vrot.slane %v9160_v35, 1  ;;  %v20080_v18 = vsel %vm22659_vm12, %v19982_v48, %v9594_v51  ;;  %vm22687_vm12 = vmmov %vm22676_vm7 }
 0xc5a   : > { %v20082_v23 = vrot.slane %v9613_v63, 7  ;;  %v9616_v39 = vshll.u32 %v9155_v61, 16  ;;  %v9677_v36 = vshrl.u32 %v20070_v46, 16  ;;  %v20090_v55 = vsel %vm22660_vm15, %v19984_v52, %v9602_v37  ;;  %vm22689_vm15 = vmmov %vm22662_vm5 }
 0xc5b   : > { %10427 = vmatmul.mubr.bf16.gmra.mxu0 %v19939_v54  ;;  %22661 = vst [vmem:[#allocation47_spill] sm:$0xff] %v20090_v55  ;;  %v20092_v11 = vrot.slane %v9621_v59, 7  ;;  %v9624_v34 = vshll.u32 %v20019_v9, 16  ;;  %v9248_v48 = vsel %vm22662_vm5, %v9245_v60, %v9247_v21  ;;  %v20101_v61 = vsel %vm22663_vm10, %v20005_v5, %v9634_v30  ;;  %v20108_v59 = vpop.f32.mrf.mxu1  ;;  %vm22690_vm5 = vmmov %vm22674_vm1 }
 0xc5c   : > { %10434 = vmatprep.mubr.bf16.mxu0 %v20080_v18  ;;  %22664 = vst [vmem:[#allocation55_spill] sm:$0xff] %v20101_v61  ;;  %v20103_v35 = vrot.slane %v9653_v44, 7  ;;  %v9656_v51 = vshll.u32 %v9023_v6, 16  ;;  %v9163_v52 = vsel %vm22665_vm8, %v9158_v12, %v9162_v22  ;;  %v9170_v63 = vrot.slane %v9168_v19, 1 }
 0xc5d   : > { %v9166_v37 = vor.u32 %v9164_v45, %v9162_v22  ;;  %v9618_v9 = vor.u32 %v9616_v39, %v20082_v23  ;;  %v9637_v38 = vshrl.u32 %v9163_v52, 16  ;;  %v9172_v60 = vshrl.u32 %v20063_v4, 16  ;;  %v22668_v45 = vld [vmem:[#allocation49_spill] sm:$0xff]  ;;  %v20138_v10 = vpop.f32.mrf.mxu1 }
 0xc5e   : > { %10596 = vmatmul.mubr.bf16.gmra.mxu1 %v20090_v55  ;;  %v9626_v53 = vor.u32 %v9624_v34, %v20092_v11  ;;  %v9645_v5 = vshrl.u32 %v9248_v48, 16  ;;  %v20112_v30 = vrot.slane %v9677_v36, 7  ;;  %v9680_v6 = vshll.u32 %v20070_v46, 16  ;;  %v22670_v4 = vld [vmem:[#allocation45_spill] sm:$0xff]  ;;  %v22672_v34 = vld [vmem:[#allocation44_spill] sm:$0xff] }
 0xc5f   : > { %10603 = vmatprep.mubr.bf16.mxu1 %v20101_v61  ;;  %v22666_v44 = vrot.slane %v20066_v14, 1  ;;  %v9658_v19 = vor.u32 %v9656_v51, %v20103_v35  ;;  %vm22669_vm6 = vnez %v22668_v45  ;;  %vm22671_vm4 = vnez %v22670_v4 }
 0xc60   : > { %v9069_v22 = vsel %vm22669_vm6, %v20007_v27, 0.0  ;;  %v9067_v39 = vsel %vm22671_vm4, %v20022_v42, 0.0  ;;  %vm22673_vm3 = vnez %v22672_v34  ;;  %v9041_v46 = vpack.c.bf16 %v8939_v0, %v20022_v42  ;;  %vm22698_vm6 = vmmov %vm22689_vm15 }
 0xc61   : > { %v20118_v12 = vsel %vm22667_vm11, %v9247_v21, %v22666_v44  ;;  %v9004_v36 = vsel %vm22673_vm3, %v8939_v0, 0.0  ;;  %v20133_v21 = vsel %vm22674_vm1, %v20043_v31, %v9618_v9  ;;  %v20135_v51 = vrot.slane %v9637_v38, 7  ;;  %vm22699_vm4 = vmmov %vm22674_vm1 }
 0xc62   : > { %22675 = vst [vmem:[#allocation50_spill] sm:$0xff] %v20133_v21  ;;  %v9640_v44 = vshll.u32 %v9163_v52, 16  ;;  %v9171_v45 = vsel %vm22676_vm7, %v9166_v37, %v9170_v63  ;;  %v20143_v4 = vsel %vm22677_vm2, %v20045_v25, %v9626_v53  ;;  %v20147_v34 = vpack.c.bf16 %v20057_v24, %v20007_v27  ;;  %v22681_v37 = vld [vmem:[#allocation48_spill] sm:$0xff]  ;;  %vm22704_vm2 = vmmov %vm22674_vm1 }
 0xc63   : > { %10435 = vmatmul.mubr.bf16.gmra.mxu0 %v20003_v28  ;;  %22678 = vst [vmem:[#allocation58_spill] sm:$0xff] %v20143_v4  ;;  %v20149_v57 = vrot.slane %v9645_v5, 7  ;;  %v9648_v31 = vshll.u32 %v9248_v48, 16  ;;  %v20154_v52 = vsel %vm22679_vm9, %v20013_v41, %v9658_v19  ;;  %vm22682_vm0 = vnez %v22681_v37  ;;  %v20166_v41 = vpop.f32.mrf.mxu1  ;;  %vm22707_vm9 = vmmov %vm22698_vm6 }
 0xc64   : > { %10442 = vmatprep.mubr.bf16.mxu0 %v20133_v21  ;;  %22680 = vst [vmem:[#allocation17_spill] sm:$0xff] %v20154_v52  ;;  %v9006_v9 = vsel %vm22682_vm0, %v20057_v24, 0.0  ;;  %v9025_v25 = vpack.c.bf16 %v9004_v36, %v20022_v42  ;;  %v9089_v53 = vpack.c.bf16 %v8939_v0, %v9067_v39  ;;  %v20162_v38 = vpack.c.bf16 %v20057_v24, %v9069_v22  ;;  %vm22708_vm0 = vmmov %vm22676_vm7 }
 0xc65   : > { %v9176_v5 = vshll.u32 %v9041_v46, 16  ;;  %v9661_v48 = vshrl.u32 %v9171_v45, 16  ;;  %v9642_v8 = vor.u32 %v9640_v44, %v20135_v51  ;;  %v9174_v19 = vor.u32 %v9172_v60, %v9170_v63  ;;  %v20175_v55 = vpop.f32.mrf.mxu1 }
 0xc66   : > { %10604 = vmatmul.mubr.bf16.gmra.mxu1 %v20143_v4  ;;  %v9669_v4 = vshrl.u32 %v20118_v12, 16  ;;  %v20169_v37 = vpack.c.bf16 %v9006_v9, %v20007_v27  ;;  %v9184_v42 = vshll.u32 %v20147_v34, 16  ;;  %v9650_v0 = vor.u32 %v9648_v31, %v20149_v57 }
 0xc67   : > { %10611 = vmatprep.mubr.bf16.mxu1 %v20154_v52  ;;  %v9251_v24 = vrot.slane %v9089_v53, 1  ;;  %v9682_v22 = vor.u32 %v9680_v6, %v20112_v30  ;;  %v9701_v36 = vshrl.u32 %v9025_v25, 16  ;;  %v9178_v21 = vrot.slane %v9176_v5, 1 }
 0xc68   : > { %v20178_v28 = vrot.slane %v9661_v48, 7  ;;  %v9664_v63 = vshll.u32 %v9171_v45, 16  ;;  %v9180_v27 = vshrl.u32 %v9041_v46, 16  ;;  %v20183_v60 = vsel %vm22683_vm13, %v20082_v23, %v9642_v8  ;;  %v20205_v48 = vpop.f32.mrf.mxu1  ;;  %vm22709_vm13 = vmmov %vm22674_vm1 }
 0xc69   : > { %22684 = vst [vmem:[#allocation65_spill] sm:$0xff] %v20183_v60  ;;  %v20185_v31 = vrot.slane %v9669_v4, 7  ;;  %v9672_v6 = vshll.u32 %v20118_v12, 16  ;;  %v9186_v9 = vrot.slane %v9184_v42, 1  ;;  %v9725_v53 = vshrl.u32 %v20169_v37, 16  ;;  %v22693_v42 = vld [vmem:[#allocation56_spill] sm:$0xff] }
 0xc6a   : > { %v20192_v5 = vsel %vm22685_vm14, %v20092_v11, %v9650_v0  ;;  %v9179_v45 = vsel %vm22687_vm12, %v9174_v19, %v9178_v21  ;;  %v22688_v46 = vrot.slane %v20066_v14, 1  ;;  %v20201_v23 = vsel %vm22690_vm5, %v20103_v35, %v9682_v22  ;;  %v22691_v19 = vld [vmem:[#allocation53_spill] sm:$0xff] }
 0xc6b   : > { %10443 = vmatmul.mubr.bf16.gmra.mxu0 %v20051_v13  ;;  %22686 = vst [vmem:[#allocation12_spill] sm:$0xff] %v20192_v5  ;;  %v20203_v12 = vrot.slane %v9701_v36, 7  ;;  %v9704_v4 = vshll.u32 %v9025_v25, 16  ;;  %v9666_v11 = vor.u32 %v9664_v63, %v20178_v28  ;;  %vm22692_vm10 = vnez %v22691_v19  ;;  %v22695_v36 = vld [vmem:[#allocation57_spill] sm:$0xff] }
 0xc6c   : > { %10450 = vmatprep.mubr.bf16.mxu0 %v20183_v60  ;;  %v9252_v8 = vsel %vm22689_vm15, %v22688_v46, %v9251_v24  ;;  %v9071_v14 = vsel %vm22692_vm10, %v20108_v59, 0.0  ;;  %vm22694_vm8 = vnez %v22693_v42  ;;  %v20217_v35 = vpack.c.bf16 %v20138_v10, %v20084_v2  ;;  %vm22715_vm15 = vmmov %vm22674_vm1 }
 0xc6d   : > { %v9010_v0 = vsel %vm22694_vm8, %v20138_v10, 0.0  ;;  %v9182_v22 = vor.u32 %v9180_v27, %v9178_v21  ;;  %v9674_v25 = vor.u32 %v9672_v6, %v20185_v31  ;;  %vm22696_vm11 = vnez %v22695_v36  ;;  %vm22719_vm10 = vmmov %vm22674_vm1 }
 0xc6e   : > { %10612 = vmatmul.mubr.bf16.gmra.mxu1 %v20192_v5  ;;  %v9073_v63 = vsel %vm22696_vm11, %v20084_v2, 0.0  ;;  %v9685_v46 = vshrl.u32 %v9179_v45, 16  ;;  %v20223_v39 = vrot.slane %v9725_v53, 7  ;;  %v9728_v19 = vshll.u32 %v20169_v37, 16  ;;  %v20240_v53 = vpop.f32.mrf.mxu1  ;;  %vm22721_vm8 = vmmov %vm22698_vm6 }
 0xc6f   : > { %10619 = vmatprep.mubr.bf16.mxu1 %v20201_v23  ;;  %v9043_v42 = vpack.c.bf16 %v20166_v41, %v20108_v59  ;;  %v9693_v44 = vshrl.u32 %v9252_v8, 16  ;;  %v22697_v5 = vrot.slane %v20162_v38, 1  ;;  %v9706_v21 = vor.u32 %v9704_v4, %v20203_v12 }
 0xc70   : > { %v20235_v27 = vpack.c.bf16 %v9010_v0, %v20084_v2  ;;  %v20238_v6 = vpack.c.bf16 %v20166_v41, %v9071_v14  ;;  %v20244_v37 = vsel %vm22699_vm4, %v20135_v51, %v9666_v11  ;;  %v20247_v36 = vpack.c.bf16 %v20138_v10, %v9073_v63  ;;  %vm22725_vm4 = vmmov %vm22674_vm1 }
 0xc71   : > { %v20231_v60 = vsel %vm22698_vm6, %v9251_v24, %v22697_v5  ;;  %22700 = vst [vmem:[#allocation66_spill] sm:$0xff] %v20244_v37  ;;  %v9200_v24 = vshll.u32 %v20217_v35, 16  ;;  %v22701_v5 = vld [vmem:[#allocation52_spill] sm:$0xff]  ;;  %v20256_v2 = vsel %vm22674_vm1, %v20149_v57, %v9674_v25  ;;  %v20258_v14 = vrot.slane %v9685_v46, 7  ;;  %v8971_v46 = vpop.f32.mrf.mxu1  ;;  %vm22724_vm6 = vmmov %vm22708_vm0 }
 0xc72   : > { %vm22702_vm3 = vnez %v22701_v5  ;;  %22703 = vst [vmem:[#allocation18_spill] sm:$0xff] %v20256_v2  ;;  %v9688_v0 = vshll.u32 %v9179_v45, 16  ;;  %v9187_v51 = vsel %vm22676_vm7, %v9182_v22, %v9186_v9  ;;  %v9192_v10 = vshll.u32 %v9043_v42, 16  ;;  %vm22727_vm7 = vmmov %vm22721_vm8 }
 0xc73   : > { %v9008_v4 = vsel %vm22702_vm3, %v20166_v41, 0.0  ;;  %10451 = vmatmul.mubr.bf16.gmra.mxu0 %v20101_v61  ;;  %v20262_v11 = vrot.slane %v9693_v44, 7  ;;  %v9696_v63 = vshll.u32 %v9252_v8, 16  ;;  %v20266_v41 = vpack.c.bf16 %v20240_v53, %v20175_v55  ;;  %vm22726_vm3 = vmmov %vm22674_vm1 }
 0xc74   : > { %10458 = vmatprep.mubr.bf16.mxu0 %v20244_v37  ;;  %v20271_v57 = vsel %vm22704_vm2, %v20112_v30, %v9706_v21  ;;  %v9773_v45 = vshrl.u32 %v20235_v27, 16  ;;  %v9027_v22 = vpack.c.bf16 %v9008_v4, %v20108_v59  ;;  %v9255_v25 = vrot.slane %v20238_v6, 1  ;;  %vm22729_vm2 = vmmov %vm22727_vm7 }
 0xc75   : > { %v22705_v44 = vshrl.u32 %v20147_v34, 16  ;;  %v9204_v5 = vshrl.u32 %v20217_v35, 16  ;;  %v9709_v37 = vshrl.u32 %v9187_v51, 16  ;;  %v9202_v61 = vrot.slane %v9200_v24, 1 }
 0xc76   : > { %10620 = vmatmul.mubr.bf16.gmra.mxu1 %v20256_v2  ;;  %v9776_v30 = vshll.u32 %v20235_v27, 16  ;;  %v9690_v21 = vor.u32 %v9688_v0, %v20258_v14  ;;  %v9717_v59 = vshrl.u32 %v20231_v60, 16  ;;  %v9194_v4 = vrot.slane %v9192_v10, 1 }
 0xc77   : > { %v9190_v8 = vor.u32 %v22705_v44, %v9186_v9  ;;  %10627 = vmatprep.mubr.bf16.mxu1 %v20271_v57  ;;  %v9196_v6 = vshrl.u32 %v9043_v42, 16  ;;  %v9698_v13 = vor.u32 %v9696_v63, %v20262_v11  ;;  %v9045_v34 = vpack.c.bf16 %v8971_v46, %v20205_v48 }
 0xc78   : > { %v20286_v9 = vrot.slane %v9773_v45, 7  ;;  %v22706_v35 = vrot.slane %v20162_v38, 1  ;;  %v9730_v24 = vor.u32 %v9728_v19, %v20223_v39  ;;  %v9749_v27 = vshrl.u32 %v9027_v22, 16  ;;  %v22711_v45 = vld [vmem:[#allocation62_spill] sm:$0xff] }
 0xc79   : > { %v20294_v2 = vrot.slane %v9709_v37, 7  ;;  %v9712_v0 = vshll.u32 %v9187_v51, 16  ;;  %v9720_v10 = vshll.u32 %v20231_v60, 16  ;;  %v9195_v42 = vsel %vm22708_vm0, %v9190_v8, %v9194_v4  ;;  %v22713_v37 = vld [vmem:[#allocation61_spill] sm:$0xff] }
 0xc7a   : > { %v20291_v44 = vsel %vm22707_vm9, %v22706_v35, %v9255_v25  ;;  %v20301_v63 = vsel %vm22709_vm13, %v20178_v28, %v9690_v21  ;;  %v20303_v38 = vrot.slane %v9717_v59, 7  ;;  %vm22712_vm14 = vnez %v22711_v45  ;;  %v22717_v28 = vld [vmem:[#allocation63_spill] sm:$0xff]  ;;  %vm22730_vm9 = vmmov %vm22729_vm2 }
 0xc7b   : > { %10459 = vmatmul.mubr.bf16.gmra.mxu0 %v20154_v52  ;;  %22710 = vst [vmem:[#allocation54_spill] sm:$0xff] %v20301_v63  ;;  %v9077_v19 = vsel %vm22712_vm14, %v20175_v55, 0.0  ;;  %vm22714_vm12 = vnez %v22713_v37  ;;  %v9198_v35 = vor.u32 %v9196_v6, %v9194_v4  ;;  %v20314_v60 = vsel %vm22715_vm15, %v20185_v31, %v9698_v13  ;;  %vm22731_vm13 = vmmov %vm22674_vm1 }
 0xc7c   : > { %v9075_v51 = vsel %vm22714_vm12, %v20205_v48, 0.0  ;;  %10466 = vmatprep.mubr.bf16.mxu0 %v20301_v63  ;;  %22716 = vst [vmem:[#allocation15_spill] sm:$0xff] %v20314_v60  ;;  %vm22718_vm5 = vnez %v22717_v28  ;;  %v9208_v21 = vshll.u32 %v9045_v34, 16  ;;  %v20322_v59 = vsel %vm22719_vm10, %v20203_v12, %v9730_v24  ;;  %v22722_v24 = vld [vmem:[#allocation60_spill] sm:$0xff]  ;;  %vm22732_vm14 = vmmov %vm22708_vm0 }
 0xc7d   : > { %v9014_v8 = vsel %vm22718_vm5, %v20240_v53, 0.0  ;;  %v9751_v45 = vrot.slane %v9749_v27, 7  ;;  %v9752_v37 = vshll.u32 %v9027_v22, 16  ;;  %v9733_v4 = vshrl.u32 %v9195_v42, 16  ;;  %vm22733_vm12 = vmmov %vm22674_vm1 }
 0xc7e   : > { %10628 = vmatmul.mubr.bf16.gmra.mxu1 %v20314_v60  ;;  %v9206_v6 = vor.u32 %v9204_v5, %v9202_v61  ;;  %v9714_v63 = vor.u32 %v9712_v0, %v20294_v2  ;;  %v9094_v13 = vpack.c.bf16 %v20240_v53, %v9077_v19  ;;  %v9093_v31 = vpack.c.bf16 %v8971_v46, %v9075_v51  ;;  %vm22734_vm15 = vmmov %vm22708_vm0 }
 0xc7f   : > { %10635 = vmatprep.mubr.bf16.mxu1 %v20322_v59  ;;  %v22720_v28 = vrot.slane %v20247_v36, 1  ;;  %v9722_v60 = vor.u32 %v9720_v10, %v20303_v38  ;;  %v20334_v12 = vpack.c.bf16 %v9014_v8, %v20175_v55  ;;  %v9741_v22 = vshrl.u32 %v20291_v44, 16  ;;  %vm22735_vm5 = vmmov %vm22674_vm1 }
 0xc80   : > { %v9264_v5 = vshll.u32 %v20266_v41, 16  ;;  %vm22723_vm11 = vnez %v22722_v24  ;;  %v9210_v0 = vrot.slane %v9208_v21, 1  ;;  %v9212_v53 = vshrl.u32 %v9045_v34, 16  ;;  %vm22736_vm10 = vmmov %vm22674_vm1 }
 0xc81   : > { %v20330_v52 = vsel %vm22721_vm8, %v9255_v25, %v22720_v28  ;;  %v9012_v27 = vsel %vm22723_vm11, %v8971_v46, 0.0  ;;  %v9754_v19 = vor.u32 %v9752_v37, %v9751_v45  ;;  %v20340_v51 = vrot.slane %v9733_v4, 7  ;;  %vm22737_vm8 = vmmov %vm22674_vm1 }
 0xc82   : > { %v9736_v49 = vshll.u32 %v9195_v42, 16  ;;  %v9203_v25 = vsel %vm22724_vm6, %v9198_v35, %v9202_v61  ;;  %v20345_v10 = vsel %vm22725_vm4, %v20258_v14, %v9714_v63  ;;  %v9261_v55 = vrot.slane %v9094_v13, 1  ;;  %vm22738_vm11 = vmmov %vm22674_vm1 }
 0xc83   : > { %v9268_v8 = vshrl.u32 %v20266_v41, 16  ;;  %v9259_v28 = vrot.slane %v9093_v31, 1  ;;  %10467 = vmatmul.mubr.bf16.gmra.mxu0 %v20201_v23  ;;  %v20351_v46 = vsel %vm22726_vm3, %v20262_v11, %v9722_v60  ;;  %v9029_v34 = vpack.c.bf16 %v9012_v27, %v20205_v48  ;;  %vm22739_vm6 = vmmov %vm22674_vm1 }
 0xc84   : > { %v20354_v21 = vrot.slane %v9741_v22, 7  ;;  %v9744_v61 = vshll.u32 %v20291_v44, 16  ;;  %10474 = vmatprep.mubr.bf16.mxu0 %v20345_v10  ;;  %v9266_v14 = vrot.slane %v9264_v5, 1  ;;  %v20358_v42 = vor.u32 %v9212_v53, %v9210_v0  ;;  %vm22740_vm4 = vmmov %vm22674_vm1 }
 0xc85   : > { %v9757_v63 = vshrl.u32 %v9203_v25, 16  ;;  %v9778_v41 = vor.u32 %v9776_v30, %v20286_v9  ;;  %v20364_v11 = vsel %vm22674_vm1, %v20223_v39, %v9754_v19  ;;  %v9271_v48 = vsel %vm22727_vm7, %v9261_v55, %v22582_v62  ;;  %vm22741_vm3 = vmmov %vm22674_vm1 }
 0xc86   : > { %10636 = vmatmul.mubr.bf16.gmra.mxu1 %v20351_v46  ;;  %v9738_v35 = vor.u32 %v9736_v49, %v20340_v51  ;;  %v9765_v44 = vshrl.u32 %v20330_v52, 16  ;;  %v9270_v60 = vor.u32 %v9268_v8, %v9266_v14  ;;  %v22728_v37 = vrot.slane %v20247_v36, 1  ;;  %vm22742_vm7 = vmmov %vm22674_vm1 }
 0xc87   : > { %10643 = vmatprep.mubr.bf16.mxu1 %v20364_v11  ;;  %v20377_v4 = vsel %vm22730_vm9, %v9259_v28, %v9261_v55  ;;  %v9211_v39 = vsel %vm22708_vm0, %v9206_v6, %v9210_v0  ;;  %v9746_v13 = vor.u32 %v9744_v61, %v20354_v21  ;;  %v9760_v62 = vshll.u32 %v9203_v25, 16  ;;  %vm22744_vm9 = vmmov %vm22674_vm1 }
 0xc88   : > { %v20374_v30 = vsel %vm22729_vm2, %v22728_v37, %v9259_v28  ;;  %v9768_v49 = vshll.u32 %v20330_v52, 16  ;;  %v9797_v31 = vshrl.u32 %v9029_v34, 16  ;;  %v9759_v22 = vrot.slane %v9757_v63, 7  ;;  %vm22743_vm2 = vmmov %vm22674_vm1 }
 0xc89   : > { %v20383_v5 = vsel %vm22731_vm13, %v9751_v45, %v9778_v41  ;;  %v9800_v24 = vshll.u32 %v9029_v34, 16  ;;  %v9267_v36 = vsel %vm22732_vm14, %v20358_v42, %v9266_v14  ;;  %v20389_v27 = vsel %vm22733_vm12, %v20294_v2, %v9738_v35  ;;  %vm22745_vm0 = vmmov %vm22674_vm1 }
 0xc8a   : > { %v9767_v53 = vrot.slane %v9765_v44, 7  ;;  %v9781_v6 = vshrl.u32 %v9211_v39, 16  ;;  %v9805_v0 = vshrl.u32 %v9267_v36, 16  ;;  %v9813_v19 = vshrl.u32 %v20377_v4, 16  ;;  %vm22746_vm13 = vmmov %vm22745_vm0 }
 0xc8b   : > { %v9808_v25 = vshll.u32 %v9267_v36, 16  ;;  %v9272_v52 = vsel %vm22734_vm15, %v9270_v60, %v22594_v47  ;;  %v9837_v55 = vshrl.u32 %v9271_v48, 16  ;;  %10475 = vmatmul.mubr.bf16.gmra.mxu0 %v20271_v57  ;;  %v9799_v45 = vrot.slane %v9797_v31, 7  ;;  %vm22747_vm14 = vmmov %vm22745_vm0 }
 0xc8c   : > { %v9807_v8 = vrot.slane %v9805_v0, 7  ;;  %v9829_v28 = vshrl.u32 %v9272_v52, 16  ;;  %v9832_v34 = vshll.u32 %v9272_v52, 16  ;;  %10482 = vmatprep.mubr.bf16.mxu0 %v20389_v27  ;;  %v20398_v2 = vsel %vm22735_vm5, %v20303_v38, %v9746_v13  ;;  %vm22748_vm12 = vmmov %vm22745_vm0 }
 0xc8d   : > { %v20400_v61 = vrot.slane %v9837_v55, 7  ;;  %v9840_v14 = vshll.u32 %v9271_v48, 16  ;;  %v9853_v63 = vshrl.u32 %v9270_v60, 16  ;;  %v9783_v47 = vrot.slane %v9781_v6, 7  ;;  %vm22749_vm15 = vmmov %vm22745_vm0 }
 0xc8e   : > { %10644 = vmatmul.mubr.bf16.gmra.mxu1 %v20398_v2  ;;  %v9810_v41 = vor.u32 %v9808_v25, %v9807_v8  ;;  %v20403_v35 = vrot.slane %v9829_v28, 7  ;;  %v9856_v44 = vshll.u32 %v9270_v60, 16  ;;  %v9815_v37 = vrot.slane %v9813_v19, 7  ;;  %vm22765_vm5 = vmmov %vm22745_vm0 }
 0xc8f   : > { %10651 = vmatprep.mubr.bf16.mxu1 %v20383_v5  ;;  %v9842_v31 = vor.u32 %v9840_v14, %v20400_v61  ;;  %v9855_v36 = vrot.slane %v9853_v63, 7  ;;  %v9762_v0 = vor.u32 %v9760_v62, %v9759_v22  ;;  %v9770_v13 = vor.u32 %v9768_v49, %v9767_v53 }
 0xc90   : > { %v20408_v38 = vsel %vm22736_vm10, %v9783_v47, %v9810_v41  ;;  %v9834_v48 = vor.u32 %v9832_v34, %v20403_v35  ;;  %v9789_v52 = vshrl.u32 %v20374_v30, 16  ;;  %v9821_v60 = vshrl.u32 %v20334_v12, 16  ;;  %vm22767_vm10 = vmmov %vm22745_vm0 }
 0xc91   : > { %v20413_v6 = vsel %vm22737_vm8, %v9815_v37, %v9842_v31  ;;  %v9858_v25 = vor.u32 %v9856_v44, %v9855_v36  ;;  %v9802_v55 = vor.u32 %v9800_v24, %v9799_v45  ;;  %v20425_v49 = vsel %vm22740_vm4, %v20340_v51, %v9762_v0  ;;  %vm22770_vm8 = vmmov %vm22745_vm0 }
 0xc92   : > { %v20417_v19 = vsel %vm22738_vm11, %v9807_v8, %v9834_v48  ;;  %v9784_v28 = vshll.u32 %v9211_v39, 16  ;;  %v20430_v34 = vsel %vm22741_vm3, %v20354_v21, %v9770_v13  ;;  %v9791_v24 = vrot.slane %v9789_v52, 7  ;;  %vm22772_vm11 = vmmov %vm22745_vm0 }
 0xc93   : > { %v20420_v62 = vsel %vm22739_vm6, %v9807_v8, %v9858_v25  ;;  %10483 = vmatmul.mubr.bf16.gmra.mxu0 %v20322_v59  ;;  %v9792_v14 = vshll.u32 %v20374_v30, 16  ;;  %v15758_v8 = vld [vmem:[%s21838_s11 + $0x238] sm:$0xff]   ;;  %v20436_v63 = vrot.slane %v9821_v60, 7  ;;  %v9824_v41 = vshll.u32 %v20334_v12, 16 }
 0xc94   : > { %10490 = vmatprep.mubr.bf16.mxu0 %v20425_v49  ;;  %v20442_v51 = vsel %vm22674_vm1, %v20286_v9, %v9802_v55  ;;  %14856 = vmatprep.subr.bf16.mxu0 %v15758_v8  ;;  %v9786_v21 = vor.u32 %v9784_v28, %v9783_v47  ;;  %v9845_v30 = vshrl.u32 %v20358_v42, 16  ;;  %v9848_v36 = vshll.u32 %v20358_v42, 16  ;;  %v22754_v55 = vld [vmem:[#allocation59_spill] sm:$0xff]  ;;  %v22755_v28 = vld [vmem:[#allocation65_spill] sm:$0xff] }
 0xc95   : > { %v9794_v39 = vor.u32 %v9792_v14, %v9791_v24  ;;  %v9826_v44 = vor.u32 %v9824_v41, %v20436_v63  ;;  %v9816_v0 = vshll.u32 %v20377_v4, 16  ;;  %v22758_v14 = vld [vmem:[#allocation66_spill] sm:$0xff]  ;;  %v22760_v41 = vld [vmem:[#allocation17_spill] sm:$0xff] }
 0xc96   : > { %10652 = vmatmul.mubr.bf16.gmra.mxu1 %v20430_v34  ;;  %v20449_v31 = vsel %vm22742_vm7, %v9759_v22, %v9786_v21  ;;  %v9847_v12 = vrot.slane %v9845_v30, 7  ;;  %v9481_v22 = vshrl.u32 %v19643_v15, 16  ;;  %v22762_v21 = vld [vmem:[#allocation18_spill] sm:$0xff] }
 0xc97   : > { %10659 = vmatprep.mubr.bf16.mxu1 %v20442_v51  ;;  %v20454_v9 = vsel %vm22743_vm2, %v9767_v53, %v9794_v39  ;;  %v20459_v48 = vsel %vm22744_vm9, %v9799_v45, %v9826_v44  ;;  %v9818_v52 = vor.u32 %v9816_v0, %v9815_v37  ;;  %v9461_v45 = vshrl.u32 %v19614_v50, 16  ;;  %v22763_v0 = vld [vmem:[#allocation15_spill] sm:$0xff] }
 0xc98   : > { %v9850_v13 = vor.u32 %v9848_v36, %v9847_v12  ;;  %v9483_v25 = vrot.slane %v9481_v22, 7  ;;  %v20537_v22 = vld [vmem:[%s21839_s12] ss:$0 sm:$0xff] }
 0xc99   : > { %v20466_v53 = vsel %vm22746_vm13, %v9791_v24, %v9818_v52  ;;  %v9463_v60 = vrot.slane %v9461_v45, 7  ;;  %v22757_v24 = vld [vmem:[#allocation55_spill] sm:$0xff] }
 0xc9a   : > { %v9851_v42 = vsel %vm22745_vm0, %v9783_v47, %v9850_v13  ;;  %v9491_v4 = vsel %vm22747_vm14, %v9483_v25, %v19825_v40  ;;  %v9449_v47 = vshrl.u32 %v19625_v7, 16  ;;  %v15759_v40 = vld [vmem:[%s21838_s11 + $0x230] sm:$0xff]   ;;  %v15760_v7 = vld [vmem:[%s21838_s11 + $0x228] sm:$0xff]  }
 0xc9b   : > { %10491 = vmatmul.mubr.bf16.gmra.mxu0 %v20364_v11  ;;  %v9471_v15 = vsel %vm22748_vm12, %v9463_v60, %v19702_v58  ;;  %v15762_v58 = vld [vmem:[%s21838_s11 + $0x218] sm:$0xff]  }
 0xc9c   : > { %10498 = vmatprep.mubr.bf16.mxu0 %v20449_v31  ;;  %v9451_v37 = vrot.slane %v9449_v47, 7 }
 0xc9e   : > { %10660 = vmatmul.mubr.bf16.gmra.mxu1 %v20454_v9  ;;  %v9459_v50 = vsel %vm22749_vm15, %v9451_v37, %v19723_v3  ;;  %v15763_v3 = vld [vmem:[%s21838_s11 + $0x210] sm:$0xff]  }
 0xc9f   : > { %10667 = vmatprep.mubr.bf16.mxu1 %v20459_v48 }
 0xca3   : > { %10499 = vmatmul.mubr.bf16.gmra.mxu0 %v20383_v5 }
 0xca4   : > { %10506 = vmatprep.mubr.bf16.mxu0 %v9851_v42 }
 0xca6   : > { %10668 = vmatmul.mubr.bf16.gmra.mxu1 %v20466_v53 }
 0xca7   : > { %10869 = vmatprep.mubr.bf16.mxu1 %v9491_v4 }
 0xcab   : > { %10507 = vmatmul.mubr.bf16.gmra.mxu0 %v20442_v51 }
 0xcac   : > { %10708 = vmatprep.mubr.bf16.mxu0 %v9471_v15 }
 0xcae   : > { %10870 = vmatmul.mubr.bf16.vlgmr.msra.gmra.mxu1 %v19684_v43  ;;  %v15761_v43 = vld [vmem:[%s21838_s11 + $0x220] sm:$0xff]  }
 0xcaf   : > { %10877 = vmatprep.mubr.bf16.mxu1 %v19895_v16 }
 0xcb3   : > { %10709 = vmatmul.mubr.bf16.vlgmr.msra.gmra.mxu0 %v9459_v50 }
 0xcb4   : > { %10716 = vmatprep.mubr.bf16.mxu0 %v19833_v33  ;;  %14857 = vmatpush3.bf16.msra.mxu0 %v15758_v8  ;;  %v15765_v33 = vld [vmem:[%s21838_s11 + $0x200] sm:$0xff]  }
 0xcb5   : > { %14858 = vmatprep.subr.bf16.mxu0 %v15759_v40  ;;  %v22759_v8 = vld [vmem:[#allocation12_spill] sm:$0xff] }
 0xcb6   : > { %10878 = vmatmul.mubr.bf16.gmra.mxu1 %v19767_v32  ;;  %v15764_v32 = vld [vmem:[%s21838_s11 + $0x208] sm:$0xff]  }
 0xcb7   : > { %10885 = vmatprep.mubr.bf16.mxu1 %v19980_v20 }
 0xcb8   : > { %14859 = vmatpush3.bf16.msra.mxu0 %v15759_v40 }
 0xcb9   : > { %14860 = vmatprep.subr.bf16.mxu0 %v15760_v7 }
 0xcbb   : > { %10717 = vmatmul.mubr.bf16.gmra.mxu0 %v19847_v56  ;;  %v22750_v56 = vld [vmem:[#allocation51_spill] sm:$0xff] }
 0xcbc   : > { %10724 = vmatprep.mubr.bf16.mxu0 %v19921_v29  ;;  %14861 = vmatpush3.bf16.msra.mxu0 %v15760_v7 }
 0xcbd   : > { %14862 = vmatprep.subr.bf16.mxu0 %v15761_v43 }
 0xcbe   : > { %10886 = vmatmul.mubr.bf16.gmra.mxu1 %v19852_v1  ;;  %v22751_v1 = vld [vmem:[#allocation41_spill] sm:$0xff] }
 0xcbf   : > { %10893 = vmatprep.mubr.bf16.mxu1 %v20035_v17 }
 0xcc0   : > { %14863 = vmatpush3.bf16.msra.mxu0 %v15761_v43 }
 0xcc1   : > { %14864 = vmatprep.subr.bf16.mxu0 %v15762_v58 }
 0xcc3   : > { %10725 = vmatmul.mubr.bf16.gmra.mxu0 %v19895_v16  ;;  %v22752_v16 = vld [vmem:[#allocation50_spill] sm:$0xff] }
 0xcc4   : > { %10732 = vmatprep.mubr.bf16.mxu0 %v19992_v26  ;;  %14865 = vmatpush3.bf16.msra.mxu0 %v15762_v58 }
 0xcc5   : > { %14866 = vmatprep.subr.bf16.mxu0 %v15763_v3 }
 0xcc6   : > { %10894 = vmatmul.mubr.bf16.gmra.mxu1 %v19939_v54  ;;  %v22753_v54 = vld [vmem:[#allocation47_spill] sm:$0xff] }
 0xcc7   : > { %10901 = vmatprep.mubr.bf16.mxu1 %v20080_v18 }
 0xcc8   : > { %14867 = vmatpush3.bf16.msra.mxu0 %v15763_v3 }
 0xcc9   : > { %14868 = vmatprep.subr.bf16.mxu0 %v15764_v32 }
 0xccb   : > { %10733 = vmatmul.mubr.bf16.gmra.mxu0 %v19980_v20  ;;  %v22756_v20 = vld [vmem:[#allocation58_spill] sm:$0xff] }
 0xccc   : > { %10740 = vmatprep.mubr.bf16.mxu0 %v22750_v56  ;;  %14869 = vmatpush3.bf16.msra.mxu0 %v15764_v32 }
 0xccd   : > { %14870 = vmatprep.subr.bf16.mxu0 %v15765_v33 }
 0xcce   : > { %10902 = vmatmul.mubr.bf16.gmra.mxu1 %v22751_v1 }
 0xccf   : > { %10909 = vmatprep.mubr.bf16.mxu1 %v22752_v16 }
 0xcd0   : > { %14871 = vmatpush3.bf16.msra.mxu0 %v15765_v33 }
 0xcd3   : > { %10741 = vmatmul.mubr.bf16.gmra.mxu0 %v20035_v17  ;;  %v22761_v17 = vld [vmem:[#allocation54_spill] sm:$0xff] }
 0xcd4   : > { %10748 = vmatprep.mubr.bf16.mxu0 %v22753_v54 }
 0xcd6   : > { %10910 = vmatmul.mubr.bf16.gmra.mxu1 %v22754_v55 }
 0xcd7   : > { %10917 = vmatprep.mubr.bf16.mxu1 %v22755_v28 }
 0xcdb   : > { %10749 = vmatmul.mubr.bf16.gmra.mxu0 %v20080_v18 }
 0xcdc   : > { %10756 = vmatprep.mubr.bf16.mxu0 %v22756_v20 }
 0xcde   : > { %10918 = vmatmul.mubr.bf16.gmra.mxu1 %v22757_v24 }
 0xcdf   : > { %10925 = vmatprep.mubr.bf16.mxu1 %v22758_v14 }
 0xce3   : > { %10757 = vmatmul.mubr.bf16.gmra.mxu0 %v22752_v16 }
 0xce4   : > { %10764 = vmatprep.mubr.bf16.mxu0 %v22759_v8 }
 0xce6   : > { %10926 = vmatmul.mubr.bf16.gmra.mxu1 %v22760_v41 }
 0xce7   : > { %10933 = vmatprep.mubr.bf16.mxu1 %v22761_v17 }
 0xceb   : > { %10765 = vmatmul.mubr.bf16.gmra.mxu0 %v22755_v28 }
 0xcec   : > { %10772 = vmatprep.mubr.bf16.mxu0 %v22762_v21 }
 0xced   : > { %v14162_v30 = vpop.f32.mrf.mxu1 }
 0xcee   : > { %10934 = vmatmul.mubr.bf16.gmra.mxu1 %v20201_v23 }
 0xcef   : > { %10941 = vmatprep.mubr.bf16.mxu1 %v20345_v10  ;;  %v14163_v18 = vpop.f32.mrf.mxu1 }
 0xcf0   : > { %v14164_v39 = vadd.f32 %v14163_v18, %v14162_v30 }
 0xcf1   : > { %v14165_v44 = vpop.f32.mrf.mxu1 }
 0xcf3   : > { %v14050_v12 = vpop.f32.mrf.mxu0  ;;  %10773 = vmatmul.mubr.bf16.gmra.mxu0 %v22758_v14  ;;  %v14166_v36 = vpop.f32.mrf.mxu1 }
 0xcf4   : > { %10780 = vmatprep.mubr.bf16.mxu0 %v22763_v0  ;;  %v14167_v13 = vadd.f32 %v14166_v36, %v14165_v44 }
 0xcf5   : > { %v14051_v52 = vpop.f32.mrf.mxu0  ;;  %v14168_v42 = vpop.f32.mrf.mxu1 }
 0xcf6   : > { %10942 = vmatmul.mubr.bf16.gmra.mxu1 %v20271_v57  ;;  %v14052_v23 = vadd.f32 %v14051_v52, %v14050_v12 }
 0xcf7   : > { %10949 = vmatprep.mubr.bf16.mxu1 %v20389_v27  ;;  %v14053_v25 = vpop.f32.mrf.mxu0  ;;  %v14169_v4 = vpop.f32.mrf.mxu1 }
 0xcf8   : > { %v10389_v45 = vadd.f32 %v14052_v23, %v20537_v22  ;;  %v14170_v60 = vadd.f32 %v14169_v4, %v14168_v42 }
 0xcf9   : > { %v14054_v15 = vpop.f32.mrf.mxu0  ;;  %v14171_v47 = vpop.f32.mrf.mxu1 }
 0xcfa   : > { %v14055_v37 = vadd.f32 %v14054_v15, %v14053_v25  ;;  %v20542_v40 = vadd.f32 %v14164_v39, %v10389_v45 }
 0xcfb   : > { %v14056_v50 = vpop.f32.mrf.mxu0  ;;  %10781 = vmatmul.mubr.bf16.gmra.mxu0 %v22761_v17  ;;  %v14172_v7 = vpop.f32.mrf.mxu1 }
 0xcfc   : > { %v10392_v43 = vadd.f32 %v14055_v37, %v20537_v22  ;;  %10788 = vmatprep.mubr.bf16.mxu0 %v20351_v46  ;;  %v14173_v57 = vadd.f32 %v14172_v7, %v14171_v47 }
 0xcfd   : > { %v14057_v58 = vpop.f32.mrf.mxu0 }
 0xcfe   : > { %v14174_v3 = vpop.f32.mrf.mxu1  ;;  %10950 = vmatmul.mubr.bf16.gmra.mxu1 %v20322_v59  ;;  %v14058_v32 = vadd.f32 %v14057_v58, %v14056_v50  ;;  %v20549_v33 = vadd.f32 %v14167_v13, %v10392_v43 }
 0xcff   : > { %10957 = vmatprep.mubr.bf16.mxu1 %v20425_v49  ;;  %v14059_v1 = vpop.f32.mrf.mxu0 }
 0xd00   : > { %v14175_v16 = vpop.f32.mrf.mxu1  ;;  %v10397_v55 = vadd.f32 %v14058_v32, %v20537_v22 }
 0xd01   : > { %v14176_v28 = vadd.f32 %v14175_v16, %v14174_v3  ;;  %v14060_v24 = vpop.f32.mrf.mxu0 }
 0xd02   : > { %v14177_v14 = vpop.f32.mrf.mxu1  ;;  %v14061_v41 = vadd.f32 %v14060_v24, %v14059_v1  ;;  %v20552_v17 = vadd.f32 %v14170_v60, %v10397_v55 }
 0xd03   : > { %v14062_v30 = vpop.f32.mrf.mxu0  ;;  %10789 = vmatmul.mubr.bf16.gmra.mxu0 %v20345_v10 }
 0xd04   : > { %v14178_v18 = vpop.f32.mrf.mxu1  ;;  %v10400_v59 = vadd.f32 %v14061_v41, %v20537_v22  ;;  %10796 = vmatprep.mubr.bf16.mxu0 %v20398_v2 }
 0xd05   : > { %v14179_v39 = vadd.f32 %v14178_v18, %v14177_v14  ;;  %v14063_v44 = vpop.f32.mrf.mxu0 }
 0xd06   : > { %v14180_v12 = vpop.f32.mrf.mxu1  ;;  %10958 = vmatmul.mubr.bf16.gmra.mxu1 %v20364_v11  ;;  %v14064_v36 = vadd.f32 %v14063_v44, %v14062_v30  ;;  %v20559_v13 = vadd.f32 %v14173_v57, %v10400_v59 }
 0xd07   : > { %10965 = vmatprep.mubr.bf16.mxu1 %v20449_v31  ;;  %v14065_v52 = vpop.f32.mrf.mxu0 }
 0xd08   : > { %v14181_v42 = vpop.f32.mrf.mxu1  ;;  %v10405_v23 = vadd.f32 %v14064_v36, %v20537_v22 }
 0xd09   : > { %v14182_v10 = vadd.f32 %v14181_v42, %v14180_v12  ;;  %v14066_v25 = vpop.f32.mrf.mxu0 }
 0xd0a   : > { %v14183_v4 = vpop.f32.mrf.mxu1  ;;  %v14067_v45 = vadd.f32 %v14066_v25, %v14065_v52  ;;  %v20562_v60 = vadd.f32 %v14176_v28, %v10405_v23 }
 0xd0b   : > { %v14068_v15 = vpop.f32.mrf.mxu0  ;;  %10797 = vmatmul.mubr.bf16.gmra.mxu0 %v20389_v27 }
 0xd0c   : > { %v14184_v47 = vpop.f32.mrf.mxu1  ;;  %v10408_v11 = vadd.f32 %v14067_v45, %v20537_v22  ;;  %10804 = vmatprep.mubr.bf16.mxu0 %v20430_v34 }
 0xd0d   : > { %v14185_v37 = vadd.f32 %v14184_v47, %v14183_v4  ;;  %v14069_v50 = vpop.f32.mrf.mxu0  ;;  %v22764_v47 = vld [vmem:[#allocation42_spill] sm:$0xff] }
 0xd0e   : > { %v14186_v7 = vpop.f32.mrf.mxu1  ;;  %10966 = vmatmul.mubr.bf16.gmra.mxu1 %v20383_v5  ;;  %v14070_v43 = vadd.f32 %v14069_v50, %v14068_v15  ;;  %v20569_v57 = vadd.f32 %v14179_v39, %v10408_v11  ;;  %v9861_v11 = vsel %vm22765_vm5, %v20403_v35, %v22764_v47 }
 0xd0f   : > { %10973 = vmatprep.mubr.bf16.mxu1 %v20408_v38  ;;  %v14071_v58 = vpop.f32.mrf.mxu0 }
 0xd10   : > { %v14187_v3 = vpop.f32.mrf.mxu1  ;;  %v10413_v32 = vadd.f32 %v14070_v43, %v20537_v22 }
 0xd11   : > { %v14072_v27 = vpop.f32.mrf.mxu0  ;;  %v14188_v44 = vadd.f32 %v14187_v3, %v14186_v7 }
 0xd12   : > { %v14189_v1 = vpop.f32.mrf.mxu1  ;;  %v14073_v16 = vadd.f32 %v14072_v27, %v14071_v58  ;;  %v20572_v55 = vadd.f32 %v14182_v10, %v10413_v32 }
 0xd13   : > { %v14074_v28 = vpop.f32.mrf.mxu0  ;;  %10805 = vmatmul.mubr.bf16.gmra.mxu0 %v20425_v49 }
 0xd14   : > { %v14190_v24 = vpop.f32.mrf.mxu1  ;;  %v10416_v5 = vadd.f32 %v14073_v16, %v20537_v22  ;;  %10812 = vmatprep.mubr.bf16.mxu0 %v20454_v9 }
 0xd15   : > { %v14075_v14 = vpop.f32.mrf.mxu0  ;;  %v14191_v25 = vadd.f32 %v14190_v24, %v14189_v1  ;;  %v22766_v24 = vld [vmem:[#allocation9_spill] sm:$0xff] }
 0xd16   : > { %v14192_v41 = vpop.f32.mrf.mxu1  ;;  %10974 = vmatmul.mubr.bf16.gmra.mxu1 %v20442_v51  ;;  %v14076_v30 = vadd.f32 %v14075_v14, %v14074_v28  ;;  %v20579_v18 = vadd.f32 %v14185_v37, %v10416_v5  ;;  %v9860_v5 = vsel %vm22767_vm10, %v20436_v63, %v22766_v24 }
 0xd17   : > { %10981 = vmatprep.mubr.bf16.mxu1 %v20417_v19  ;;  %v14077_v59 = vpop.f32.mrf.mxu0 }
 0xd18   : > { %v14193_v39 = vpop.f32.mrf.mxu1  ;;  %v10421_v12 = vadd.f32 %v14076_v30, %v20537_v22  ;;  %v22768_v30 = vld [vmem:[#allocation32_spill] sm:$0xff] }
 0xd19   : > { %v14194_v49 = vadd.f32 %v14193_v39, %v14192_v41  ;;  %v14078_v36 = vpop.f32.mrf.mxu0 }
 0xd1a   : > { %v14195_v52 = vpop.f32.mrf.mxu1  ;;  %v14079_v42 = vadd.f32 %v14078_v36, %v14077_v59  ;;  %v20582_v23 = vadd.f32 %v14188_v44, %v10421_v12  ;;  %v9493_v59 = vshrl.u32 %v22768_v30, 16 }
 0xd1b   : > { %v14080_v10 = vpop.f32.mrf.mxu0  ;;  %10813 = vmatmul.mubr.bf16.gmra.mxu0 %v20449_v31 }
 0xd1c   : > { %v14196_v51 = vpop.f32.mrf.mxu1  ;;  %v10424_v19 = vadd.f32 %v14079_v42, %v20537_v22  ;;  %10820 = vmatprep.mubr.bf16.mxu0 %v20466_v53 }
 0xd1d   : > { %v14197_v4 = vadd.f32 %v14196_v51, %v14195_v52  ;;  %v14081_v45 = vpop.f32.mrf.mxu0 }
 0xd1e   : > { %v14198_v15 = vpop.f32.mrf.mxu1  ;;  %10982 = vmatmul.mubr.bf16.gmra.mxu1 %v20459_v48  ;;  %v14082_v37 = vadd.f32 %v14081_v45, %v14080_v10  ;;  %v20591_v50 = vadd.f32 %v14191_v25, %v10424_v19  ;;  %v9495_v10 = vrot.slane %v9493_v59, 7  ;;  %v22769_v19 = vld [vmem:[#allocation46_spill] sm:$0xff] }
 0xd1f   : > { %10989 = vmatprep.mubr.bf16.mxu1 %v9861_v11  ;;  %v14083_v31 = vpop.f32.mrf.mxu0 }
 0xd20   : > { %v14199_v7 = vpop.f32.mrf.mxu1  ;;  %v10429_v43 = vadd.f32 %v14082_v37, %v20537_v22  ;;  %v9503_v45 = vsel %vm22770_vm8, %v9495_v10, %v22769_v19 }
 0xd21   : > { %v14200_v58 = vadd.f32 %v14199_v7, %v14198_v15  ;;  %v14084_v3 = vpop.f32.mrf.mxu0 }
 0xd22   : > { %v14201_v32 = vpop.f32.mrf.mxu1  ;;  %v14085_v27 = vadd.f32 %v14084_v3, %v14083_v31  ;;  %v20594_v1 = vadd.f32 %v14194_v49, %v10429_v43 }
 0xd23   : > { %v14086_v16 = vpop.f32.mrf.mxu0  ;;  %10821 = vmatmul.mubr.bf16.gmra.mxu0 %v20408_v38 }
 0xd24   : > { %v14202_v48 = vpop.f32.mrf.mxu1  ;;  %v10432_v35 = vadd.f32 %v14085_v27, %v20537_v22  ;;  %10828 = vmatprep.mubr.bf16.mxu0 %v20413_v6 }
 0xd25   : > { %v14203_v28 = vadd.f32 %v14202_v48, %v14201_v32  ;;  %v14087_v14 = vpop.f32.mrf.mxu0 }
 0xd26   : > { %v14204_v41 = vpop.f32.mrf.mxu1  ;;  %10990 = vmatmul.mubr.bf16.gmra.mxu1 %v9860_v5  ;;  %v14088_v39 = vadd.f32 %v14087_v14, %v14086_v16  ;;  %v20603_v44 = vadd.f32 %v14197_v4, %v10432_v35 }
 0xd27   : > { %v14089_v12 = vpop.f32.mrf.mxu0 }
 0xd28   : > { %v14205_v38 = vpop.f32.mrf.mxu1  ;;  %v10437_v49 = vadd.f32 %v14088_v39, %v20537_v22 }
 0xd29   : > { %v14206_v36 = vadd.f32 %v14205_v38, %v14204_v41  ;;  %v14090_v52 = vpop.f32.mrf.mxu0 }
 0xd2a   : > { %v14207_v42 = vpop.f32.mrf.mxu1  ;;  %v14091_v51 = vadd.f32 %v14090_v52, %v14089_v12  ;;  %v20606_v25 = vadd.f32 %v14200_v58, %v10437_v49 }
 0xd2b   : > { %v14092_v63 = vpop.f32.mrf.mxu0  ;;  %10829 = vmatmul.mubr.bf16.gmra.mxu0 %v20420_v62 }
 0xd2c   : > { %v14208_v15 = vpop.f32.mrf.mxu1  ;;  %v10440_v4 = vadd.f32 %v14091_v51, %v20537_v22  ;;  %14872 = vmatprep.mubr.bf16.mxu0 %v9503_v45 }
 0xd2d   : > { %v14209_v47 = vadd.f32 %v14208_v15, %v14207_v42  ;;  %v14093_v11 = vpop.f32.mrf.mxu0 }
 0xd2e   : > { %v14210_v37 = vpop.f32.mrf.mxu1  ;;  %v14094_v31 = vadd.f32 %v14093_v11, %v14092_v63  ;;  %v20612_v7 = vadd.f32 %v14203_v28, %v10440_v4 }
 0xd2f   : > { %v14095_v43 = vpop.f32.mrf.mxu0 }
 0xd30   : > { %v14211_v3 = vpop.f32.mrf.mxu1  ;;  %v10445_v58 = vadd.f32 %v14094_v31, %v20537_v22 }
 0xd31   : > { %v14212_v32 = vadd.f32 %v14211_v3, %v14210_v37  ;;  %v14096_v27 = vpop.f32.mrf.mxu0 }
 0xd32   : > { %v14213_v62 = vpop.f32.mrf.mxu1  ;;  %v14097_v16 = vadd.f32 %v14096_v27, %v14095_v43  ;;  %v20615_v48 = vadd.f32 %v14206_v36, %v10445_v58 }
 0xd33   : > { %v14098_v35 = vpop.f32.mrf.mxu0  ;;  %14873 = vmatmul.mubr.bf16.vlgmr.msra.gmra.mxu0 %v19921_v29 }
 0xd34   : > { %v14214_v24 = vpop.f32.mrf.mxu1  ;;  %v10448_v5 = vadd.f32 %v14097_v16, %v20537_v22  ;;  %14876 = vmatprep.mubr.bf16.mxu0 %v19992_v26 }
 0xd35   : > { %v14215_v28 = vadd.f32 %v14214_v24, %v14213_v62  ;;  %v14099_v14 = vpop.f32.mrf.mxu0 }
 0xd36   : > { %v14216_v41 = vpop.f32.mrf.mxu1  ;;  %v14100_v30 = vadd.f32 %v14099_v14, %v14098_v35  ;;  %v20620_v59 = vadd.f32 %v14209_v47, %v10448_v5 }
 0xd37   : > { %v14101_v39 = vpop.f32.mrf.mxu0 }
 0xd38   : > { %v14217_v12 = vpop.f32.mrf.mxu1  ;;  %v10453_v38 = vadd.f32 %v14100_v30, %v20537_v22 }
 0xd39   : > { %v14218_v49 = vadd.f32 %v14217_v12, %v14216_v41  ;;  %v14102_v36 = vpop.f32.mrf.mxu0 }
 0xd3a   : > { %v14219_v52 = vpop.f32.mrf.mxu1  ;;  %v14103_v42 = vadd.f32 %v14102_v36, %v14101_v39  ;;  %v20623_v29 = vadd.f32 %v14212_v32, %v10453_v38 }
 0xd3b   : > { %v14104_v10 = vpop.f32.mrf.mxu0  ;;  %14877 = vmatmul.mubr.bf16.gmra.mxu0 %v22750_v56 }
 0xd3c   : > { %v14220_v26 = vpop.f32.mrf.mxu1  ;;  %v10456_v51 = vadd.f32 %v14103_v42, %v20537_v22  ;;  %14880 = vmatprep.mubr.bf16.mxu0 %v22753_v54 }
 0xd3d   : > { %v14221_v63 = vadd.f32 %v14220_v26, %v14219_v52  ;;  %v14105_v19 = vpop.f32.mrf.mxu0 }
 0xd3e   : > { %v14222_v45 = vpop.f32.mrf.mxu1  ;;  %v14106_v15 = vadd.f32 %v14105_v19, %v14104_v10  ;;  %v20628_v4 = vadd.f32 %v14215_v28, %v10456_v51 }
 0xd3f   : > { %v14107_v47 = vpop.f32.mrf.mxu0 }
 0xd40   : > { %v14223_v11 = vpop.f32.mrf.mxu1  ;;  %v10461_v37 = vadd.f32 %v14106_v15, %v20537_v22 }
 0xd41   : > { %v14224_v31 = vadd.f32 %v14223_v11, %v14222_v45  ;;  %v14108_v43 = vpop.f32.mrf.mxu0 }
 0xd42   : > { %v14225_v3 = vpop.f32.mrf.mxu1  ;;  %v14109_v58 = vadd.f32 %v14108_v43, %v14107_v47  ;;  %v20631_v56 = vadd.f32 %v14218_v49, %v10461_v37 }
 0xd43   : > { %v14110_v32 = vpop.f32.mrf.mxu0  ;;  %14881 = vmatmul.mubr.bf16.gmra.mxu0 %v22756_v20 }
 0xd44   : > { %v14226_v54 = vpop.f32.mrf.mxu1  ;;  %v10464_v27 = vadd.f32 %v14109_v58, %v20537_v22  ;;  %14884 = vmatprep.mubr.bf16.mxu0 %v22759_v8 }
 0xd45   : > { %v14227_v62 = vadd.f32 %v14226_v54, %v14225_v3  ;;  %v14111_v16 = vpop.f32.mrf.mxu0 }
 0xd46   : > { %v14228_v35 = vpop.f32.mrf.mxu1  ;;  %v14112_v24 = vadd.f32 %v14111_v16, %v14110_v32  ;;  %v20636_v5 = vadd.f32 %v14221_v63, %v10464_v27 }
 0xd47   : > { %v14113_v28 = vpop.f32.mrf.mxu0 }
 0xd48   : > { %v14229_v14 = vpop.f32.mrf.mxu1  ;;  %v10469_v41 = vadd.f32 %v14112_v24, %v20537_v22 }
 0xd49   : > { %v14230_v30 = vadd.f32 %v14229_v14, %v14228_v35  ;;  %v14114_v39 = vpop.f32.mrf.mxu0 }
 0xd4a   : > { %v14231_v12 = vpop.f32.mrf.mxu1  ;;  %v14115_v38 = vadd.f32 %v14114_v39, %v14113_v28  ;;  %v20639_v20 = vadd.f32 %v14224_v31, %v10469_v41 }
 0xd4b   : > { %v14116_v49 = vpop.f32.mrf.mxu0  ;;  %14885 = vmatmul.mubr.bf16.gmra.mxu0 %v22762_v21 }
 0xd4c   : > { %v14232_v8 = vpop.f32.mrf.mxu1  ;;  %v10472_v36 = vadd.f32 %v14115_v38, %v20537_v22  ;;  %14888 = vmatprep.mubr.bf16.mxu0 %v22763_v0 }
 0xd4d   : > { %v14233_v52 = vadd.f32 %v14232_v8, %v14231_v12  ;;  %v14117_v42 = vpop.f32.mrf.mxu0 }
 0xd4e   : > { %v14234_v10 = vpop.f32.mrf.mxu1  ;;  %v14118_v26 = vadd.f32 %v14117_v42, %v14116_v49  ;;  %v20644_v51 = vadd.f32 %v14227_v62, %v10472_v36 }
 0xd4f   : > { %v14119_v63 = vpop.f32.mrf.mxu0 }
 0xd50   : > { %v14235_v19 = vpop.f32.mrf.mxu1  ;;  %v10477_v45 = vadd.f32 %v14118_v26, %v20537_v22 }
 0xd51   : > { %v14236_v15 = vadd.f32 %v14235_v19, %v14234_v10  ;;  %v14120_v47 = vpop.f32.mrf.mxu0 }
 0xd52   : > { %v14237_v11 = vpop.f32.mrf.mxu1  ;;  %v14121_v37 = vadd.f32 %v14120_v47, %v14119_v63  ;;  %v20647_v21 = vadd.f32 %v14230_v30, %v10477_v45 }
 0xd53   : > { %v14122_v31 = vpop.f32.mrf.mxu0  ;;  %14889 = vmatmul.mubr.bf16.gmra.mxu0 %v20351_v46 }
 0xd54   : > { %v14238_v0 = vpop.f32.mrf.mxu1  ;;  %v10480_v43 = vadd.f32 %v14121_v37, %v20537_v22  ;;  %14892 = vmatprep.mubr.bf16.mxu0 %v20398_v2 }
 0xd55   : > { %v14239_v3 = vadd.f32 %v14238_v0, %v14237_v11  ;;  %v14123_v58 = vpop.f32.mrf.mxu0 }
 0xd56   : > { %v14240_v32 = vpop.f32.mrf.mxu1  ;;  %v14124_v54 = vadd.f32 %v14123_v58, %v14122_v31  ;;  %v20652_v27 = vadd.f32 %v14233_v52, %v10480_v43 }
 0xd57   : > { %v14125_v62 = vpop.f32.mrf.mxu0 }
 0xd58   : > { %v14241_v16 = vpop.f32.mrf.mxu1  ;;  %v10485_v35 = vadd.f32 %v14124_v54, %v20537_v22 }
 0xd59   : > { %v14242_v24 = vadd.f32 %v14241_v16, %v14240_v32  ;;  %v14126_v28 = vpop.f32.mrf.mxu0 }
 0xd5a   : > { %v14243_v14 = vpop.f32.mrf.mxu1  ;;  %v14127_v41 = vadd.f32 %v14126_v28, %v14125_v62  ;;  %v20655_v46 = vadd.f32 %v14236_v15, %v10485_v35 }
 0xd5b   : > { %v14128_v30 = vpop.f32.mrf.mxu0  ;;  %14893 = vmatmul.mubr.bf16.gmra.mxu0 %v20430_v34 }
 0xd5c   : > { %v14244_v2 = vpop.f32.mrf.mxu1  ;;  %v10488_v39 = vadd.f32 %v14127_v41, %v20537_v22  ;;  %14896 = vmatprep.mubr.bf16.mxu0 %v20454_v9 }
 0xd5d   : > { %v14245_v12 = vadd.f32 %v14244_v2, %v14243_v14  ;;  %v14129_v38 = vpop.f32.mrf.mxu0 }
 0xd5e   : > { %v14246_v49 = vpop.f32.mrf.mxu1  ;;  %v14130_v8 = vadd.f32 %v14129_v38, %v14128_v30  ;;  %v20660_v36 = vadd.f32 %v14239_v3, %v10488_v39 }
 0xd5f   : > { %v14131_v52 = vpop.f32.mrf.mxu0 }
 0xd60   : > { %v14247_v42 = vpop.f32.mrf.mxu1  ;;  %v10493_v10 = vadd.f32 %v14130_v8, %v20537_v22 }
 0xd61   : > { %v14248_v26 = vadd.f32 %v14247_v42, %v14246_v49  ;;  %v14132_v63 = vpop.f32.mrf.mxu0 }
 0xd62   : > { %v14249_v19 = vpop.f32.mrf.mxu1  ;;  %v14133_v45 = vadd.f32 %v14132_v63, %v14131_v52  ;;  %v20663_v34 = vadd.f32 %v14242_v24, %v10493_v10 }
 0xd63   : > { %v14134_v15 = vpop.f32.mrf.mxu0  ;;  %14897 = vmatmul.mubr.bf16.gmra.mxu0 %v20466_v53  ;;  %v22771_v53 = vld [vmem:[#allocation43_spill] sm:$0xff] }
 0xd64   : > { %v14250_v9 = vpop.f32.mrf.mxu1  ;;  %v10496_v47 = vadd.f32 %v14133_v45, %v20537_v22  ;;  %14900 = vmatprep.mubr.bf16.mxu0 %v20413_v6  ;;  %v9862_v24 = vsel %vm22772_vm11, %v20400_v61, %v22771_v53 }
 0xd65   : > { %v14251_v11 = vadd.f32 %v14250_v9, %v14249_v19  ;;  %v14135_v37 = vpop.f32.mrf.mxu0 }
 0xd66   : > { %v14252_v31 = vpop.f32.mrf.mxu1  ;;  %v14136_v0 = vadd.f32 %v14135_v37, %v14134_v15  ;;  %v20668_v43 = vadd.f32 %v14245_v12, %v10496_v47 }
 0xd67   : > { %v14137_v3 = vpop.f32.mrf.mxu0 }
 0xd68   : > { %v14253_v58 = vpop.f32.mrf.mxu1  ;;  %v10501_v32 = vadd.f32 %v14136_v0, %v20537_v22 }
 0xd69   : > { %v14254_v54 = vadd.f32 %v14253_v58, %v14252_v31  ;;  %v14138_v62 = vpop.f32.mrf.mxu0 }
 0xd6a   : > { %v14255_v16 = vpop.f32.mrf.mxu1  ;;  %v14139_v35 = vadd.f32 %v14138_v62, %v14137_v3  ;;  %v20674_v28 = vadd.f32 %v14248_v26, %v10501_v32 }
 0xd6b   : > { %v14140_v6 = vpop.f32.mrf.mxu0  ;;  %14901 = vmatmul.mubr.bf16.gmra.mxu0 %v9862_v24 }
 0xd6c   : > { %v14256_v14 = vpop.f32.mrf.mxu1  ;;  %v10504_v41 = vadd.f32 %v14139_v35, %v20537_v22 }
 0xd6d   : > { %v14257_v30 = vadd.f32 %v14256_v14, %v14255_v16  ;;  %v14141_v2 = vpop.f32.mrf.mxu0 }
 0xd6e   : > { %v20677_v39 = vpop.f32.mrf.mxu1  ;;  %v14142_v12 = vadd.f32 %v14141_v2, %v14140_v6  ;;  %v20679_v38 = vadd.f32 %v14251_v11, %v10504_v41 }
 0xd6f   : > { %v14143_v49 = vpop.f32.mrf.mxu0 }
 0xd70   : > { %v20681_v8 = vpop.f32.mrf.mxu1  ;;  %v10509_v52 = vadd.f32 %v14142_v12, %v20537_v22 }
 0xd71   : > { %v14144_v61 = vpop.f32.mrf.mxu0 }
 0xd72   : > { %v20684_v42 = vpop.f32.mrf.mxu1  ;;  %v14145_v10 = vadd.f32 %v14144_v61, %v14143_v49  ;;  %v20686_v26 = vadd.f32 %v14254_v54, %v10509_v52 }
 0xd73   : > { %v14274_v63 = vpop.f32.mrf.mxu0 }
 0xd74   : > { %v20688_v19 = vpop.f32.mrf.mxu1  ;;  %v10512_v45 = vadd.f32 %v14145_v10, %v20537_v22 }
 0xd75   : > { %v14275_v15 = vpop.f32.mrf.mxu0 }
 0xd76   : > { %v20691_v9 = vpop.f32.mrf.mxu1  ;;  %v14276_v47 = vadd.f32 %v14275_v15, %v14274_v63  ;;  %v20693_v11 = vadd.f32 %v14257_v30, %v10512_v45 }
 0xd77   : > { %v14277_v37 = vpop.f32.mrf.mxu0 }
 0xd78   : > { %v20695_v31 = vpop.f32.mrf.mxu1  ;;  %v20698_v0 = vadd.f32 %v14276_v47, %v20542_v40 }
 0xd79   : > { %v14278_v3 = vpop.f32.mrf.mxu0 }
 0xd7a   : > { %v20700_v58 = vpop.f32.mrf.mxu1  ;;  %v14279_v32 = vadd.f32 %v14278_v3, %v14277_v37 }
 0xd7b   : > { %v14280_v54 = vpop.f32.mrf.mxu0 }
 0xd7c   : > { %v20702_v62 = vpop.f32.mrf.mxu1  ;;  %v20705_v22 = vadd.f32 %v14279_v32, %v20549_v33 }
 0xd7d   : > { %v14281_v16 = vpop.f32.mrf.mxu0 }
 0xd7e   : > { %v20707_v35 = vpop.f32.mrf.mxu1  ;;  %v14282_v53 = vadd.f32 %v14281_v16, %v14280_v54 }
 0xd7f   : > { %v14283_v24 = vpop.f32.mrf.mxu0 }
 0xd80   : > { %v20709_v6 = vpop.f32.mrf.mxu1  ;;  %v20712_v40 = vadd.f32 %v14282_v53, %v20552_v17 }
 0xd81   : > { %v14284_v14 = vpop.f32.mrf.mxu0 }
 0xd82   : > { %v20714_v41 = vpop.f32.mrf.mxu1  ;;  %v14285_v30 = vadd.f32 %v14284_v14, %v14283_v24 }
 0xd83   : > { %v14286_v2 = vpop.f32.mrf.mxu0 }
 0xd84   : > { %v20716_v12 = vpop.f32.mrf.mxu1  ;;  %v20719_v33 = vadd.f32 %v14285_v30, %v20559_v13 }
 0xd85   : > { %v14287_v49 = vpop.f32.mrf.mxu0 }
 0xd86   : > { %v20721_v52 = vpop.f32.mrf.mxu1  ;;  %v14288_v61 = vadd.f32 %v14287_v49, %v14286_v2 }
 0xd87   : > { %v14289_v10 = vpop.f32.mrf.mxu0 }
 0xd88   : > { %v20723_v63 = vpop.f32.mrf.mxu1  ;;  %v20726_v17 = vadd.f32 %v14288_v61, %v20562_v60 }
 0xd89   : > { %v14290_v45 = vpop.f32.mrf.mxu0 }
 0xd8a   : > { %v20728_v15 = vpop.f32.mrf.mxu1  ;;  %v14291_v47 = vadd.f32 %v14290_v45, %v14289_v10 }
 0xd8b   : > { %v14292_v37 = vpop.f32.mrf.mxu0 }
 0xd8c   : > { %v20730_v3 = vpop.f32.mrf.mxu1  ;;  %v20733_v13 = vadd.f32 %v14291_v47, %v20569_v57 }
 0xd8d   : > { %v14293_v32 = vpop.f32.mrf.mxu0 }
 0xd8e   : > { %v20735_v54 = vpop.f32.mrf.mxu1  ;;  %v14294_v16 = vadd.f32 %v14293_v32, %v14292_v37 }
 0xd8f   : > { %22773 = vst [vmem:[#allocation13_spill] sm:$0xff] %v20735_v54  ;;  %v14295_v53 = vpop.f32.mrf.mxu0 }
 0xd90   : > { %v20737_v24 = vpop.f32.mrf.mxu1  ;;  %v20740_v60 = vadd.f32 %v14294_v16, %v20572_v55 }
 0xd91   : > { %22774 = vst [vmem:[#allocation64_spill] sm:$0xff] %v20737_v24  ;;  %v14296_v14 = vpop.f32.mrf.mxu0 }
 0xd92   : > { %v20742_v30 = vpop.f32.mrf.mxu1  ;;  %v14297_v2 = vadd.f32 %v14296_v14, %v14295_v53 }
 0xd93   : > { %22775 = vst [vmem:[#allocation14_spill] sm:$0xff] %v20742_v30  ;;  %v14298_v49 = vpop.f32.mrf.mxu0 }
 0xd94   : > { %v20744_v61 = vpop.f32.mrf.mxu1  ;;  %v20747_v57 = vadd.f32 %v14297_v2, %v20579_v18 }
 0xd95   : > { %22776 = vst [vmem:[#allocation67_spill] sm:$0xff] %v20744_v61  ;;  %v14299_v10 = vpop.f32.mrf.mxu0 }
 0xd96   : > { %v20749_v45 = vpop.f32.mrf.mxu1  ;;  %v14300_v47 = vadd.f32 %v14299_v10, %v14298_v49 }
 0xd97   : > { %v14301_v37 = vpop.f32.mrf.mxu0 }
 0xd98   : > { %v20751_v32 = vpop.f32.mrf.mxu1  ;;  %v20754_v55 = vadd.f32 %v14300_v47, %v20582_v23 }
 0xd99   : > { %v14302_v16 = vpop.f32.mrf.mxu0 }
 0xd9a   : > { %22777 = vst [vmem:[#allocation68_spill] sm:$0xff] %v20754_v55  ;;  %v20756_v24 = vpop.f32.mrf.mxu1  ;;  %v14303_v53 = vadd.f32 %v14302_v16, %v14301_v37 }
 0xd9b   : > { %22778 = vst [vmem:[#allocation69_spill] sm:$0xff] %v20756_v24  ;;  %v14304_v14 = vpop.f32.mrf.mxu0 }
 0xd9c   : > { %v20758_v30 = vpop.f32.mrf.mxu1  ;;  %v20761_v18 = vadd.f32 %v14303_v53, %v20591_v50 }
 0xd9d   : > { %v14305_v2 = vpop.f32.mrf.mxu0 }
 0xd9e   : > { %22779 = vst [vmem:[#allocation10_spill] sm:$0xff] %v20761_v18  ;;  %v20763_v61 = vpop.f32.mrf.mxu1  ;;  %v14306_v49 = vadd.f32 %v14305_v2, %v14304_v14 }
 0xd9f   : > { %22780 = vst [vmem:[#allocation70_spill] sm:$0xff] %v20763_v61  ;;  %v14307_v10 = vpop.f32.mrf.mxu0 }
 0xda0   : > { %v20765_v54 = vpop.f32.mrf.mxu1  ;;  %v20768_v23 = vadd.f32 %v14306_v49, %v20594_v1 }
 0xda1   : > { %22781 = vst [vmem:[#allocation71_spill] sm:$0xff] %v20765_v54  ;;  %v14308_v47 = vpop.f32.mrf.mxu0 }
 0xda2   : > { %v20770_v55 = vpop.f32.mrf.mxu1  ;;  %v14309_v37 = vadd.f32 %v14308_v47, %v14307_v10 }
 0xda3   : > { %22782 = vst [vmem:[#allocation23_spill] sm:$0xff] %v20770_v55  ;;  %v14310_v16 = vpop.f32.mrf.mxu0 }
 0xda4   : > { %v20772_v24 = vpop.f32.mrf.mxu1  ;;  %v20775_v50 = vadd.f32 %v14309_v37, %v20603_v44 }
 0xda5   : > { %22783 = vst [vmem:[#allocation20_spill] sm:$0xff] %v20772_v24  ;;  %v14311_v53 = vpop.f32.mrf.mxu0 }
 0xda6   : > { %v20777_v18 = vpop.f32.mrf.mxu1  ;;  %v14312_v14 = vadd.f32 %v14311_v53, %v14310_v16 }
 0xda7   : > { %22784 = vst [vmem:[#allocation21_spill] sm:$0xff] %v20777_v18  ;;  %v14313_v2 = vpop.f32.mrf.mxu0 }
 0xda8   : > { %v20779_v61 = vpop.f32.mrf.mxu1  ;;  %v20782_v1 = vadd.f32 %v14312_v14, %v20606_v25 }
 0xda9   : > { %22785 = vst [vmem:[#allocation22_spill] sm:$0xff] %v20779_v61  ;;  %v14314_v49 = vpop.f32.mrf.mxu0 }
 0xdaa   : > { %22786 = vst [vmem:[#allocation11_spill] sm:$0xff] %v20782_v1  ;;  %v20784_v54 = vpop.f32.mrf.mxu1  ;;  %v14315_v10 = vadd.f32 %v14314_v49, %v14313_v2 }
 0xdab   : > { %22787 = vst [vmem:[#allocation27_spill] sm:$0xff] %v20784_v54  ;;  %v14316_v47 = vpop.f32.mrf.mxu0 }
 0xdac   : > { %v20786_v55 = vpop.f32.mrf.mxu1  ;;  %v20789_v44 = vadd.f32 %v14315_v10, %v20612_v7 }
 0xdad   : > { %22788 = vst [vmem:[#allocation25_spill] sm:$0xff] %v20786_v55  ;;  %v14317_v37 = vpop.f32.mrf.mxu0 }
 0xdae   : > { %22789 = vst [vmem:[#allocation26_spill] sm:$0xff] %v20789_v44  ;;  %v20791_v24 = vpop.f32.mrf.mxu1  ;;  %v14318_v16 = vadd.f32 %v14317_v37, %v14316_v47 }
 0xdaf   : > { %22790 = vst [vmem:[#allocation24_spill] sm:$0xff] %v20791_v24  ;;  %v14319_v53 = vpop.f32.mrf.mxu0 }
 0xdb0   : > { %v20793_v18 = vpop.f32.mrf.mxu1  ;;  %v20796_v25 = vadd.f32 %v14318_v16, %v20615_v48 }
 0xdb1   : > { %22791 = vst [vmem:[#allocation8_spill] sm:$0xff] %v20793_v18  ;;  %v14320_v14 = vpop.f32.mrf.mxu0 }
 0xdb2   : > { %22792 = vst [vmem:[#allocation19_spill] sm:$0xff] %v20796_v25  ;;  %v14437_v1 = vpop.f32.mrf.mxu1  ;;  %v14321_v54 = vadd.f32 %v14320_v14, %v14319_v53 }
 0xdb3   : > { %v14322_v2 = vpop.f32.mrf.mxu0 }
 0xdb4   : > { %v14438_v49 = vpop.f32.mrf.mxu1  ;;  %v20799_v55 = vadd.f32 %v14321_v54, %v20620_v59 }
 0xdb5   : > { %v14439_v7 = vadd.f32 %v14438_v49, %v14437_v1  ;;  %v14323_v10 = vpop.f32.mrf.mxu0 }
 0xdb6   : > { %22793 = vst [vmem:[#allocation16_spill] sm:$0xff] %v20799_v55  ;;  %v20801_v44 = vpop.f32.mrf.mxu1  ;;  %v14324_v24 = vadd.f32 %v14323_v10, %v14322_v2 }
 0xdb7   : > { %v14325_v47 = vpop.f32.mrf.mxu0 }
 0xdb8   : > { %v20803_v37 = vpop.f32.mrf.mxu1  ;;  %v20806_v18 = vadd.f32 %v14324_v24, %v20623_v29 }
 0xdb9   : > { %22794 = vst [vmem:[#allocation30_spill] sm:$0xff] %v20803_v37  ;;  %v14326_v48 = vpop.f32.mrf.mxu0 }
 0xdba   : > { %22795 = vst [vmem:[#allocation31_spill] sm:$0xff] %v20806_v18  ;;  %v14443_v16 = vpop.f32.mrf.mxu1  ;;  %v14327_v25 = vadd.f32 %v14326_v48, %v14325_v47 }
 0xdbb   : > { %v14328_v53 = vpop.f32.mrf.mxu0 }
 0xdbc   : > { %v14444_v14 = vpop.f32.mrf.mxu1  ;;  %v10778_v61 = vadd.f32 %v14327_v25, %v20628_v4 }
 0xdbd   : > { %v14445_v59 = vadd.f32 %v14444_v14, %v14443_v16  ;;  %v14329_v54 = vpop.f32.mrf.mxu0 }
 0xdbe   : > { %v20809_v1 = vpop.f32.mrf.mxu1  ;;  %v14330_v49 = vadd.f32 %v14329_v54, %v14328_v53  ;;  %v20811_v55 = vadd.f32 %v14439_v7, %v10778_v61 }
 0xdbf   : > { %v14331_v2 = vpop.f32.mrf.mxu0 }
 0xdc0   : > { %v20813_v10 = vpop.f32.mrf.mxu1  ;;  %v20816_v29 = vadd.f32 %v14330_v49, %v20631_v56 }
 0xdc1   : > { %22796 = vst [vmem:[#allocation29_spill] sm:$0xff] %v20813_v10  ;;  %v14332_v24 = vpop.f32.mrf.mxu0 }
 0xdc2   : > { %v20818_v18 = vpop.f32.mrf.mxu1  ;;  %v14333_v47 = vadd.f32 %v14332_v24, %v14331_v2 }
 0xdc3   : > { %22797 = vst [vmem:[#allocation28_spill] sm:$0xff] %v20818_v18  ;;  %v14334_v48 = vpop.f32.mrf.mxu0 }
 0xdc4   : > { %v20820_v37 = vpop.f32.mrf.mxu1  ;;  %v10786_v4 = vadd.f32 %v14333_v47, %v20636_v5 }
 0xdc5   : > { %22798 = vst [vmem:[#allocation35_spill] sm:$0xff] %v20820_v37  ;;  %v14335_v25 = vpop.f32.mrf.mxu0 }
 0xdc6   : > { %v20823_v16 = vpop.f32.mrf.mxu1  ;;  %v14336_v61 = vadd.f32 %v14335_v25, %v14334_v48  ;;  %v20825_v7 = vadd.f32 %v14445_v59, %v10786_v4 }
 0xdc7   : > { %v14337_v53 = vpop.f32.mrf.mxu0 }
 0xdc8   : > { %22799 = vst [vmem:[#allocation36_spill] sm:$0xff] %v20825_v7  ;;  %v20827_v14 = vpop.f32.mrf.mxu1  ;;  %v20830_v56 = vadd.f32 %v14336_v61, %v20639_v20 }
 0xdc9   : > { %v14338_v54 = vpop.f32.mrf.mxu0 }
 0xdca   : > { %22800 = vst [vmem:[#allocation34_spill] sm:$0xff] %v20830_v56  ;;  %v14455_v49 = vpop.f32.mrf.mxu1  ;;  %v14339_v2 = vadd.f32 %v14338_v54, %v14337_v53 }
 0xdcb   : > { %v14340_v24 = vpop.f32.mrf.mxu0 }
 0xdcc   : > { %v14456_v18 = vpop.f32.mrf.mxu1  ;;  %v20833_v37 = vadd.f32 %v14339_v2, %v20644_v51 }
 0xdcd   : > { %v14457_v5 = vadd.f32 %v14456_v18, %v14455_v49  ;;  %v14341_v47 = vpop.f32.mrf.mxu0 }
 0xdce   : > { %22801 = vst [vmem:[#allocation33_spill] sm:$0xff] %v20833_v37  ;;  %v20835_v10 = vpop.f32.mrf.mxu1  ;;  %v14342_v59 = vadd.f32 %v14341_v47, %v14340_v24 }
 0xdcf   : > { %22802 = vst [vmem:[#allocation40_spill] sm:$0xff] %v20835_v10  ;;  %v14343_v48 = vpop.f32.mrf.mxu0 }
 0xdd0   : > { %v20837_v4 = vpop.f32.mrf.mxu1  ;;  %v20840_v25 = vadd.f32 %v14342_v59, %v20647_v21 }
 0xdd1   : > { %22803 = vst [vmem:[#allocation38_spill] sm:$0xff] %v20837_v4  ;;  %v14344_v20 = vpop.f32.mrf.mxu0 }
 0xdd2   : > { %v14461_v61 = vpop.f32.mrf.mxu1  ;;  %v14345_v7 = vadd.f32 %v14344_v20, %v14343_v48 }
 0xdd3   : > { %v14346_v53 = vpop.f32.mrf.mxu0 }
 0xdd4   : > { %v14462_v54 = vpop.f32.mrf.mxu1  ;;  %v10802_v56 = vadd.f32 %v14345_v7, %v20652_v27 }
 0xdd5   : > { %v14463_v51 = vadd.f32 %v14462_v54, %v14461_v61  ;;  %v14347_v2 = vpop.f32.mrf.mxu0 }
 0xdd6   : > { %v20843_v18 = vpop.f32.mrf.mxu1  ;;  %v14348_v49 = vadd.f32 %v14347_v2, %v14346_v53  ;;  %v20845_v10 = vadd.f32 %v14457_v5, %v10802_v56 }
 0xdd7   : > { %v14349_v24 = vpop.f32.mrf.mxu0 }
 0xdd8   : > { %22804 = vst [vmem:[#allocation37_spill] sm:$0xff] %v20845_v10  ;;  %v20847_v47 = vpop.f32.mrf.mxu1  ;;  %v20850_v21 = vadd.f32 %v14348_v49, %v20655_v46 }
 0xdd9   : > { %v14350_v59 = vpop.f32.mrf.mxu0 }
 0xdda   : > { %v20852_v4 = vpop.f32.mrf.mxu1  ;;  %v14351_v48 = vadd.f32 %v14350_v59, %v14349_v24 }
 0xddb   : > { %v14352_v20 = vpop.f32.mrf.mxu0 }
 0xddc   : > { %v20854_v37 = vpop.f32.mrf.mxu1  ;;  %v10810_v27 = vadd.f32 %v14351_v48, %v20660_v36 }
 0xddd   : > { %22805 = vst [vmem:[#allocation39_spill] sm:$0xff] %v20854_v37  ;;  %v14353_v7 = vpop.f32.mrf.mxu0 }
 0xdde   : > { %v20857_v61 = vpop.f32.mrf.mxu1  ;;  %v14354_v56 = vadd.f32 %v14353_v7, %v14352_v20  ;;  %v20859_v5 = vadd.f32 %v14463_v51, %v10810_v27 }
 0xddf   : > { %22806 = vst [vmem:[#allocation49_spill] sm:$0xff] %v20857_v61  ;;  %v14355_v53 = vpop.f32.mrf.mxu0 }
 0xde0   : > { %22807 = vst [vmem:[#allocation45_spill] sm:$0xff] %v20859_v5  ;;  %v20861_v54 = vpop.f32.mrf.mxu1  ;;  %v20864_v46 = vadd.f32 %v14354_v56, %v20663_v34 }
 0xde1   : > { %22808 = vst [vmem:[#allocation44_spill] sm:$0xff] %v20861_v54  ;;  %v14356_v2 = vpop.f32.mrf.mxu0 }
 0xde2   : > { %v14473_v49 = vpop.f32.mrf.mxu1  ;;  %v14357_v24 = vadd.f32 %v14356_v2, %v14355_v53 }
 0xde3   : > { %v14358_v59 = vpop.f32.mrf.mxu0 }
 0xde4   : > { %v14474_v10 = vpop.f32.mrf.mxu1  ;;  %v20867_v37 = vadd.f32 %v14357_v24, %v20668_v43  ;;  %v14394_v43 = vadd.f32 %v20695_v31, %v20691_v9 }
 0xde5   : > { %v14475_v36 = vadd.f32 %v14474_v10, %v14473_v49  ;;  %v14359_v48 = vpop.f32.mrf.mxu0 }
 0xde6   : > { %v14360_v61 = vadd.f32 %v14359_v48, %v14358_v59  ;;  %v10880_v24 = vadd.f32 %v14394_v43, %v20712_v40  ;;  %v14406_v40 = vadd.f32 %v20723_v63, %v20721_v52  ;;  %v14400_v52 = vadd.f32 %v20709_v6, %v20707_v35 }
 0xde7   : > { %v14361_v20 = vpop.f32.mrf.mxu0 }
 0xde8   : > { %v20870_v51 = vadd.f32 %v14360_v61, %v20674_v28  ;;  %v14388_v28 = vadd.f32 %v20681_v8, %v20677_v39  ;;  %v14391_v39 = vadd.f32 %v20688_v19, %v20684_v42 }
 0xde9   : > { %v14362_v27 = vpop.f32.mrf.mxu0 }
 0xdea   : > { %v14363_v7 = vadd.f32 %v14362_v27, %v14361_v20  ;;  %v10872_v9 = vadd.f32 %v14388_v28, %v20698_v0 }
 0xdeb   : > { %v14364_v5 = vpop.f32.mrf.mxu0 }
 0xdec   : > { %v10826_v34 = vadd.f32 %v14363_v7, %v20679_v38  ;;  %v14397_v38 = vadd.f32 %v20702_v62, %v20700_v58 }
 0xded   : > { %v14365_v56 = vpop.f32.mrf.mxu0 }
 0xdee   : > { %v14366_v54 = vadd.f32 %v14365_v56, %v14364_v5  ;;  %v20873_v53 = vadd.f32 %v14475_v36, %v10826_v34  ;;  %v10883_v48 = vadd.f32 %v14397_v38, %v20719_v33  ;;  %v10896_v56 = vadd.f32 %v14406_v40, %v20740_v60 }
 0xdef   : > { %v14367_v2 = vpop.f32.mrf.mxu0  ;;  %v10888_v60 = vadd.f32 %v14400_v52, %v20726_v17  ;;  %v14409_v40 = vadd.f32 %v20730_v3, %v20728_v15  ;;  %v22058_v3 = vmov 1  }
 0xdf0   : > { %v20878_v10 = vadd.f32 %v14366_v54, %v20686_v26 }
 0xdf1   : > { %v14368_v49 = vpop.f32.mrf.mxu0 }
 0xdf2   : > { %v14369_v61 = vadd.f32 %v14368_v49, %v14367_v2 }
 0xdf3   : > { %v14874_v59 = vpop.f32.mrf.mxu0 }
 0xdf4   : > { %v20886_v5 = vadd.f32 %v14369_v61, %v20693_v11  ;;  %v11041_v36 = vadd.f32 %v14874_v59, %v10880_v24  ;;  %v10875_v11 = vadd.f32 %v14391_v39, %v20705_v22 }
 0xdf5   : > { %v11032_v31 = vpop.f32.mrf.mxu0 }
 0xdf6   : > { %v11161_v26 = vmax.f32 %v11041_v36, 0.0  ;;  %v11033_v54 = vadd.f32 %v11032_v31, %v10872_v9 }
 0xdf7   : > { %v14875_v8 = vpop.f32.mrf.mxu0 }
 0xdf8   : > { %v14922_v20 = vcvt.f32.s32 %v11161_v26  ;;  %v11159_v58 = vmax.f32 %v11033_v54, 0.0  ;;  %v11044_v62 = vadd.f32 %v14875_v8, %v10883_v48  ;;  %v14920_v19 = vand.u32 2147483647, %v11161_v26 }
 0xdf9   : > { %v11035_v27 = vpop.f32.mrf.mxu0  ;;  %v14925_v63 = vand.u32 2147483648, %v11161_v26 }
 0xdfa   : > { %v14923_v7 = vcvt.s32.f32 %v14922_v20  ;;  %v14906_v0 = vcvt.f32.s32 %v11159_v58  ;;  %v11162_v34 = vmax.f32 %v11044_v62, 0.0  ;;  %v11036_v2 = vadd.f32 %v11035_v27, %v10875_v11 }
 0xdfb   : > { %v14878_v33 = vpop.f32.mrf.mxu0  ;;  %v14904_v24 = vand.u32 2147483647, %v11159_v58  ;;  %v14909_v38 = vand.u32 2147483648, %v11159_v58  ;;  %vm14921_vm6 = vcmp.lt.f32.partialorder %v14920_v19, 8388608.0 }
 0xdfc   : > { %v14907_v43 = vcvt.s32.f32 %v14906_v0  ;;  %v14930_v49 = vcvt.f32.s32 %v11162_v34  ;;  %v11057_v42 = vadd.f32 %v14878_v33, %v10896_v56  ;;  %v20898_v28 = vmax.f32 %v11036_v2, 0.0 }
 0xdfd   : > { %v11048_v61 = vpop.f32.mrf.mxu0  ;;  %v14924_v22 = vand.u32 2147483647, %v14923_v7  ;;  %vm14905_vm4 = vcmp.lt.f32.partialorder %v14904_v24, 8388608.0  ;;  %v10899_v7 = vadd.f32 %v14409_v40, %v20747_v57  ;;  %v14928_v2 = vand.u32 2147483647, %v11162_v34 }
 0xdfe   : > { %v14908_v59 = vand.u32 2147483647, %v14907_v43  ;;  %v14931_v36 = vcvt.s32.f32 %v14930_v49  ;;  %v14914_v54 = vcvt.f32.s32 %v20898_v28  ;;  %v20902_v48 = vmax.f32 %v11057_v42, 0.0 }
 0xdff   : > { %v14879_v9 = vpop.f32.mrf.mxu0  ;;  %v14926_v31 = vor.u32 %v14925_v63, %v14924_v22  ;;  %v11049_v39 = vadd.f32 %v11048_v61, %v10888_v60  ;;  %v14917_v19 = vand.u32 2147483648, %v20898_v28  ;;  %vm14929_vm3 = vcmp.lt.f32.partialorder %v14928_v2, 8388608.0 }
 0xe00   : > { %v14910_v8 = vor.u32 %v14909_v38, %v14908_v59  ;;  %v14932_v62 = vand.u32 2147483647, %v14931_v36  ;;  %v14915_v11 = vcvt.s32.f32 %v14914_v54  ;;  %v14954_v27 = vcvt.f32.s32 %v20902_v48 }
 0xe01   : > { %v11051_v35 = vpop.f32.mrf.mxu0  ;;  %v20904_v6 = vsel %vm14921_vm6, %v14926_v31, %v11161_v26  ;;  %v14933_v26 = vand.u32 2147483648, %v11162_v34  ;;  %v20914_v0 = vmax.f32 %v11049_v39, 0.0  ;;  %v11060_v15 = vadd.f32 %v14879_v9, %v10899_v7 }
 0xe02   : > { %11268 = vperm.xlu1 %15200, %v20904_v6   ;;  %v20909_v17 = vsel %vm14905_vm4, %v14910_v8, %v11159_v58  ;;  %v14955_v43 = vcvt.s32.f32 %v14954_v27  ;;  %v14916_v57 = vand.u32 2147483647, %v14915_v11  ;;  %v22809_v63 = vmov 0  }
 0xe03   : > { %v14882_v20 = vpop.f32.mrf.mxu0  ;;  %11258 = vperm.xlu0 %15202, %v20909_v17   ;;  %v14934_v33 = vor.u32 %v14933_v26, %v14932_v62  ;;  %v14938_v49 = vcvt.f32.s32 %v20914_v0  ;;  %v20928_v52 = vmax.f32 %v11060_v15, 0.0  ;;  %v14912_v24 = vand.u32 2147483647, %v20898_v28 }
 0xe04   : > { %v14403_v59 = vadd.f32 %v20716_v12, %v20714_v41  ;;  %v14918_v38 = vor.u32 %v14917_v19, %v14916_v57  ;;  %v14956_v36 = vand.u32 2147483647, %v14955_v43  ;;  %v14957_v31 = vand.u32 2147483648, %v20902_v48 }
 0xe05   : > { %v20916_v56 = vpop.f32.mrf.mxu0  ;;  %v20933_v22 = vsel %vm14929_vm3, %v14934_v33, %v11162_v34  ;;  %v14939_v60 = vcvt.s32.f32 %v14938_v49  ;;  %v14962_v54 = vcvt.f32.s32 %v20928_v52  ;;  %vm14913_vm1 = vcmp.lt.f32.partialorder %v14912_v24, 8388608.0 }
 0xe06   : > { %15201 = vset.pattern.permute.xlu1 %v22058_v3  ;;  %v10891_v34 = vadd.f32 %v14403_v59, %v20733_v13  ;;  %v14952_v41 = vand.u32 2147483647, %v20902_v48  ;;  %v20950_v8 = vsel %vm14913_vm1, %v14918_v38, %v20898_v28  ;;  %v14958_v40 = vor.u32 %v14957_v31, %v14956_v36  ;;  %v22810_v36 = vld [vmem:[#allocation13_spill] sm:$0xff] }
 0xe07   : > { %11572 = vperm.xlu1 %15201, %v20904_v6   ;;  %v20920_v58 = vpop.f32.mrf.mxu0  ;;  %15203 = vset.pattern.permute.xlu0 %v22058_v3  ;;  %v14418_v62 = vadd.f32 %v20751_v32, %v20749_v45  ;;  %v14940_v11 = vand.u32 2147483647, %v14939_v60  ;;  %v14963_v27 = vcvt.s32.f32 %v14962_v54  ;;  %v14936_v32 = vand.u32 2147483647, %v20914_v0  ;;  %v22811_v60 = vld [vmem:[#allocation64_spill] sm:$0xff] }
 0xe08   : > { %11564 = vperm.xlu0 %15203, %v20909_v17   ;;  %v11052_v12 = vadd.f32 %v11051_v35, %v10891_v34  ;;  %v14941_v35 = vand.u32 2147483648, %v20914_v0  ;;  %vm14953_vm7 = vcmp.lt.f32.partialorder %v14952_v41, 8388608.0  ;;  %v14965_v49 = vand.u32 2147483648, %v20928_v52 }
 0xe09   : > { %v20925_v42 = vpop.f32.mrf.mxu0  ;;  %v10912_v7 = vadd.f32 %v14418_v62, %v20768_v23  ;;  %v14959_v45 = vsel %vm14953_vm7, %v14958_v40, %v20902_v48  ;;  %v14964_v43 = vand.u32 2147483647, %v14963_v27  ;;  %vm14937_vm2 = vcmp.lt.f32.partialorder %v14936_v32, 8388608.0  ;;  %v22813_v27 = vld [vmem:[#allocation69_spill] sm:$0xff] }
 0xe0a   : > { %v11164_v26 = vmax.f32 %v11052_v12, 0.0  ;;  %v14942_v33 = vor.u32 %v14941_v35, %v14940_v11  ;;  %v22060_v24 = vmov 2   ;;  %v14412_v31 = vadd.f32 %v22811_v60, %v22810_v36  ;;  %v22812_v12 = vld [vmem:[#allocation68_spill] sm:$0xff] }
 0xe0b   : > { %15204 = vset.pattern.permute.xlu1 %v22809_v63  ;;  %v20931_v61 = vpop.f32.mrf.mxu0  ;;  %v11073_v15 = vadd.f32 %v14882_v20, %v10912_v7  ;;  %v14960_v20 = vand.u32 2147483647, %v20928_v52  ;;  %v14966_v38 = vor.u32 %v14965_v49, %v14964_v43  ;;  %v22056_v62 = vmov 3   ;;  %v22814_v49 = vld [vmem:[#allocation14_spill] sm:$0xff] }
 0xe0c   : > { %11273 = vperm.xlu1 %15204, %v20933_v22   ;;  %11576 = vperm.xlu0 %15203, %v20933_v22   ;;  %v14946_v23 = vcvt.f32.s32 %v11164_v26  ;;  %v20972_v59 = vsel %vm14937_vm2, %v14942_v33, %v20914_v0  ;;  %v10904_v40 = vadd.f32 %v14412_v31, %v22812_v12  ;;  %v14949_v32 = vand.u32 2147483648, %v11164_v26 }
 0xe0d   : > { %v20940_v9 = vpop.f32.mrf.mxu0  ;;  %v11169_v19 = vmax.f32 %v11073_v15, 0.0  ;;  %vm14961_vm9 = vcmp.lt.f32.partialorder %v14960_v20, 8388608.0  ;;  %v14944_v43 = vand.u32 2147483647, %v11164_v26 }
 0xe0e   : > { %v14947_v34 = vcvt.s32.f32 %v14946_v23  ;;  %v14967_v0 = vsel %vm14961_vm9, %v14966_v38, %v20928_v52  ;;  %v11065_v11 = vadd.f32 %v20916_v56, %v10904_v40  ;;  %v22815_v52 = vld [vmem:[#allocation67_spill] sm:$0xff] }
 0xe0f   : > { %v20945_v39 = vpop.f32.mrf.mxu0  ;;  %v14986_v41 = vcvt.f32.s32 %v11169_v19  ;;  %v14415_v23 = vadd.f32 %v22815_v52, %v22814_v49  ;;  %v14989_v38 = vand.u32 2147483648, %v11169_v19  ;;  %vm14945_vm0 = vcmp.lt.f32.partialorder %v14944_v43, 8388608.0  ;;  %v22822_v49 = vld [vmem:[#allocation11_spill] sm:$0xff] }
 0xe10   : > { %15206 = vset.pattern.permute.xlu1 %v22058_v3  ;;  %15205 = vset.pattern.permute.xlu0 %v22809_v63  ;;  %v14948_v35 = vand.u32 2147483647, %v14947_v34  ;;  %v11167_v33 = vmax.f32 %v11065_v11, 0.0  ;;  %v22817_v34 = vld [vmem:[#allocation21_spill] sm:$0xff] }
 0xe11   : > { %11568 = vperm.xlu1 %15206, %v20950_v8   ;;  %v20956_v13 = vpop.f32.mrf.mxu0  ;;  %11263 = vperm.xlu0 %15205, %v20950_v8   ;;  %v14987_v7 = vcvt.s32.f32 %v14986_v41  ;;  %v22818_v41 = vld [vmem:[#allocation22_spill] sm:$0xff] }
 0xe12   : > { %v14430_v12 = vadd.f32 %v22818_v41, %v22817_v34 }
 0xe13   : > { %v20961_v28 = vpop.f32.mrf.mxu0 }
 0xe15   : > { %11588 = vperm.xlu1 %15206, %v14959_v45   ;;  %v20965_v2 = vpop.f32.mrf.mxu0  ;;  %11288 = vperm.xlu0 %15205, %v14959_v45  }
 0xe17   : > { %v20967_v57 = vpop.f32.mrf.mxu0 }
 0xe19   : > { %15207 = vset.pattern.permute.xlu1 %v22060_v24  ;;  %v11099_v48 = vpop.f32.mrf.mxu0  ;;  %11278 = vperm.xlu0 %15205, %v20972_v59  }
 0xe1a   : > { %11864 = vperm.xlu1 %15207, %v14959_v45   ;;  %v20979_v54 = vadd.f32 %v11099_v48, %v20811_v55  ;;  %v14421_v55 = vadd.f32 %v20758_v30, %v22813_v27  ;;  %v14950_v30 = vor.u32 %v14949_v32, %v14948_v35  ;;  %v22816_v48 = vld [vmem:[#allocation10_spill] sm:$0xff]  ;;  %v22819_v27 = vld [vmem:[#allocation19_spill] sm:$0xff] }
 0xe1b   : > { %v10907_v20 = vadd.f32 %v14415_v23, %v22816_v48  ;;  %v22821_v32 = vld [vmem:[#allocation71_spill] sm:$0xff] }
 0xe1c   : > { %v10915_v15 = vadd.f32 %v14421_v55, %v20775_v50  ;;  %v14970_v50 = vcvt.f32.s32 %v11167_v33  ;;  %v20999_v31 = vsel %vm14945_vm0, %v14950_v30, %v11164_v26  ;;  %v10928_v55 = vadd.f32 %v14430_v12, %v22819_v27 }
 0xe1d   : > { %15211 = vset.pattern.permute.xlu0 %v22058_v3  ;;  %v11068_v60 = vadd.f32 %v20925_v42, %v10907_v20  ;;  %v22820_v42 = vld [vmem:[#allocation70_spill] sm:$0xff] }
 0xe1e   : > { %15208 = vset.pattern.permute.xlu1 %v22056_v62  ;;  %11592 = vperm.xlu0 %15211, %v14967_v0   ;;  %v11076_v56 = vadd.f32 %v20920_v58, %v10915_v15  ;;  %v14984_v58 = vand.u32 2147483647, %v11169_v19  ;;  %v14971_v11 = vcvt.s32.f32 %v14970_v50  ;;  %v14424_v15 = vadd.f32 %v22821_v32, %v22820_v42  ;;  %v22824_v50 = vld [vmem:[#allocation20_spill] sm:$0xff] }
 0xe1f   : > { %12140 = vperm.xlu1 %15208, %v14959_v45   ;;  %v14988_v45 = vand.u32 2147483647, %v14987_v7  ;;  %v11168_v7 = vmax.f32 %v11068_v60, 0.0  ;;  %v11089_v26 = vadd.f32 %v20931_v61, %v10928_v55  ;;  %v14968_v61 = vand.u32 2147483647, %v11167_v33 }
 0xe20   : > { %v11170_v36 = vmax.f32 %v11076_v56, 0.0  ;;  %vm14985_vm13 = vcmp.lt.f32.partialorder %v14984_v58, 8388608.0  ;;  %v10920_v52 = vadd.f32 %v14424_v15, %v22822_v49  ;;  %v14972_v23 = vand.u32 2147483647, %v14971_v11  ;;  %v22825_v58 = vld [vmem:[#allocation26_spill] sm:$0xff] }
 0xe21   : > { %v14990_v40 = vor.u32 %v14989_v38, %v14988_v45  ;;  %v14978_v30 = vcvt.f32.s32 %v11168_v7  ;;  %v14973_v45 = vand.u32 2147483648, %v11167_v33  ;;  %v11173_v48 = vmax.f32 %v11089_v26, 0.0  ;;  %v22823_v38 = vld [vmem:[#allocation23_spill] sm:$0xff] }
 0xe22   : > { %15212 = vset.pattern.permute.xlu0 %v22060_v24  ;;  %v14994_v35 = vcvt.f32.s32 %v11170_v36  ;;  %v11081_v20 = vadd.f32 %v20940_v9, %v10920_v52  ;;  %v14427_v60 = vadd.f32 %v22824_v50, %v22823_v38  ;;  %v14997_v11 = vand.u32 2147483648, %v11170_v36  ;;  %v22826_v52 = vld [vmem:[#allocation30_spill] sm:$0xff] }
 0xe23   : > { %15209 = vset.pattern.permute.xlu1 %v22058_v3  ;;  %11868 = vperm.xlu0 %15212, %v14967_v0   ;;  %v14991_v43 = vsel %vm14985_vm13, %v14990_v40, %v11169_v19  ;;  %v14974_v19 = vor.u32 %v14973_v45, %v14972_v23  ;;  %v15018_v12 = vcvt.f32.s32 %v11173_v48  ;;  %vm14969_vm14 = vcmp.lt.f32.partialorder %v14968_v61, 8388608.0 }
 0xe24   : > { %11580 = vperm.xlu1 %15209, %v20972_v59   ;;  %v14995_v56 = vcvt.s32.f32 %v14994_v35  ;;  %v10923_v34 = vadd.f32 %v14427_v60, %v22825_v58  ;;  %v11171_v40 = vmax.f32 %v11081_v20, 0.0  ;;  %v14992_v55 = vand.u32 2147483647, %v11170_v36 }
 0xe25   : > { %v21021_v27 = vsel %vm14969_vm14, %v14974_v19, %v11167_v33  ;;  %v15019_v32 = vcvt.s32.f32 %v15018_v12  ;;  %v14981_v26 = vand.u32 2147483648, %v11168_v7  ;;  %v14442_v23 = vadd.f32 %v22826_v52, %v20801_v44  ;;  %v22828_v12 = vld [vmem:[#allocation8_spill] sm:$0xff] }
 0xe26   : > { %v14996_v41 = vand.u32 2147483647, %v14995_v56  ;;  %v11084_v9 = vadd.f32 %v20956_v13, %v10923_v34  ;;  %v15002_v15 = vcvt.f32.s32 %v11171_v40  ;;  %vm14993_vm12 = vcmp.lt.f32.partialorder %v14992_v55, 8388608.0 }
 0xe27   : > { %15215 = vset.pattern.permute.xlu0 %v22058_v3  ;;  %v14976_v13 = vand.u32 2147483647, %v11168_v7  ;;  %v15020_v45 = vand.u32 2147483647, %v15019_v32  ;;  %v10944_v38 = vadd.f32 %v14442_v23, %v20816_v29  ;;  %v15021_v50 = vand.u32 2147483648, %v11173_v48 }
 0xe28   : > { %15210 = vset.pattern.permute.xlu1 %v22809_v63  ;;  %11584 = vperm.xlu0 %15215, %v20999_v31   ;;  %v14998_v35 = vor.u32 %v14997_v11, %v14996_v41  ;;  %v11172_v49 = vmax.f32 %v11084_v9, 0.0  ;;  %v15016_v61 = vand.u32 2147483647, %v11173_v48  ;;  %v15005_v58 = vand.u32 2147483648, %v11171_v40 }
 0xe29   : > { %11293 = vperm.xlu1 %15210, %v14967_v0   ;;  %vm14977_vm15 = vcmp.lt.f32.partialorder %v14976_v13, 8388608.0  ;;  %v11105_v60 = vadd.f32 %v20961_v28, %v10944_v38  ;;  %v15000_v41 = vand.u32 2147483647, %v11171_v40 }
 0xe2a   : > { %v21029_v33 = vsel %vm14993_vm12, %v14998_v35, %v11170_v36  ;;  %v15010_v20 = vcvt.f32.s32 %v11172_v49  ;;  %v15022_v36 = vor.u32 %v15021_v50, %v15020_v45  ;;  %vm15017_vm5 = vcmp.lt.f32.partialorder %v15016_v61, 8388608.0  ;;  %v22829_v35 = vld [vmem:[#allocation31_spill] sm:$0xff] }
 0xe2b   : > { %v11177_v34 = vmax.f32 %v11105_v60, 0.0  ;;  %vm15001_vm10 = vcmp.lt.f32.partialorder %v15000_v41, 8388608.0  ;;  %v22831_v41 = vld [vmem:[#allocation34_spill] sm:$0xff] }
 0xe2c   : > { %15217 = vset.pattern.permute.xlu0 %v22809_v63  ;;  %v21039_v29 = vsel %vm15017_vm5, %v15022_v36, %v11173_v48  ;;  %v15008_v48 = vand.u32 2147483647, %v11172_v49 }
 0xe2d   : > { %15213 = vset.pattern.permute.xlu1 %v22056_v62  ;;  %11308 = vperm.xlu0 %15217, %v14991_v43   ;;  %v15050_v55 = vcvt.f32.s32 %v11177_v34  ;;  %v15048_v38 = vand.u32 2147483647, %v11177_v34 }
 0xe2e   : > { %12144 = vperm.xlu1 %15213, %v14967_v0   ;;  %v14979_v0 = vcvt.s32.f32 %v14978_v30  ;;  %v15003_v30 = vcvt.s32.f32 %v15002_v15  ;;  %vm15009_vm8 = vcmp.lt.f32.partialorder %v15008_v48, 8388608.0 }
 0xe2f   : > { %v15051_v13 = vcvt.s32.f32 %v15050_v55  ;;  %vm15049_vm11 = vcmp.lt.f32.partialorder %v15048_v38, 8388608.0  ;;  %v22832_v55 = vld [vmem:[#allocation28_spill] sm:$0xff] }
 0xe30   : > { %v14980_v42 = vand.u32 2147483647, %v14979_v0  ;;  %v15004_v19 = vand.u32 2147483647, %v15003_v30  ;;  %v15011_v0 = vcvt.s32.f32 %v15010_v20  ;;  %v15053_v30 = vand.u32 2147483648, %v11177_v34 }
 0xe31   : > { %15219 = vset.pattern.permute.xlu0 %v22060_v24 }
 0xe32   : > { %15214 = vset.pattern.permute.xlu1 %v22809_v63  ;;  %11880 = vperm.xlu0 %15219, %v14991_v43   ;;  %v14982_v56 = vor.u32 %v14981_v26, %v14980_v42  ;;  %v15006_v28 = vor.u32 %v15005_v58, %v15004_v19  ;;  %v15012_v9 = vand.u32 2147483647, %v15011_v0 }
 0xe33   : > { %11283 = vperm.xlu1 %15214, %v20999_v31  }
 0xe34   : > { %v21034_v44 = vsel %vm14977_vm15, %v14982_v56, %v11168_v7  ;;  %v22827_v7 = vld [vmem:[#allocation24_spill] sm:$0xff]  ;;  %v21047_v32 = vsel %vm15001_vm10, %v15006_v28, %v11171_v40  ;;  %v14454_v40 = vadd.f32 %v20827_v14, %v20823_v16  ;;  %v14894_v56 = vpop.f32.mrf.mxu0 }
 0xe35   : > { %v14436_v11 = vadd.f32 %v22828_v12, %v22827_v7 }
 0xe36   : > { %15221 = vset.pattern.permute.xlu0 %v22809_v63  ;;  %v10960_v20 = vadd.f32 %v14454_v40, %v20840_v25  ;;  %v22830_v25 = vld [vmem:[#allocation29_spill] sm:$0xff]  ;;  %v11112_v19 = vpop.f32.mrf.mxu0 }
 0xe37   : > { %15216 = vset.pattern.permute.xlu1 %v22060_v24  ;;  %11298 = vperm.xlu0 %15221, %v21021_v27   ;;  %v10936_v42 = vadd.f32 %v14436_v11, %v22829_v35  ;;  %v14448_v61 = vadd.f32 %v22830_v25, %v20809_v1  ;;  %v22833_v35 = vld [vmem:[#allocation35_spill] sm:$0xff] }
 0xe38   : > { %11860 = vperm.xlu1 %15216, %v20999_v31   ;;  %v21079_v11 = vpop.f32.mrf.mxu0 }
 0xe39   : > { %v11097_v15 = vadd.f32 %v20965_v2, %v10936_v42  ;;  %v15052_v2 = vand.u32 2147483647, %v15051_v13  ;;  %v10952_v28 = vadd.f32 %v14448_v61, %v22831_v41  ;;  %v14451_v42 = vadd.f32 %v22833_v35, %v22832_v55  ;;  %v22835_v13 = vld [vmem:[#allocation25_spill] sm:$0xff] }
 0xe3b   : > { %15225 = vset.pattern.permute.xlu0 %v22058_v3  ;;  %v11175_v52 = vmax.f32 %v11097_v15, 0.0  ;;  %v15054_v50 = vor.u32 %v15053_v30, %v15052_v2  ;;  %v11115_v15 = vpop.f32.mrf.mxu0  ;;  %v22836_v30 = vld [vmem:[#allocation33_spill] sm:$0xff] }
 0xe3c   : > { %15218 = vset.pattern.permute.xlu1 %v22058_v3  ;;  %11608 = vperm.xlu0 %15225, %v21029_v33  }
 0xe3d   : > { %11604 = vperm.xlu1 %15218, %v14991_v43   ;;  %v15034_v45 = vcvt.f32.s32 %v11175_v52  ;;  %v21067_v60 = vsel %vm15049_vm11, %v15054_v50, %v11177_v34  ;;  %v15037_v0 = vand.u32 2147483648, %v11175_v52  ;;  %v15032_v7 = vand.u32 2147483647, %v11175_v52  ;;  %v14898_v61 = vpop.f32.mrf.mxu0 }
 0xe3e   : > { %v11113_v34 = vadd.f32 %v11112_v19, %v10952_v28 }
 0xe3f   : > { %v15035_v16 = vcvt.s32.f32 %v15034_v45  ;;  %vm15033_vm6 = vcmp.lt.f32.partialorder %v15032_v7, 8388608.0  ;;  %v10955_v45 = vadd.f32 %v14451_v42, %v22836_v30  ;;  %v11128_v35 = vpop.f32.mrf.mxu0 }
 0xe40   : > { %11600 = vperm.xlu0 %15225, %v21034_v44  }
 0xe41   : > { %15220 = vset.pattern.permute.xlu1 %v22056_v62  ;;  %v15036_v36 = vand.u32 2147483647, %v15035_v16  ;;  %v14466_v16 = vadd.f32 %v20847_v47, %v20843_v18 }
 0xe42   : > { %12156 = vperm.xlu1 %15220, %v14991_v43   ;;  %v15013_v43 = vand.u32 2147483648, %v11172_v49 }
 0xe43   : > { %v15038_v12 = vor.u32 %v15037_v0, %v15036_v36  ;;  %v10976_v36 = vadd.f32 %v14466_v16, %v20864_v46 }
 0xe44   : > { %15230 = vset.pattern.permute.xlu0 %v22809_v63  ;;  %v15014_v26 = vor.u32 %v15013_v43, %v15012_v9  ;;  %v11179_v9 = vmax.f32 %v11113_v34, 0.0  ;;  %v22838_v34 = vld [vmem:[#allocation40_spill] sm:$0xff] }
 0xe45   : > { %11328 = vperm.xlu0 %15230, %v21039_v29   ;;  %v21082_v43 = vsel %vm15033_vm6, %v15038_v12, %v11175_v52  ;;  %v22839_v12 = vld [vmem:[#allocation38_spill] sm:$0xff] }
 0xe46   : > { %15222 = vset.pattern.permute.xlu1 %v22058_v3  ;;  %v21054_v23 = vsel %vm15009_vm8, %v15014_v26, %v11172_v49  ;;  %v11121_v49 = vadd.f32 %v14894_v56, %v10960_v20  ;;  %v22834_v26 = vld [vmem:[#allocation27_spill] sm:$0xff]  ;;  %v15066_v56 = vcvt.f32.s32 %v11179_v9  ;;  %v22837_v20 = vld [vmem:[#allocation16_spill] sm:$0xff]  ;;  %v15064_v46 = vand.u32 2147483647, %v11179_v9 }
 0xe47   : > { %11596 = vperm.xlu1 %15222, %v21021_v27   ;;  %v14433_v40 = vadd.f32 %v22835_v13, %v22834_v26 }
 0xe48   : > { %v11181_v14 = vmax.f32 %v11121_v49, 0.0  ;;  %v11116_v49 = vadd.f32 %v11115_v15, %v10955_v45  ;;  %v15067_v25 = vcvt.s32.f32 %v15066_v56  ;;  %vm15065_vm3 = vcmp.lt.f32.partialorder %v15064_v46, 8388608.0 }
 0xe49   : > { %11318 = vperm.xlu0 %15230, %v21047_v32   ;;  %v10931_v38 = vadd.f32 %v14433_v40, %v22837_v20 }
 0xe4a   : > { %v15082_v58 = vcvt.f32.s32 %v11181_v14  ;;  %v15085_v2 = vand.u32 2147483648, %v11181_v14  ;;  %v15080_v52 = vand.u32 2147483647, %v11181_v14  ;;  %v11180_v19 = vmax.f32 %v11116_v49, 0.0 }
 0xe4b   : > { %15223 = vset.pattern.permute.xlu1 %v22060_v24  ;;  %v15068_v47 = vand.u32 2147483647, %v15067_v25 }
 0xe4c   : > { %11872 = vperm.xlu1 %15223, %v21021_v27   ;;  %v15083_v1 = vcvt.s32.f32 %v15082_v58  ;;  %vm15081_vm4 = vcmp.lt.f32.partialorder %v15080_v52, 8388608.0  ;;  %v11137_v58 = vadd.f32 %v14898_v61, %v10976_v36  ;;  %v15074_v41 = vcvt.f32.s32 %v11180_v19  ;;  %v14899_v61 = vpop.f32.mrf.mxu0 }
 0xe4d   : > { %15241 = vset.pattern.permute.xlu0 %v22058_v3  ;;  %v15077_v56 = vand.u32 2147483648, %v11180_v19 }
 0xe4e   : > { %11616 = vperm.xlu0 %15241, %v21054_v23   ;;  %v15084_v48 = vand.u32 2147483647, %v15083_v1  ;;  %v21107_v28 = vmax.f32 %v11137_v58, 0.0  ;;  %v14460_v1 = vadd.f32 %v22839_v12, %v22838_v34  ;;  %v15075_v55 = vcvt.s32.f32 %v15074_v41 }
 0xe50   : > { %15224 = vset.pattern.permute.xlu1 %v22809_v63  ;;  %v15086_v50 = vor.u32 %v15085_v2, %v15084_v48  ;;  %v15114_v42 = vcvt.f32.s32 %v21107_v28  ;;  %v10968_v48 = vadd.f32 %v14460_v1, %v20850_v21  ;;  %v15076_v40 = vand.u32 2147483647, %v15075_v55 }
 0xe51   : > { %11313 = vperm.xlu1 %15224, %v21029_v33   ;;  %v15072_v21 = vand.u32 2147483647, %v11180_v19 }
 0xe52   : > { %15242 = vset.pattern.permute.xlu0 %v22060_v24  ;;  %v21102_v0 = vsel %vm15081_vm4, %v15086_v50, %v11181_v14  ;;  %v11129_v13 = vadd.f32 %v11128_v35, %v10968_v48  ;;  %v15115_v2 = vcvt.s32.f32 %v15114_v42  ;;  %v14476_v50 = vpop.f32.mrf.mxu1  ;;  %v22844_v48 = vld [vmem:[#allocation36_spill] sm:$0xff] }
 0xe53   : > { %11892 = vperm.xlu0 %15242, %v21054_v23   ;;  %vm15073_vm1 = vcmp.lt.f32.partialorder %v15072_v21, 8388608.0 }
 0xe54   : > { %v21123_v45 = vmax.f32 %v11129_v13, 0.0  ;;  %v15116_v49 = vand.u32 2147483647, %v15115_v2 }
 0xe55   : > { %15226 = vset.pattern.permute.xlu1 %v22060_v24 }
 0xe56   : > { %11884 = vperm.xlu1 %15226, %v21029_v33   ;;  %v15098_v25 = vcvt.f32.s32 %v21123_v45 }
 0xe57   : > { %15244 = vset.pattern.permute.xlu0 %v22809_v63 }
 0xe58   : > { %11348 = vperm.xlu0 %15244, %v21067_v60   ;;  %v15099_v34 = vcvt.s32.f32 %v15098_v25 }
 0xe5a   : > { %15227 = vset.pattern.permute.xlu1 %v22809_v63 }
 0xe5b   : > { %11303 = vperm.xlu1 %15227, %v21034_v44  }
 0xe5c   : > { %15245 = vset.pattern.permute.xlu0 %v22058_v3 }
 0xe5d   : > { %11636 = vperm.xlu0 %15245, %v21067_v60  }
 0xe5f   : > { %15228 = vset.pattern.permute.xlu1 %v22060_v24 }
 0xe60   : > { %11876 = vperm.xlu1 %15228, %v21034_v44  }
 0xe61   : > { %15246 = vset.pattern.permute.xlu0 %v22809_v63 }
 0xe62   : > { %11338 = vperm.xlu0 %15246, %v21082_v43  }
 0xe64   : > { %15229 = vset.pattern.permute.xlu1 %v22056_v62 }
 0xe65   : > { %12152 = vperm.xlu1 %15229, %v21034_v44   ;;  %v11092_v44 = vadd.f32 %v20945_v39, %v10931_v38  ;;  %v15069_v39 = vand.u32 2147483648, %v11179_v9 }
 0xe66   : > { %15247 = vset.pattern.permute.xlu0 %v22058_v3 }
 0xe67   : > { %11628 = vperm.xlu0 %15247, %v21082_v43   ;;  %v11174_v18 = vmax.f32 %v11092_v44, 0.0  ;;  %v15070_v14 = vor.u32 %v15069_v39, %v15068_v47  ;;  %v15117_v44 = vand.u32 2147483648, %v21107_v28  ;;  %v15112_v47 = vand.u32 2147483647, %v21107_v28  ;;  %v22841_v39 = vld [vmem:[#allocation39_spill] sm:$0xff] }
 0xe68   : > { %v14469_v41 = vadd.f32 %v22841_v39, %v20852_v4  ;;  %v22847_v39 = vld [vmem:[#allocation49_spill] sm:$0xff] }
 0xe69   : > { %15231 = vset.pattern.permute.xlu1 %v22058_v3  ;;  %v15026_v7 = vcvt.f32.s32 %v11174_v18  ;;  %v21118_v26 = vsel %vm15065_vm3, %v15070_v14, %v11179_v9  ;;  %v15029_v52 = vand.u32 2147483648, %v11174_v18  ;;  %v15078_v9 = vor.u32 %v15077_v56, %v15076_v40  ;;  %v14477_v14 = vpop.f32.mrf.mxu1 }
 0xe6a   : > { %11620 = vperm.xlu1 %15231, %v21039_v29   ;;  %v15024_v38 = vand.u32 2147483647, %v11174_v18  ;;  %v10979_v12 = vadd.f32 %v14469_v41, %v20867_v37  ;;  %vm15113_vm2 = vcmp.lt.f32.partialorder %v15112_v47, 8388608.0  ;;  %v14478_v35 = vadd.f32 %v14477_v14, %v14476_v50 }
 0xe6b   : > { %15252 = vset.pattern.permute.xlu0 %v22809_v63  ;;  %v15027_v15 = vcvt.s32.f32 %v15026_v7  ;;  %v21136_v58 = vsel %vm15073_vm1, %v15078_v9, %v11180_v19  ;;  %v21146_v19 = vpop.f32.mrf.mxu0  ;;  %v15100_v37 = vand.u32 2147483647, %v15099_v34 }
 0xe6c   : > { %11368 = vperm.xlu0 %15252, %v21102_v0   ;;  %vm15025_vm7 = vcmp.lt.f32.partialorder %v15024_v38, 8388608.0  ;;  %v11140_v4 = vadd.f32 %v14899_v61, %v10979_v12  ;;  %v10992_v13 = vadd.f32 %v14478_v35, %v20878_v10  ;;  %v21197_v12 = vmax.f32 %v20979_v54, 0.0 }
 0xe6d   : > { %v15028_v30 = vand.u32 2147483647, %v15027_v15  ;;  %v11108_v15 = vadd.f32 %v20967_v57, %v22844_v48 }
 0xe6e   : > { %15232 = vset.pattern.permute.xlu1 %v22060_v24  ;;  %v11186_v2 = vmax.f32 %v11140_v4, 0.0  ;;  %v15042_v54 = vcvt.f32.s32 %v21197_v12 }
 0xe6f   : > { %11896 = vperm.xlu1 %15232, %v21039_v29   ;;  %v15030_v16 = vor.u32 %v15029_v52, %v15028_v30  ;;  %v15096_v30 = vand.u32 2147483647, %v21123_v45  ;;  %v21167_v52 = vmax.f32 %v11108_v15, 0.0 }
 0xe70   : > { %15253 = vset.pattern.permute.xlu0 %v22058_v3  ;;  %v15122_v10 = vcvt.f32.s32 %v11186_v2  ;;  %v15120_v48 = vand.u32 2147483647, %v11186_v2 }
 0xe71   : > { %11652 = vperm.xlu0 %15253, %v21102_v0   ;;  %v15031_v7 = vsel %vm15025_vm7, %v15030_v16, %v11174_v18  ;;  %v14902_v18 = vpop.f32.mrf.mxu0  ;;  %vm15097_vm9 = vcmp.lt.f32.partialorder %v15096_v30, 8388608.0  ;;  %v15058_v50 = vcvt.f32.s32 %v21167_v52 }
 0xe72   : > { %v11153_v56 = vadd.f32 %v14902_v18, %v10992_v13  ;;  %v15125_v18 = vand.u32 2147483648, %v11186_v2  ;;  %vm15121_vm0 = vcmp.lt.f32.partialorder %v15120_v48, 8388608.0 }
 0xe73   : > { %15233 = vset.pattern.permute.xlu1 %v22058_v3  ;;  %v15059_v47 = vcvt.s32.f32 %v15058_v50  ;;  %v11144_v35 = vpop.f32.mrf.mxu0  ;;  %v15056_v50 = vand.u32 2147483647, %v21167_v52 }
 0xe74   : > { %11612 = vperm.xlu1 %15233, %v21047_v32   ;;  %v21174_v38 = vmax.f32 %v11153_v56, 0.0  ;;  %v15061_v56 = vand.u32 2147483648, %v21167_v52 }
 0xe75   : > { %15255 = vset.pattern.permute.xlu0 %v22809_v63  ;;  %v15060_v15 = vand.u32 2147483647, %v15059_v47  ;;  %vm15057_vm13 = vcmp.lt.f32.partialorder %v15056_v50, 8388608.0 }
 0xe76   : > { %11358 = vperm.xlu0 %15255, %v21118_v26   ;;  %v15146_v61 = vcvt.f32.s32 %v21174_v38 }
 0xe78   : > { %15234 = vset.pattern.permute.xlu1 %v22060_v24  ;;  %v15147_v4 = vcvt.s32.f32 %v15146_v61  ;;  %v15062_v61 = vor.u32 %v15061_v56, %v15060_v15 }
 0xe79   : > { %11888 = vperm.xlu1 %15234, %v21047_v32  }
 0xe7a   : > { %15256 = vset.pattern.permute.xlu0 %v22058_v3 }
 0xe7b   : > { %11644 = vperm.xlu0 %15256, %v21118_v26  }
 0xe7d   : > { %v21127_v20 = vpop.permute.xlu1 %11268  ;;  %15235 = vset.pattern.permute.xlu1 %v22056_v62 }
 0xe7e   : > { %12164 = vperm.xlu1 %15235, %v21047_v32   ;;  %v21133_v36 = vpop.permute.xlu0 %11258  ;;  %v15118_v32 = vor.u32 %v15117_v44, %v15116_v49  ;;  %v15123_v44 = vcvt.s32.f32 %v15122_v10  ;;  %v15148_v10 = vand.u32 2147483647, %v15147_v4 }
 0xe7f   : > { %22840 = vst [vmem:[#allocation48_spill] sm:$0xff] %v21133_v36  ;;  %15263 = vset.pattern.permute.xlu0 %v22060_v24 }
 0xe80   : > { %11924 = vperm.xlu0 %15263, %v21136_v58   ;;  %v21152_v55 = vsel %vm15113_vm2, %v15118_v32, %v21107_v28  ;;  %v15101_v28 = vand.u32 2147483648, %v21123_v45  ;;  %v15124_v34 = vand.u32 2147483647, %v15123_v44  ;;  %v15149_v44 = vand.u32 2147483648, %v21174_v38 }
 0xe82   : > { %v21142_v46 = vpop.permute.xlu1 %11572  ;;  %15236 = vset.pattern.permute.xlu1 %v22809_v63  ;;  %v15102_v21 = vor.u32 %v15101_v28, %v15100_v37  ;;  %v15126_v28 = vor.u32 %v15125_v18, %v15124_v34  ;;  %v15043_v34 = vcvt.s32.f32 %v15042_v54  ;;  %v15150_v4 = vor.u32 %v15149_v44, %v15148_v10 }
 0xe83   : > { %22842 = vst [vmem:[#allocation53_spill] sm:$0xff] %v21142_v46  ;;  %11333 = vperm.xlu1 %15236, %v15031_v7   ;;  %v21148_v1 = vpop.permute.xlu0 %11564 }
 0xe84   : > { %22843 = vst [vmem:[#allocation56_spill] sm:$0xff] %v21148_v1  ;;  %15265 = vset.pattern.permute.xlu0 %v22809_v63  ;;  %v21178_v49 = vsel %vm15097_vm9, %v15102_v21, %v21123_v45  ;;  %v22848_v45 = vld [vmem:[#allocation44_spill] sm:$0xff] }
 0xe85   : > { %11388 = vperm.xlu0 %15265, %v21152_v55   ;;  %v14472_v41 = vadd.f32 %v22848_v45, %v22847_v39  ;;  %v21214_v39 = vsel %vm15121_vm0, %v15126_v28, %v11186_v2  ;;  %v15144_v45 = vand.u32 2147483647, %v21174_v38  ;;  %v21225_v2 = vsel %vm15057_vm13, %v15062_v61, %v21167_v52  ;;  %v22852_v52 = vld [vmem:[#allocation37_spill] sm:$0xff] }
 0xe86   : > { %v11124_v54 = vadd.f32 %v21079_v11, %v22852_v52 }
 0xe87   : > { %v21155_v42 = vpop.permute.xlu1 %11273  ;;  %15237 = vset.pattern.permute.xlu1 %v22058_v3  ;;  %v21161_v40 = vpop.permute.xlu0 %11576  ;;  %v10984_v37 = vadd.f32 %v14472_v41, %v20870_v51  ;;  %vm15145_vm14 = vcmp.lt.f32.partialorder %v15144_v45, 8388608.0 }
 0xe88   : > { %11624 = vperm.xlu1 %15237, %v15031_v7   ;;  %22845 = vst [vmem:[#allocation57_spill] sm:$0xff] %v21161_v40  ;;  %v21230_v15 = vsel %vm15145_vm14, %v15150_v4, %v21174_v38  ;;  %v11182_v44 = vmax.f32 %v11124_v54, 0.0 }
 0xe89   : > { %15266 = vset.pattern.permute.xlu0 %v22058_v3  ;;  %v11145_v13 = vadd.f32 %v11144_v35, %v10984_v37  ;;  %v14903_v35 = vpop.f32.mrf.mxu0 }
 0xe8a   : > { %11668 = vperm.xlu0 %15266, %v21152_v55  }
 0xe8b   : > { %v11187_v47 = vmax.f32 %v11145_v13, 0.0  ;;  %v15044_v13 = vand.u32 2147483647, %v15043_v34 }
 0xe8c   : > { %15238 = vset.pattern.permute.xlu1 %v22060_v24  ;;  %v21170_v57 = vpop.permute.xlu1 %11568  ;;  %v21172_v9 = vpop.permute.xlu0 %11263 }
 0xe8d   : > { %22846 = vst [vmem:[#allocation52_spill] sm:$0xff] %v21170_v57  ;;  %11900 = vperm.xlu1 %15238, %v15031_v7   ;;  %v15130_v48 = vcvt.f32.s32 %v11187_v47  ;;  %v15128_v4 = vand.u32 2147483647, %v11187_v47 }
 0xe8e   : > { %15269 = vset.pattern.permute.xlu0 %v22809_v63 }
 0xe8f   : > { %11378 = vperm.xlu0 %15269, %v21178_v49   ;;  %v15131_v10 = vcvt.s32.f32 %v15130_v48  ;;  %vm15129_vm15 = vcmp.lt.f32.partialorder %v15128_v4, 8388608.0  ;;  %v15093_v4 = vand.u32 2147483648, %v11182_v44 }
 0xe90   : > { %v21181_v16 = vpop.permute.xlu1 %11588  ;;  %v21185_v25 = vpop.permute.xlu0 %11288 }
 0xe91   : > { %15239 = vset.pattern.permute.xlu1 %v22056_v62  ;;  %v15132_v11 = vand.u32 2147483647, %v15131_v10 }
 0xe92   : > { %12176 = vperm.xlu1 %15239, %v15031_v7   ;;  %v14479_v7 = vpop.f32.mrf.mxu1 }
 0xe93   : > { %15270 = vset.pattern.permute.xlu0 %v22058_v3 }
 0xe94   : > { %11660 = vperm.xlu0 %15270, %v21178_v49   ;;  %v21194_v14 = vpop.permute.xlu0 %11278  ;;  %v14480_v51 = vpop.f32.mrf.mxu1 }
 0xe95   : > { %v21191_v32 = vpop.permute.xlu1 %11864  ;;  %v14481_v41 = vadd.f32 %v14480_v51, %v14479_v7  ;;  %v15040_v51 = vand.u32 2147483647, %v21197_v12 }
 0xe96   : > { %22849 = vst [vmem:[#allocation62_spill] sm:$0xff] %v21191_v32  ;;  %15240 = vset.pattern.permute.xlu1 %v22809_v63 }
 0xe97   : > { %11323 = vperm.xlu1 %15240, %v21054_v23   ;;  %vm15041_vm12 = vcmp.lt.f32.partialorder %v15040_v51, 8388608.0 }
 0xe98   : > { %15271 = vset.pattern.permute.xlu0 %v22060_v24 }
 0xe99   : > { %11936 = vperm.xlu0 %15271, %v21178_v49   ;;  %v21208_v21 = vpop.permute.xlu0 %11592 }
 0xe9a   : > { %v21205_v30 = vpop.permute.xlu1 %12140 }
 0xe9b   : > { %22850 = vst [vmem:[#allocation61_spill] sm:$0xff] %v21205_v30  ;;  %15243 = vset.pattern.permute.xlu1 %v22056_v62 }
 0xe9c   : > { %12168 = vperm.xlu1 %15243, %v21054_v23   ;;  %v10995_v23 = vadd.f32 %v14481_v41, %v20886_v5  ;;  %v15045_v5 = vand.u32 2147483648, %v21197_v12 }
 0xe9d   : > { %11948 = vperm.xlu0 %15271, %v21214_v39  }
 0xe9e   : > { %v21220_v37 = vpop.permute.xlu0 %11868  ;;  %v11156_v7 = vadd.f32 %v14903_v35, %v10995_v23  ;;  %v15046_v38 = vor.u32 %v15045_v5, %v15044_v13  ;;  %v15133_v35 = vand.u32 2147483648, %v11187_v47  ;;  %v15090_v23 = vcvt.f32.s32 %v11182_v44 }
 0xe9f   : > { %v21218_v18 = vpop.permute.xlu1 %11580  ;;  %22851 = vst [vmem:[#allocation63_spill] sm:$0xff] %v21220_v37 }
 0xea0   : > { %15248 = vset.pattern.permute.xlu1 %v22809_v63  ;;  %v11190_v50 = vmax.f32 %v11156_v7, 0.0  ;;  %v21251_v34 = vsel %vm15041_vm12, %v15046_v38, %v21197_v12  ;;  %v15134_v48 = vor.u32 %v15133_v35, %v15132_v11  ;;  %v15091_v12 = vcvt.s32.f32 %v15090_v23 }
 0xea1   : > { %11353 = vperm.xlu1 %15248, %v21225_v2   ;;  %15278 = vset.pattern.permute.xlu0 %v22809_v63 }
 0xea2   : > { %11408 = vperm.xlu0 %15278, %v21230_v15   ;;  %v15154_v41 = vcvt.f32.s32 %v11190_v50  ;;  %v21263_v52 = vsel %vm15129_vm15, %v15134_v48, %v11187_v47  ;;  %v15157_v38 = vand.u32 2147483648, %v11190_v50  ;;  %v15152_v11 = vand.u32 2147483647, %v11190_v50 }
 0xea3   : > { %v21236_v56 = vpop.permute.xlu0 %11584  ;;  %v15088_v48 = vand.u32 2147483647, %v11182_v44 }
 0xea4   : > { %v21234_v28 = vpop.permute.xlu1 %11293  ;;  %v15155_v7 = vcvt.s32.f32 %v15154_v41  ;;  %v15092_v41 = vand.u32 2147483647, %v15091_v12  ;;  %vm15153_vm5 = vcmp.lt.f32.partialorder %v15152_v11, 8388608.0  ;;  %v22857_v11 = vmov 1  }
 0xea5   : > { %15249 = vset.pattern.permute.xlu1 %v22058_v3  ;;  %vm15089_vm10 = vcmp.lt.f32.partialorder %v15088_v48, 8388608.0 }
 0xea6   : > { %11640 = vperm.xlu1 %15249, %v21225_v2   ;;  %15279 = vset.pattern.permute.xlu0 %v22058_v3  ;;  %v15156_v54 = vand.u32 2147483647, %v15155_v7  ;;  %v15094_v7 = vor.u32 %v15093_v4, %v15092_v41  ;;  %v22858_v41 = vld [vmem:[#allocation45_spill] sm:$0xff] }
 0xea7   : > { %11684 = vperm.xlu0 %15279, %v21230_v15  }
 0xea8   : > { %v21247_v45 = vpop.permute.xlu0 %11308  ;;  %v15158_v35 = vor.u32 %v15157_v38, %v15156_v54  ;;  %v15095_v38 = vsel %vm15089_vm10, %v15094_v7, %v11182_v44 }
 0xea9   : > { %v21245_v61 = vpop.permute.xlu1 %12144 }
 0xeaa   : > { %22853 = vst [vmem:[#allocation60_spill] sm:$0xff] %v21245_v61  ;;  %15250 = vset.pattern.permute.xlu1 %v22809_v63  ;;  %v21279_v62 = vsel %vm15153_vm5, %v15158_v35, %v11190_v50  ;;  %v11132_v35 = vadd.f32 %v21146_v19, %v22858_v41  ;;  %v22860_v61 = vmov 3  }
 0xeab   : > { %11343 = vperm.xlu1 %15250, %v21251_v34   ;;  %15280 = vset.pattern.permute.xlu0 %v22060_v24 }
 0xeac   : > { %11960 = vperm.xlu0 %15280, %v21230_v15   ;;  %v11184_v48 = vmax.f32 %v11132_v35, 0.0 }
 0xead   : > { %v21258_v5 = vpop.permute.xlu0 %11880 }
 0xeae   : > { %v21256_v13 = vpop.permute.xlu1 %11283  ;;  %22854 = vst [vmem:[#allocation51_spill] sm:$0xff] %v21258_v5  ;;  %v15106_v30 = vcvt.f32.s32 %v11184_v48  ;;  %v15109_v37 = vand.u32 2147483648, %v11184_v48 }
 0xeaf   : > { %15251 = vset.pattern.permute.xlu1 %v22058_v3 }
 0xeb0   : > { %11632 = vperm.xlu1 %15251, %v21251_v34   ;;  %15282 = vset.pattern.permute.xlu0 %v22809_v63  ;;  %v15107_v41 = vcvt.s32.f32 %v15106_v30  ;;  %v15104_v30 = vand.u32 2147483647, %v11184_v48 }
 0xeb1   : > { %11398 = vperm.xlu0 %15282, %v21263_v52  }
 0xeb2   : > { %v21268_v51 = vpop.permute.xlu0 %11298  ;;  %v15108_v32 = vand.u32 2147483647, %v15107_v41  ;;  %vm15105_vm8 = vcmp.lt.f32.partialorder %v15104_v30, 8388608.0  ;;  %v21374_v30 = vld [vmem:[#allocation4 + $0x78] sm:$0xff] }
 0xeb3   : > { %v21266_v10 = vpop.permute.xlu1 %11860 }
 0xeb4   : > { %22855 = vst [vmem:[#allocation41_spill] sm:$0xff] %v21266_v10  ;;  %15254 = vset.pattern.permute.xlu1 %v22060_v24 }
 0xeb5   : > { %11928 = vperm.xlu1 %15254, %v21102_v0   ;;  %15283 = vset.pattern.permute.xlu0 %v22058_v3 }
 0xeb6   : > { %11676 = vperm.xlu0 %15283, %v21263_v52  }
 0xeb7   : > { %v21276_v23 = vpop.permute.xlu0 %11608 }
 0xeb8   : > { %v21274_v47 = vpop.permute.xlu1 %11604 }
 0xeb9   : > { %11920 = vperm.xlu1 %15254, %v21118_v26  }
 0xeba   : > { %11688 = vperm.xlu0 %15283, %v21279_v62  }
 0xebb   : > { %v21282_v12 = vpop.permute.xlu0 %11600 }
 0xebd   : > { %15257 = vset.pattern.permute.xlu1 %v22809_v63  ;;  %v21285_v54 = vpop.permute.xlu1 %12156 }
 0xebe   : > { %22856 = vst [vmem:[#allocation50_spill] sm:$0xff] %v21285_v54  ;;  %11373 = vperm.xlu1 %15257, %v15095_v38   ;;  %15290 = vset.pattern.permute.xlu0 %v22060_v24  ;;  %v15110_v54 = vor.u32 %v15109_v37, %v15108_v32 }
 0xebf   : > { %11856 = vperm.xlu0 %15290, %v20972_v59  }
 0xec0   : > { %v21289_v3 = vpop.permute.xlu0 %11328  ;;  %v15111_v41 = vsel %vm15105_vm8, %v15110_v54, %v11184_v48 }
 0xec2   : > { %15258 = vset.pattern.permute.xlu1 %v22857_v11  ;;  %v21292_v50 = vpop.permute.xlu1 %11596 }
 0xec3   : > { %11656 = vperm.xlu1 %15258, %v15095_v38   ;;  %11912 = vperm.xlu0 %15290, %v21067_v60  }
 0xec4   : > { %v21297_v4 = vpop.permute.xlu0 %11318 }
 0xec7   : > { %15259 = vset.pattern.permute.xlu1 %v22060_v24  ;;  %v21300_v44 = vpop.permute.xlu1 %11872  ;;  %11844 = vperm.xlu0 %15290, %v20950_v8  }
 0xec8   : > { %22859 = vst [vmem:[#allocation47_spill] sm:$0xff] %v21300_v44  ;;  %11932 = vperm.xlu1 %15259, %v15095_v38  }
 0xec9   : > { %v21303_v7 = vpop.permute.xlu0 %11616 }
 0xecb   : > { %15297 = vset.pattern.permute.xlu0 %v22860_v61 }
 0xecc   : > { %15260 = vset.pattern.permute.xlu1 %v22860_v61  ;;  %v21306_v10 = vpop.permute.xlu1 %11313  ;;  %12240 = vperm.xlu0 %15297, %v21279_v62  }
 0xecd   : > { %12208 = vperm.xlu1 %15260, %v15095_v38  }
 0xece   : > { %v21310_v19 = vpop.permute.xlu0 %11892 }
 0xecf   : > { %22861 = vst [vmem:[#allocation59_spill] sm:$0xff] %v21310_v19 }
 0xed0   : > { %12172 = vperm.xlu0 %15297, %v21039_v29  }
 0xed1   : > { %15261 = vset.pattern.permute.xlu1 %v22809_v63  ;;  %v21313_v35 = vpop.permute.xlu1 %11884 }
 0xed2   : > { %22862 = vst [vmem:[#allocation65_spill] sm:$0xff] %v21313_v35  ;;  %11363 = vperm.xlu1 %15261, %v21136_v58   ;;  %v22866_v35 = vmov 2  }
 0xed3   : > { %v21317_v24 = vpop.permute.xlu0 %11348 }
 0xed4   : > { %12228 = vperm.xlu0 %15297, %v21263_v52  }
 0xed6   : > { %15262 = vset.pattern.permute.xlu1 %v22857_v11  ;;  %v21321_v38 = vpop.permute.xlu1 %11303 }
 0xed7   : > { %11648 = vperm.xlu1 %15262, %v21136_v58  }
 0xed8   : > { %v21324_v44 = vpop.permute.xlu0 %11636  ;;  %12160 = vperm.xlu0 %15297, %v21029_v33  }
 0xed9   : > { %22863 = vst [vmem:[#allocation58_spill] sm:$0xff] %v21324_v44 }
 0xedb   : > { %15264 = vset.pattern.permute.xlu1 %v22860_v61  ;;  %v21328_v29 = vpop.permute.xlu1 %11876 }
 0xedc   : > { %22864 = vst [vmem:[#allocation55_spill] sm:$0xff] %v21328_v29  ;;  %12200 = vperm.xlu1 %15264, %v21136_v58   ;;  %12216 = vperm.xlu0 %15297, %v15111_v41  }
 0xedd   : > { %v21331_v5 = vpop.permute.xlu0 %11338 }
 0xede   : > { %22865 = vst [vmem:[#allocation66_spill] sm:$0xff] %v21331_v5 }
 0xee0   : > { %15267 = vset.pattern.permute.xlu1 %v22866_v35  ;;  %v21334_v19 = vpop.permute.xlu1 %12152  ;;  %12148 = vperm.xlu0 %15297, %v21021_v27  }
 0xee1   : > { %22867 = vst [vmem:[#allocation12_spill] sm:$0xff] %v21334_v19  ;;  %11944 = vperm.xlu1 %15267, %v21152_v55  }
 0xee2   : > { %v21338_v33 = vpop.permute.xlu0 %11628 }
 0xee3   : > { %22868 = vst [vmem:[#allocation17_spill] sm:$0xff] %v21338_v33 }
 0xee4   : > { %12204 = vperm.xlu0 %15297, %v21102_v0  }
 0xee5   : > { %15268 = vset.pattern.permute.xlu1 %v22860_v61  ;;  %v21341_v32 = vpop.permute.xlu1 %11620 }
 0xee6   : > { %12220 = vperm.xlu1 %15268, %v21152_v55  }
 0xee7   : > { %v21345_v58 = vpop.permute.xlu0 %11368 }
 0xee8   : > { %12136 = vperm.xlu0 %15297, %v20999_v31  }
 0xeea   : > { %12212 = vperm.xlu1 %15268, %v21178_v49   ;;  %v21349_v37 = vpop.permute.xlu1 %11896 }
 0xeeb   : > { %22869 = vst [vmem:[#allocation54_spill] sm:$0xff] %v21349_v37 }
 0xeec   : > { %v21351_v54 = vpop.permute.xlu0 %11652  ;;  %12192 = vperm.xlu0 %15297, %v21225_v2  }
 0xeee   : > { %15272 = vset.pattern.permute.xlu1 %v22809_v63 }
 0xeef   : > { %11393 = vperm.xlu1 %15272, %v21214_v39   ;;  %v21356_v27 = vpop.permute.xlu1 %11612 }
 0xef0   : > { %12124 = vperm.xlu0 %15297, %v20904_v6  }
 0xef1   : > { %v21359_v0 = vpop.permute.xlu0 %11358 }
 0xef3   : > { %15273 = vset.pattern.permute.xlu1 %v22857_v11 }
 0xef4   : > { %11672 = vperm.xlu1 %15273, %v21214_v39   ;;  %v21363_v31 = vpop.permute.xlu1 %11888  ;;  %12180 = vperm.xlu0 %15297, %v21082_v43  }
 0xef5   : > { %22870 = vst [vmem:[#allocation18_spill] sm:$0xff] %v21363_v31 }
 0xef6   : > { %v21366_v55 = vpop.permute.xlu0 %11644 }
 0xef8   : > { %15274 = vset.pattern.permute.xlu1 %v22860_v61 }
 0xef9   : > { %12224 = vperm.xlu1 %15274, %v21214_v39   ;;  %v21370_v49 = vpop.permute.xlu1 %12164  ;;  %v11147_v39 = vpop.f32.mrf.mxu0 }
 0xefa   : > { %22871 = vst [vmem:[#allocation15_spill] sm:$0xff] %v21370_v49 }
 0xefb   : > { %v21372_v48 = vpop.permute.xlu0 %11924 }
 0xefc   : > { %22872 = vst [vmem:[#allocation42_spill] sm:$0xff] %v21372_v48  ;;  %v11148_v48 = vadd.f32 %v11147_v39, %v20873_v53 }
 0xefd   : > { %15275 = vset.pattern.permute.xlu1 %v22809_v63 }
 0xefe   : > { %11383 = vperm.xlu1 %15275, %v15111_v41   ;;  %v11334_v19 = vpop.permute.xlu1 %11333  ;;  %v11188_v57 = vmax.f32 %v11148_v48, 0.0 }
 0xeff   : > { %v21378_v29 = vmul.f32 %v11334_v19, %v21374_v30 }
 0xf00   : > { %v21380_v31 = vpop.permute.xlu0 %11388  ;;  %v15138_v36 = vcvt.f32.s32 %v11188_v57  ;;  %v15141_v39 = vand.u32 2147483648, %v11188_v57 }
 0xf02   : > { %15276 = vset.pattern.permute.xlu1 %v22857_v11 }
 0xf03   : > { %11664 = vperm.xlu1 %15276, %v15111_v41   ;;  %v11625_v37 = vpop.permute.xlu1 %11624 }
 0xf05   : > { %v21383_v1 = vpop.permute.xlu0 %11668 }
 0xf07   : > { %15277 = vset.pattern.permute.xlu1 %v22866_v35 }
 0xf08   : > { %11940 = vperm.xlu1 %15277, %v15111_v41   ;;  %v11901_v49 = vpop.permute.xlu1 %11900  ;;  %v15139_v41 = vcvt.s32.f32 %v15138_v36 }
 0xf09   : > { %v21388_v33 = vmul.f32 %v11901_v49, %v21374_v30 }
 0xf0a   : > { %v21390_v19 = vpop.permute.xlu0 %11378 }
 0xf0b   : > { %22873 = vst [vmem:[#allocation9_spill] sm:$0xff] %v21388_v33 }
 0xf0c   : > { %15281 = vset.pattern.permute.xlu1 %v22860_v61 }
 0xf0d   : > { %v12177_v46 = vpop.permute.xlu1 %12176  ;;  %12236 = vperm.xlu1 %15281, %v21230_v15  }
 0xf0e   : > { %v21395_v44 = vmul.f32 %v12177_v46, %v21374_v30  ;;  %v15140_v46 = vand.u32 2147483647, %v15139_v41 }
 0xf0f   : > { %v21397_v5 = vpop.permute.xlu0 %11660 }
 0xf10   : > { %22874 = vst [vmem:[#allocation32_spill] sm:$0xff] %v21395_v44  ;;  %v15136_v44 = vand.u32 2147483647, %v11188_v57  ;;  %v15142_v36 = vor.u32 %v15141_v39, %v15140_v46  ;;  %v21440_v46 = vld [vmem:[#allocation4 + $0xf8] sm:$0xff] }
 0xf11   : > { %15284 = vset.pattern.permute.xlu1 %v22866_v35 }
 0xf12   : > { %v21400_v53 = vpop.permute.xlu1 %11323  ;;  %11952 = vperm.xlu1 %15284, %v21263_v52   ;;  %vm15137_vm11 = vcmp.lt.f32.partialorder %v15136_v44, 8388608.0 }
 0xf14   : > { %v21403_v49 = vpop.permute.xlu0 %11936 }
 0xf15   : > { %22875 = vst [vmem:[#allocation46_spill] sm:$0xff] %v21403_v49  ;;  %v15143_v49 = vsel %vm15137_vm11, %v15142_v36, %v11188_v57 }
 0xf16   : > { %15285 = vset.pattern.permute.xlu1 %v22809_v63 }
 0xf17   : > { %v21406_v48 = vpop.permute.xlu1 %12168  ;;  %11413 = vperm.xlu1 %15285, %v21279_v62  }
 0xf18   : > { %22876 = vst [vmem:[#allocation43_spill] sm:$0xff] %v21406_v48  ;;  %v21409_v15 = vpop.permute.xlu0 %11948 }
 0xf19   : > { %22877 = vst [vmem:[#allocation13_spill] sm:$0xff] %v21409_v15 }
 0xf1b   : > { %15286 = vset.pattern.permute.xlu1 %v22866_v35 }
 0xf1c   : > { %v21412_v33 = vpop.permute.xlu1 %11353  ;;  %11964 = vperm.xlu1 %15286, %v21279_v62  }
 0xf1d   : > { %v21415_v52 = vpop.permute.xlu0 %11408 }
 0xf20   : > { %15287 = vset.pattern.permute.xlu1 %v22809_v63 }
 0xf21   : > { %v21418_v48 = vpop.permute.xlu1 %11640  ;;  %11403 = vperm.xlu1 %15287, %v15143_v49  }
 0xf22   : > { %v11685_v41 = vpop.permute.xlu0 %11684 }
 0xf25   : > { %15288 = vset.pattern.permute.xlu1 %v22857_v11 }
 0xf26   : > { %v21421_v15 = vpop.permute.xlu1 %11343  ;;  %11680 = vperm.xlu1 %15288, %v15143_v49  }
 0xf27   : > { %v21423_v40 = vpop.permute.xlu0 %11960 }
 0xf28   : > { %22878 = vst [vmem:[#allocation64_spill] sm:$0xff] %v21423_v40  ;;  %v21444_v40 = vld [vmem:[#allocation4 + $0xf0] sm:$0xff] }
 0xf2a   : > { %15289 = vset.pattern.permute.xlu1 %v22860_v61 }
 0xf2b   : > { %v21426_v62 = vpop.permute.xlu1 %11632  ;;  %12196 = vperm.xlu1 %15289, %v21118_v26   ;;  %v11706_v26 = vmul.f32 %v11625_v37, %v21374_v30 }
 0xf2c   : > { %22879 = vst [vmem:[#allocation68_spill] sm:$0xff] %v21426_v62  ;;  %v21429_v44 = vpop.permute.xlu0 %11398 }
 0xf2f   : > { %12132 = vperm.xlu1 %15289, %v20972_v59   ;;  %v21447_v59 = vld [vmem:[#allocation4 + $0x70] sm:$0xff] }
 0xf30   : > { %v21432_v63 = vpop.permute.xlu1 %11928  ;;  %22882 = vst [vmem:[#allocation67_spill] sm:$0xff] %v21447_v59 }
 0xf31   : > { %22880 = vst [vmem:[#allocation69_spill] sm:$0xff] %v21432_v63  ;;  %v21434_v57 = vpop.permute.xlu0 %11676  ;;  %v11721_v63 = vmul.f32 %v11685_v41, %v21444_v40 }
 0xf33   : > { %15291 = vset.pattern.permute.xlu1 %v22866_v35 }
 0xf34   : > { %v21437_v11 = vpop.permute.xlu1 %11920  ;;  %11916 = vperm.xlu1 %15291, %v21225_v2   ;;  %v11705_v2 = vmul.f32 %v21341_v32, %v21447_v59 }
 0xf35   : > { %22881 = vst [vmem:[#allocation14_spill] sm:$0xff] %v21437_v11  ;;  %v11689_v39 = vpop.permute.xlu0 %11688 }
 0xf36   : > { %v11722_v36 = vmul.f32 %v11689_v39, %v21440_v46  ;;  %v21457_v39 = vld.sshfl [vmem:[%s21846_s19] sm:$0x33 pattern:$0x76325410] }
 0xf37   : > { %v21461_v37 = vcombine.high %v21457_v39, %v21457_v39 }
 0xf38   : > { %11852 = vperm.xlu1 %15291, %v20933_v22   ;;  %14541 = vmatprep.subr.mxu0 %v11722_v36 }
 0xf39   : > { %v21450_v62 = vpop.permute.xlu1 %11373  ;;  %14542 = vmatpush3.msra.mxu0 %v11706_v26  ;;  %22883 = vst [vmem:[#allocation10_spill] sm:$0xff] %v21461_v37  ;;  %11523 = vmatprep.mubr.f32.mxu1 %v21461_v37 }
 0xf3a   : > { %14543 = vmatprep.subr.mxu0 %v11721_v63  ;;  %11798 = vmatprep.mubr.f32.mxu0 %v21461_v37  ;;  %v21544_v37 = vld [vmem:[#allocation4 + $0x58] sm:$0xff] }
 0xf3b   : > { %14544 = vmatpush3.msra.mxu0 %v11705_v2 }
 0xf3c   : > { %15292 = vset.pattern.permute.xlu1 %v22860_v61 }
 0xf3d   : > { %12128 = vperm.xlu1 %15292, %v20933_v22  }
 0xf3e   : > { %v21466_v30 = vpop.permute.xlu1 %11656 }
 0xf41   : > { %12188 = vperm.xlu1 %15292, %v21067_v60  }
 0xf43   : > { %v21470_v32 = vpop.permute.xlu1 %11932 }
 0xf44   : > { %22884 = vst [vmem:[#allocation21_spill] sm:$0xff] %v21470_v32 }
 0xf45   : > { %15293 = vset.pattern.permute.xlu1 %v22866_v35 }
 0xf46   : > { %11956 = vperm.xlu1 %15293, %v15143_v49  }
 0xf48   : > { %v21473_v41 = vpop.permute.xlu1 %12208 }
 0xf49   : > { %22885 = vst [vmem:[#allocation22_spill] sm:$0xff] %v21473_v41  ;;  %v21509_v41 = vpop.permute.xlu0 %11856 }
 0xf4a   : > { %15294 = vset.pattern.permute.xlu1 %v22860_v61  ;;  %22894 = vst [vmem:[#allocation24_spill] sm:$0xff] %v21509_v41  ;;  %v21523_v41 = vld [vmem:[#allocation4 + $0xe0] sm:$0xff] }
 0xf4b   : > { %12232 = vperm.xlu1 %15294, %v15143_v49  }
 0xf4d   : > { %v21476_v63 = vpop.permute.xlu1 %11363 }
 0xf4f   : > { %15295 = vset.pattern.permute.xlu1 %v22866_v35 }
 0xf50   : > { %11848 = vperm.xlu1 %15295, %v20904_v6  }
 0xf52   : > { %v21480_v22 = vpop.permute.xlu1 %11648 }
 0xf54   : > { %11908 = vperm.xlu1 %15295, %v21251_v34  }
 0xf57   : > { %v21483_v60 = vpop.permute.xlu1 %12200 }
 0xf58   : > { %22886 = vst [vmem:[#allocation19_spill] sm:$0xff] %v21483_v60  ;;  %15296 = vset.pattern.permute.xlu1 %v22860_v61 }
 0xf59   : > { %12184 = vperm.xlu1 %15296, %v21251_v34  }
 0xf5c   : > { %v21487_v36 = vpop.permute.xlu1 %11944 }
 0xf5d   : > { %22887 = vst [vmem:[#allocation70_spill] sm:$0xff] %v21487_v36  ;;  %12120 = vperm.xlu1 %15296, %v20950_v8  }
 0xf61   : > { %v21490_v49 = vpop.permute.xlu1 %12220  ;;  %15298 = vset.pattern.permute.xlu1 %v22866_v35 }
 0xf62   : > { %22888 = vst [vmem:[#allocation71_spill] sm:$0xff] %v21490_v49  ;;  %11904 = vperm.xlu1 %15298, %v21082_v43   ;;  %v21516_v49 = vpop.permute.xlu0 %11912 }
 0xf63   : > { %22895 = vst [vmem:[#allocation8_spill] sm:$0xff] %v21516_v49  ;;  %v21538_v49 = vld [vmem:[#allocation4 + $0xd0] sm:$0xff] }
 0xf65   : > { %v21494_v6 = vpop.permute.xlu1 %12212 }
 0xf66   : > { %22889 = vst [vmem:[#allocation11_spill] sm:$0xff] %v21494_v6  ;;  %11840 = vperm.xlu1 %15298, %v20909_v17  }
 0xf6a   : > { %v11394_v26 = vpop.permute.xlu1 %11393  ;;  %15299 = vset.pattern.permute.xlu1 %v22860_v61  ;;  %v11430_v61 = vmul.f32 %v21289_v3, %v21447_v59  ;;  %v21558_v59 = vld [vmem:[#allocation4 + $0xc0] sm:$0xff] }
 0xf6b   : > { %12116 = vperm.xlu1 %15299, %v20909_v17   ;;  %v11446_v17 = vmul.f32 %v21415_v52, %v21444_v40  ;;  %v21527_v52 = vld [vmem:[#allocation4 + $0x60] sm:$0xff] }
 0xf6f   : > { %v11673_v34 = vpop.permute.xlu1 %11672 }
 0xf74   : > { %v21499_v2 = vpop.permute.xlu1 %12224 }
 0xf75   : > { %22890 = vst [vmem:[#allocation23_spill] sm:$0xff] %v21499_v2 }
 0xf79   : > { %v11384_v60 = vpop.permute.xlu1 %11383 }
 0xf7e   : > { %v21501_v8 = vpop.permute.xlu1 %11664 }
 0xf83   : > { %v21503_v11 = vpop.permute.xlu1 %11940 }
 0xf84   : > { %22891 = vst [vmem:[#allocation20_spill] sm:$0xff] %v21503_v11  ;;  %v21521_v11 = vld [vmem:[#allocation4 + $0xe8] sm:$0xff] }
 0xf88   : > { %v21505_v35 = vpop.permute.xlu1 %12236 }
 0xf89   : > { %22892 = vst [vmem:[#allocation26_spill] sm:$0xff] %v21505_v35 }
 0xf8d   : > { %v21507_v43 = vpop.permute.xlu1 %11952 }
 0xf8e   : > { %22893 = vst [vmem:[#allocation30_spill] sm:$0xff] %v21507_v43  ;;  %v21542_v43 = vld [vmem:[#allocation4 + $0x50] sm:$0xff] }
 0xf92   : > { %v11414_v6 = vpop.permute.xlu1 %11413 }
 0xf93   : > { %v11447_v32 = vmul.f32 %v21440_v46, %v11414_v6  ;;  %v21525_v6 = vpop.permute.xlu0 %11844 }
 0xf94   : > { %22896 = vst [vmem:[#allocation31_spill] sm:$0xff] %v21525_v6  ;;  %v21540_v6 = vld [vmem:[#allocation4 + $0xd8] sm:$0xff] }
 0xf95   : > { %14506 = vmatprep.subr.mxu1 %v11447_v32  ;;  %v21529_v32 = vld [vmem:[#allocation4 + $0x68] sm:$0xff] }
 0xf96   : > { %14507 = vmatpush3.msra.mxu1 %v21378_v29  ;;  %v11429_v29 = vmul.f32 %v21529_v32, %v21400_v53  ;;  %v11427_v53 = vmul.f32 %v21544_v37, %v21306_v10  ;;  %v11719_v10 = vmul.f32 %v21434_v57, %v21523_v41  ;;  %v11718_v57 = vmul.f32 %v21540_v6, %v11673_v34 }
 0xf97   : > { %v21519_v2 = vpop.permute.xlu1 %11964  ;;  %14508 = vmatprep.subr.mxu1 %v11446_v17  ;;  %v11444_v17 = vmul.f32 %v21429_v44, %v21523_v41  ;;  %v21549_v44 = vpop.permute.xlu0 %12240  ;;  %v11717_v34 = vmul.f32 %v21383_v1, %v21538_v49 }
 0xf98   : > { %14509 = vmatpush3.msra.mxu1 %v11430_v61  ;;  %v11428_v61 = vmul.f32 %v21297_v4, %v21527_v52 }
 0xf9c   : > { %v11404_v36 = vpop.permute.xlu1 %11403 }
 0xf9d   : > { %v11445_v3 = vmul.f32 %v11404_v36, %v21521_v11  ;;  %v11443_v36 = vmul.f32 %v21540_v6, %v11394_v26  ;;  %v11426_v26 = vmul.f32 %v21247_v45, %v21542_v43 }
 0xf9f   : > { %14510 = vmatprep.subr.mxu1 %v11445_v3  ;;  %v11704_v3 = vmul.f32 %v21303_v7, %v21529_v32  ;;  %v11703_v7 = vmul.f32 %v21356_v27, %v21527_v52  ;;  %v11440_v27 = vmul.f32 %v21390_v19, %v21558_v59  ;;  %v11701_v19 = vmul.f32 %v21274_v47, %v21542_v43 }
 0xfa0   : > { %14511 = vmatpush3.msra.mxu1 %v11429_v29  ;;  %v11442_v29 = vmul.f32 %v21380_v31, %v21538_v49 }
 0xfa1   : > { %v11681_v35 = vpop.permute.xlu1 %11680  ;;  %14512 = vmatprep.subr.mxu1 %v11444_v17  ;;  %v21562_v17 = vld [vmem:[#allocation4 + $0xc8] sm:$0xff] }
 0xfa2   : > { %v11720_v4 = vmul.f32 %v11681_v35, %v21521_v11  ;;  %14513 = vmatpush3.msra.mxu1 %v11428_v61  ;;  %v21564_v35 = vld [vmem:[#allocation4 + $0x40] sm:$0xff]  ;;  %v21566_v61 = vld [vmem:[#allocation4 + $0x48] sm:$0xff]  ;;  %v11441_v31 = vmul.f32 %v21562_v17, %v11384_v60  ;;  %v11716_v1 = vmul.f32 %v21562_v17, %v21501_v8  ;;  %v11715_v8 = vmul.f32 %v21397_v5, %v21558_v59 }
 0xfa3   : > { %14514 = vmatprep.subr.mxu1 %v11443_v36  ;;  %v11425_v45 = vmul.f32 %v21566_v61, %v21321_v38  ;;  %v21573_v36 = vld [vmem:[#allocation4 + $0xb8] sm:$0xff]  ;;  %v11424_v60 = vmul.f32 %v21268_v51, %v21564_v35  ;;  %v21584_v38 = vld [vmem:[#allocation4 + $0xb0] sm:$0xff] }
 0xfa4   : > { %14515 = vmatpush3.msra.mxu1 %v11427_v53  ;;  %14545 = vmatprep.subr.mxu0 %v11720_v4  ;;  %v11702_v4 = vmul.f32 %v21276_v23, %v21544_v37  ;;  %v21592_v23 = vld [vmem:[#allocation4 + $0x38] sm:$0xff]  ;;  %v11438_v47 = vmul.f32 %v21345_v58, %v21584_v38  ;;  %v11699_v58 = vmul.f32 %v21292_v50, %v21564_v35 }
 0xfa5   : > { %14516 = vmatprep.subr.mxu1 %v11442_v29  ;;  %14546 = vmatpush3.msra.mxu0 %v11704_v3  ;;  %v21588_v3 = vpop.permute.xlu0 %12172  ;;  %v21590_v29 = vld [vmem:[#allocation4 + $0x30] sm:$0xff]  ;;  %v11423_v51 = vmul.f32 %v21592_v23, %v21234_v28  ;;  %v21612_v28 = vld [vmem:[#allocation4 + $0xa8] sm:$0xff]  ;;  %v11714_v5 = vmul.f32 %v21466_v30, %v21573_v36  ;;  %v11698_v50 = vmul.f32 %v21208_v21, %v21592_v23 }
 0xfa6   : > { %v21576_v53 = vpop.permute.xlu1 %12196  ;;  %14517 = vmatpush3.msra.mxu1 %v11426_v26  ;;  %14547 = vmatprep.subr.mxu0 %v11719_v10  ;;  %v11439_v26 = vmul.f32 %v21450_v62, %v21573_v36  ;;  %v11422_v62 = vmul.f32 %v21590_v29, %v21185_v25  ;;  %v11713_v30 = vmul.f32 %v21351_v54, %v21584_v38  ;;  %v21655_v54 = vld [vmem:[#allocation4 + $0x8] sm:$0xff] }
 0xfa7   : > { %14518 = vmatprep.subr.mxu1 %v11441_v31  ;;  %14548 = vmatpush3.msra.mxu0 %v11703_v7  ;;  %v11700_v7 = vmul.f32 %v21282_v12, %v21566_v61  ;;  %v21610_v31 = vld [vmem:[#allocation4 + $0xa0] sm:$0xff]  ;;  %v21618_v12 = vld [vmem:[#allocation4 + $0x28] sm:$0xff]  ;;  %v11697_v21 = vmul.f32 %v21181_v16, %v21590_v29 }
 0xfa8   : > { %14519 = vmatpush3.msra.mxu1 %v11425_v45  ;;  %14549 = vmatprep.subr.mxu0 %v11718_v57  ;;  %v21616_v45 = vld [vmem:[#allocation4 + $0x20] sm:$0xff]  ;;  %v11437_v57 = vmul.f32 %v21612_v28, %v21476_v63  ;;  %v11421_v25 = vmul.f32 %v21618_v12, %v21256_v13  ;;  %v11436_v63 = vmul.f32 %v21359_v0, %v21610_v31 }
 0xfa9   : > { %14520 = vmatprep.subr.mxu1 %v11440_v27  ;;  %14550 = vmatpush3.msra.mxu0 %v11702_v4  ;;  %v21626_v4 = vld [vmem:[#allocation4 + $0x98] sm:$0xff]  ;;  %v21630_v27 = vpop.permute.xlu0 %12228  ;;  %v11420_v13 = vmul.f32 %v21194_v14, %v21616_v45  ;;  %v21651_v14 = vld [vmem:[#allocation4 + $0x88] sm:$0xff] }
 0xfaa   : > { %v21602_v10 = vpop.permute.xlu1 %12132  ;;  %14521 = vmatpush3.msra.mxu1 %v11424_v60  ;;  %14551 = vmatprep.subr.mxu0 %v11717_v34  ;;  %v11227_v60 = vld [vmem:[#allocation4 + $0x18] sm:$0xff]  ;;  %v11435_v0 = vmul.f32 %v21412_v33, %v21626_v4 }
 0xfab   : > { %14522 = vmatprep.subr.mxu1 %v11439_v26  ;;  %14552 = vmatpush3.msra.mxu0 %v11701_v19  ;;  %v21640_v19 = vld [vmem:[#allocation4 + $0x90] sm:$0xff] }
 0xfac   : > { %14523 = vmatpush3.msra.mxu1 %v11423_v51  ;;  %14553 = vmatprep.subr.mxu0 %v11716_v1  ;;  %v21644_v26 = vld [vmem:[#allocation4 + $0x10] sm:$0xff]  ;;  %v11419_v51 = vmul.f32 %v21155_v42, %v11227_v60  ;;  %v11712_v1 = vmul.f32 %v21612_v28, %v21480_v22  ;;  %v11434_v16 = vmul.f32 %v21317_v24, %v21640_v19 }
 0xfad   : > { %14524 = vmatprep.subr.mxu1 %v11438_v47  ;;  %14554 = vmatpush3.msra.mxu0 %v11700_v7  ;;  %v11696_v7 = vmul.f32 %v21236_v56, %v21618_v12  ;;  %v11418_v42 = vmul.f32 %v21127_v20, %v21644_v26  ;;  %v21665_v47 = vld [vmem:[#allocation4 + $0x80] sm:$0xff]  ;;  %v11711_v22 = vmul.f32 %v21366_v55, %v21610_v31  ;;  %v22897_v55 = vld [vmem:[#allocation57_spill] sm:$0xff] }
 0xfae   : > { %14525 = vmatpush3.msra.mxu1 %v11422_v62  ;;  %14555 = vmatprep.subr.mxu0 %v11715_v8  ;;  %v21669_v62 = vpop.permute.xlu0 %12160  ;;  %v11224_v56 = vld [vmem:[#allocation4] sm:$0xff]  ;;  %v11695_v24 = vmul.f32 %v21218_v18, %v21616_v45  ;;  %v11433_v8 = vmul.f32 %v21421_v15, %v21651_v14  ;;  %v11417_v20 = vmul.f32 %v21655_v54, %v21172_v9  ;;  %v22900_v15 = vld [vmem:[#allocation58_spill] sm:$0xff]  ;;  %v22901_v9 = vld [vmem:[#allocation53_spill] sm:$0xff] }
 0xfaf   : > { %v21636_v34 = vpop.permute.xlu1 %11916  ;;  %14526 = vmatprep.subr.mxu1 %v11437_v57  ;;  %14556 = vmatpush3.msra.mxu0 %v11699_v58  ;;  %v11710_v58 = vmul.f32 %v21418_v48, %v21626_v4  ;;  %v11694_v57 = vmul.f32 %v22897_v55, %v11227_v60  ;;  %v22899_v18 = vld [vmem:[#allocation48_spill] sm:$0xff]  ;;  %v11693_v48 = vmul.f32 %v22901_v9, %v21644_v26  ;;  %v22912_v9 = vld [vmem:[#allocation10_spill] sm:$0xff] }
 0xfb0   : > { %14527 = vmatpush3.msra.mxu1 %v11421_v25  ;;  %14557 = vmatprep.subr.mxu0 %v11714_v5  ;;  %v22898_v25 = vld [vmem:[#allocation66_spill] sm:$0xff]  ;;  %v11998_v60 = vmul.f32 %v21519_v2, %v21440_v46 }
 0xfb1   : > { %14528 = vmatprep.subr.mxu1 %v11436_v63  ;;  %14558 = vmatpush3.msra.mxu0 %v11698_v50  ;;  %v11432_v5 = vmul.f32 %v22898_v25, %v21665_v47  ;;  %v11416_v50 = vmul.f32 %v22899_v18, %v11224_v56  ;;  %v11709_v63 = vmul.f32 %v22900_v15, %v21640_v19  ;;  %v22910_v18 = vld [vmem:[#allocation26_spill] sm:$0xff] }
 0xfb2   : > { %14529 = vmatpush3.msra.mxu1 %v11420_v13  ;;  %14559 = vmatprep.subr.mxu0 %v11713_v30  ;;  %v22902_v30 = vld [vmem:[#allocation68_spill] sm:$0xff]  ;;  %v12274_v25 = vmul.f32 %v21549_v44, %v21440_v46  ;;  %v22913_v44 = vld [vmem:[#allocation59_spill] sm:$0xff] }
 0xfb3   : > { %v21661_v33 = vpop.permute.xlu1 %11852  ;;  %14530 = vmatprep.subr.mxu1 %v11435_v0  ;;  %14560 = vmatpush3.msra.mxu0 %v11697_v21  ;;  %v11708_v21 = vmul.f32 %v22902_v30, %v21651_v14  ;;  %v21693_v0 = vpop.permute.xlu0 %12216 }
 0xfb4   : > { %14531 = vmatpush3.msra.mxu1 %v11419_v51  ;;  %14561 = vmatprep.subr.mxu0 %v11712_v1  ;;  %v22903_v51 = vld [vmem:[#allocation52_spill] sm:$0xff] }
 0xfb5   : > { %14532 = vmatprep.subr.mxu1 %v11434_v16  ;;  %14562 = vmatpush3.msra.mxu0 %v11696_v7  ;;  %v11692_v1 = vmul.f32 %v22903_v51, %v21655_v54  ;;  %v22904_v7 = vld [vmem:[#allocation17_spill] sm:$0xff] }
 0xfb6   : > { %14533 = vmatpush3.msra.mxu1 %v11418_v42  ;;  %14563 = vmatprep.subr.mxu0 %v11711_v22  ;;  %v11707_v16 = vmul.f32 %v22904_v7, %v21665_v47  ;;  %v22905_v42 = vld [vmem:[#allocation64_spill] sm:$0xff] }
 0xfb7   : > { %14534 = vmatprep.subr.mxu1 %v11433_v8  ;;  %14564 = vmatpush3.msra.mxu0 %v11695_v24  ;;  %v11997_v2 = vmul.f32 %v22905_v42, %v21444_v40  ;;  %v22906_v24 = vld [vmem:[#allocation56_spill] sm:$0xff] }
 0xfb8   : > { %v21685_v13 = vpop.permute.xlu1 %12128  ;;  %14535 = vmatpush3.msra.mxu1 %v11417_v20  ;;  %14565 = vmatprep.subr.mxu0 %v11710_v58  ;;  %v11691_v8 = vmul.f32 %v22906_v24, %v11224_v56  ;;  %v22907_v20 = vld [vmem:[#allocation67_spill] sm:$0xff]  ;;  %v22908_v58 = vld [vmem:[#allocation54_spill] sm:$0xff] }
 0xfb9   : > { %14536 = vmatprep.subr.mxu1 %v11432_v5  ;;  %14566 = vmatpush3.msra.mxu0 %v11694_v57  ;;  %v11981_v55 = vmul.f32 %v22908_v58, %v22907_v20  ;;  %v22909_v57 = vld [vmem:[#allocation9_spill] sm:$0xff]  ;;  %v21710_v5 = vpop.permute.xlu0 %12148  ;;  %v12257_v56 = vmul.f32 %v21588_v3, %v22907_v20  ;;  %v22915_v3 = vld [vmem:[#allocation18_spill] sm:$0xff]  ;;  %v22918_v24 = vld [vmem:[#allocation43_spill] sm:$0xff] }
 0xfba   : > { %14537 = vmatpush3.msra.mxu1 %v11416_v50  ;;  %14567 = vmatprep.subr.mxu0 %v11709_v63  ;;  %v12273_v50 = vmul.f32 %v22910_v18, %v21444_v40  ;;  %v22911_v63 = vld [vmem:[#allocation32_spill] sm:$0xff]  ;;  %v22914_v40 = vld [vmem:[#allocation30_spill] sm:$0xff]  ;;  %v11979_v30 = vmul.f32 %v22915_v3, %v21527_v52  ;;  %v22921_v18 = vld [vmem:[#allocation15_spill] sm:$0xff] }
 0xfbb   : > { %14568 = vmatpush3.msra.mxu0 %v11693_v48  ;;  %14576 = vmatprep.subr.mxu1 %v11998_v60  ;;  %v11980_v48 = vmul.f32 %v22913_v44, %v21529_v32  ;;  %v11995_v60 = vmul.f32 %v22914_v40, %v21523_v41  ;;  %v22919_v20 = vld [vmem:[#allocation70_spill] sm:$0xff] }
 0xfbc   : > { %v21701_v22 = vpop.permute.xlu1 %12188  ;;  %11524 = vmatmul.mubr.f32.vlgmr.msra.gmra.mxu1 %v21457_v39  ;;  %14569 = vmatprep.subr.mxu0 %v11708_v21  ;;  %v22916_v21 = vld [vmem:[#allocation13_spill] sm:$0xff]  ;;  %v11993_v58 = vmul.f32 %v22919_v20, %v21538_v49  ;;  %v22934_v20 = vld [vmem:[#allocation11_spill] sm:$0xff] }
 0xfbd   : > { %14577 = vmatpush3.msra.mxu1 %v22909_v57  ;;  %14570 = vmatpush3.msra.mxu0 %v11692_v1  ;;  %v11994_v51 = vmul.f32 %v22916_v21, %v21540_v6  ;;  %v21729_v1 = vpop.permute.xlu0 %12204  ;;  %v22929_v21 = vld [vmem:[#allocation21_spill] sm:$0xff] }
 0xfbe   : > { %14578 = vmatprep.subr.mxu1 %v11997_v2  ;;  %14571 = vmatprep.subr.mxu0 %v11707_v16  ;;  %v22917_v16 = vld [vmem:[#allocation65_spill] sm:$0xff] }
 0xfbf   : > { %14579 = vmatpush3.msra.mxu1 %v11981_v55  ;;  %14572 = vmatpush3.msra.mxu0 %v11691_v8  ;;  %v11978_v42 = vmul.f32 %v22917_v16, %v21544_v37  ;;  %v12256_v8 = vmul.f32 %v22918_v24, %v21529_v32  ;;  %v22920_v55 = vld [vmem:[#allocation51_spill] sm:$0xff]  ;;  %v22933_v24 = vld [vmem:[#allocation62_spill] sm:$0xff] }
 0xfc0   : > { %14611 = vmatprep.subr.mxu0 %v12274_v25  ;;  %11799 = vmatmul.mubr.f32.vlgmr.msra.gmra.mxu0 %v21457_v39  ;;  %v11977_v57 = vmul.f32 %v22920_v55, %v21542_v43  ;;  %v12271_v25 = vmul.f32 %v21630_v27, %v21523_v41  ;;  %v22923_v32 = vld [vmem:[#allocation55_spill] sm:$0xff]  ;;  %v22925_v41 = vld [vmem:[#allocation46_spill] sm:$0xff]  ;;  %v12251_v55 = vmul.f32 %v21710_v5, %v21564_v35 }
 0xfc1   : > { %v11957_v15 = vpop.permute.xlu1 %11956  ;;  %14612 = vmatpush3.msra.mxu0 %v22911_v63  ;;  %12074 = vmatprep.mubr.f32.mxu1 %v22912_v9  ;;  %v22924_v63 = vld [vmem:[#allocation23_spill] sm:$0xff]  ;;  %v11991_v27 = vmul.f32 %v22925_v41, %v21558_v59  ;;  %v12137_v44 = vpop.permute.xlu0 %12136 }
 0xfc2   : > { %v11996_v46 = vmul.f32 %v11957_v15, %v21521_v11  ;;  %14613 = vmatprep.subr.mxu0 %v12273_v50  ;;  %12350 = vmatprep.mubr.f32.mxu0 %v22912_v9  ;;  %v12255_v50 = vmul.f32 %v22921_v18, %v21527_v52  ;;  %v11976_v15 = vmul.f32 %v22923_v32, %v21566_v61  ;;  %v22937_v18 = vld [vmem:[#allocation22_spill] sm:$0xff] }
 0xfc3   : > { %14614 = vmatpush3.msra.mxu0 %v12257_v56  ;;  %v12270_v9 = vmul.f32 %v22924_v63, %v21540_v6  ;;  %v12254_v52 = vmul.f32 %v21669_v62, %v21544_v37  ;;  %v22928_v6 = vld [vmem:[#allocation50_spill] sm:$0xff]  ;;  %v22930_v37 = vld [vmem:[#allocation63_spill] sm:$0xff] }
 0xfc4   : > { %14580 = vmatprep.subr.mxu1 %v11996_v46  ;;  %v11974_v62 = vmul.f32 %v22930_v37, %v21592_v23 }
 0xfc5   : > { %14581 = vmatpush3.msra.mxu1 %v11980_v48  ;;  %v22926_v48 = vld [vmem:[#allocation47_spill] sm:$0xff] }
 0xfc6   : > { %v12233_v7 = vpop.permute.xlu1 %12232  ;;  %14582 = vmatprep.subr.mxu1 %v11995_v60  ;;  %v11975_v40 = vmul.f32 %v22926_v48, %v21564_v35  ;;  %v22927_v60 = vld [vmem:[#allocation71_spill] sm:$0xff]  ;;  %v22940_v35 = vld [vmem:[#allocation24_spill] sm:$0xff] }
 0xfc7   : > { %v12272_v2 = vmul.f32 %v12233_v7, %v21521_v11  ;;  %14583 = vmatpush3.msra.mxu1 %v11979_v30  ;;  %v22922_v11 = vld [vmem:[#allocation20_spill] sm:$0xff]  ;;  %v12269_v3 = vmul.f32 %v22927_v60, %v21538_v49  ;;  %v12253_v30 = vmul.f32 %v22928_v6, %v21542_v43  ;;  %v12268_v7 = vmul.f32 %v21693_v0, %v21562_v17 }
 0xfc8   : > { %14584 = vmatprep.subr.mxu1 %v11994_v51  ;;  %v11992_v56 = vmul.f32 %v21562_v17, %v22922_v11  ;;  %v11990_v51 = vmul.f32 %v22929_v21, %v21573_v36  ;;  %v22931_v49 = vld [vmem:[#allocation12_spill] sm:$0xff]  ;;  %v22935_v17 = vld [vmem:[#allocation42_spill] sm:$0xff]  ;;  %v11971_v5 = vmul.f32 %v22940_v35, %v21616_v45  ;;  %v12248_v60 = vmul.f32 %v12137_v44, %v21618_v12 }
 0xfc9   : > { %14585 = vmatpush3.msra.mxu1 %v11978_v42  ;;  %14615 = vmatprep.subr.mxu0 %v12272_v2  ;;  %v12252_v42 = vmul.f32 %v22931_v49, %v21566_v61  ;;  %v22932_v2 = vld [vmem:[#allocation69_spill] sm:$0xff]  ;;  %v11988_v0 = vmul.f32 %v22935_v17, %v21612_v28  ;;  %v12193_v61 = vpop.permute.xlu0 %12192 }
 0xfca   : > { %14586 = vmatprep.subr.mxu1 %v11993_v58  ;;  %14616 = vmatpush3.msra.mxu0 %v12256_v8  ;;  %v11989_v43 = vmul.f32 %v22932_v2, %v21584_v38  ;;  %v11973_v8 = vmul.f32 %v22933_v24, %v21590_v29  ;;  %v12267_v58 = vmul.f32 %v22934_v20, %v21558_v59  ;;  %v22938_v59 = vld [vmem:[#allocation60_spill] sm:$0xff] }
 0xfcb   : > { %v21750_v46 = vpop.permute.xlu1 %11848  ;;  %14587 = vmatpush3.msra.mxu1 %v11977_v57  ;;  %14617 = vmatprep.subr.mxu0 %v12271_v25  ;;  %v22936_v57 = vld [vmem:[#allocation41_spill] sm:$0xff]  ;;  %v12250_v11 = vmul.f32 %v22938_v59, %v21592_v23  ;;  %v11986_v23 = vmul.f32 %v21636_v34, %v21626_v4  ;;  %v12263_v34 = vmul.f32 %v21576_v53, %v21610_v31 }
 0xfcc   : > { %14588 = vmatprep.subr.mxu1 %v11992_v56  ;;  %14618 = vmatpush3.msra.mxu0 %v12255_v50  ;;  %v11972_v25 = vmul.f32 %v22936_v57, %v21618_v12  ;;  %v12266_v50 = vmul.f32 %v22937_v18, %v21573_v36  ;;  %v22939_v56 = vld [vmem:[#allocation14_spill] sm:$0xff]  ;;  %v22941_v36 = vld [vmem:[#allocation61_spill] sm:$0xff]  ;;  %v22944_v12 = vld [vmem:[#allocation31_spill] sm:$0xff] }
 0xfcd   : > { %14589 = vmatpush3.msra.mxu1 %v11976_v15  ;;  %14619 = vmatprep.subr.mxu0 %v12270_v9  ;;  %v11987_v32 = vmul.f32 %v22939_v56, %v21610_v31  ;;  %v11810_v15 = vld [vmem:[#allocation4 + $0x18] sm:$0xff]  ;;  %v12265_v9 = vmul.f32 %v21729_v1, %v21584_v38  ;;  %v12249_v41 = vmul.f32 %v22941_v36, %v21590_v29  ;;  %v22943_v38 = vld [vmem:[#allocation8_spill] sm:$0xff] }
 0xfce   : > { %14590 = vmatprep.subr.mxu1 %v11991_v27  ;;  %14620 = vmatpush3.msra.mxu0 %v12254_v52  ;;  %v11809_v27 = vld [vmem:[#allocation4 + $0x10] sm:$0xff]  ;;  %v22942_v52 = vld [vmem:[#allocation19_spill] sm:$0xff]  ;;  %v11985_v1 = vmul.f32 %v22943_v38, %v21640_v19  ;;  %v11968_v44 = vmul.f32 %v22944_v12, %v21655_v54  ;;  %v12246_v53 = vmul.f32 %v21685_v13, %v11810_v15 }
 0xfcf   : > { %v11909_v16 = vpop.permute.xlu1 %11908  ;;  %14591 = vmatpush3.msra.mxu1 %v11975_v40  ;;  %14621 = vmatprep.subr.mxu0 %v12269_v3  ;;  %v12264_v48 = vmul.f32 %v22942_v52, %v21612_v28  ;;  %v11970_v40 = vmul.f32 %v21661_v33, %v11810_v15  ;;  %v12125_v3 = vpop.permute.xlu0 %12124  ;;  %v11969_v6 = vmul.f32 %v21750_v46, %v11809_v27  ;;  %v12084_v46 = vld [vmem:[#allocation4 + $0x8] sm:$0xff] }
 0xfd0   : > { %14592 = vmatprep.subr.mxu1 %v11990_v51  ;;  %14622 = vmatpush3.msra.mxu0 %v12253_v30  ;;  %v12247_v28 = vmul.f32 %v21602_v10, %v21616_v45  ;;  %v11984_v33 = vmul.f32 %v11909_v16, %v21651_v14  ;;  %v12262_v30 = vmul.f32 %v12193_v61, %v21626_v4  ;;  %v11807_v51 = vld [vmem:[#allocation4] sm:$0xff] }
 0xfd1   : > { %14593 = vmatpush3.msra.mxu1 %v11974_v62  ;;  %14623 = vmatprep.subr.mxu0 %v12268_v7  ;;  %v12261_v31 = vmul.f32 %v21701_v22, %v21640_v19  ;;  %v12245_v45 = vmul.f32 %v12125_v3, %v21644_v26 }
 0xfd2   : > { %14594 = vmatprep.subr.mxu1 %v11989_v43  ;;  %14624 = vmatpush3.msra.mxu0 %v12252_v42 }
 0xfd3   : > { %14595 = vmatpush3.msra.mxu1 %v11973_v8  ;;  %14625 = vmatprep.subr.mxu0 %v12267_v58  ;;  %v12181_v21 = vpop.permute.xlu0 %12180 }
 0xfd4   : > { %v12185_v63 = vpop.permute.xlu1 %12184  ;;  %14596 = vmatprep.subr.mxu1 %v11988_v0  ;;  %14626 = vmatpush3.msra.mxu0 %v12251_v55  ;;  %v12259_v19 = vmul.f32 %v12181_v21, %v21665_v47 }
 0xfd5   : > { %14597 = vmatpush3.msra.mxu1 %v11972_v25  ;;  %14627 = vmatprep.subr.mxu0 %v12266_v50  ;;  %v12260_v4 = vmul.f32 %v12185_v63, %v21651_v14 }
 0xfd6   : > { %14598 = vmatprep.subr.mxu1 %v11987_v32  ;;  %14628 = vmatpush3.msra.mxu0 %v12250_v11 }
 0xfd7   : > { %14599 = vmatpush3.msra.mxu1 %v11971_v5  ;;  %14629 = vmatprep.subr.mxu0 %v12265_v9 }
 0xfd8   : > { %v12121_v29 = vpop.permute.xlu1 %12120  ;;  %14600 = vmatprep.subr.mxu1 %v11986_v23  ;;  %14630 = vmatpush3.msra.mxu0 %v12249_v41 }
 0xfd9   : > { %14601 = vmatpush3.msra.mxu1 %v11970_v40  ;;  %14631 = vmatprep.subr.mxu0 %v12264_v48  ;;  %v12244_v13 = vmul.f32 %v12121_v29, %v12084_v46 }
 0xfda   : > { %14602 = vmatprep.subr.mxu1 %v11985_v1  ;;  %14632 = vmatpush3.msra.mxu0 %v12248_v60 }
 0xfdb   : > { %14603 = vmatpush3.msra.mxu1 %v11969_v6  ;;  %14633 = vmatprep.subr.mxu0 %v12263_v34 }
 0xfdc   : > { %14604 = vmatprep.subr.mxu1 %v11984_v33  ;;  %14634 = vmatpush3.msra.mxu0 %v12247_v28 }
 0xfdd   : > { %v11905_v10 = vpop.permute.xlu1 %11904  ;;  %14605 = vmatpush3.msra.mxu1 %v11968_v44  ;;  %14635 = vmatprep.subr.mxu0 %v12262_v30 }
 0xfde   : > { %v11983_v54 = vmul.f32 %v11905_v10, %v21665_v47  ;;  %14636 = vmatpush3.msra.mxu0 %v12246_v53 }
 0xfdf   : > { %14637 = vmatprep.subr.mxu0 %v12261_v31 }
 0xfe0   : > { %14606 = vmatprep.subr.mxu1 %v11983_v54  ;;  %14638 = vmatpush3.msra.mxu0 %v12245_v45 }
 0xfe1   : > { %v11841_v22 = vpop.permute.xlu1 %11840  ;;  %14639 = vmatprep.subr.mxu0 %v12260_v4 }
 0xfe2   : > { %v11967_v37 = vmul.f32 %v11841_v22, %v11807_v51  ;;  %14640 = vmatpush3.msra.mxu0 %v12244_v13 }
 0xfe3   : > { %14641 = vmatprep.subr.mxu0 %v12259_v19 }
 0xfe4   : > { %14607 = vmatpush3.msra.mxu1 %v11967_v37 }
 0xfe5   : > { %12075 = vmatmul.mubr.f32.vlgmr.msra.gmra.mxu1 %v21457_v39 }
 0xfe6   : > { %v12117_v26 = vpop.permute.xlu1 %12116 }
 0xfe7   : > { %v12243_v62 = vmul.f32 %v12117_v26, %v11807_v51 }
 0xfe9   : > { %14642 = vmatpush3.msra.mxu0 %v12243_v62 }
 0xfea   : > { %12351 = vmatmul.mubr.f32.vlgmr.msra.gmra.mxu0 %v21457_v39 }
0x107c   : > { %v14538_v14 = vpop.f32.mrf.mxu1 }
0x107e   : > { %v14539_v47 = vpop.f32.mrf.mxu1 }
0x107f   : > { %v14540_v7 = vadd.f32 %v14539_v47, %v14538_v14 }
0x1080   : > { %v14573_v16 = vpop.f32.mrf.mxu0 }
0x1081   : > { %11529 = vst [vmem:[%s686_s4] sm:$0x3] %v14540_v7 }
0x1082   : > { %v14574_v49 = vpop.f32.mrf.mxu0 }
0x1083   : > { %v14575_v42 = vadd.f32 %v14574_v49, %v14573_v16 }
0x1085   : > { %12941 = vst [vmem:[%s686_s4 + $0x2] sm:$0x3] %v14575_v42 }
0x10a5   : > { %v14608_v2 = vpop.f32.mrf.mxu1 }
0x10a7   : > { %v14609_v43 = vpop.f32.mrf.mxu1 }
0x10a8   : > { %v14610_v24 = vadd.f32 %v14609_v43, %v14608_v2 }
0x10aa   : > { %v14643_v8 = vpop.f32.mrf.mxu0  ;;  %12943 = vst [vmem:[%s686_s4 + $0x4] sm:$0x3] %v14610_v24 }
0x10ac   : > { %v14644_v20 = vpop.f32.mrf.mxu0 }
0x10ad   : > { %v14645_v39 = vadd.f32 %v14644_v20, %v14643_v8 }
0x10af   : > { %12945 = vst [vmem:[%s686_s4 + $0x6] sm:$0x3] %v14645_v39 }
0x10b0 PF: > { %s33_s2 = sadd.s32 1, %s15833_s2  }
0x10b1   : > { %p30_p2 = scmp.ge.s32.totalorder %s33_s2, 4  }
0x10b3   :  { %32 = sbr.rel (!%p30_p2) target bundleno = 10 (0xa), region = 146 }
0x10b8   :  { %12379 = vsyncpa [#allocation3], 1 }
0x10b9   :  { %12381 = vsyncpa [#allocation3 + $0x1], 1 }
0x10ba   :  { %12382 = vsyncpa [#allocation5], 1 }

</bundles_post_ra>
